<compile_context>
chip_gen: v6e
topology: v6e:2x2x1
jax: 0.10.0
libtpu: 0.0.40
codegen_flags: <defaults>
</compile_context>

<pallas_src>
import jax
import jax.numpy as jnp
from jax.experimental import pallas as pl
from jax.experimental.pallas import tpu as pltpu

K = 5            # conv kernel size
PAD = 2          # "same" padding for stride 1, kernel 5
NEG_SLOPE = 0.2  # nn.LeakyReLU(negative_slope=0.2)


def _round_up(n, m):
    return (n + m - 1) // m * m


def _leaky_relu(x):
    return jnp.where(x > 0, x, NEG_SLOPE * x)


# ------------------------------ fused kernel ---------------------------------

def _make_mynet_kernel(H, W, Cz, n_layers):
    L1 = n_layers + 1
    Wp = _round_up(W + 2 * PAD, 8)           # padded (junk-extended) row width
    Hp = H + 2 * PAD                         # padded height
    NE = H * Wp                              # flattened output positions (junk cols masked)
    OFF = PAD * Wp + PAD                     # logical index of output (0,0) in the padded image
    POFF = (-OFF) % 128                      # left lane margin -> z store is 128-aligned
    STORE_OFF = POFF + OFF                   # multiple of 128
    NCOL = NE + (K - 1) * Wp                 # columns consumed by the ky output shifts (== Hp*Wp)
    NCOLP = _round_up(NCOL, 128)             # lane-padded im2col width
    NPADL = _round_up(POFF + (K - 1) + NCOLP, 128)   # padded-z lane width
    XROW = K * Cz                            # first x-tap row of the im2col buffer
    KC = K * Cz + 8                          # contraction depth: K*Cz z taps + K x taps + pad
    f32 = jnp.float32
    bf16 = jnp.bfloat16

    def kernel(xrows_ref, wl_ref, b_ref, g_ref, out_ref, zpad_ref, col_ref):
        # ---- per-sample init (padding lanes / unused rows must be zero) -----
        zpad_ref[...] = jnp.zeros((Cz, NPADL), f32)
        col_ref[...] = jnp.zeros((KC, NCOLP), bf16)

        # x taps of the contraction buffer (constant across layers, shifted on host):
        #   col[XROW + kx, q] = x_padded_flat[q + kx]
        col_ref[XROW:XROW + 8, :] = xrows_ref[0]

        # valid-column mask for the flattened-padding trick (junk cols -> 0)
        lane = jax.lax.broadcasted_iota(jnp.int32, (1, NE), 1)
        vmask = ((lane % Wp) < W).astype(f32)

        # ---- layers 0..n: z = lrelu(conv(z, wz) + conv(x, wx) + b) ----------
        # (layer 0 has a zero wz block in the packed weights; z rows of col are
        #  zero at that point, so its dot only sees the x taps.)
        for i in range(L1):
            if i > 0:
                # kx-pack z taps along sublanes: col[kx*Cz + ci, q] = z_pad[ci, q + kx]
                for kx in range(K):
                    col_ref[kx * Cz:(kx + 1) * Cz, :] = (
                        zpad_ref[:, POFF + kx:POFF + kx + NCOLP].astype(bf16))
            acc = b_ref[i]                                           # (Cz, 1) f32 bias
            for ky in range(K):
                part = jnp.dot(wl_ref[i * K + ky], col_ref[...],
                               preferred_element_type=f32)           # (Cz, NCOLP) f32
                acc = acc + part[:, ky * Wp:ky * Wp + NE]            # ky output shift
            z = _leaky_relu(acc) * vmask
            zpad_ref[:, STORE_OFF:STORE_OFF + NE] = z                # 128-aligned, lane-dense

        # ---- final 1-channel conv + spatial mean == <zpad, G> / (H*W) -------
        total = jnp.sum(zpad_ref[...] * g_ref[...], keepdims=True)   # (1, 1)
        out_ref[0] = jnp.broadcast_to(total * (1.0 / (H * W)), (8, 128))

    dims = dict(Wp=Wp, Hp=Hp, NE=NE, POFF=POFF, NCOLP=NCOLP,
                NPADL=NPADL, XROW=XROW, KC=KC)
    return kernel, dims


# ------------------------------ forward wrapper -------------------------------

def mynet_forward(x_nchw, params):
    # convex / clamp_weights() is a no-op in the reference module (returns 0).
    n_layers = len(params["wz"])
    L1 = n_layers + 1
    Cz = params["wz"][0].shape[0]
    B, Cin, H, W = x_nchw.shape
    assert Cin == 1, "input-injection path assumes n_chan == 1 (module default)"

    kernel, d = _make_mynet_kernel(H, W, Cz, n_layers)
    Wp, Hp, NE = d["Wp"], d["Hp"], d["NE"]
    POFF, NCOLP, NPADL, KC = d["POFF"], d["NCOLP"], d["NPADL"], d["KC"]
    f32, bf16 = jnp.float32, jnp.bfloat16

    # ---- x taps: xrows[b, kx, q] = x_padded_flat[b, q + kx] -----------------
    x2 = x_nchw[:, 0].astype(f32)                                      # (B, H, W)
    xp = jnp.pad(x2, ((0, 0), (PAD, Hp - H - PAD), (PAD, Wp - W - PAD)))
    xflat = jnp.pad(xp.reshape(B, Hp * Wp),
                    ((0, 0), (0, NCOLP + K - 1 - Hp * Wp)))
    xrows = jnp.stack([xflat[:, kx:kx + NCOLP] for kx in range(K)], axis=1)
    xrows = jnp.pad(xrows, ((0, 0), (0, 8 - K), (0, 0))).astype(bf16)  # (B, 8, NCOLP)

    # ---- packed per-(layer, ky) LHS weights: (L1*K, Cz, KC), bf16 -----------
    #   cols [0, K*Cz)      : wz[i-1][co, ci, ky, kx] at kx*Cz + ci (zero for i=0)
    #   cols [K*Cz, K*Cz+K) : wx[i][co, 0, ky, kx]
    wz_st = jnp.stack(params["wz"]).astype(f32)                        # (L, co, ci, ky, kx)
    wzb = jnp.transpose(wz_st, (0, 3, 1, 4, 2)).reshape(n_layers, K, Cz, K * Cz)
    wzb = jnp.concatenate([jnp.zeros((1, K, Cz, K * Cz), f32), wzb], axis=0)
    wx_st = jnp.stack([w[:, 0] for w in params["wx"]]).astype(f32)     # (L1, co, ky, kx)
    wxb = jnp.transpose(wx_st, (0, 2, 1, 3))                           # (L1, ky, co, kx)
    tailz = jnp.zeros((L1, K, Cz, KC - K * Cz - K), f32)
    wl = jnp.concatenate([wzb, wxb, tailz], axis=-1)                   # (L1, K, Cz, KC)
    wl = wl.reshape(L1 * K, Cz, KC).astype(bf16)

    ball = jnp.stack(params["bx"]).astype(f32).reshape(L1, Cz, 1)      # (L1, Cz, 1)

    # ---- G: final conv + valid-position mean folded into one weight image ---
    #   G[ci, POFF + l] = sum_{ky,kx} wf[ci,ky,kx] * [l - ky*Wp - kx is a valid output]
    wf = params["wf"][0].astype(f32)                                   # (Cz, K, K)
    lg = jnp.arange(NPADL) - POFF
    G = jnp.zeros((Cz, NPADL), f32)
    for ky in range(K):
        for kx in range(K):
            p = lg - (ky * Wp + kx)
            valid = ((p >= 0) & (p < NE) & ((p % Wp) < W)).astype(f32)
            G = G + wf[:, ky, kx][:, None] * valid[None, :]

    out = pl.pallas_call(
        kernel,
        out_shape=jax.ShapeDtypeStruct((B, 8, 128), f32),
        grid=(B,),
        in_specs=[
            pl.BlockSpec((1, 8, NCOLP), lambda b: (b, 0, 0)),          # x taps
            pl.BlockSpec((L1 * K, Cz, KC), lambda b: (0, 0, 0)),       # packed weights
            pl.BlockSpec((L1, Cz, 1), lambda b: (0, 0, 0)),            # biases
            pl.BlockSpec((Cz, NPADL), lambda b: (0, 0)),               # G
        ],
        out_specs=pl.BlockSpec((1, 8, 128), lambda b: (b, 0, 0)),
        scratch_shapes=[
            pltpu.VMEM((Cz, NPADL), f32),                              # padded z image
            pltpu.VMEM((KC, NCOLP), bf16),                             # kx-packed im2col
        ],
        compiler_params=pltpu.CompilerParams(
            dimension_semantics=("parallel",)),
    )(xrows, wl, ball, G)
    return out[:, 0, :1]                                               # (B, 1)


# ----------------------------- synthetic params --------------------------------

def init_params(key, n_channels=32, n_layers=5, n_chan=1, kernel_size=5):
    """Deterministic synthetic params matching MyNet.__init__ shapes."""
    keys = list(jax.random.split(key, 2 * (n_layers + 1) + n_layers + 1))
    ki = iter(keys)
    bound = 1.0 / float(n_chan * kernel_size * kernel_size) ** 0.5  # torch conv default
    wx, bx = [], []
    for _ in range(n_layers + 1):
        wx.append(jax.random.uniform(next(ki),
                                     (n_channels, n_chan, kernel_size, kernel_size),
                                     jnp.float32, -bound, bound))
        bx.append(jax.random.uniform(next(ki), (n_channels,), jnp.float32, -bound, bound))
    # initialize_weights(): wzs and final_conv2d ~ U[0, 0.001]
    wz = [jax.random.uniform(next(ki),
                             (n_channels, n_channels, kernel_size, kernel_size),
                             jnp.float32, 0.0, 0.001) for _ in range(n_layers)]
    wf = jax.random.uniform(next(ki), (1, n_channels, kernel_size, kernel_size),
                            jnp.float32, 0.0, 0.001)
    return {"wx": wx, "bx": bx, "wz": wz, "wf": wf}


# ----------------------------- pure-JAX reference -------------------------------

def ref_forward(x_nchw, params):
    x = jnp.transpose(x_nchw, (0, 2, 3, 1)).astype(jnp.float32)

    def conv(inp, w_oihw, b=None):
        y = jax.lax.conv_general_dilated(
            inp, jnp.transpose(w_oihw, (2, 3, 1, 0)), (1, 1), "SAME",
            dimension_numbers=("NHWC", "HWIO", "NHWC"))
        return y if b is None else y + b

    lrelu = lambda t: jnp.where(t > 0, t, NEG_SLOPE * t)
    z = lrelu(conv(x, params["wx"][0], params["bx"][0]))
    for i in range(len(params["wz"])):
        z = lrelu(conv(z, params["wz"][i]) + conv(x, params["wx"][i + 1], params["bx"][i + 1]))
    z = conv(z, params["wf"])
    B = z.shape[0]
    return z.reshape(B, -1).mean(axis=1, keepdims=True)


# ------------------------------------ main --------------------------------------

if __name__ == "__main__":
    n_channels, n_layers, n_chan = 32, 5, 1
    B, H, W = 2, 16, 16

    key = jax.random.PRNGKey(0)
    k_x, k_p = jax.random.split(key)
    params = init_params(k_p, n_channels=n_channels, n_layers=n_layers, n_chan=n_chan)
    x = jax.random.normal(k_x, (B, n_chan, H, W), jnp.float32)

    out = jax.block_until_ready(jax.jit(mynet_forward)(x, params))
    ref = jax.block_until_ready(ref_forward(x, params))

    assert out.shape == (B, 1), out.shape
    # tolerance accounts for the MXU's single-bf16-pass default precision (both
    # the fused kernel with bf16-packed operands and the XLA conv reference use
    # it), plus differing summation orders.
    assert jnp.allclose(out, ref, rtol=3e-3, atol=3e-4), (out, ref)
    print("KERNEL_OK")
</pallas_src>

<mosaic_0001>
module attributes {stable_mosaic.version = 11 : i64} {
  func.func @kernel(%arg0: i32, %arg1: memref<1x8x512xbf16, #tpu.memory_space<vmem>>, %arg2: memref<30x32x168xbf16, #tpu.memory_space<vmem>>, %arg3: memref<6x32x1xf32, #tpu.memory_space<vmem>>, %arg4: memref<32x640xf32, #tpu.memory_space<vmem>>, %arg5: memref<1x8x128xf32, #tpu.memory_space<vmem>>, %arg6: memref<32x640xf32, #tpu.memory_space<vmem>>, %arg7: memref<168x512xbf16, #tpu.memory_space<vmem>>) attributes {dimension_semantics = [#tpu.dimension_semantics<parallel>], iteration_bounds = array<i64: 2>, scalar_prefetch = 0 : i64, scratch_operands = 2 : i64, tpu.core_type = #tpu.core_type<tc>, window_params = [{transform_indices = @transform_0, window_bounds = array<i64: 1, 8, 512>}, {pipeline_mode = #tpu.pipeline_mode<synchronous>, transform_indices = @transform_1, window_bounds = array<i64: 30, 32, 168>}, {pipeline_mode = #tpu.pipeline_mode<synchronous>, transform_indices = @transform_2, window_bounds = array<i64: 6, 32, 1>}, {pipeline_mode = #tpu.pipeline_mode<synchronous>, transform_indices = @transform_3, window_bounds = array<i64: 32, 640>}, {transform_indices = @transform_4, window_bounds = array<i64: 1, 8, 128>}]} {
    %cst = arith.constant 0.000000e+00 : f32
    %0 = vector.broadcast %cst : f32 to vector<32x640xf32>
    %c0 = arith.constant 0 : index
    %c0_0 = arith.constant 0 : index
    %1 = vector.load %arg6[%c0, %c0_0] : memref<32x640xf32, #tpu.memory_space<vmem>>, vector<32x640xf32>
    tpu.vector_store %arg6[%c0, %c0_0], %0 {strides = array<i32>} : memref<32x640xf32, #tpu.memory_space<vmem>>, vector<32x640xf32>,
    %cst_1 = arith.constant 0.000000e+00 : bf16
    %2 = vector.broadcast %cst_1 : bf16 to vector<168x512xbf16>
    %c0_2 = arith.constant 0 : index
    %c0_3 = arith.constant 0 : index
    %3 = vector.load %arg7[%c0_2, %c0_3] : memref<168x512xbf16, #tpu.memory_space<vmem>>, vector<168x512xbf16>
    tpu.vector_store %arg7[%c0_2, %c0_3], %2 {strides = array<i32>} : memref<168x512xbf16, #tpu.memory_space<vmem>>, vector<168x512xbf16>,
    %c0_4 = arith.constant 0 : index
    %c0_5 = arith.constant 0 : index
    %c0_6 = arith.constant 0 : index
    %4 = vector.load %arg1[%c0_4, %c0_5, %c0_6] : memref<1x8x512xbf16, #tpu.memory_space<vmem>>, vector<1x8x512xbf16>
    %5 = vector.shape_cast %4 : vector<1x8x512xbf16> to vector<8x512xbf16>
    %c160 = arith.constant 160 : index
    %c0_7 = arith.constant 0 : index
    %6 = vector.load %arg7[%c160, %c0_7] : memref<168x512xbf16, #tpu.memory_space<vmem>>, vector<8x512xbf16>
    tpu.vector_store %arg7[%c160, %c0_7], %5 {strides = array<i32>} : memref<168x512xbf16, #tpu.memory_space<vmem>>, vector<8x512xbf16>,
    %7 = tpu.iota {dimensions = array<i32: 1>} : vector<1x384xi32>
    %c24_i32 = arith.constant 24 : i32
    %c0_i32 = arith.constant 0 : i32
    %8 = arith.cmpi eq, %c24_i32, %c0_i32 : i32
    %c1_i32 = arith.constant 1 : i32
    %9 = arith.select %8, %c1_i32, %c24_i32 : i32
    %10 = vector.broadcast %9 : i32 to vector<1x384xi32>
    %11 = arith.remsi %7, %10 : vector<1x384xi32>
    %c0_i32_8 = arith.constant 0 : i32
    %12 = vector.broadcast %c0_i32_8 : i32 to vector<1x384xi32>
    %13 = arith.cmpi ne, %11, %12 : vector<1x384xi32>
    %c0_i32_9 = arith.constant 0 : i32
    %14 = vector.broadcast %c0_i32_9 : i32 to vector<1x384xi32>
    %15 = arith.cmpi slt, %11, %14 : vector<1x384xi32>
    %c0_i32_10 = arith.constant 0 : i32
    %16 = arith.cmpi slt, %9, %c0_i32_10 : i32
    %17 = vector.broadcast %16 : i1 to vector<1x384xi1>
    %18 = vector.broadcast %17 : vector<1x384xi1> to vector<1x384xi1>
    %19 = arith.xori %15, %18 : vector<1x384xi1>
    %20 = arith.andi %19, %13 : vector<1x384xi1>
    %21 = vector.broadcast %9 : i32 to vector<1x384xi32>
    %22 = arith.addi %11, %21 : vector<1x384xi32>
    %23 = arith.select %20, %22, %11 : vector<1x384xi1>, vector<1x384xi32>
    %c16_i32 = arith.constant 16 : i32
    %24 = vector.broadcast %c16_i32 : i32 to vector<1x384xi32>
    %25 = arith.cmpi slt, %23, %24 : vector<1x384xi32>
    %26 = arith.extui %25 : vector<1x384xi1> to vector<1x384xi32>
    %27 = arith.sitofp %26 : vector<1x384xi32> to vector<1x384xf32>
    %c0_11 = arith.constant 0 : index
    %c0_12 = arith.constant 0 : index
    %c0_13 = arith.constant 0 : index
    %28 = vector.load %arg3[%c0_11, %c0_12, %c0_13] : memref<6x32x1xf32, #tpu.memory_space<vmem>>, vector<1x32x1xf32>
    %29 = vector.shape_cast %28 : vector<1x32x1xf32> to vector<32x1xf32>
    %c0_14 = arith.constant 0 : index
    %c0_15 = arith.constant 0 : index
    %c0_16 = arith.constant 0 : index
    %30 = vector.load %arg2[%c0_14, %c0_15, %c0_16] : memref<30x32x168xbf16, #tpu.memory_space<vmem>>, vector<1x32x168xbf16>
    %31 = vector.shape_cast %30 : vector<1x32x168xbf16> to vector<32x168xbf16>
    %c0_17 = arith.constant 0 : index
    %c0_18 = arith.constant 0 : index
    %32 = vector.load %arg7[%c0_17, %c0_18] : memref<168x512xbf16, #tpu.memory_space<vmem>>, vector<168x512xbf16>
    %cst_19 = arith.constant dense<0.000000e+00> : vector<32x512xf32>
    %33 = tpu.matmul %31, %32, %cst_19 {dimension_numbers = #tpu.dot_dimension_numbers<[1], [0], [0], [1], [0, 0, 1, 1], [], []>} : vector<32x168xbf16>, vector<168x512xbf16>, vector<32x512xf32> -> vector<32x512xf32>
    %34 = vector.extract_strided_slice %33 {offsets = [0, 0], sizes = [32, 384], strides = [1, 1]} : vector<32x512xf32> to vector<32x384xf32>
    %35 = vector.broadcast %29 : vector<32x1xf32> to vector<32x384xf32>
    %36 = arith.addf %35, %34 : vector<32x384xf32>
    %c1 = arith.constant 1 : index
    %c0_20 = arith.constant 0 : index
    %c0_21 = arith.constant 0 : index
    %37 = vector.load %arg2[%c1, %c0_20, %c0_21] : memref<30x32x168xbf16, #tpu.memory_space<vmem>>, vector<1x32x168xbf16>
    %38 = vector.shape_cast %37 : vector<1x32x168xbf16> to vector<32x168xbf16>
    %c0_22 = arith.constant 0 : index
    %c0_23 = arith.constant 0 : index
    %39 = vector.load %arg7[%c0_22, %c0_23] : memref<168x512xbf16, #tpu.memory_space<vmem>>, vector<168x512xbf16>
    %cst_24 = arith.constant dense<0.000000e+00> : vector<32x512xf32>
    %40 = tpu.matmul %38, %39, %cst_24 {dimension_numbers = #tpu.dot_dimension_numbers<[1], [0], [0], [1], [0, 0, 1, 1], [], []>} : vector<32x168xbf16>, vector<168x512xbf16>, vector<32x512xf32> -> vector<32x512xf32>
    %41 = vector.extract_strided_slice %40 {offsets = [0, 24], sizes = [32, 384], strides = [1, 1]} : vector<32x512xf32> to vector<32x384xf32>
    %42 = arith.addf %36, %41 : vector<32x384xf32>
    %c2 = arith.constant 2 : index
    %c0_25 = arith.constant 0 : index
    %c0_26 = arith.constant 0 : index
    %43 = vector.load %arg2[%c2, %c0_25, %c0_26] : memref<30x32x168xbf16, #tpu.memory_space<vmem>>, vector<1x32x168xbf16>
    %44 = vector.shape_cast %43 : vector<1x32x168xbf16> to vector<32x168xbf16>
    %c0_27 = arith.constant 0 : index
    %c0_28 = arith.constant 0 : index
    %45 = vector.load %arg7[%c0_27, %c0_28] : memref<168x512xbf16, #tpu.memory_space<vmem>>, vector<168x512xbf16>
    %cst_29 = arith.constant dense<0.000000e+00> : vector<32x512xf32>
    %46 = tpu.matmul %44, %45, %cst_29 {dimension_numbers = #tpu.dot_dimension_numbers<[1], [0], [0], [1], [0, 0, 1, 1], [], []>} : vector<32x168xbf16>, vector<168x512xbf16>, vector<32x512xf32> -> vector<32x512xf32>
    %47 = vector.extract_strided_slice %46 {offsets = [0, 48], sizes = [32, 384], strides = [1, 1]} : vector<32x512xf32> to vector<32x384xf32>
    %48 = arith.addf %42, %47 : vector<32x384xf32>
    %c3 = arith.constant 3 : index
    %c0_30 = arith.constant 0 : index
    %c0_31 = arith.constant 0 : index
    %49 = vector.load %arg2[%c3, %c0_30, %c0_31] : memref<30x32x168xbf16, #tpu.memory_space<vmem>>, vector<1x32x168xbf16>
    %50 = vector.shape_cast %49 : vector<1x32x168xbf16> to vector<32x168xbf16>
    %c0_32 = arith.constant 0 : index
    %c0_33 = arith.constant 0 : index
    %51 = vector.load %arg7[%c0_32, %c0_33] : memref<168x512xbf16, #tpu.memory_space<vmem>>, vector<168x512xbf16>
    %cst_34 = arith.constant dense<0.000000e+00> : vector<32x512xf32>
    %52 = tpu.matmul %50, %51, %cst_34 {dimension_numbers = #tpu.dot_dimension_numbers<[1], [0], [0], [1], [0, 0, 1, 1], [], []>} : vector<32x168xbf16>, vector<168x512xbf16>, vector<32x512xf32> -> vector<32x512xf32>
    %53 = vector.extract_strided_slice %52 {offsets = [0, 72], sizes = [32, 384], strides = [1, 1]} : vector<32x512xf32> to vector<32x384xf32>
    %54 = arith.addf %48, %53 : vector<32x384xf32>
    %c4 = arith.constant 4 : index
    %c0_35 = arith.constant 0 : index
    %c0_36 = arith.constant 0 : index
    %55 = vector.load %arg2[%c4, %c0_35, %c0_36] : memref<30x32x168xbf16, #tpu.memory_space<vmem>>, vector<1x32x168xbf16>
    %56 = vector.shape_cast %55 : vector<1x32x168xbf16> to vector<32x168xbf16>
    %c0_37 = arith.constant 0 : index
    %c0_38 = arith.constant 0 : index
    %57 = vector.load %arg7[%c0_37, %c0_38] : memref<168x512xbf16, #tpu.memory_space<vmem>>, vector<168x512xbf16>
    %cst_39 = arith.constant dense<0.000000e+00> : vector<32x512xf32>
    %58 = tpu.matmul %56, %57, %cst_39 {dimension_numbers = #tpu.dot_dimension_numbers<[1], [0], [0], [1], [0, 0, 1, 1], [], []>} : vector<32x168xbf16>, vector<168x512xbf16>, vector<32x512xf32> -> vector<32x512xf32>
    %59 = vector.extract_strided_slice %58 {offsets = [0, 96], sizes = [32, 384], strides = [1, 1]} : vector<32x512xf32> to vector<32x384xf32>
    %60 = arith.addf %54, %59 : vector<32x384xf32>
    %cst_40 = arith.constant 0.000000e+00 : f32
    %61 = vector.broadcast %cst_40 : f32 to vector<32x384xf32>
    %62 = arith.cmpf ogt, %60, %61 : vector<32x384xf32>
    %cst_41 = arith.constant 2.000000e-01 : f32
    %63 = vector.broadcast %cst_41 : f32 to vector<32x384xf32>
    %64 = arith.mulf %63, %60 : vector<32x384xf32>
    %65 = arith.select %62, %60, %64 : vector<32x384xi1>, vector<32x384xf32>
    %66 = vector.broadcast %27 : vector<1x384xf32> to vector<32x384xf32>
    %67 = arith.mulf %65, %66 : vector<32x384xf32>
    %c0_42 = arith.constant 0 : index
    %c128 = arith.constant 128 : index
    %68 = vector.load %arg6[%c0_42, %c128] : memref<32x640xf32, #tpu.memory_space<vmem>>, vector<32x384xf32>
    tpu.vector_store %arg6[%c0_42, %c128], %67 {strides = array<i32>} : memref<32x640xf32, #tpu.memory_space<vmem>>, vector<32x384xf32>,
    %c0_43 = arith.constant 0 : index
    %c78 = arith.constant 78 : index
    %69 = vector.load %arg6[%c0_43, %c78] : memref<32x640xf32, #tpu.memory_space<vmem>>, vector<32x512xf32>
    %70 = arith.truncf %69 : vector<32x512xf32> to vector<32x512xbf16>
    %c0_44 = arith.constant 0 : index
    %c0_45 = arith.constant 0 : index
    %71 = vector.load %arg7[%c0_44, %c0_45] : memref<168x512xbf16, #tpu.memory_space<vmem>>, vector<32x512xbf16>
    tpu.vector_store %arg7[%c0_44, %c0_45], %70 {strides = array<i32>} : memref<168x512xbf16, #tpu.memory_space<vmem>>, vector<32x512xbf16>,
    %c0_46 = arith.constant 0 : index
    %c79 = arith.constant 79 : index
    %72 = vector.load %arg6[%c0_46, %c79] : memref<32x640xf32, #tpu.memory_space<vmem>>, vector<32x512xf32>
    %73 = arith.truncf %72 : vector<32x512xf32> to vector<32x512xbf16>
    %c32 = arith.constant 32 : index
    %c0_47 = arith.constant 0 : index
    %74 = vector.load %arg7[%c32, %c0_47] : memref<168x512xbf16, #tpu.memory_space<vmem>>, vector<32x512xbf16>
    tpu.vector_store %arg7[%c32, %c0_47], %73 {strides = array<i32>} : memref<168x512xbf16, #tpu.memory_space<vmem>>, vector<32x512xbf16>,
    %c0_48 = arith.constant 0 : index
    %c80 = arith.constant 80 : index
    %75 = vector.load %arg6[%c0_48, %c80] : memref<32x640xf32, #tpu.memory_space<vmem>>, vector<32x512xf32>
    %76 = arith.truncf %75 : vector<32x512xf32> to vector<32x512xbf16>
    %c64 = arith.constant 64 : index
    %c0_49 = arith.constant 0 : index
    %77 = vector.load %arg7[%c64, %c0_49] : memref<168x512xbf16, #tpu.memory_space<vmem>>, vector<32x512xbf16>
    tpu.vector_store %arg7[%c64, %c0_49], %76 {strides = array<i32>} : memref<168x512xbf16, #tpu.memory_space<vmem>>, vector<32x512xbf16>,
    %c0_50 = arith.constant 0 : index
    %c81 = arith.constant 81 : index
    %78 = vector.load %arg6[%c0_50, %c81] : memref<32x640xf32, #tpu.memory_space<vmem>>, vector<32x512xf32>
    %79 = arith.truncf %78 : vector<32x512xf32> to vector<32x512xbf16>
    %c96 = arith.constant 96 : index
    %c0_51 = arith.constant 0 : index
    %80 = vector.load %arg7[%c96, %c0_51] : memref<168x512xbf16, #tpu.memory_space<vmem>>, vector<32x512xbf16>
    tpu.vector_store %arg7[%c96, %c0_51], %79 {strides = array<i32>} : memref<168x512xbf16, #tpu.memory_space<vmem>>, vector<32x512xbf16>,
    %c0_52 = arith.constant 0 : index
    %c82 = arith.constant 82 : index
    %81 = vector.load %arg6[%c0_52, %c82] : memref<32x640xf32, #tpu.memory_space<vmem>>, vector<32x512xf32>
    %82 = arith.truncf %81 : vector<32x512xf32> to vector<32x512xbf16>
    %c128_53 = arith.constant 128 : index
    %c0_54 = arith.constant 0 : index
    %83 = vector.load %arg7[%c128_53, %c0_54] : memref<168x512xbf16, #tpu.memory_space<vmem>>, vector<32x512xbf16>
    tpu.vector_store %arg7[%c128_53, %c0_54], %82 {strides = array<i32>} : memref<168x512xbf16, #tpu.memory_space<vmem>>, vector<32x512xbf16>,
    %c1_55 = arith.constant 1 : index
    %c0_56 = arith.constant 0 : index
    %c0_57 = arith.constant 0 : index
    %84 = vector.load %arg3[%c1_55, %c0_56, %c0_57] : memref<6x32x1xf32, #tpu.memory_space<vmem>>, vector<1x32x1xf32>
    %85 = vector.shape_cast %84 : vector<1x32x1xf32> to vector<32x1xf32>
    %c5 = arith.constant 5 : index
    %c0_58 = arith.constant 0 : index
    %c0_59 = arith.constant 0 : index
    %86 = vector.load %arg2[%c5, %c0_58, %c0_59] : memref<30x32x168xbf16, #tpu.memory_space<vmem>>, vector<1x32x168xbf16>
    %87 = vector.shape_cast %86 : vector<1x32x168xbf16> to vector<32x168xbf16>
    %c0_60 = arith.constant 0 : index
    %c0_61 = arith.constant 0 : index
    %88 = vector.load %arg7[%c0_60, %c0_61] : memref<168x512xbf16, #tpu.memory_space<vmem>>, vector<168x512xbf16>
    %cst_62 = arith.constant dense<0.000000e+00> : vector<32x512xf32>
    %89 = tpu.matmul %87, %88, %cst_62 {dimension_numbers = #tpu.dot_dimension_numbers<[1], [0], [0], [1], [0, 0, 1, 1], [], []>} : vector<32x168xbf16>, vector<168x512xbf16>, vector<32x512xf32> -> vector<32x512xf32>
    %90 = vector.extract_strided_slice %89 {offsets = [0, 0], sizes = [32, 384], strides = [1, 1]} : vector<32x512xf32> to vector<32x384xf32>
    %91 = vector.broadcast %85 : vector<32x1xf32> to vector<32x384xf32>
    %92 = arith.addf %91, %90 : vector<32x384xf32>
    %c6 = arith.constant 6 : index
    %c0_63 = arith.constant 0 : index
    %c0_64 = arith.constant 0 : index
    %93 = vector.load %arg2[%c6, %c0_63, %c0_64] : memref<30x32x168xbf16, #tpu.memory_space<vmem>>, vector<1x32x168xbf16>
    %94 = vector.shape_cast %93 : vector<1x32x168xbf16> to vector<32x168xbf16>
    %c0_65 = arith.constant 0 : index
    %c0_66 = arith.constant 0 : index
    %95 = vector.load %arg7[%c0_65, %c0_66] : memref<168x512xbf16, #tpu.memory_space<vmem>>, vector<168x512xbf16>
    %cst_67 = arith.constant dense<0.000000e+00> : vector<32x512xf32>
    %96 = tpu.matmul %94, %95, %cst_67 {dimension_numbers = #tpu.dot_dimension_numbers<[1], [0], [0], [1], [0, 0, 1, 1], [], []>} : vector<32x168xbf16>, vector<168x512xbf16>, vector<32x512xf32> -> vector<32x512xf32>
    %97 = vector.extract_strided_slice %96 {offsets = [0, 24], sizes = [32, 384], strides = [1, 1]} : vector<32x512xf32> to vector<32x384xf32>
    %98 = arith.addf %92, %97 : vector<32x384xf32>
    %c7 = arith.constant 7 : index
    %c0_68 = arith.constant 0 : index
    %c0_69 = arith.constant 0 : index
    %99 = vector.load %arg2[%c7, %c0_68, %c0_69] : memref<30x32x168xbf16, #tpu.memory_space<vmem>>, vector<1x32x168xbf16>
    %100 = vector.shape_cast %99 : vector<1x32x168xbf16> to vector<32x168xbf16>
    %c0_70 = arith.constant 0 : index
    %c0_71 = arith.constant 0 : index
    %101 = vector.load %arg7[%c0_70, %c0_71] : memref<168x512xbf16, #tpu.memory_space<vmem>>, vector<168x512xbf16>
    %cst_72 = arith.constant dense<0.000000e+00> : vector<32x512xf32>
    %102 = tpu.matmul %100, %101, %cst_72 {dimension_numbers = #tpu.dot_dimension_numbers<[1], [0], [0], [1], [0, 0, 1, 1], [], []>} : vector<32x168xbf16>, vector<168x512xbf16>, vector<32x512xf32> -> vector<32x512xf32>
    %103 = vector.extract_strided_slice %102 {offsets = [0, 48], sizes = [32, 384], strides = [1, 1]} : vector<32x512xf32> to vector<32x384xf32>
    %104 = arith.addf %98, %103 : vector<32x384xf32>
    %c8 = arith.constant 8 : index
    %c0_73 = arith.constant 0 : index
    %c0_74 = arith.constant 0 : index
    %105 = vector.load %arg2[%c8, %c0_73, %c0_74] : memref<30x32x168xbf16, #tpu.memory_space<vmem>>, vector<1x32x168xbf16>
    %106 = vector.shape_cast %105 : vector<1x32x168xbf16> to vector<32x168xbf16>
    %c0_75 = arith.constant 0 : index
    %c0_76 = arith.constant 0 : index
    %107 = vector.load %arg7[%c0_75, %c0_76] : memref<168x512xbf16, #tpu.memory_space<vmem>>, vector<168x512xbf16>
    %cst_77 = arith.constant dense<0.000000e+00> : vector<32x512xf32>
    %108 = tpu.matmul %106, %107, %cst_77 {dimension_numbers = #tpu.dot_dimension_numbers<[1], [0], [0], [1], [0, 0, 1, 1], [], []>} : vector<32x168xbf16>, vector<168x512xbf16>, vector<32x512xf32> -> vector<32x512xf32>
    %109 = vector.extract_strided_slice %108 {offsets = [0, 72], sizes = [32, 384], strides = [1, 1]} : vector<32x512xf32> to vector<32x384xf32>
    %110 = arith.addf %104, %109 : vector<32x384xf32>
    %c9 = arith.constant 9 : index
    %c0_78 = arith.constant 0 : index
    %c0_79 = arith.constant 0 : index
    %111 = vector.load %arg2[%c9, %c0_78, %c0_79] : memref<30x32x168xbf16, #tpu.memory_space<vmem>>, vector<1x32x168xbf16>
    %112 = vector.shape_cast %111 : vector<1x32x168xbf16> to vector<32x168xbf16>
    %c0_80 = arith.constant 0 : index
    %c0_81 = arith.constant 0 : index
    %113 = vector.load %arg7[%c0_80, %c0_81] : memref<168x512xbf16, #tpu.memory_space<vmem>>, vector<168x512xbf16>
    %cst_82 = arith.constant dense<0.000000e+00> : vector<32x512xf32>
    %114 = tpu.matmul %112, %113, %cst_82 {dimension_numbers = #tpu.dot_dimension_numbers<[1], [0], [0], [1], [0, 0, 1, 1], [], []>} : vector<32x168xbf16>, vector<168x512xbf16>, vector<32x512xf32> -> vector<32x512xf32>
    %115 = vector.extract_strided_slice %114 {offsets = [0, 96], sizes = [32, 384], strides = [1, 1]} : vector<32x512xf32> to vector<32x384xf32>
    %116 = arith.addf %110, %115 : vector<32x384xf32>
    %cst_83 = arith.constant 0.000000e+00 : f32
    %117 = vector.broadcast %cst_83 : f32 to vector<32x384xf32>
    %118 = arith.cmpf ogt, %116, %117 : vector<32x384xf32>
    %cst_84 = arith.constant 2.000000e-01 : f32
    %119 = vector.broadcast %cst_84 : f32 to vector<32x384xf32>
    %120 = arith.mulf %119, %116 : vector<32x384xf32>
    %121 = arith.select %118, %116, %120 : vector<32x384xi1>, vector<32x384xf32>
    %122 = vector.broadcast %27 : vector<1x384xf32> to vector<32x384xf32>
    %123 = arith.mulf %121, %122 : vector<32x384xf32>
    %c0_85 = arith.constant 0 : index
    %c128_86 = arith.constant 128 : index
    %124 = vector.load %arg6[%c0_85, %c128_86] : memref<32x640xf32, #tpu.memory_space<vmem>>, vector<32x384xf32>
    tpu.vector_store %arg6[%c0_85, %c128_86], %123 {strides = array<i32>} : memref<32x640xf32, #tpu.memory_space<vmem>>, vector<32x384xf32>,
    %c0_87 = arith.constant 0 : index
    %c78_88 = arith.constant 78 : index
    %125 = vector.load %arg6[%c0_87, %c78_88] : memref<32x640xf32, #tpu.memory_space<vmem>>, vector<32x512xf32>
    %126 = arith.truncf %125 : vector<32x512xf32> to vector<32x512xbf16>
    %c0_89 = arith.constant 0 : index
    %c0_90 = arith.constant 0 : index
    %127 = vector.load %arg7[%c0_89, %c0_90] : memref<168x512xbf16, #tpu.memory_space<vmem>>, vector<32x512xbf16>
    tpu.vector_store %arg7[%c0_89, %c0_90], %126 {strides = array<i32>} : memref<168x512xbf16, #tpu.memory_space<vmem>>, vector<32x512xbf16>,
    %c0_91 = arith.constant 0 : index
    %c79_92 = arith.constant 79 : index
    %128 = vector.load %arg6[%c0_91, %c79_92] : memref<32x640xf32, #tpu.memory_space<vmem>>, vector<32x512xf32>
    %129 = arith.truncf %128 : vector<32x512xf32> to vector<32x512xbf16>
    %c32_93 = arith.constant 32 : index
    %c0_94 = arith.constant 0 : index
    %130 = vector.load %arg7[%c32_93, %c0_94] : memref<168x512xbf16, #tpu.memory_space<vmem>>, vector<32x512xbf16>
    tpu.vector_store %arg7[%c32_93, %c0_94], %129 {strides = array<i32>} : memref<168x512xbf16, #tpu.memory_space<vmem>>, vector<32x512xbf16>,
    %c0_95 = arith.constant 0 : index
    %c80_96 = arith.constant 80 : index
    %131 = vector.load %arg6[%c0_95, %c80_96] : memref<32x640xf32, #tpu.memory_space<vmem>>, vector<32x512xf32>
    %132 = arith.truncf %131 : vector<32x512xf32> to vector<32x512xbf16>
    %c64_97 = arith.constant 64 : index
    %c0_98 = arith.constant 0 : index
    %133 = vector.load %arg7[%c64_97, %c0_98] : memref<168x512xbf16, #tpu.memory_space<vmem>>, vector<32x512xbf16>
    tpu.vector_store %arg7[%c64_97, %c0_98], %132 {strides = array<i32>} : memref<168x512xbf16, #tpu.memory_space<vmem>>, vector<32x512xbf16>,
    %c0_99 = arith.constant 0 : index
    %c81_100 = arith.constant 81 : index
    %134 = vector.load %arg6[%c0_99, %c81_100] : memref<32x640xf32, #tpu.memory_space<vmem>>, vector<32x512xf32>
    %135 = arith.truncf %134 : vector<32x512xf32> to vector<32x512xbf16>
    %c96_101 = arith.constant 96 : index
    %c0_102 = arith.constant 0 : index
    %136 = vector.load %arg7[%c96_101, %c0_102] : memref<168x512xbf16, #tpu.memory_space<vmem>>, vector<32x512xbf16>
    tpu.vector_store %arg7[%c96_101, %c0_102], %135 {strides = array<i32>} : memref<168x512xbf16, #tpu.memory_space<vmem>>, vector<32x512xbf16>,
    %c0_103 = arith.constant 0 : index
    %c82_104 = arith.constant 82 : index
    %137 = vector.load %arg6[%c0_103, %c82_104] : memref<32x640xf32, #tpu.memory_space<vmem>>, vector<32x512xf32>
    %138 = arith.truncf %137 : vector<32x512xf32> to vector<32x512xbf16>
    %c128_105 = arith.constant 128 : index
    %c0_106 = arith.constant 0 : index
    %139 = vector.load %arg7[%c128_105, %c0_106] : memref<168x512xbf16, #tpu.memory_space<vmem>>, vector<32x512xbf16>
    tpu.vector_store %arg7[%c128_105, %c0_106], %138 {strides = array<i32>} : memref<168x512xbf16, #tpu.memory_space<vmem>>, vector<32x512xbf16>,
    %c2_107 = arith.constant 2 : index
    %c0_108 = arith.constant 0 : index
    %c0_109 = arith.constant 0 : index
    %140 = vector.load %arg3[%c2_107, %c0_108, %c0_109] : memref<6x32x1xf32, #tpu.memory_space<vmem>>, vector<1x32x1xf32>
    %141 = vector.shape_cast %140 : vector<1x32x1xf32> to vector<32x1xf32>
    %c10 = arith.constant 10 : index
    %c0_110 = arith.constant 0 : index
    %c0_111 = arith.constant 0 : index
    %142 = vector.load %arg2[%c10, %c0_110, %c0_111] : memref<30x32x168xbf16, #tpu.memory_space<vmem>>, vector<1x32x168xbf16>
    %143 = vector.shape_cast %142 : vector<1x32x168xbf16> to vector<32x168xbf16>
    %c0_112 = arith.constant 0 : index
    %c0_113 = arith.constant 0 : index
    %144 = vector.load %arg7[%c0_112, %c0_113] : memref<168x512xbf16, #tpu.memory_space<vmem>>, vector<168x512xbf16>
    %cst_114 = arith.constant dense<0.000000e+00> : vector<32x512xf32>
    %145 = tpu.matmul %143, %144, %cst_114 {dimension_numbers = #tpu.dot_dimension_numbers<[1], [0], [0], [1], [0, 0, 1, 1], [], []>} : vector<32x168xbf16>, vector<168x512xbf16>, vector<32x512xf32> -> vector<32x512xf32>
    %146 = vector.extract_strided_slice %145 {offsets = [0, 0], sizes = [32, 384], strides = [1, 1]} : vector<32x512xf32> to vector<32x384xf32>
    %147 = vector.broadcast %141 : vector<32x1xf32> to vector<32x384xf32>
    %148 = arith.addf %147, %146 : vector<32x384xf32>
    %c11 = arith.constant 11 : index
    %c0_115 = arith.constant 0 : index
    %c0_116 = arith.constant 0 : index
    %149 = vector.load %arg2[%c11, %c0_115, %c0_116] : memref<30x32x168xbf16, #tpu.memory_space<vmem>>, vector<1x32x168xbf16>
    %150 = vector.shape_cast %149 : vector<1x32x168xbf16> to vector<32x168xbf16>
    %c0_117 = arith.constant 0 : index
    %c0_118 = arith.constant 0 : index
    %151 = vector.load %arg7[%c0_117, %c0_118] : memref<168x512xbf16, #tpu.memory_space<vmem>>, vector<168x512xbf16>
    %cst_119 = arith.constant dense<0.000000e+00> : vector<32x512xf32>
    %152 = tpu.matmul %150, %151, %cst_119 {dimension_numbers = #tpu.dot_dimension_numbers<[1], [0], [0], [1], [0, 0, 1, 1], [], []>} : vector<32x168xbf16>, vector<168x512xbf16>, vector<32x512xf32> -> vector<32x512xf32>
    %153 = vector.extract_strided_slice %152 {offsets = [0, 24], sizes = [32, 384], strides = [1, 1]} : vector<32x512xf32> to vector<32x384xf32>
    %154 = arith.addf %148, %153 : vector<32x384xf32>
    %c12 = arith.constant 12 : index
    %c0_120 = arith.constant 0 : index
    %c0_121 = arith.constant 0 : index
    %155 = vector.load %arg2[%c12, %c0_120, %c0_121] : memref<30x32x168xbf16, #tpu.memory_space<vmem>>, vector<1x32x168xbf16>
    %156 = vector.shape_cast %155 : vector<1x32x168xbf16> to vector<32x168xbf16>
    %c0_122 = arith.constant 0 : index
    %c0_123 = arith.constant 0 : index
    %157 = vector.load %arg7[%c0_122, %c0_123] : memref<168x512xbf16, #tpu.memory_space<vmem>>, vector<168x512xbf16>
    %cst_124 = arith.constant dense<0.000000e+00> : vector<32x512xf32>
    %158 = tpu.matmul %156, %157, %cst_124 {dimension_numbers = #tpu.dot_dimension_numbers<[1], [0], [0], [1], [0, 0, 1, 1], [], []>} : vector<32x168xbf16>, vector<168x512xbf16>, vector<32x512xf32> -> vector<32x512xf32>
    %159 = vector.extract_strided_slice %158 {offsets = [0, 48], sizes = [32, 384], strides = [1, 1]} : vector<32x512xf32> to vector<32x384xf32>
    %160 = arith.addf %154, %159 : vector<32x384xf32>
    %c13 = arith.constant 13 : index
    %c0_125 = arith.constant 0 : index
    %c0_126 = arith.constant 0 : index
    %161 = vector.load %arg2[%c13, %c0_125, %c0_126] : memref<30x32x168xbf16, #tpu.memory_space<vmem>>, vector<1x32x168xbf16>
    %162 = vector.shape_cast %161 : vector<1x32x168xbf16> to vector<32x168xbf16>
    %c0_127 = arith.constant 0 : index
    %c0_128 = arith.constant 0 : index
    %163 = vector.load %arg7[%c0_127, %c0_128] : memref<168x512xbf16, #tpu.memory_space<vmem>>, vector<168x512xbf16>
    %cst_129 = arith.constant dense<0.000000e+00> : vector<32x512xf32>
    %164 = tpu.matmul %162, %163, %cst_129 {dimension_numbers = #tpu.dot_dimension_numbers<[1], [0], [0], [1], [0, 0, 1, 1], [], []>} : vector<32x168xbf16>, vector<168x512xbf16>, vector<32x512xf32> -> vector<32x512xf32>
    %165 = vector.extract_strided_slice %164 {offsets = [0, 72], sizes = [32, 384], strides = [1, 1]} : vector<32x512xf32> to vector<32x384xf32>
    %166 = arith.addf %160, %165 : vector<32x384xf32>
    %c14 = arith.constant 14 : index
    %c0_130 = arith.constant 0 : index
    %c0_131 = arith.constant 0 : index
    %167 = vector.load %arg2[%c14, %c0_130, %c0_131] : memref<30x32x168xbf16, #tpu.memory_space<vmem>>, vector<1x32x168xbf16>
    %168 = vector.shape_cast %167 : vector<1x32x168xbf16> to vector<32x168xbf16>
    %c0_132 = arith.constant 0 : index
    %c0_133 = arith.constant 0 : index
    %169 = vector.load %arg7[%c0_132, %c0_133] : memref<168x512xbf16, #tpu.memory_space<vmem>>, vector<168x512xbf16>
    %cst_134 = arith.constant dense<0.000000e+00> : vector<32x512xf32>
    %170 = tpu.matmul %168, %169, %cst_134 {dimension_numbers = #tpu.dot_dimension_numbers<[1], [0], [0], [1], [0, 0, 1, 1], [], []>} : vector<32x168xbf16>, vector<168x512xbf16>, vector<32x512xf32> -> vector<32x512xf32>
    %171 = vector.extract_strided_slice %170 {offsets = [0, 96], sizes = [32, 384], strides = [1, 1]} : vector<32x512xf32> to vector<32x384xf32>
    %172 = arith.addf %166, %171 : vector<32x384xf32>
    %cst_135 = arith.constant 0.000000e+00 : f32
    %173 = vector.broadcast %cst_135 : f32 to vector<32x384xf32>
    %174 = arith.cmpf ogt, %172, %173 : vector<32x384xf32>
    %cst_136 = arith.constant 2.000000e-01 : f32
    %175 = vector.broadcast %cst_136 : f32 to vector<32x384xf32>
    %176 = arith.mulf %175, %172 : vector<32x384xf32>
    %177 = arith.select %174, %172, %176 : vector<32x384xi1>, vector<32x384xf32>
    %178 = vector.broadcast %27 : vector<1x384xf32> to vector<32x384xf32>
    %179 = arith.mulf %177, %178 : vector<32x384xf32>
    %c0_137 = arith.constant 0 : index
    %c128_138 = arith.constant 128 : index
    %180 = vector.load %arg6[%c0_137, %c128_138] : memref<32x640xf32, #tpu.memory_space<vmem>>, vector<32x384xf32>
    tpu.vector_store %arg6[%c0_137, %c128_138], %179 {strides = array<i32>} : memref<32x640xf32, #tpu.memory_space<vmem>>, vector<32x384xf32>,
    %c0_139 = arith.constant 0 : index
    %c78_140 = arith.constant 78 : index
    %181 = vector.load %arg6[%c0_139, %c78_140] : memref<32x640xf32, #tpu.memory_space<vmem>>, vector<32x512xf32>
    %182 = arith.truncf %181 : vector<32x512xf32> to vector<32x512xbf16>
    %c0_141 = arith.constant 0 : index
    %c0_142 = arith.constant 0 : index
    %183 = vector.load %arg7[%c0_141, %c0_142] : memref<168x512xbf16, #tpu.memory_space<vmem>>, vector<32x512xbf16>
    tpu.vector_store %arg7[%c0_141, %c0_142], %182 {strides = array<i32>} : memref<168x512xbf16, #tpu.memory_space<vmem>>, vector<32x512xbf16>,
    %c0_143 = arith.constant 0 : index
    %c79_144 = arith.constant 79 : index
    %184 = vector.load %arg6[%c0_143, %c79_144] : memref<32x640xf32, #tpu.memory_space<vmem>>, vector<32x512xf32>
    %185 = arith.truncf %184 : vector<32x512xf32> to vector<32x512xbf16>
    %c32_145 = arith.constant 32 : index
    %c0_146 = arith.constant 0 : index
    %186 = vector.load %arg7[%c32_145, %c0_146] : memref<168x512xbf16, #tpu.memory_space<vmem>>, vector<32x512xbf16>
    tpu.vector_store %arg7[%c32_145, %c0_146], %185 {strides = array<i32>} : memref<168x512xbf16, #tpu.memory_space<vmem>>, vector<32x512xbf16>,
    %c0_147 = arith.constant 0 : index
    %c80_148 = arith.constant 80 : index
    %187 = vector.load %arg6[%c0_147, %c80_148] : memref<32x640xf32, #tpu.memory_space<vmem>>, vector<32x512xf32>
    %188 = arith.truncf %187 : vector<32x512xf32> to vector<32x512xbf16>
    %c64_149 = arith.constant 64 : index
    %c0_150 = arith.constant 0 : index
    %189 = vector.load %arg7[%c64_149, %c0_150] : memref<168x512xbf16, #tpu.memory_space<vmem>>, vector<32x512xbf16>
    tpu.vector_store %arg7[%c64_149, %c0_150], %188 {strides = array<i32>} : memref<168x512xbf16, #tpu.memory_space<vmem>>, vector<32x512xbf16>,
    %c0_151 = arith.constant 0 : index
    %c81_152 = arith.constant 81 : index
    %190 = vector.load %arg6[%c0_151, %c81_152] : memref<32x640xf32, #tpu.memory_space<vmem>>, vector<32x512xf32>
    %191 = arith.truncf %190 : vector<32x512xf32> to vector<32x512xbf16>
    %c96_153 = arith.constant 96 : index
    %c0_154 = arith.constant 0 : index
    %192 = vector.load %arg7[%c96_153, %c0_154] : memref<168x512xbf16, #tpu.memory_space<vmem>>, vector<32x512xbf16>
    tpu.vector_store %arg7[%c96_153, %c0_154], %191 {strides = array<i32>} : memref<168x512xbf16, #tpu.memory_space<vmem>>, vector<32x512xbf16>,
    %c0_155 = arith.constant 0 : index
    %c82_156 = arith.constant 82 : index
    %193 = vector.load %arg6[%c0_155, %c82_156] : memref<32x640xf32, #tpu.memory_space<vmem>>, vector<32x512xf32>
    %194 = arith.truncf %193 : vector<32x512xf32> to vector<32x512xbf16>
    %c128_157 = arith.constant 128 : index
    %c0_158 = arith.constant 0 : index
    %195 = vector.load %arg7[%c128_157, %c0_158] : memref<168x512xbf16, #tpu.memory_space<vmem>>, vector<32x512xbf16>
    tpu.vector_store %arg7[%c128_157, %c0_158], %194 {strides = array<i32>} : memref<168x512xbf16, #tpu.memory_space<vmem>>, vector<32x512xbf16>,
    %c3_159 = arith.constant 3 : index
    %c0_160 = arith.constant 0 : index
    %c0_161 = arith.constant 0 : index
    %196 = vector.load %arg3[%c3_159, %c0_160, %c0_161] : memref<6x32x1xf32, #tpu.memory_space<vmem>>, vector<1x32x1xf32>
    %197 = vector.shape_cast %196 : vector<1x32x1xf32> to vector<32x1xf32>
    %c15 = arith.constant 15 : index
    %c0_162 = arith.constant 0 : index
    %c0_163 = arith.constant 0 : index
    %198 = vector.load %arg2[%c15, %c0_162, %c0_163] : memref<30x32x168xbf16, #tpu.memory_space<vmem>>, vector<1x32x168xbf16>
    %199 = vector.shape_cast %198 : vector<1x32x168xbf16> to vector<32x168xbf16>
    %c0_164 = arith.constant 0 : index
    %c0_165 = arith.constant 0 : index
    %200 = vector.load %arg7[%c0_164, %c0_165] : memref<168x512xbf16, #tpu.memory_space<vmem>>, vector<168x512xbf16>
    %cst_166 = arith.constant dense<0.000000e+00> : vector<32x512xf32>
    %201 = tpu.matmul %199, %200, %cst_166 {dimension_numbers = #tpu.dot_dimension_numbers<[1], [0], [0], [1], [0, 0, 1, 1], [], []>} : vector<32x168xbf16>, vector<168x512xbf16>, vector<32x512xf32> -> vector<32x512xf32>
    %202 = vector.extract_strided_slice %201 {offsets = [0, 0], sizes = [32, 384], strides = [1, 1]} : vector<32x512xf32> to vector<32x384xf32>
    %203 = vector.broadcast %197 : vector<32x1xf32> to vector<32x384xf32>
    %204 = arith.addf %203, %202 : vector<32x384xf32>
    %c16 = arith.constant 16 : index
    %c0_167 = arith.constant 0 : index
    %c0_168 = arith.constant 0 : index
    %205 = vector.load %arg2[%c16, %c0_167, %c0_168] : memref<30x32x168xbf16, #tpu.memory_space<vmem>>, vector<1x32x168xbf16>
    %206 = vector.shape_cast %205 : vector<1x32x168xbf16> to vector<32x168xbf16>
    %c0_169 = arith.constant 0 : index
    %c0_170 = arith.constant 0 : index
    %207 = vector.load %arg7[%c0_169, %c0_170] : memref<168x512xbf16, #tpu.memory_space<vmem>>, vector<168x512xbf16>
    %cst_171 = arith.constant dense<0.000000e+00> : vector<32x512xf32>
    %208 = tpu.matmul %206, %207, %cst_171 {dimension_numbers = #tpu.dot_dimension_numbers<[1], [0], [0], [1], [0, 0, 1, 1], [], []>} : vector<32x168xbf16>, vector<168x512xbf16>, vector<32x512xf32> -> vector<32x512xf32>
    %209 = vector.extract_strided_slice %208 {offsets = [0, 24], sizes = [32, 384], strides = [1, 1]} : vector<32x512xf32> to vector<32x384xf32>
    %210 = arith.addf %204, %209 : vector<32x384xf32>
    %c17 = arith.constant 17 : index
    %c0_172 = arith.constant 0 : index
    %c0_173 = arith.constant 0 : index
    %211 = vector.load %arg2[%c17, %c0_172, %c0_173] : memref<30x32x168xbf16, #tpu.memory_space<vmem>>, vector<1x32x168xbf16>
    %212 = vector.shape_cast %211 : vector<1x32x168xbf16> to vector<32x168xbf16>
    %c0_174 = arith.constant 0 : index
    %c0_175 = arith.constant 0 : index
    %213 = vector.load %arg7[%c0_174, %c0_175] : memref<168x512xbf16, #tpu.memory_space<vmem>>, vector<168x512xbf16>
    %cst_176 = arith.constant dense<0.000000e+00> : vector<32x512xf32>
    %214 = tpu.matmul %212, %213, %cst_176 {dimension_numbers = #tpu.dot_dimension_numbers<[1], [0], [0], [1], [0, 0, 1, 1], [], []>} : vector<32x168xbf16>, vector<168x512xbf16>, vector<32x512xf32> -> vector<32x512xf32>
    %215 = vector.extract_strided_slice %214 {offsets = [0, 48], sizes = [32, 384], strides = [1, 1]} : vector<32x512xf32> to vector<32x384xf32>
    %216 = arith.addf %210, %215 : vector<32x384xf32>
    %c18 = arith.constant 18 : index
    %c0_177 = arith.constant 0 : index
    %c0_178 = arith.constant 0 : index
    %217 = vector.load %arg2[%c18, %c0_177, %c0_178] : memref<30x32x168xbf16, #tpu.memory_space<vmem>>, vector<1x32x168xbf16>
    %218 = vector.shape_cast %217 : vector<1x32x168xbf16> to vector<32x168xbf16>
    %c0_179 = arith.constant 0 : index
    %c0_180 = arith.constant 0 : index
    %219 = vector.load %arg7[%c0_179, %c0_180] : memref<168x512xbf16, #tpu.memory_space<vmem>>, vector<168x512xbf16>
    %cst_181 = arith.constant dense<0.000000e+00> : vector<32x512xf32>
    %220 = tpu.matmul %218, %219, %cst_181 {dimension_numbers = #tpu.dot_dimension_numbers<[1], [0], [0], [1], [0, 0, 1, 1], [], []>} : vector<32x168xbf16>, vector<168x512xbf16>, vector<32x512xf32> -> vector<32x512xf32>
    %221 = vector.extract_strided_slice %220 {offsets = [0, 72], sizes = [32, 384], strides = [1, 1]} : vector<32x512xf32> to vector<32x384xf32>
    %222 = arith.addf %216, %221 : vector<32x384xf32>
    %c19 = arith.constant 19 : index
    %c0_182 = arith.constant 0 : index
    %c0_183 = arith.constant 0 : index
    %223 = vector.load %arg2[%c19, %c0_182, %c0_183] : memref<30x32x168xbf16, #tpu.memory_space<vmem>>, vector<1x32x168xbf16>
    %224 = vector.shape_cast %223 : vector<1x32x168xbf16> to vector<32x168xbf16>
    %c0_184 = arith.constant 0 : index
    %c0_185 = arith.constant 0 : index
    %225 = vector.load %arg7[%c0_184, %c0_185] : memref<168x512xbf16, #tpu.memory_space<vmem>>, vector<168x512xbf16>
    %cst_186 = arith.constant dense<0.000000e+00> : vector<32x512xf32>
    %226 = tpu.matmul %224, %225, %cst_186 {dimension_numbers = #tpu.dot_dimension_numbers<[1], [0], [0], [1], [0, 0, 1, 1], [], []>} : vector<32x168xbf16>, vector<168x512xbf16>, vector<32x512xf32> -> vector<32x512xf32>
    %227 = vector.extract_strided_slice %226 {offsets = [0, 96], sizes = [32, 384], strides = [1, 1]} : vector<32x512xf32> to vector<32x384xf32>
    %228 = arith.addf %222, %227 : vector<32x384xf32>
    %cst_187 = arith.constant 0.000000e+00 : f32
    %229 = vector.broadcast %cst_187 : f32 to vector<32x384xf32>
    %230 = arith.cmpf ogt, %228, %229 : vector<32x384xf32>
    %cst_188 = arith.constant 2.000000e-01 : f32
    %231 = vector.broadcast %cst_188 : f32 to vector<32x384xf32>
    %232 = arith.mulf %231, %228 : vector<32x384xf32>
    %233 = arith.select %230, %228, %232 : vector<32x384xi1>, vector<32x384xf32>
    %234 = vector.broadcast %27 : vector<1x384xf32> to vector<32x384xf32>
    %235 = arith.mulf %233, %234 : vector<32x384xf32>
    %c0_189 = arith.constant 0 : index
    %c128_190 = arith.constant 128 : index
    %236 = vector.load %arg6[%c0_189, %c128_190] : memref<32x640xf32, #tpu.memory_space<vmem>>, vector<32x384xf32>
    tpu.vector_store %arg6[%c0_189, %c128_190], %235 {strides = array<i32>} : memref<32x640xf32, #tpu.memory_space<vmem>>, vector<32x384xf32>,
    %c0_191 = arith.constant 0 : index
    %c78_192 = arith.constant 78 : index
    %237 = vector.load %arg6[%c0_191, %c78_192] : memref<32x640xf32, #tpu.memory_space<vmem>>, vector<32x512xf32>
    %238 = arith.truncf %237 : vector<32x512xf32> to vector<32x512xbf16>
    %c0_193 = arith.constant 0 : index
    %c0_194 = arith.constant 0 : index
    %239 = vector.load %arg7[%c0_193, %c0_194] : memref<168x512xbf16, #tpu.memory_space<vmem>>, vector<32x512xbf16>
    tpu.vector_store %arg7[%c0_193, %c0_194], %238 {strides = array<i32>} : memref<168x512xbf16, #tpu.memory_space<vmem>>, vector<32x512xbf16>,
    %c0_195 = arith.constant 0 : index
    %c79_196 = arith.constant 79 : index
    %240 = vector.load %arg6[%c0_195, %c79_196] : memref<32x640xf32, #tpu.memory_space<vmem>>, vector<32x512xf32>
    %241 = arith.truncf %240 : vector<32x512xf32> to vector<32x512xbf16>
    %c32_197 = arith.constant 32 : index
    %c0_198 = arith.constant 0 : index
    %242 = vector.load %arg7[%c32_197, %c0_198] : memref<168x512xbf16, #tpu.memory_space<vmem>>, vector<32x512xbf16>
    tpu.vector_store %arg7[%c32_197, %c0_198], %241 {strides = array<i32>} : memref<168x512xbf16, #tpu.memory_space<vmem>>, vector<32x512xbf16>,
    %c0_199 = arith.constant 0 : index
    %c80_200 = arith.constant 80 : index
    %243 = vector.load %arg6[%c0_199, %c80_200] : memref<32x640xf32, #tpu.memory_space<vmem>>, vector<32x512xf32>
    %244 = arith.truncf %243 : vector<32x512xf32> to vector<32x512xbf16>
    %c64_201 = arith.constant 64 : index
    %c0_202 = arith.constant 0 : index
    %245 = vector.load %arg7[%c64_201, %c0_202] : memref<168x512xbf16, #tpu.memory_space<vmem>>, vector<32x512xbf16>
    tpu.vector_store %arg7[%c64_201, %c0_202], %244 {strides = array<i32>} : memref<168x512xbf16, #tpu.memory_space<vmem>>, vector<32x512xbf16>,
    %c0_203 = arith.constant 0 : index
    %c81_204 = arith.constant 81 : index
    %246 = vector.load %arg6[%c0_203, %c81_204] : memref<32x640xf32, #tpu.memory_space<vmem>>, vector<32x512xf32>
    %247 = arith.truncf %246 : vector<32x512xf32> to vector<32x512xbf16>
    %c96_205 = arith.constant 96 : index
    %c0_206 = arith.constant 0 : index
    %248 = vector.load %arg7[%c96_205, %c0_206] : memref<168x512xbf16, #tpu.memory_space<vmem>>, vector<32x512xbf16>
    tpu.vector_store %arg7[%c96_205, %c0_206], %247 {strides = array<i32>} : memref<168x512xbf16, #tpu.memory_space<vmem>>, vector<32x512xbf16>,
    %c0_207 = arith.constant 0 : index
    %c82_208 = arith.constant 82 : index
    %249 = vector.load %arg6[%c0_207, %c82_208] : memref<32x640xf32, #tpu.memory_space<vmem>>, vector<32x512xf32>
    %250 = arith.truncf %249 : vector<32x512xf32> to vector<32x512xbf16>
    %c128_209 = arith.constant 128 : index
    %c0_210 = arith.constant 0 : index
    %251 = vector.load %arg7[%c128_209, %c0_210] : memref<168x512xbf16, #tpu.memory_space<vmem>>, vector<32x512xbf16>
    tpu.vector_store %arg7[%c128_209, %c0_210], %250 {strides = array<i32>} : memref<168x512xbf16, #tpu.memory_space<vmem>>, vector<32x512xbf16>,
    %c4_211 = arith.constant 4 : index
    %c0_212 = arith.constant 0 : index
    %c0_213 = arith.constant 0 : index
    %252 = vector.load %arg3[%c4_211, %c0_212, %c0_213] : memref<6x32x1xf32, #tpu.memory_space<vmem>>, vector<1x32x1xf32>
    %253 = vector.shape_cast %252 : vector<1x32x1xf32> to vector<32x1xf32>
    %c20 = arith.constant 20 : index
    %c0_214 = arith.constant 0 : index
    %c0_215 = arith.constant 0 : index
    %254 = vector.load %arg2[%c20, %c0_214, %c0_215] : memref<30x32x168xbf16, #tpu.memory_space<vmem>>, vector<1x32x168xbf16>
    %255 = vector.shape_cast %254 : vector<1x32x168xbf16> to vector<32x168xbf16>
    %c0_216 = arith.constant 0 : index
    %c0_217 = arith.constant 0 : index
    %256 = vector.load %arg7[%c0_216, %c0_217] : memref<168x512xbf16, #tpu.memory_space<vmem>>, vector<168x512xbf16>
    %cst_218 = arith.constant dense<0.000000e+00> : vector<32x512xf32>
    %257 = tpu.matmul %255, %256, %cst_218 {dimension_numbers = #tpu.dot_dimension_numbers<[1], [0], [0], [1], [0, 0, 1, 1], [], []>} : vector<32x168xbf16>, vector<168x512xbf16>, vector<32x512xf32> -> vector<32x512xf32>
    %258 = vector.extract_strided_slice %257 {offsets = [0, 0], sizes = [32, 384], strides = [1, 1]} : vector<32x512xf32> to vector<32x384xf32>
    %259 = vector.broadcast %253 : vector<32x1xf32> to vector<32x384xf32>
    %260 = arith.addf %259, %258 : vector<32x384xf32>
    %c21 = arith.constant 21 : index
    %c0_219 = arith.constant 0 : index
    %c0_220 = arith.constant 0 : index
    %261 = vector.load %arg2[%c21, %c0_219, %c0_220] : memref<30x32x168xbf16, #tpu.memory_space<vmem>>, vector<1x32x168xbf16>
    %262 = vector.shape_cast %261 : vector<1x32x168xbf16> to vector<32x168xbf16>
    %c0_221 = arith.constant 0 : index
    %c0_222 = arith.constant 0 : index
    %263 = vector.load %arg7[%c0_221, %c0_222] : memref<168x512xbf16, #tpu.memory_space<vmem>>, vector<168x512xbf16>
    %cst_223 = arith.constant dense<0.000000e+00> : vector<32x512xf32>
    %264 = tpu.matmul %262, %263, %cst_223 {dimension_numbers = #tpu.dot_dimension_numbers<[1], [0], [0], [1], [0, 0, 1, 1], [], []>} : vector<32x168xbf16>, vector<168x512xbf16>, vector<32x512xf32> -> vector<32x512xf32>
    %265 = vector.extract_strided_slice %264 {offsets = [0, 24], sizes = [32, 384], strides = [1, 1]} : vector<32x512xf32> to vector<32x384xf32>
    %266 = arith.addf %260, %265 : vector<32x384xf32>
    %c22 = arith.constant 22 : index
    %c0_224 = arith.constant 0 : index
    %c0_225 = arith.constant 0 : index
    %267 = vector.load %arg2[%c22, %c0_224, %c0_225] : memref<30x32x168xbf16, #tpu.memory_space<vmem>>, vector<1x32x168xbf16>
    %268 = vector.shape_cast %267 : vector<1x32x168xbf16> to vector<32x168xbf16>
    %c0_226 = arith.constant 0 : index
    %c0_227 = arith.constant 0 : index
    %269 = vector.load %arg7[%c0_226, %c0_227] : memref<168x512xbf16, #tpu.memory_space<vmem>>, vector<168x512xbf16>
    %cst_228 = arith.constant dense<0.000000e+00> : vector<32x512xf32>
    %270 = tpu.matmul %268, %269, %cst_228 {dimension_numbers = #tpu.dot_dimension_numbers<[1], [0], [0], [1], [0, 0, 1, 1], [], []>} : vector<32x168xbf16>, vector<168x512xbf16>, vector<32x512xf32> -> vector<32x512xf32>
    %271 = vector.extract_strided_slice %270 {offsets = [0, 48], sizes = [32, 384], strides = [1, 1]} : vector<32x512xf32> to vector<32x384xf32>
    %272 = arith.addf %266, %271 : vector<32x384xf32>
    %c23 = arith.constant 23 : index
    %c0_229 = arith.constant 0 : index
    %c0_230 = arith.constant 0 : index
    %273 = vector.load %arg2[%c23, %c0_229, %c0_230] : memref<30x32x168xbf16, #tpu.memory_space<vmem>>, vector<1x32x168xbf16>
    %274 = vector.shape_cast %273 : vector<1x32x168xbf16> to vector<32x168xbf16>
    %c0_231 = arith.constant 0 : index
    %c0_232 = arith.constant 0 : index
    %275 = vector.load %arg7[%c0_231, %c0_232] : memref<168x512xbf16, #tpu.memory_space<vmem>>, vector<168x512xbf16>
    %cst_233 = arith.constant dense<0.000000e+00> : vector<32x512xf32>
    %276 = tpu.matmul %274, %275, %cst_233 {dimension_numbers = #tpu.dot_dimension_numbers<[1], [0], [0], [1], [0, 0, 1, 1], [], []>} : vector<32x168xbf16>, vector<168x512xbf16>, vector<32x512xf32> -> vector<32x512xf32>
    %277 = vector.extract_strided_slice %276 {offsets = [0, 72], sizes = [32, 384], strides = [1, 1]} : vector<32x512xf32> to vector<32x384xf32>
    %278 = arith.addf %272, %277 : vector<32x384xf32>
    %c24 = arith.constant 24 : index
    %c0_234 = arith.constant 0 : index
    %c0_235 = arith.constant 0 : index
    %279 = vector.load %arg2[%c24, %c0_234, %c0_235] : memref<30x32x168xbf16, #tpu.memory_space<vmem>>, vector<1x32x168xbf16>
    %280 = vector.shape_cast %279 : vector<1x32x168xbf16> to vector<32x168xbf16>
    %c0_236 = arith.constant 0 : index
    %c0_237 = arith.constant 0 : index
    %281 = vector.load %arg7[%c0_236, %c0_237] : memref<168x512xbf16, #tpu.memory_space<vmem>>, vector<168x512xbf16>
    %cst_238 = arith.constant dense<0.000000e+00> : vector<32x512xf32>
    %282 = tpu.matmul %280, %281, %cst_238 {dimension_numbers = #tpu.dot_dimension_numbers<[1], [0], [0], [1], [0, 0, 1, 1], [], []>} : vector<32x168xbf16>, vector<168x512xbf16>, vector<32x512xf32> -> vector<32x512xf32>
    %283 = vector.extract_strided_slice %282 {offsets = [0, 96], sizes = [32, 384], strides = [1, 1]} : vector<32x512xf32> to vector<32x384xf32>
    %284 = arith.addf %278, %283 : vector<32x384xf32>
    %cst_239 = arith.constant 0.000000e+00 : f32
    %285 = vector.broadcast %cst_239 : f32 to vector<32x384xf32>
    %286 = arith.cmpf ogt, %284, %285 : vector<32x384xf32>
    %cst_240 = arith.constant 2.000000e-01 : f32
    %287 = vector.broadcast %cst_240 : f32 to vector<32x384xf32>
    %288 = arith.mulf %287, %284 : vector<32x384xf32>
    %289 = arith.select %286, %284, %288 : vector<32x384xi1>, vector<32x384xf32>
    %290 = vector.broadcast %27 : vector<1x384xf32> to vector<32x384xf32>
    %291 = arith.mulf %289, %290 : vector<32x384xf32>
    %c0_241 = arith.constant 0 : index
    %c128_242 = arith.constant 128 : index
    %292 = vector.load %arg6[%c0_241, %c128_242] : memref<32x640xf32, #tpu.memory_space<vmem>>, vector<32x384xf32>
    tpu.vector_store %arg6[%c0_241, %c128_242], %291 {strides = array<i32>} : memref<32x640xf32, #tpu.memory_space<vmem>>, vector<32x384xf32>,
    %c0_243 = arith.constant 0 : index
    %c78_244 = arith.constant 78 : index
    %293 = vector.load %arg6[%c0_243, %c78_244] : memref<32x640xf32, #tpu.memory_space<vmem>>, vector<32x512xf32>
    %294 = arith.truncf %293 : vector<32x512xf32> to vector<32x512xbf16>
    %c0_245 = arith.constant 0 : index
    %c0_246 = arith.constant 0 : index
    %295 = vector.load %arg7[%c0_245, %c0_246] : memref<168x512xbf16, #tpu.memory_space<vmem>>, vector<32x512xbf16>
    tpu.vector_store %arg7[%c0_245, %c0_246], %294 {strides = array<i32>} : memref<168x512xbf16, #tpu.memory_space<vmem>>, vector<32x512xbf16>,
    %c0_247 = arith.constant 0 : index
    %c79_248 = arith.constant 79 : index
    %296 = vector.load %arg6[%c0_247, %c79_248] : memref<32x640xf32, #tpu.memory_space<vmem>>, vector<32x512xf32>
    %297 = arith.truncf %296 : vector<32x512xf32> to vector<32x512xbf16>
    %c32_249 = arith.constant 32 : index
    %c0_250 = arith.constant 0 : index
    %298 = vector.load %arg7[%c32_249, %c0_250] : memref<168x512xbf16, #tpu.memory_space<vmem>>, vector<32x512xbf16>
    tpu.vector_store %arg7[%c32_249, %c0_250], %297 {strides = array<i32>} : memref<168x512xbf16, #tpu.memory_space<vmem>>, vector<32x512xbf16>,
    %c0_251 = arith.constant 0 : index
    %c80_252 = arith.constant 80 : index
    %299 = vector.load %arg6[%c0_251, %c80_252] : memref<32x640xf32, #tpu.memory_space<vmem>>, vector<32x512xf32>
    %300 = arith.truncf %299 : vector<32x512xf32> to vector<32x512xbf16>
    %c64_253 = arith.constant 64 : index
    %c0_254 = arith.constant 0 : index
    %301 = vector.load %arg7[%c64_253, %c0_254] : memref<168x512xbf16, #tpu.memory_space<vmem>>, vector<32x512xbf16>
    tpu.vector_store %arg7[%c64_253, %c0_254], %300 {strides = array<i32>} : memref<168x512xbf16, #tpu.memory_space<vmem>>, vector<32x512xbf16>,
    %c0_255 = arith.constant 0 : index
    %c81_256 = arith.constant 81 : index
    %302 = vector.load %arg6[%c0_255, %c81_256] : memref<32x640xf32, #tpu.memory_space<vmem>>, vector<32x512xf32>
    %303 = arith.truncf %302 : vector<32x512xf32> to vector<32x512xbf16>
    %c96_257 = arith.constant 96 : index
    %c0_258 = arith.constant 0 : index
    %304 = vector.load %arg7[%c96_257, %c0_258] : memref<168x512xbf16, #tpu.memory_space<vmem>>, vector<32x512xbf16>
    tpu.vector_store %arg7[%c96_257, %c0_258], %303 {strides = array<i32>} : memref<168x512xbf16, #tpu.memory_space<vmem>>, vector<32x512xbf16>,
    %c0_259 = arith.constant 0 : index
    %c82_260 = arith.constant 82 : index
    %305 = vector.load %arg6[%c0_259, %c82_260] : memref<32x640xf32, #tpu.memory_space<vmem>>, vector<32x512xf32>
    %306 = arith.truncf %305 : vector<32x512xf32> to vector<32x512xbf16>
    %c128_261 = arith.constant 128 : index
    %c0_262 = arith.constant 0 : index
    %307 = vector.load %arg7[%c128_261, %c0_262] : memref<168x512xbf16, #tpu.memory_space<vmem>>, vector<32x512xbf16>
    tpu.vector_store %arg7[%c128_261, %c0_262], %306 {strides = array<i32>} : memref<168x512xbf16, #tpu.memory_space<vmem>>, vector<32x512xbf16>,
    %c5_263 = arith.constant 5 : index
    %c0_264 = arith.constant 0 : index
    %c0_265 = arith.constant 0 : index
    %308 = vector.load %arg3[%c5_263, %c0_264, %c0_265] : memref<6x32x1xf32, #tpu.memory_space<vmem>>, vector<1x32x1xf32>
    %309 = vector.shape_cast %308 : vector<1x32x1xf32> to vector<32x1xf32>
    %c25 = arith.constant 25 : index
    %c0_266 = arith.constant 0 : index
    %c0_267 = arith.constant 0 : index
    %310 = vector.load %arg2[%c25, %c0_266, %c0_267] : memref<30x32x168xbf16, #tpu.memory_space<vmem>>, vector<1x32x168xbf16>
    %311 = vector.shape_cast %310 : vector<1x32x168xbf16> to vector<32x168xbf16>
    %c0_268 = arith.constant 0 : index
    %c0_269 = arith.constant 0 : index
    %312 = vector.load %arg7[%c0_268, %c0_269] : memref<168x512xbf16, #tpu.memory_space<vmem>>, vector<168x512xbf16>
    %cst_270 = arith.constant dense<0.000000e+00> : vector<32x512xf32>
    %313 = tpu.matmul %311, %312, %cst_270 {dimension_numbers = #tpu.dot_dimension_numbers<[1], [0], [0], [1], [0, 0, 1, 1], [], []>} : vector<32x168xbf16>, vector<168x512xbf16>, vector<32x512xf32> -> vector<32x512xf32>
    %314 = vector.extract_strided_slice %313 {offsets = [0, 0], sizes = [32, 384], strides = [1, 1]} : vector<32x512xf32> to vector<32x384xf32>
    %315 = vector.broadcast %309 : vector<32x1xf32> to vector<32x384xf32>
    %316 = arith.addf %315, %314 : vector<32x384xf32>
    %c26 = arith.constant 26 : index
    %c0_271 = arith.constant 0 : index
    %c0_272 = arith.constant 0 : index
    %317 = vector.load %arg2[%c26, %c0_271, %c0_272] : memref<30x32x168xbf16, #tpu.memory_space<vmem>>, vector<1x32x168xbf16>
    %318 = vector.shape_cast %317 : vector<1x32x168xbf16> to vector<32x168xbf16>
    %c0_273 = arith.constant 0 : index
    %c0_274 = arith.constant 0 : index
    %319 = vector.load %arg7[%c0_273, %c0_274] : memref<168x512xbf16, #tpu.memory_space<vmem>>, vector<168x512xbf16>
    %cst_275 = arith.constant dense<0.000000e+00> : vector<32x512xf32>
    %320 = tpu.matmul %318, %319, %cst_275 {dimension_numbers = #tpu.dot_dimension_numbers<[1], [0], [0], [1], [0, 0, 1, 1], [], []>} : vector<32x168xbf16>, vector<168x512xbf16>, vector<32x512xf32> -> vector<32x512xf32>
    %321 = vector.extract_strided_slice %320 {offsets = [0, 24], sizes = [32, 384], strides = [1, 1]} : vector<32x512xf32> to vector<32x384xf32>
    %322 = arith.addf %316, %321 : vector<32x384xf32>
    %c27 = arith.constant 27 : index
    %c0_276 = arith.constant 0 : index
    %c0_277 = arith.constant 0 : index
    %323 = vector.load %arg2[%c27, %c0_276, %c0_277] : memref<30x32x168xbf16, #tpu.memory_space<vmem>>, vector<1x32x168xbf16>
    %324 = vector.shape_cast %323 : vector<1x32x168xbf16> to vector<32x168xbf16>
    %c0_278 = arith.constant 0 : index
    %c0_279 = arith.constant 0 : index
    %325 = vector.load %arg7[%c0_278, %c0_279] : memref<168x512xbf16, #tpu.memory_space<vmem>>, vector<168x512xbf16>
    %cst_280 = arith.constant dense<0.000000e+00> : vector<32x512xf32>
    %326 = tpu.matmul %324, %325, %cst_280 {dimension_numbers = #tpu.dot_dimension_numbers<[1], [0], [0], [1], [0, 0, 1, 1], [], []>} : vector<32x168xbf16>, vector<168x512xbf16>, vector<32x512xf32> -> vector<32x512xf32>
    %327 = vector.extract_strided_slice %326 {offsets = [0, 48], sizes = [32, 384], strides = [1, 1]} : vector<32x512xf32> to vector<32x384xf32>
    %328 = arith.addf %322, %327 : vector<32x384xf32>
    %c28 = arith.constant 28 : index
    %c0_281 = arith.constant 0 : index
    %c0_282 = arith.constant 0 : index
    %329 = vector.load %arg2[%c28, %c0_281, %c0_282] : memref<30x32x168xbf16, #tpu.memory_space<vmem>>, vector<1x32x168xbf16>
    %330 = vector.shape_cast %329 : vector<1x32x168xbf16> to vector<32x168xbf16>
    %c0_283 = arith.constant 0 : index
    %c0_284 = arith.constant 0 : index
    %331 = vector.load %arg7[%c0_283, %c0_284] : memref<168x512xbf16, #tpu.memory_space<vmem>>, vector<168x512xbf16>
    %cst_285 = arith.constant dense<0.000000e+00> : vector<32x512xf32>
    %332 = tpu.matmul %330, %331, %cst_285 {dimension_numbers = #tpu.dot_dimension_numbers<[1], [0], [0], [1], [0, 0, 1, 1], [], []>} : vector<32x168xbf16>, vector<168x512xbf16>, vector<32x512xf32> -> vector<32x512xf32>
    %333 = vector.extract_strided_slice %332 {offsets = [0, 72], sizes = [32, 384], strides = [1, 1]} : vector<32x512xf32> to vector<32x384xf32>
    %334 = arith.addf %328, %333 : vector<32x384xf32>
    %c29 = arith.constant 29 : index
    %c0_286 = arith.constant 0 : index
    %c0_287 = arith.constant 0 : index
    %335 = vector.load %arg2[%c29, %c0_286, %c0_287] : memref<30x32x168xbf16, #tpu.memory_space<vmem>>, vector<1x32x168xbf16>
    %336 = vector.shape_cast %335 : vector<1x32x168xbf16> to vector<32x168xbf16>
    %c0_288 = arith.constant 0 : index
    %c0_289 = arith.constant 0 : index
    %337 = vector.load %arg7[%c0_288, %c0_289] : memref<168x512xbf16, #tpu.memory_space<vmem>>, vector<168x512xbf16>
    %cst_290 = arith.constant dense<0.000000e+00> : vector<32x512xf32>
    %338 = tpu.matmul %336, %337, %cst_290 {dimension_numbers = #tpu.dot_dimension_numbers<[1], [0], [0], [1], [0, 0, 1, 1], [], []>} : vector<32x168xbf16>, vector<168x512xbf16>, vector<32x512xf32> -> vector<32x512xf32>
    %339 = vector.extract_strided_slice %338 {offsets = [0, 96], sizes = [32, 384], strides = [1, 1]} : vector<32x512xf32> to vector<32x384xf32>
    %340 = arith.addf %334, %339 : vector<32x384xf32>
    %cst_291 = arith.constant 0.000000e+00 : f32
    %341 = vector.broadcast %cst_291 : f32 to vector<32x384xf32>
    %342 = arith.cmpf ogt, %340, %341 : vector<32x384xf32>
    %cst_292 = arith.constant 2.000000e-01 : f32
    %343 = vector.broadcast %cst_292 : f32 to vector<32x384xf32>
    %344 = arith.mulf %343, %340 : vector<32x384xf32>
    %345 = arith.select %342, %340, %344 : vector<32x384xi1>, vector<32x384xf32>
    %346 = vector.broadcast %27 : vector<1x384xf32> to vector<32x384xf32>
    %347 = arith.mulf %345, %346 : vector<32x384xf32>
    %c0_293 = arith.constant 0 : index
    %c128_294 = arith.constant 128 : index
    %348 = vector.load %arg6[%c0_293, %c128_294] : memref<32x640xf32, #tpu.memory_space<vmem>>, vector<32x384xf32>
    tpu.vector_store %arg6[%c0_293, %c128_294], %347 {strides = array<i32>} : memref<32x640xf32, #tpu.memory_space<vmem>>, vector<32x384xf32>,
    %c0_295 = arith.constant 0 : index
    %c0_296 = arith.constant 0 : index
    %349 = vector.load %arg6[%c0_295, %c0_296] : memref<32x640xf32, #tpu.memory_space<vmem>>, vector<32x640xf32>
    %c0_297 = arith.constant 0 : index
    %c0_298 = arith.constant 0 : index
    %350 = vector.load %arg4[%c0_297, %c0_298] : memref<32x640xf32, #tpu.memory_space<vmem>>, vector<32x640xf32>
    %351 = arith.mulf %349, %350 : vector<32x640xf32>
    %352 = vector.shape_cast %351 : vector<32x640xf32> to vector<1x32x640xf32>
    %cst_299 = arith.constant dense<0.000000e+00> : vector<1xf32>
    %353 = vector.multi_reduction <add>, %352, %cst_299 [1, 2] : vector<1x32x640xf32> to vector<1xf32>
    %354 = vector.shape_cast %353 : vector<1xf32> to vector<1x1x1xf32>
    %355 = vector.extract %354[0, 0, 0] : f32 from vector<1x1x1xf32>
    %356 = vector.broadcast %355 : f32 to vector<1x1xf32>
    %cst_300 = arith.constant 3.906250e-03 : f32
    %357 = vector.broadcast %cst_300 : f32 to vector<1x1xf32>
    %358 = arith.mulf %356, %357 : vector<1x1xf32>
    %359 = vector.shape_cast %358 : vector<1x1xf32> to vector<1x1xf32>
    %360 = vector.broadcast %359 : vector<1x1xf32> to vector<8x128xf32>
    %c0_301 = arith.constant 0 : index
    %c0_302 = arith.constant 0 : index
    %c0_303 = arith.constant 0 : index
    %361 = vector.load %arg5[%c0_301, %c0_302, %c0_303] : memref<1x8x128xf32, #tpu.memory_space<vmem>>, vector<1x8x128xf32>
    %362 = vector.shape_cast %361 : vector<1x8x128xf32> to vector<8x128xf32>
    %363 = vector.shape_cast %360 : vector<8x128xf32> to vector<1x8x128xf32>
    tpu.vector_store %arg5[%c0_301, %c0_302, %c0_303], %363 {strides = array<i32>} : memref<1x8x128xf32, #tpu.memory_space<vmem>>, vector<1x8x128xf32>,
    return
  }
  func.func @transform_0(%arg0: i32) -> (i32, i32, i32) {
    %c0_i32 = arith.constant 0 : i32
    %c0_i32_0 = arith.constant 0 : i32
    %c0_i32_1 = arith.constant 0 : i32
    return %arg0, %c0_i32, %c0_i32_0 : i32, i32, i32
  }
  func.func @transform_1(%arg0: i32) -> (i32, i32, i32) {
    %c0_i32 = arith.constant 0 : i32
    %c0_i32_0 = arith.constant 0 : i32
    %c0_i32_1 = arith.constant 0 : i32
    %c0_i32_2 = arith.constant 0 : i32
    return %c0_i32, %c0_i32_0, %c0_i32_1 : i32, i32, i32
  }
  func.func @transform_2(%arg0: i32) -> (i32, i32, i32) {
    %c0_i32 = arith.constant 0 : i32
    %c0_i32_0 = arith.constant 0 : i32
    %c0_i32_1 = arith.constant 0 : i32
    %c0_i32_2 = arith.constant 0 : i32
    return %c0_i32, %c0_i32_0, %c0_i32_1 : i32, i32, i32
  }
  func.func @transform_3(%arg0: i32) -> (i32, i32) {
    %c0_i32 = arith.constant 0 : i32
    %c0_i32_0 = arith.constant 0 : i32
    %c0_i32_1 = arith.constant 0 : i32
    return %c0_i32, %c0_i32_0 : i32, i32
  }
  func.func @transform_4(%arg0: i32) -> (i32, i32, i32) {
    %c0_i32 = arith.constant 0 : i32
    %c0_i32_0 = arith.constant 0 : i32
    %c0_i32_1 = arith.constant 0 : i32
    return %arg0, %c0_i32, %c0_i32_0 : i32, i32, i32
  }
}

</mosaic_0001>

<bundles_post_ra>
// kernel: mynet_forward.1
= control target key start
LH: loop header
LB: loop body
LE: loop exit
PB: predicated region body
PF: predicated region fallthrough
CT: control target
= control target key end

     0   :  { %s13759_s15 = smov 0   ;;  %s19977_s0 = inlined_call_operand.vmem [shape: bf16[2,8,512], index: 0, kind: input, shape index: {}]   ;;  %s19978_s1 = inlined_call_operand.vmem [shape: bf16[30,32,168], index: 1, kind: input, shape index: {}]   ;;  %s19979_s2 = inlined_call_operand.vmem [shape: f32[6,32,1], index: 2, kind: input, shape index: {}]   ;;  %s19980_s3 = inlined_call_operand.vmem [shape: f32[32,640], index: 3, kind: input, shape index: {}]   ;;  %s19981_s4 = inlined_call_operand.vmem [shape: f32[2,8,128], index: 4, kind: output, shape index: {}]  }
   0x1 LB: > { %s12186_s16 = sadd.s32 4294967295, %s13720_s15   ;;  %p12190_p0 = scmp.ge.s32.totalorder %s13720_s15, 1  ;;  %s13720_s15 = sphi %s13759_s15, %s14_s15  }
   0x2   : > { %p162_p1 = scmp.lt.s32.totalorder %s13720_s15, 3 }
   0x4   : > { %p163_p2 = pnand %p12190_p0, %p162_p1 }
   0x6   : > { %166 = sbr.rel (%p163_p2) target bundleno = 4367 (0x110f), region = 36 }
   0xb   : > { %v13722_v0 = vmov 0   ;;  %v13536_v3 = vld [vmem:[%s19978_s1 + $0x4] ss:$8 sps:$4 sm:$0xff]   ;;  %vm602_vm0 = vcmask 326656   ;;  %p187_p3 = scmp.lt.s32.totalorder %s12186_s16, 1  ;;  %v326_v6 = vld [vmem:[%s19979_s2 + $0x10] sm:$0xff] }
   0xc   : > { %v13767_v1 = vcombine.high %v13722_v0, %v13722_v0  ;;  %v13769_v2 = vcombine.low %v13722_v0, %v13722_v0  ;;  %13529 = vset.pattern.permute.xlu1 %v13722_v0  ;;  %13528 = vset.pattern.permute.xlu0 %v13722_v0  ;;  %v324_v4 = vld [vmem:[%s19979_s2] sm:$0xff]  ;;  %v325_v5 = vld [vmem:[%s19979_s2 + $0x8] sm:$0xff]  ;;  %v327_v9 = vld [vmem:[%s19979_s2 + $0x18] sm:$0xff]  ;;  %vm609_vm1 = vcmask 1043456   ;;  %v19982_v24 = vmov 0.0|0.0   ;;  %s13725_s24 = smov 48  }
   0xd   : > { %12246 = vmatprep.mubr.msk.bf16.mxu0 %vm602_vm0, %v13536_v3  ;;  %12249 = vmatprep.mubr.msk.bf16.mxu1 %vm602_vm0, %v13536_v3  ;;  %s20237_s16 = smov (!%p187_p3, %s12186_s16), 1  ;;  %v13534_v16 = vld [vmem:[%s19978_s1] ss:$8 sps:$4 sm:$0xff]   ;;  %v13537_v17 = vld [vmem:[%s19978_s1 + $0x14] ss:$8 sps:$4 sm:$0xff]   ;;  %s13726_s25 = smov 104  }
   0xe   : > { %622 = vmatprep.subr.bf16.mxu0 %v13767_v1  ;;  %675 = vmatprep.subr.bf16.mxu1 %v13767_v1  ;;  %s13199_s23 = sshll.u32 %s20237_s16, 4  ;;  %v13539_v18 = vld [vmem:[%s19978_s1 + $0x10] ss:$8 sps:$4 sm:$0xff]   ;;  %v13542_v19 = vld [vmem:[%s19978_s1 + $0x24] ss:$8 sps:$4 sm:$0xff]   ;;  %s13728_s27 = smov 56  }
   0xf   : > { %623 = vmatpush1.bf16.msra.mxu0 %v13769_v2  ;;  %676 = vmatpush1.bf16.msra.mxu1 %v13769_v2  ;;  %s191_s26 = scalar_lea.vmem %s19977_s0, %s13199_s23  ;;  %v13540_v20 = vld [vmem:[%s19978_s1 + $0x20] ss:$8 sps:$4 sm:$0xff]   ;;  %v13543_v21 = vld [vmem:[%s19978_s1 + $0x34] ss:$8 sps:$4 sm:$0xff]   ;;  %v13545_v22 = vld [vmem:[%s19978_s1 + $0x30] ss:$8 sps:$4 sm:$0xff]  }
  0x10   : > { %624 = vmatprep.subr.bf16.mxu0 %v13767_v1  ;;  %677 = vmatprep.subr.bf16.mxu1 %v13767_v1  ;;  %v259_v7 = vld [vmem:[%s191_s26] sm:$0xff]  ;;  %v260_v8 = vld [vmem:[%s191_s26 + $0x8] sm:$0xff]  ;;  %s13724_s23 = smov 47   ;;  %v13549_v26 = vld [vmem:[%s19978_s1 + $0x54] ss:$8 sps:$4 sm:$0xff]   ;;  %s13727_s26 = smov 80  }
  0x11   : > { %726 = vperm.xlu1 %13529, %v324_v4   ;;  %736 = vperm.xlu0 %13528, %v326_v6   ;;  %v13826_v10 = vcombine.high %v259_v7, %v259_v7  ;;  %v13830_v11 = vcombine.high %v260_v8, %v260_v8  ;;  %v12241_v12 = vcombine.low %v259_v7, %v259_v7  ;;  %v13548_v23 = vld [vmem:[%s19978_s1 + $0x44] ss:$8 sps:$4 sm:$0xff]   ;;  %v13546_v25 = vld [vmem:[%s19978_s1 + $0x40] ss:$8 sps:$4 sm:$0xff]   ;;  %v13551_v27 = vld [vmem:[%s19978_s1 + $0x50] ss:$8 sps:$4 sm:$0xff]  }
  0x12   : > { %v12243_v13 = vcombine.low %v260_v8, %v260_v8  ;;  %v13554_v28 = vld [vmem:[%s19978_s1 + $0x64] ss:$8 sps:$4 sm:$0xff]   ;;  %v13552_v29 = vld [vmem:[%s19978_s1 + $0x60] ss:$8 sps:$4 sm:$0xff]   ;;  %v13555_v30 = vld [vmem:[%s19978_s1 + $0x74] ss:$8 sps:$4 sm:$0xff]  }
  0x13   : > { %625 = vmatpush1.bf16.msra.mxu0 %v13769_v2  ;;  %678 = vmatpush1.bf16.msra.mxu1 %v13769_v2  ;;  %20045 = vst [vmem:[#allocation4_spill] sm:$0xff] %v13826_v10  ;;  %20046 = vst [vmem:[#allocation5_spill] sm:$0xff] %v13830_v11  ;;  %v13839_v14 = vsel %vm609_vm1, %v12241_v12, 0  ;;  %v13557_v31 = vld [vmem:[%s19978_s1 + $0x70] ss:$8 sps:$4 sm:$0xff]   ;;  %s13729_s28 = smov 32  }
  0x14   : > { %626 = vmatprep.subr.bf16.mxu0 %v13767_v1  ;;  %679 = vmatprep.subr.bf16.mxu1 %v13767_v1  ;;  %20047 = vst [vmem:[#allocation6_spill] sm:$0xff] %v13839_v14  ;;  %v13842_v15 = vsel %vm609_vm1, %v12243_v13, 0  ;;  %v13560_v32 = vld [vmem:[%s19978_s1 + $0x84] ss:$8 sps:$4 sm:$0xff]   ;;  %v13558_v33 = vld [vmem:[%s19978_s1 + $0x80] ss:$8 sps:$4 sm:$0xff]  }
  0x15   : > { %731 = vperm.xlu1 %13529, %v325_v5   ;;  %741 = vperm.xlu0 %13528, %v327_v9   ;;  %20048 = vst [vmem:[#allocation7_spill] sm:$0xff] %v13842_v15  ;;  %v13561_v34 = vld [vmem:[%s19978_s1 + $0x94] ss:$8 sps:$4 sm:$0xff]   ;;  %v13563_v35 = vld [vmem:[%s19978_s1 + $0x90] ss:$8 sps:$4 sm:$0xff]   ;;  %s13730_s29 = smov 49  }
  0x16   : > { %s13731_s30 = smov 50   ;;  %vm939_vm4 = vcmask 850944   ;;  %vm1159_vm8 = vcmask 654336   ;;  %vm1379_vm11 = vcmask 457728   ;;  %vm1599_vm13 = vcmask 261120   ;;  %s13733_s5 = smov 46  }
  0x17   : > { %627 = vmatpush1.bf16.msra.mxu0 %v13769_v2  ;;  %680 = vmatpush1.bf16.msra.mxu1 %v13769_v2 }
  0x18   : > { %628 = vmatprep.subr.bf16.mxu0 %v13767_v1  ;;  %681 = vmatprep.subr.bf16.mxu1 %v13767_v1 }
  0x19   : > { %2208 = vrot.lane.b32.xlu0 %v19982_v24, %s13724_s23  ;;  %2214 = vrot.lane.b32.xlu1 %v19982_v24, %s13724_s23 }
  0x1b   : > { %629 = vmatpush1.bf16.msra.mxu0 %v13769_v2  ;;  %682 = vmatpush1.bf16.msra.mxu1 %v13769_v2 }
  0x1c   : > { %630 = vmatprep.subr.bf16.mxu0 %v13767_v1  ;;  %683 = vmatprep.subr.bf16.mxu1 %v13767_v1 }
  0x1d   : > { %2196 = vrot.lane.b32.xlu0 %v19982_v24, %s13724_s23  ;;  %2202 = vrot.lane.b32.xlu1 %v19982_v24, %s13724_s23 }
  0x1f   : > { %631 = vmatpush1.bf16.msra.mxu0 %v13769_v2  ;;  %684 = vmatpush1.bf16.msra.mxu1 %v13769_v2 }
  0x20   : > { %632 = vmatprep.subr.bf16.mxu0 %v13767_v1  ;;  %685 = vmatprep.subr.bf16.mxu1 %v13767_v1 }
  0x21   : > { %2067 = vrot.lane.b32.xlu0 %v19982_v24, %s13725_s24  ;;  %2073 = vrot.lane.b32.xlu1 %v19982_v24, %s13725_s24 }
  0x23   : > { %633 = vmatpush1.bf16.msra.mxu0 %v13769_v2  ;;  %686 = vmatpush1.bf16.msra.mxu1 %v13769_v2 }
  0x24   : > { %634 = vmatprep.subr.bf16.mxu0 %v13767_v1  ;;  %687 = vmatprep.subr.bf16.mxu1 %v13767_v1 }
  0x27   : > { %635 = vmatpush1.bf16.msra.mxu0 %v13769_v2  ;;  %688 = vmatpush1.bf16.msra.mxu1 %v13769_v2 }
  0x28   : > { %636 = vmatprep.subr.bf16.mxu0 %v13767_v1  ;;  %689 = vmatprep.subr.bf16.mxu1 %v13767_v1 }
  0x2b   : > { %637 = vmatpush1.bf16.msra.mxu0 %v13769_v2  ;;  %690 = vmatpush1.bf16.msra.mxu1 %v13769_v2 }
  0x2c   : > { %12245 = vmatprep.subr.msk.bf16.mxu0 %vm609_vm1, %v13826_v10  ;;  %12248 = vmatprep.subr.msk.bf16.mxu1 %vm609_vm1, %v13830_v11 }
  0x2f   : > { %649 = vmatpush2.bf16.msra.mxu0 %v13839_v14  ;;  %702 = vmatpush2.bf16.msra.mxu1 %v13842_v15 }
  0x30   : > { %650 = vmatprep.subr.bf16.mxu0 %v13767_v1  ;;  %703 = vmatprep.subr.bf16.mxu1 %v13767_v1 }
  0x33   : > { %651 = vmatpush2.bf16.msra.mxu0 %v13769_v2  ;;  %704 = vmatpush2.bf16.msra.mxu1 %v13769_v2 }
  0x34   : > { %652 = vmatprep.subr.bf16.mxu0 %v13767_v1  ;;  %705 = vmatprep.subr.bf16.mxu1 %v13767_v1 }
  0x37   : > { %653 = vmatpush2.bf16.msra.mxu0 %v13769_v2  ;;  %706 = vmatpush2.bf16.msra.mxu1 %v13769_v2 }
  0x38   : > { %785 = vmatprep.subr.bf16.mxu0 %v13767_v1  ;;  %838 = vmatprep.subr.bf16.mxu1 %v13767_v1 }
  0x3a   : > { %655 = vmatmul.mubr.bf16.vlgmr.msra.gmra.mxu0 %v13534_v16  ;;  %708 = vmatmul.mubr.bf16.vlgmr.msra.gmra.mxu1 %v13534_v16 }
  0x3b   : > { %786 = vmatpush1.bf16.msra.mxu0 %v13769_v2  ;;  %839 = vmatpush1.bf16.msra.mxu1 %v13769_v2 }
  0x3c   : > { %787 = vmatprep.subr.bf16.mxu0 %v13767_v1  ;;  %840 = vmatprep.subr.bf16.mxu1 %v13767_v1 }
  0x3d   : > { %12247 = vmatprep.mubr.msk.bf16.mxu0 %vm602_vm0, %v13537_v17  ;;  %12250 = vmatprep.mubr.msk.bf16.mxu1 %vm602_vm0, %v13537_v17 }
  0x3f   : > { %788 = vmatpush1.bf16.msra.mxu0 %v13769_v2  ;;  %841 = vmatpush1.bf16.msra.mxu1 %v13769_v2 }
  0x40   : > { %789 = vmatprep.subr.bf16.mxu0 %v13767_v1  ;;  %842 = vmatprep.subr.bf16.mxu1 %v13767_v1 }
  0x42   : > { %665 = vmatmul.mubr.bf16.gmra.mxu0 %v13539_v18  ;;  %716 = vmatmul.mubr.bf16.gmra.mxu1 %v13539_v18 }
  0x43   : > { %790 = vmatpush1.bf16.msra.mxu0 %v13769_v2  ;;  %843 = vmatpush1.bf16.msra.mxu1 %v13769_v2 }
  0x44   : > { %791 = vmatprep.subr.bf16.mxu0 %v13767_v1  ;;  %844 = vmatprep.subr.bf16.mxu1 %v13767_v1 }
  0x45   : > { %12260 = vmatprep.mubr.msk.bf16.mxu0 %vm602_vm0, %v13542_v19  ;;  %12263 = vmatprep.mubr.msk.bf16.mxu1 %vm602_vm0, %v13542_v19 }
  0x47   : > { %792 = vmatpush1.bf16.msra.mxu0 %v13769_v2  ;;  %845 = vmatpush1.bf16.msra.mxu1 %v13769_v2 }
  0x48   : > { %793 = vmatprep.subr.bf16.mxu0 %v13767_v1  ;;  %846 = vmatprep.subr.bf16.mxu1 %v13767_v1 }
  0x4b   : > { %794 = vmatpush1.bf16.msra.mxu0 %v13769_v2  ;;  %847 = vmatpush1.bf16.msra.mxu1 %v13769_v2 }
  0x4c   : > { %795 = vmatprep.subr.bf16.mxu0 %v13767_v1  ;;  %848 = vmatprep.subr.bf16.mxu1 %v13767_v1 }
  0x4f   : > { %796 = vmatpush1.bf16.msra.mxu0 %v13769_v2  ;;  %849 = vmatpush1.bf16.msra.mxu1 %v13769_v2 }
  0x50   : > { %797 = vmatprep.subr.bf16.mxu0 %v13767_v1  ;;  %850 = vmatprep.subr.bf16.mxu1 %v13767_v1 }
  0x53   : > { %798 = vmatpush1.bf16.msra.mxu0 %v13769_v2  ;;  %851 = vmatpush1.bf16.msra.mxu1 %v13769_v2 }
  0x54   : > { %799 = vmatprep.subr.bf16.mxu0 %v13767_v1  ;;  %852 = vmatprep.subr.bf16.mxu1 %v13767_v1 }
  0x57   : > { %800 = vmatpush1.bf16.msra.mxu0 %v13769_v2  ;;  %853 = vmatpush1.bf16.msra.mxu1 %v13769_v2 }
  0x58   : > { %12259 = vmatprep.subr.msk.bf16.mxu0 %vm609_vm1, %v13826_v10  ;;  %12262 = vmatprep.subr.msk.bf16.mxu1 %vm609_vm1, %v13830_v11 }
  0x5b   : > { %812 = vmatpush2.bf16.msra.mxu0 %v13839_v14  ;;  %865 = vmatpush2.bf16.msra.mxu1 %v13842_v15 }
  0x5c   : > { %813 = vmatprep.subr.bf16.mxu0 %v13767_v1  ;;  %866 = vmatprep.subr.bf16.mxu1 %v13767_v1 }
  0x5f   : > { %814 = vmatpush2.bf16.msra.mxu0 %v13769_v2  ;;  %867 = vmatpush2.bf16.msra.mxu1 %v13769_v2 }
  0x60   : > { %815 = vmatprep.subr.bf16.mxu0 %v13767_v1  ;;  %868 = vmatprep.subr.bf16.mxu1 %v13767_v1 }
  0x63   : > { %816 = vmatpush2.bf16.msra.mxu0 %v13769_v2  ;;  %869 = vmatpush2.bf16.msra.mxu1 %v13769_v2 }
  0x64   : > { %1005 = vmatprep.subr.bf16.mxu0 %v13767_v1  ;;  %1058 = vmatprep.subr.bf16.mxu1 %v13767_v1 }
  0x66   : > { %818 = vmatmul.mubr.bf16.vlgmr.msra.gmra.mxu0 %v13540_v20  ;;  %871 = vmatmul.mubr.bf16.vlgmr.msra.gmra.mxu1 %v13540_v20 }
  0x67   : > { %1006 = vmatpush1.bf16.msra.mxu0 %v13769_v2  ;;  %1059 = vmatpush1.bf16.msra.mxu1 %v13769_v2 }
  0x68   : > { %1007 = vmatprep.subr.bf16.mxu0 %v13767_v1  ;;  %1060 = vmatprep.subr.bf16.mxu1 %v13767_v1 }
  0x69   : > { %12261 = vmatprep.mubr.msk.bf16.mxu0 %vm602_vm0, %v13543_v21  ;;  %12264 = vmatprep.mubr.msk.bf16.mxu1 %vm602_vm0, %v13543_v21 }
  0x6b   : > { %1008 = vmatpush1.bf16.msra.mxu0 %v13769_v2  ;;  %1061 = vmatpush1.bf16.msra.mxu1 %v13769_v2 }
  0x6c   : > { %1009 = vmatprep.subr.bf16.mxu0 %v13767_v1  ;;  %1062 = vmatprep.subr.bf16.mxu1 %v13767_v1 }
  0x6e   : > { %828 = vmatmul.mubr.bf16.gmra.mxu0 %v13545_v22  ;;  %881 = vmatmul.mubr.bf16.gmra.mxu1 %v13545_v22 }
  0x6f   : > { %1010 = vmatpush1.bf16.msra.mxu0 %v13769_v2  ;;  %1063 = vmatpush1.bf16.msra.mxu1 %v13769_v2 }
  0x70   : > { %1011 = vmatprep.subr.bf16.mxu0 %v13767_v1  ;;  %1064 = vmatprep.subr.bf16.mxu1 %v13767_v1 }
  0x71   : > { %12274 = vmatprep.mubr.msk.bf16.mxu0 %vm602_vm0, %v13548_v23  ;;  %12277 = vmatprep.mubr.msk.bf16.mxu1 %vm602_vm0, %v13548_v23 }
  0x73   : > { %1012 = vmatpush1.bf16.msra.mxu0 %v13769_v2  ;;  %1065 = vmatpush1.bf16.msra.mxu1 %v13769_v2 }
  0x74   : > { %1013 = vmatprep.subr.bf16.mxu0 %v13767_v1  ;;  %1066 = vmatprep.subr.bf16.mxu1 %v13767_v1 }
  0x77   : > { %1014 = vmatpush1.bf16.msra.mxu0 %v13769_v2  ;;  %1067 = vmatpush1.bf16.msra.mxu1 %v13769_v2 }
  0x78   : > { %1015 = vmatprep.subr.bf16.mxu0 %v13767_v1  ;;  %1068 = vmatprep.subr.bf16.mxu1 %v13767_v1 }
  0x7b   : > { %1016 = vmatpush1.bf16.msra.mxu0 %v13769_v2  ;;  %1069 = vmatpush1.bf16.msra.mxu1 %v13769_v2 }
  0x7c   : > { %1017 = vmatprep.subr.bf16.mxu0 %v13767_v1  ;;  %1070 = vmatprep.subr.bf16.mxu1 %v13767_v1 }
  0x7f   : > { %1018 = vmatpush1.bf16.msra.mxu0 %v13769_v2  ;;  %1071 = vmatpush1.bf16.msra.mxu1 %v13769_v2 }
  0x80   : > { %1019 = vmatprep.subr.bf16.mxu0 %v13767_v1  ;;  %1072 = vmatprep.subr.bf16.mxu1 %v13767_v1 }
  0x83   : > { %1020 = vmatpush1.bf16.msra.mxu0 %v13769_v2  ;;  %1073 = vmatpush1.bf16.msra.mxu1 %v13769_v2 }
  0x84   : > { %12273 = vmatprep.subr.msk.bf16.mxu0 %vm609_vm1, %v13826_v10  ;;  %12276 = vmatprep.subr.msk.bf16.mxu1 %vm609_vm1, %v13830_v11 }
  0x87   : > { %1032 = vmatpush2.bf16.msra.mxu0 %v13839_v14  ;;  %1085 = vmatpush2.bf16.msra.mxu1 %v13842_v15 }
  0x88   : > { %1033 = vmatprep.subr.bf16.mxu0 %v13767_v1  ;;  %1086 = vmatprep.subr.bf16.mxu1 %v13767_v1 }
  0x8b   : > { %1034 = vmatpush2.bf16.msra.mxu0 %v13769_v2  ;;  %1087 = vmatpush2.bf16.msra.mxu1 %v13769_v2 }
  0x8c   : > { %1035 = vmatprep.subr.bf16.mxu0 %v13767_v1  ;;  %1088 = vmatprep.subr.bf16.mxu1 %v13767_v1 }
  0x8f   : > { %1036 = vmatpush2.bf16.msra.mxu0 %v13769_v2  ;;  %1089 = vmatpush2.bf16.msra.mxu1 %v13769_v2 }
  0x90   : > { %1225 = vmatprep.subr.bf16.mxu0 %v13767_v1  ;;  %1278 = vmatprep.subr.bf16.mxu1 %v13767_v1 }
  0x92   : > { %1038 = vmatmul.mubr.bf16.vlgmr.msra.gmra.mxu0 %v13546_v25  ;;  %1091 = vmatmul.mubr.bf16.vlgmr.msra.gmra.mxu1 %v13546_v25  ;;  %v14181_v25 = vpop.permute.xlu0 %736 }
  0x93   : > { %1226 = vmatpush1.bf16.msra.mxu0 %v13769_v2  ;;  %1279 = vmatpush1.bf16.msra.mxu1 %v13769_v2 }
  0x94   : > { %1227 = vmatprep.subr.bf16.mxu0 %v13767_v1  ;;  %1280 = vmatprep.subr.bf16.mxu1 %v13767_v1 }
  0x95   : > { %12275 = vmatprep.mubr.msk.bf16.mxu0 %vm602_vm0, %v13549_v26  ;;  %12278 = vmatprep.mubr.msk.bf16.mxu1 %vm602_vm0, %v13549_v26 }
  0x97   : > { %1228 = vmatpush1.bf16.msra.mxu0 %v13769_v2  ;;  %1281 = vmatpush1.bf16.msra.mxu1 %v13769_v2 }
  0x98   : > { %1229 = vmatprep.subr.bf16.mxu0 %v13767_v1  ;;  %1282 = vmatprep.subr.bf16.mxu1 %v13767_v1 }
  0x9a   : > { %1048 = vmatmul.mubr.bf16.gmra.mxu0 %v13551_v27  ;;  %1101 = vmatmul.mubr.bf16.gmra.mxu1 %v13551_v27  ;;  %v14183_v27 = vpop.permute.xlu1 %726 }
  0x9b   : > { %1230 = vmatpush1.bf16.msra.mxu0 %v13769_v2  ;;  %1283 = vmatpush1.bf16.msra.mxu1 %v13769_v2 }
  0x9c   : > { %1231 = vmatprep.subr.bf16.mxu0 %v13767_v1  ;;  %1284 = vmatprep.subr.bf16.mxu1 %v13767_v1 }
  0x9d   : > { %12288 = vmatprep.mubr.msk.bf16.mxu0 %vm602_vm0, %v13554_v28  ;;  %12291 = vmatprep.mubr.msk.bf16.mxu1 %vm602_vm0, %v13554_v28 }
  0x9f   : > { %1232 = vmatpush1.bf16.msra.mxu0 %v13769_v2  ;;  %1285 = vmatpush1.bf16.msra.mxu1 %v13769_v2 }
  0xa0   : > { %1233 = vmatprep.subr.bf16.mxu0 %v13767_v1  ;;  %1286 = vmatprep.subr.bf16.mxu1 %v13767_v1 }
  0xa3   : > { %1234 = vmatpush1.bf16.msra.mxu0 %v13769_v2  ;;  %1287 = vmatpush1.bf16.msra.mxu1 %v13769_v2 }
  0xa4   : > { %1235 = vmatprep.subr.bf16.mxu0 %v13767_v1  ;;  %1288 = vmatprep.subr.bf16.mxu1 %v13767_v1 }
  0xa7   : > { %1236 = vmatpush1.bf16.msra.mxu0 %v13769_v2  ;;  %1289 = vmatpush1.bf16.msra.mxu1 %v13769_v2 }
  0xa8   : > { %1237 = vmatprep.subr.bf16.mxu0 %v13767_v1  ;;  %1290 = vmatprep.subr.bf16.mxu1 %v13767_v1 }
  0xab   : > { %1238 = vmatpush1.bf16.msra.mxu0 %v13769_v2  ;;  %1291 = vmatpush1.bf16.msra.mxu1 %v13769_v2 }
  0xac   : > { %1239 = vmatprep.subr.bf16.mxu0 %v13767_v1  ;;  %1292 = vmatprep.subr.bf16.mxu1 %v13767_v1 }
  0xaf   : > { %1240 = vmatpush1.bf16.msra.mxu0 %v13769_v2  ;;  %1293 = vmatpush1.bf16.msra.mxu1 %v13769_v2 }
  0xb0   : > { %12287 = vmatprep.subr.msk.bf16.mxu0 %vm609_vm1, %v13826_v10  ;;  %12290 = vmatprep.subr.msk.bf16.mxu1 %vm609_vm1, %v13830_v11 }
  0xb3   : > { %1252 = vmatpush2.bf16.msra.mxu0 %v13839_v14  ;;  %1305 = vmatpush2.bf16.msra.mxu1 %v13842_v15 }
  0xb4   : > { %1253 = vmatprep.subr.bf16.mxu0 %v13767_v1  ;;  %1306 = vmatprep.subr.bf16.mxu1 %v13767_v1 }
  0xb7   : > { %1254 = vmatpush2.bf16.msra.mxu0 %v13769_v2  ;;  %1307 = vmatpush2.bf16.msra.mxu1 %v13769_v2 }
  0xb8   : > { %1255 = vmatprep.subr.bf16.mxu0 %v13767_v1  ;;  %1308 = vmatprep.subr.bf16.mxu1 %v13767_v1 }
  0xbb   : > { %1256 = vmatpush2.bf16.msra.mxu0 %v13769_v2  ;;  %1309 = vmatpush2.bf16.msra.mxu1 %v13769_v2 }
  0xbc   : > { %1445 = vmatprep.subr.bf16.mxu0 %v13767_v1  ;;  %1498 = vmatprep.subr.bf16.mxu1 %v13767_v1 }
  0xbe   : > { %1258 = vmatmul.mubr.bf16.vlgmr.msra.gmra.mxu0 %v13552_v29  ;;  %1311 = vmatmul.mubr.bf16.vlgmr.msra.gmra.mxu1 %v13552_v29 }
  0xbf   : > { %1446 = vmatpush1.bf16.msra.mxu0 %v13769_v2  ;;  %1499 = vmatpush1.bf16.msra.mxu1 %v13769_v2 }
  0xc0   : > { %1447 = vmatprep.subr.bf16.mxu0 %v13767_v1  ;;  %1500 = vmatprep.subr.bf16.mxu1 %v13767_v1 }
  0xc1   : > { %12289 = vmatprep.mubr.msk.bf16.mxu0 %vm602_vm0, %v13555_v30  ;;  %12292 = vmatprep.mubr.msk.bf16.mxu1 %vm602_vm0, %v13555_v30  ;;  %v14187_v30 = vpop.permute.xlu0 %741 }
  0xc2   : > { %20052 = vst [vmem:[#allocation11_spill] sm:$0xff] %v14187_v30 }
  0xc3   : > { %1448 = vmatpush1.bf16.msra.mxu0 %v13769_v2  ;;  %1501 = vmatpush1.bf16.msra.mxu1 %v13769_v2 }
  0xc4   : > { %1449 = vmatprep.subr.bf16.mxu0 %v13767_v1  ;;  %1502 = vmatprep.subr.bf16.mxu1 %v13767_v1 }
  0xc6   : > { %1268 = vmatmul.mubr.bf16.gmra.mxu0 %v13557_v31  ;;  %1321 = vmatmul.mubr.bf16.gmra.mxu1 %v13557_v31 }
  0xc7   : > { %1450 = vmatpush1.bf16.msra.mxu0 %v13769_v2  ;;  %1503 = vmatpush1.bf16.msra.mxu1 %v13769_v2 }
  0xc8   : > { %1451 = vmatprep.subr.bf16.mxu0 %v13767_v1  ;;  %1504 = vmatprep.subr.bf16.mxu1 %v13767_v1 }
  0xc9   : > { %12302 = vmatprep.mubr.msk.bf16.mxu0 %vm602_vm0, %v13560_v32  ;;  %12305 = vmatprep.mubr.msk.bf16.mxu1 %vm602_vm0, %v13560_v32 }
  0xcb   : > { %1452 = vmatpush1.bf16.msra.mxu0 %v13769_v2  ;;  %1505 = vmatpush1.bf16.msra.mxu1 %v13769_v2 }
  0xcc   : > { %1453 = vmatprep.subr.bf16.mxu0 %v13767_v1  ;;  %1506 = vmatprep.subr.bf16.mxu1 %v13767_v1 }
  0xcf   : > { %1454 = vmatpush1.bf16.msra.mxu0 %v13769_v2  ;;  %1507 = vmatpush1.bf16.msra.mxu1 %v13769_v2 }
  0xd0   : > { %1455 = vmatprep.subr.bf16.mxu0 %v13767_v1  ;;  %1508 = vmatprep.subr.bf16.mxu1 %v13767_v1 }
  0xd3   : > { %1456 = vmatpush1.bf16.msra.mxu0 %v13769_v2  ;;  %1509 = vmatpush1.bf16.msra.mxu1 %v13769_v2 }
  0xd4   : > { %1457 = vmatprep.subr.bf16.mxu0 %v13767_v1  ;;  %1510 = vmatprep.subr.bf16.mxu1 %v13767_v1 }
  0xd7   : > { %1458 = vmatpush1.bf16.msra.mxu0 %v13769_v2  ;;  %1511 = vmatpush1.bf16.msra.mxu1 %v13769_v2 }
  0xd8   : > { %1459 = vmatprep.subr.bf16.mxu0 %v13767_v1  ;;  %1512 = vmatprep.subr.bf16.mxu1 %v13767_v1 }
  0xdb   : > { %1460 = vmatpush1.bf16.msra.mxu0 %v13769_v2  ;;  %1513 = vmatpush1.bf16.msra.mxu1 %v13769_v2 }
  0xdc   : > { %12301 = vmatprep.subr.msk.bf16.mxu0 %vm609_vm1, %v13826_v10  ;;  %12304 = vmatprep.subr.msk.bf16.mxu1 %vm609_vm1, %v13830_v11 }
  0xdf   : > { %1472 = vmatpush2.bf16.msra.mxu0 %v13839_v14  ;;  %1525 = vmatpush2.bf16.msra.mxu1 %v13842_v15 }
  0xe0   : > { %1473 = vmatprep.subr.bf16.mxu0 %v13767_v1  ;;  %1526 = vmatprep.subr.bf16.mxu1 %v13767_v1 }
  0xe3   : > { %1474 = vmatpush2.bf16.msra.mxu0 %v13769_v2  ;;  %1527 = vmatpush2.bf16.msra.mxu1 %v13769_v2 }
  0xe4   : > { %1475 = vmatprep.subr.bf16.mxu0 %v13767_v1  ;;  %1528 = vmatprep.subr.bf16.mxu1 %v13767_v1 }
  0xe7   : > { %1476 = vmatpush2.bf16.msra.mxu0 %v13769_v2  ;;  %1529 = vmatpush2.bf16.msra.mxu1 %v13769_v2 }
  0xea   : > { %1478 = vmatmul.mubr.bf16.vlgmr.msra.gmra.mxu0 %v13558_v33  ;;  %1531 = vmatmul.mubr.bf16.vlgmr.msra.gmra.mxu1 %v13558_v33  ;;  %v14190_v33 = vpop.permute.xlu1 %731 }
  0xeb   : > { %12303 = vmatprep.mubr.msk.bf16.mxu0 %vm602_vm0, %v13561_v34  ;;  %12306 = vmatprep.mubr.msk.bf16.mxu1 %vm602_vm0, %v13561_v34  ;;  %v14194_v34 = vpop.permute.xlu0 %2208 }
  0xec   : > { %20053 = vst [vmem:[#allocation12_spill] sm:$0xff] %v14194_v34 }
  0xf2   : > { %1488 = vmatmul.mubr.bf16.gmra.mxu0 %v13563_v35  ;;  %1541 = vmatmul.mubr.bf16.gmra.mxu1 %v13563_v35 }
  0xfa   : > { %v14125_v36 = vpop.f32.mrf.mxu1  ;;  %v14133_v44 = vpop.f32.mrf.mxu0 }
  0xfc   : > { %v711_v37 = vpop.f32.mrf.mxu1  ;;  %v14135_v45 = vpop.f32.mrf.mxu0 }
  0xfe   : > { %v14127_v38 = vpop.f32.mrf.mxu1  ;;  %v14137_v46 = vpop.f32.mrf.mxu0 }
 0x100   : > { %v714_v39 = vpop.f32.mrf.mxu1  ;;  %v14139_v47 = vpop.f32.mrf.mxu0 }
 0x101   : > { %v14197_v39 = vpop.permute.xlu1 %2214 }
 0x102   : > { %v14129_v40 = vpop.f32.mrf.mxu1  ;;  %v14141_v48 = vpop.f32.mrf.mxu0  ;;  %20054 = vst [vmem:[#allocation13_spill] sm:$0xff] %v14197_v39 }
 0x104   : > { %v719_v41 = vpop.f32.mrf.mxu1  ;;  %v14143_v49 = vpop.f32.mrf.mxu0 }
 0x106   : > { %v14131_v42 = vpop.f32.mrf.mxu1  ;;  %v14145_v50 = vpop.f32.mrf.mxu0 }
 0x107   : > { %20049 = vst [vmem:[#allocation8_spill] sm:$0xff] %v14131_v42  ;;  %20050 = vst [vmem:[#allocation9_spill] sm:$0xff] %v14145_v50 }
 0x108   : > { %v722_v43 = vpop.f32.mrf.mxu1  ;;  %v14147_v51 = vpop.f32.mrf.mxu0 }
 0x109   : > { %20051 = vst [vmem:[#allocation10_spill] sm:$0xff] %v14147_v51 }
 0x126   : > { %v819_v52 = vpop.f32.mrf.mxu0  ;;  %v872_v53 = vpop.f32.mrf.mxu1 }
 0x127   : > { %907 = vrot.lane.b32.xlu0 %v819_v52, %s13726_s25  ;;  %v14201_v52 = vpop.permute.xlu0 %2196 }
 0x128   : > { %v821_v54 = vpop.f32.mrf.mxu0  ;;  %v874_v55 = vpop.f32.mrf.mxu1  ;;  %20055 = vst [vmem:[#allocation14_spill] sm:$0xff] %v14201_v52 }
 0x129   : > { %909 = vrot.lane.b32.xlu1 %v821_v54, %s13726_s25 }
 0x12a   : > { %v823_v56 = vpop.f32.mrf.mxu0  ;;  %v876_v57 = vpop.f32.mrf.mxu1 }
 0x12b   : > { %911 = vrot.lane.b32.xlu0 %v872_v53, %s13726_s25 }
 0x12c   : > { %v825_v58 = vpop.f32.mrf.mxu0  ;;  %v878_v60 = vpop.f32.mrf.mxu1 }
 0x12d   : > { %913 = vrot.lane.b32.xlu1 %v874_v55, %s13726_s25  ;;  %v14204_v55 = vpop.permute.xlu1 %2202 }
 0x12e   : > { %v829_v59 = vpop.f32.mrf.mxu0  ;;  %v882_v62 = vpop.f32.mrf.mxu1  ;;  %20056 = vst [vmem:[#allocation15_spill] sm:$0xff] %v14204_v55 }
 0x12f   : > { %915 = vrot.lane.b32.xlu0 %v823_v56, %s13726_s25 }
 0x130   : > { %v831_v61 = vpop.f32.mrf.mxu0  ;;  %v884_v63 = vpop.f32.mrf.mxu1 }
 0x131   : > { %917 = vrot.lane.b32.xlu1 %v825_v58, %s13726_s25  ;;  %v14208_v58 = vpop.permute.xlu0 %2067 }
 0x132   : > { %v833_v0 = vpop.f32.mrf.mxu0  ;;  %v886_v2 = vpop.f32.mrf.mxu1  ;;  %20057 = vst [vmem:[#allocation16_spill] sm:$0xff] %v14208_v58 }
 0x133   : > { %919 = vrot.lane.b32.xlu0 %v876_v57, %s13726_s25 }
 0x134   : > { %v835_v1 = vpop.f32.mrf.mxu0  ;;  %v888_v3 = vpop.f32.mrf.mxu1 }
 0x135   : > { %921 = vrot.lane.b32.xlu1 %v878_v60, %s13726_s25 }
 0x137   : > { %923 = vrot.lane.b32.xlu0 %v829_v59, %s13726_s25  ;;  %v14211_v59 = vpop.permute.xlu1 %2073 }
 0x138   : > { %20058 = vst [vmem:[#allocation17_spill] sm:$0xff] %v14211_v59 }
 0x139   : > { %925 = vrot.lane.b32.xlu1 %v831_v61, %s13726_s25 }
 0x13b   : > { %927 = vrot.lane.b32.xlu0 %v882_v62, %s13726_s25 }
 0x13d   : > { %929 = vrot.lane.b32.xlu1 %v884_v63, %s13726_s25 }
 0x13f   : > { %931 = vrot.lane.b32.xlu0 %v833_v0, %s13726_s25 }
 0x141   : > { %933 = vrot.lane.b32.xlu1 %v835_v1, %s13726_s25 }
 0x143   : > { %935 = vrot.lane.b32.xlu0 %v886_v2, %s13726_s25 }
 0x145   : > { %937 = vrot.lane.b32.xlu1 %v888_v3, %s13726_s25 }
 0x152   : > { %v1039_v4 = vpop.f32.mrf.mxu0  ;;  %v1092_v5 = vpop.f32.mrf.mxu1 }
 0x153   : > { %1127 = vrot.lane.b32.xlu0 %v1039_v4, %s13727_s26 }
 0x154   : > { %v1041_v6 = vpop.f32.mrf.mxu0  ;;  %v1094_v7 = vpop.f32.mrf.mxu1 }
 0x155   : > { %1129 = vrot.lane.b32.xlu1 %v1041_v6, %s13727_s26 }
 0x156   : > { %v1043_v8 = vpop.f32.mrf.mxu0  ;;  %v1096_v9 = vpop.f32.mrf.mxu1 }
 0x157   : > { %1131 = vrot.lane.b32.xlu0 %v1092_v5, %s13727_s26 }
 0x158   : > { %v1045_v12 = vpop.f32.mrf.mxu0  ;;  %v1098_v16 = vpop.f32.mrf.mxu1 }
 0x159   : > { %1133 = vrot.lane.b32.xlu1 %v1094_v7, %s13727_s26 }
 0x15a   : > { %v1049_v13 = vpop.f32.mrf.mxu0  ;;  %v1102_v18 = vpop.f32.mrf.mxu1 }
 0x15b   : > { %1135 = vrot.lane.b32.xlu0 %v1043_v8, %s13727_s26 }
 0x15c   : > { %v1051_v17 = vpop.f32.mrf.mxu0  ;;  %v1104_v19 = vpop.f32.mrf.mxu1 }
 0x15d   : > { %1137 = vrot.lane.b32.xlu1 %v1045_v12, %s13727_s26 }
 0x15e   : > { %v1053_v20 = vpop.f32.mrf.mxu0  ;;  %v1106_v22 = vpop.f32.mrf.mxu1 }
 0x15f   : > { %1139 = vrot.lane.b32.xlu0 %v1096_v9, %s13727_s26 }
 0x160   : > { %v1055_v21 = vpop.f32.mrf.mxu0  ;;  %v1108_v23 = vpop.f32.mrf.mxu1 }
 0x161   : > { %1141 = vrot.lane.b32.xlu1 %v1098_v16, %s13727_s26 }
 0x163   : > { %1143 = vrot.lane.b32.xlu0 %v1049_v13, %s13727_s26 }
 0x165   : > { %1145 = vrot.lane.b32.xlu1 %v1051_v17, %s13727_s26 }
 0x167   : > { %1147 = vrot.lane.b32.xlu0 %v1102_v18, %s13727_s26 }
 0x169   : > { %1149 = vrot.lane.b32.xlu1 %v1104_v19, %s13727_s26 }
 0x16b   : > { %1151 = vrot.lane.b32.xlu0 %v1053_v20, %s13727_s26 }
 0x16d   : > { %1153 = vrot.lane.b32.xlu1 %v1055_v21, %s13727_s26 }
 0x16f   : > { %1155 = vrot.lane.b32.xlu0 %v1106_v22, %s13727_s26 }
 0x171   : > { %1157 = vrot.lane.b32.xlu1 %v1108_v23, %s13727_s26 }
 0x17e   : > { %v1259_v26 = vpop.f32.mrf.mxu0  ;;  %v1312_v28 = vpop.f32.mrf.mxu1 }
 0x17f   : > { %1347 = vrot.lane.b32.xlu0 %v1259_v26, %s13728_s27 }
 0x180   : > { %v1261_v29 = vpop.f32.mrf.mxu0  ;;  %v1314_v31 = vpop.f32.mrf.mxu1 }
 0x181   : > { %1349 = vrot.lane.b32.xlu1 %v1261_v29, %s13728_s27 }
 0x182   : > { %v1263_v32 = vpop.f32.mrf.mxu0  ;;  %v1316_v35 = vpop.f32.mrf.mxu1 }
 0x183   : > { %1351 = vrot.lane.b32.xlu0 %v1312_v28, %s13728_s27 }
 0x184   : > { %v1265_v37 = vpop.f32.mrf.mxu0  ;;  %v1318_v43 = vpop.f32.mrf.mxu1 }
 0x185   : > { %1353 = vrot.lane.b32.xlu1 %v1314_v31, %s13728_s27 }
 0x186   : > { %v1269_v41 = vpop.f32.mrf.mxu0  ;;  %v1322_v54 = vpop.f32.mrf.mxu1 }
 0x187   : > { %1355 = vrot.lane.b32.xlu0 %v1263_v32, %s13728_s27 }
 0x188   : > { %v1271_v53 = vpop.f32.mrf.mxu0  ;;  %v1324_v56 = vpop.f32.mrf.mxu1 }
 0x189   : > { %1357 = vrot.lane.b32.xlu1 %v1265_v37, %s13728_s27 }
 0x18a   : > { %v1273_v57 = vpop.f32.mrf.mxu0  ;;  %v1326_v61 = vpop.f32.mrf.mxu1 }
 0x18b   : > { %1359 = vrot.lane.b32.xlu0 %v1316_v35, %s13728_s27 }
 0x18c   : > { %v1275_v60 = vpop.f32.mrf.mxu0  ;;  %v1328_v63 = vpop.f32.mrf.mxu1 }
 0x18d   : > { %1361 = vrot.lane.b32.xlu1 %v1318_v43, %s13728_s27 }
 0x18f   : > { %1363 = vrot.lane.b32.xlu0 %v1269_v41, %s13728_s27 }
 0x191   : > { %1365 = vrot.lane.b32.xlu1 %v1271_v53, %s13728_s27 }
 0x193   : > { %1367 = vrot.lane.b32.xlu0 %v1322_v54, %s13728_s27 }
 0x195   : > { %1369 = vrot.lane.b32.xlu1 %v1324_v56, %s13728_s27 }
 0x197   : > { %1371 = vrot.lane.b32.xlu0 %v1273_v57, %s13728_s27 }
 0x199   : > { %v14214_v62 = vpop.permute.xlu0 %907  ;;  %1373 = vrot.lane.b32.xlu1 %v1275_v60, %s13728_s27 }
 0x19b   : > { %v14217_v0 = vpop.permute.xlu1 %909  ;;  %1375 = vrot.lane.b32.xlu0 %v1326_v61, %s13728_s27 }
 0x19d   : > { %v14220_v1 = vpop.permute.xlu0 %911  ;;  %1377 = vrot.lane.b32.xlu1 %v1328_v63, %s13728_s27 }
 0x19f   : > { %v14223_v2 = vpop.permute.xlu1 %913 }
 0x1a1   : > { %v14225_v3 = vpop.permute.xlu0 %915 }
 0x1a3   : > { %v14227_v4 = vpop.permute.xlu1 %917 }
 0x1a5   : > { %v14229_v5 = vpop.permute.xlu0 %919 }
 0x1a7   : > { %v14231_v7 = vpop.permute.xlu1 %921 }
 0x1a9   : > { %v14235_v12 = vpop.permute.xlu0 %923 }
 0x1aa   : > { %v1479_v6 = vpop.f32.mrf.mxu0  ;;  %v1532_v8 = vpop.f32.mrf.mxu1 }
 0x1ab   : > { %1567 = vrot.lane.b32.xlu0 %v1479_v6, %s13729_s28  ;;  %v14238_v17 = vpop.permute.xlu1 %925 }
 0x1ac   : > { %v1481_v9 = vpop.f32.mrf.mxu0  ;;  %v1534_v13 = vpop.f32.mrf.mxu1 }
 0x1ad   : > { %1569 = vrot.lane.b32.xlu1 %v1481_v9, %s13729_s28  ;;  %v14242_v20 = vpop.permute.xlu0 %927 }
 0x1ae   : > { %v1483_v16 = vpop.f32.mrf.mxu0  ;;  %v1536_v18 = vpop.f32.mrf.mxu1 }
 0x1af   : > { %1571 = vrot.lane.b32.xlu0 %v1532_v8, %s13729_s28  ;;  %v14245_v22 = vpop.permute.xlu1 %929 }
 0x1b0   : > { %v1485_v19 = vpop.f32.mrf.mxu0  ;;  %v1538_v23 = vpop.f32.mrf.mxu1 }
 0x1b1   : > { %1573 = vrot.lane.b32.xlu1 %v1534_v13, %s13729_s28  ;;  %v14249_v29 = vpop.permute.xlu0 %931 }
 0x1b2   : > { %v1489_v21 = vpop.f32.mrf.mxu0  ;;  %v1542_v28 = vpop.f32.mrf.mxu1  ;;  %20059 = vst [vmem:[#allocation18_spill] sm:$0xff] %v14249_v29 }
 0x1b3   : > { %1575 = vrot.lane.b32.xlu0 %v1483_v16, %s13729_s28  ;;  %v14252_v31 = vpop.permute.xlu1 %933 }
 0x1b4   : > { %v1491_v26 = vpop.f32.mrf.mxu0  ;;  %20060 = vst [vmem:[#allocation19_spill] sm:$0xff] %v14252_v31  ;;  %v1544_v32 = vpop.f32.mrf.mxu1 }
 0x1b5   : > { %1577 = vrot.lane.b32.xlu1 %v1485_v19, %s13729_s28  ;;  %v14256_v37 = vpop.permute.xlu0 %935 }
 0x1b6   : > { %v1493_v35 = vpop.f32.mrf.mxu0  ;;  %20061 = vst [vmem:[#allocation20_spill] sm:$0xff] %v14256_v37  ;;  %v1546_v43 = vpop.f32.mrf.mxu1 }
 0x1b7   : > { %1579 = vrot.lane.b32.xlu0 %v1536_v18, %s13729_s28  ;;  %v14259_v53 = vpop.permute.xlu1 %937 }
 0x1b8   : > { %v1495_v41 = vpop.f32.mrf.mxu0  ;;  %v1548_v56 = vpop.f32.mrf.mxu1 }
 0x1b9   : > { %1581 = vrot.lane.b32.xlu1 %v1538_v23, %s13729_s28 }
 0x1bb   : > { %1583 = vrot.lane.b32.xlu0 %v1489_v21, %s13729_s28 }
 0x1bd   : > { %1585 = vrot.lane.b32.xlu1 %v1491_v26, %s13729_s28 }
 0x1bf   : > { %1587 = vrot.lane.b32.xlu0 %v1542_v28, %s13729_s28 }
 0x1c1   : > { %1589 = vrot.lane.b32.xlu1 %v1544_v32, %s13729_s28 }
 0x1c3   : > { %1591 = vrot.lane.b32.xlu0 %v1493_v35, %s13729_s28 }
 0x1c5   : > { %v14262_v54 = vpop.permute.xlu0 %1127  ;;  %1593 = vrot.lane.b32.xlu1 %v1495_v41, %s13729_s28 }
 0x1c7   : > { %v14265_v57 = vpop.permute.xlu1 %1129  ;;  %1595 = vrot.lane.b32.xlu0 %v1546_v43, %s13729_s28  ;;  %v263_v43 = vlaneseq }
 0x1c9   : > { %v14268_v60 = vpop.permute.xlu0 %1131  ;;  %1597 = vrot.lane.b32.xlu1 %v1548_v56, %s13729_s28 }
 0x1cb   : > { %v14271_v61 = vpop.permute.xlu1 %1133  ;;  %2055 = vrot.lane.b32.xlu0 %v19982_v24, %s13725_s24 }
 0x1cd   : > { %2061 = vrot.lane.b32.xlu1 %v19982_v24, %s13725_s24  ;;  %v14277_v63 = vpop.permute.xlu0 %1135 }
 0x1cf   : > { %1926 = vrot.lane.b32.xlu0 %v19982_v24, %s13730_s29  ;;  %v14281_v6 = vpop.permute.xlu1 %1137 }
 0x1d1   : > { %1932 = vrot.lane.b32.xlu1 %v19982_v24, %s13730_s29  ;;  %v14287_v8 = vpop.permute.xlu0 %1139 }
 0x1d3   : > { %1914 = vrot.lane.b32.xlu0 %v19982_v24, %s13730_s29  ;;  %v14291_v9 = vpop.permute.xlu1 %1141 }
 0x1d5   : > { %1920 = vrot.lane.b32.xlu1 %v19982_v24, %s13730_s29  ;;  %v14297_v13 = vpop.permute.xlu0 %1143 }
 0x1d7   : > { %1784 = vrot.lane.b32.xlu0 %v19982_v24, %s13731_s30  ;;  %v14301_v16 = vpop.permute.xlu1 %1145 }
 0x1d9   : > { %1790 = vrot.lane.b32.xlu1 %v19982_v24, %s13731_s30  ;;  %v14303_v18 = vpop.permute.xlu0 %1147 }
 0x1db   : > { %1772 = vrot.lane.b32.xlu0 %v19982_v24, %s13731_s30  ;;  %v14305_v19 = vpop.permute.xlu1 %1149  ;;  %v264_v24 = vand.u32 127, %v263_v43 }
 0x1dd   : > { %v14307_v21 = vpop.permute.xlu0 %1151  ;;  %v265_v15 = vadd.s32 128, %v264_v24  ;;  %v14327_v11 = vmul.u32.u64.low 2863311531, %v264_v24  ;;  %v14328_v59 = vmul.u32.u64.high 2863311531, %v264_v24, %v14327_v11  ;;  %v266_v58 = vadd.s32 256, %v264_v24 }
 0x1de   : > { %20062 = vst [vmem:[#allocation21_spill] sm:$0xff] %v14307_v21 }
 0x1df   : > { %v14309_v23 = vpop.permute.xlu1 %1153  ;;  %v14332_v39 = vmul.u32.u64.low 2863311531, %v265_v15  ;;  %v14333_v55 = vmul.u32.u64.high 2863311531, %v265_v15, %v14332_v39  ;;  %v14337_v21 = vmul.u32.u64.low 2863311531, %v266_v58  ;;  %v14338_v50 = vmul.u32.u64.high 2863311531, %v266_v58, %v14337_v21 }
 0x1e0   : > { %20063 = vst [vmem:[#allocation22_spill] sm:$0xff] %v14309_v23  ;;  %v273_v29 = vshrl.u32 %v14328_v59, 4 }
 0x1e1   : > { %v14311_v26 = vpop.permute.xlu0 %1155  ;;  %v284_v51 = vshrl.u32 %v14333_v55, 4  ;;  %v744_v55 = vadd.f32 %v14183_v27, %v14133_v44  ;;  %v14373_v44 = vadd.f32 %v14181_v25, %v14141_v48 }
 0x1e2   : > { %20064 = vst [vmem:[#allocation23_spill] sm:$0xff] %v14311_v26  ;;  %v274_v11 = vmul.u32 24, %v273_v29  ;;  %v295_v26 = vshrl.u32 %v14338_v50, 4  ;;  %v746_v50 = vadd.f32 %v14183_v27, %v14125_v36  ;;  %v748_v36 = vadd.f32 %v14190_v33, %v14139_v47 }
 0x1e3   : > { %v14313_v28 = vpop.permute.xlu1 %1157  ;;  %v285_v31 = vmul.u32 24, %v284_v51  ;;  %v745_v51 = vadd.f32 %v14183_v27, %v14135_v45  ;;  %v940_v45 = vsel %vm939_vm4, %v14214_v62, %v14217_v0  ;;  %v14383_v27 = vadd.f32 %v14181_v25, %v14143_v49 }
 0x1e4   : > { %20065 = vst [vmem:[#allocation24_spill] sm:$0xff] %v14313_v28  ;;  %v275_v30 = vsub.s32 %v264_v24, %v274_v11  ;;  %v296_v42 = vmul.u32 24, %v295_v26  ;;  %v14387_v47 = vadd.f32 %v14181_v25, %v14129_v40  ;;  %v964_v62 = vadd.f32 %v940_v45, %v744_v55 }
 0x1e5   : > { %v286_v37 = vsub.s32 %v265_v15, %v285_v31  ;;  %v747_v15 = vadd.f32 %v14190_v33, %v14137_v46  ;;  %v749_v31 = vadd.f32 %v14190_v33, %v14127_v38  ;;  %v941_v38 = vsel %vm939_vm4, %v14217_v0, %v14220_v1 }
 0x1e6   : > { %vm300_vm2 = vcmp.ne.s32.totalorder %v275_v30, 0  ;;  %vm303_vm3 = vcmp.lt.s32.totalorder %v275_v30, 0  ;;  %v297_v59 = vsub.s32 %v266_v58, %v296_v42  ;;  %v309_v24 = vadd.s32 24, %v275_v30 }
 0x1e7   : > { %vm14365_vm5 = vmand %vm303_vm3, %vm300_vm2  ;;  %vm301_vm6 = vcmp.ne.s32.totalorder %v286_v37, 0  ;;  %vm304_vm7 = vcmp.lt.s32.totalorder %v286_v37, 0  ;;  %v310_v46 = vadd.s32 24, %v286_v37  ;;  %v942_v49 = vsel %vm939_vm4, %v14220_v1, %v14223_v2 }
 0x1e8   : > { %vm302_vm9 = vcmp.ne.s32.totalorder %v297_v59, 0  ;;  %vm305_vm10 = vcmp.lt.s32.totalorder %v297_v59, 0  ;;  %v312_v33 = vsel %vm14365_vm5, %v309_v24, %v275_v30  ;;  %vm14394_vm12 = vmand %vm304_vm7, %vm301_vm6  ;;  %v1160_v40 = vsel %vm1159_vm8, %v14262_v54, %v14265_v57 }
 0x1e9   : > { %v311_v25 = vadd.s32 24, %v297_v59  ;;  %v965_v0 = vadd.f32 %v941_v38, %v745_v51  ;;  %v943_v30 = vsel %vm939_vm4, %v14225_v3, %v14227_v4  ;;  %vm14411_vm14 = vmand %vm305_vm10, %vm302_vm9  ;;  %v1161_v1 = vsel %vm1159_vm8, %v14265_v57, %v14268_v60 }
 0x1ea   : > { %vm315_vm15 = vcmp.lt.s32.totalorder %v312_v33, 16  ;;  %v313_v3 = vsel %vm14394_vm12, %v310_v46, %v286_v37  ;;  %v966_v54 = vadd.f32 %v942_v49, %v746_v50  ;;  %v944_v55 = vsel %vm939_vm4, %v14227_v4, %v14229_v5 }
 0x1eb   : > { %v945_v51 = vsel %vm939_vm4, %v14229_v5, %v14231_v7  ;;  %v1184_v24 = vadd.f32 %v1160_v40, %v964_v62  ;;  %v967_v57 = vadd.f32 %v943_v30, %v747_v15  ;;  %v314_v50 = vsel %vm14411_vm14, %v311_v25, %v297_v59 }
 0x1ec   : > { %v1185_v45 = vadd.f32 %v1161_v1, %v965_v0  ;;  %v19997_v38 = vmov 0.0   ;;  %vm316_vm2 = vcmp.lt.s32.totalorder %v313_v3, 16  ;;  %v968_v7 = vadd.f32 %v944_v55, %v748_v36 }
 0x1ed   : > { %v14438_v46 = vsel %vm315_vm15, 1.0, %v19997_v38  ;;  %v969_v15 = vadd.f32 %v945_v51, %v749_v31  ;;  %vm317_vm3 = vcmp.lt.s32.totalorder %v314_v50, 16  ;;  %v946_v62 = vsel %vm939_vm4, %v14235_v12, %v14238_v17 }
 0x1ee   : > { %v1164_v36 = vsel %vm1159_vm8, %v14281_v6, %v14287_v8  ;;  %v14451_v31 = vsel %vm316_vm2, 1.0, %v19997_v38  ;;  %v947_v0 = vsel %vm939_vm4, %v14238_v17, %v14242_v20  ;;  %v1163_v12 = vsel %vm1159_vm8, %v14277_v63, %v14281_v6 }
 0x1ef   : > { %20072 = vst [vmem:[#allocation25_spill] sm:$0xff] %v14451_v31  ;;  %v14461_v30 = vsel %vm317_vm3, 1.0, %v19997_v38  ;;  %v1188_v55 = vadd.f32 %v1164_v36, %v968_v7  ;;  %v1165_v51 = vsel %vm1159_vm8, %v14287_v8, %v14291_v9  ;;  %v1187_v50 = vadd.f32 %v1163_v12, %v967_v57 }
 0x1f0   : > { %20073 = vst [vmem:[#allocation26_spill] sm:$0xff] %v14461_v30  ;;  %v971_v36 = vadd.f32 %v947_v0, %v14383_v27 }
 0x1f1   : > { %v14315_v32 = vpop.permute.xlu0 %1347 }
 0x1f3   : > { %v14317_v35 = vpop.permute.xlu1 %1349 }
 0x1f4   : > { %v1380_v2 = vsel %vm1379_vm11, %v14315_v32, %v14317_v35  ;;  %v1162_v32 = vsel %vm1159_vm8, %v14268_v60, %v14271_v61 }
 0x1f5   : > { %v14319_v41 = vpop.permute.xlu0 %1351  ;;  %v1404_v4 = vadd.f32 %v1380_v2, %v1184_v24 }
 0x1f6   : > { %v1381_v37 = vsel %vm1379_vm11, %v14317_v35, %v14319_v41  ;;  %v1186_v35 = vadd.f32 %v1162_v32, %v966_v54 }
 0x1f7   : > { %v14321_v56 = vpop.permute.xlu1 %1353  ;;  %v1405_v33 = vadd.f32 %v1381_v37, %v1185_v45  ;;  %v948_v37 = vsel %vm939_vm4, %v14242_v20, %v14245_v22  ;;  %v1189_v45 = vadd.f32 %v1165_v51, %v969_v15 }
 0x1f8   : > { %v1382_v60 = vsel %vm1379_vm11, %v14319_v41, %v14321_v56 }
 0x1f9   : > { %v14323_v14 = vpop.permute.xlu0 %1355  ;;  %v1406_v56 = vadd.f32 %v1382_v60, %v1186_v35  ;;  %v1167_v35 = vsel %vm1159_vm8, %v14301_v16, %v14303_v18 }
 0x1fa   : > { %v1191_v27 = vadd.f32 %v1167_v35, %v971_v36  ;;  %v20077_v35 = vld [vmem:[#allocation19_spill] sm:$0xff] }
 0x1fb   : > { %v14325_v10 = vpop.permute.xlu1 %1357  ;;  %v20079_v36 = vld [vmem:[#allocation23_spill] sm:$0xff] }
 0x1fc   : > { %v1383_v6 = vsel %vm1379_vm11, %v14323_v14, %v14325_v10 }
 0x1fd   : > { %v14330_v52 = vpop.permute.xlu0 %1359  ;;  %v1407_v7 = vadd.f32 %v1383_v6, %v1187_v50 }
 0x1fe   : > { %v1384_v17 = vsel %vm1379_vm11, %v14325_v10, %v14330_v52 }
 0x1ff   : > { %v14335_v34 = vpop.permute.xlu1 %1361 }
 0x200   : > { %v1385_v8 = vsel %vm1379_vm11, %v14330_v52, %v14335_v34  ;;  %v970_v34 = vadd.f32 %v946_v62, %v14373_v44  ;;  %v1166_v52 = vsel %vm1159_vm8, %v14297_v13, %v14301_v16  ;;  %v972_v44 = vadd.f32 %v948_v37, %v14387_v47 }
 0x201   : > { %v14340_v43 = vpop.permute.xlu0 %1363  ;;  %v1409_v22 = vadd.f32 %v1385_v8, %v1189_v45  ;;  %v1168_v13 = vsel %vm1159_vm8, %v14303_v18, %v14305_v19 }
 0x202   : > { %v1192_v0 = vadd.f32 %v1168_v13, %v972_v44  ;;  %v20081_v13 = vld [vmem:[#allocation22_spill] sm:$0xff] }
 0x203   : > { %v14343_v23 = vpop.permute.xlu1 %1365 }
 0x205   : > { %v14347_v28 = vpop.permute.xlu0 %1367 }
 0x206   : > { %v1387_v16 = vsel %vm1379_vm11, %v14343_v23, %v14347_v28 }
 0x207   : > { %v14349_v39 = vpop.permute.xlu1 %1369  ;;  %v1411_v12 = vadd.f32 %v1387_v16, %v1191_v27  ;;  %v1170_v16 = vsel %vm1159_vm8, %v20081_v13, %v20079_v36 }
 0x208   : > { %v1388_v18 = vsel %vm1379_vm11, %v14347_v28, %v14349_v39 }
 0x209   : > { %v14351_v21 = vpop.permute.xlu0 %1371 }
 0x20b   : > { %v14359_v29 = vpop.permute.xlu1 %1373 }
 0x20d   : > { %v14389_v48 = vpop.permute.xlu0 %1375 }
 0x20f   : > { %v14407_v26 = vpop.permute.xlu1 %1377 }
 0x210   : > { %v1391_v27 = vsel %vm1379_vm11, %v14389_v48, %v14407_v26  ;;  %v20082_v26 = vld [vmem:[#allocation18_spill] sm:$0xff] }
 0x21d   : > { %v1568_v42 = vpop.permute.xlu0 %1567 }
 0x21f   : > { %v1570_v5 = vpop.permute.xlu1 %1569 }
 0x220   : > { %v1600_v61 = vsel %vm1599_vm13, %v1568_v42, %v1570_v5 }
 0x221   : > { %v1624_v58 = vadd.f32 %v1600_v61, %v1404_v4  ;;  %v1572_v59 = vpop.permute.xlu0 %1571  ;;  %v1408_v4 = vadd.f32 %v1384_v17, %v1188_v55 }
 0x222   : > { %v1601_v41 = vsel %vm1599_vm13, %v1570_v5, %v1572_v59 }
 0x223   : > { %vm1636_vm5 = vcmp.gt.f32.partialorder %v1624_v58, 0.0  ;;  %v1648_v49 = vmul.f32 0.2, %v1624_v58  ;;  %v1625_v40 = vadd.f32 %v1601_v41, %v1405_v33  ;;  %v1574_v25 = vpop.permute.xlu1 %1573 }
 0x224   : > { %v1602_v11 = vsel %vm1599_vm13, %v1572_v59, %v1574_v25  ;;  %v1386_v25 = vsel %vm1379_vm11, %v14340_v43, %v14343_v23  ;;  %v1412_v43 = vadd.f32 %v1388_v18, %v1192_v0  ;;  %v1390_v18 = vsel %vm1379_vm11, %v14359_v29, %v14389_v48 }
 0x225   : > { %v1660_v1 = vsel %vm1636_vm5, %v1624_v58, %v1648_v49  ;;  %vm1637_vm6 = vcmp.gt.f32.partialorder %v1625_v40, 0.0  ;;  %v1649_v2 = vmul.f32 0.2, %v1625_v40  ;;  %v1626_v3 = vadd.f32 %v1602_v11, %v1406_v56  ;;  %v1576_v54 = vpop.permute.xlu0 %1575 }
 0x226   : > { %v1672_v63 = vmul.f32 %v14438_v46, %v1660_v1  ;;  %v1190_v56 = vadd.f32 %v1166_v52, %v970_v34  ;;  %v20075_v52 = vld [vmem:[#allocation8_spill] sm:$0xff] }
 0x227   : > { %v1661_v24 = vsel %vm1637_vm6, %v1625_v40, %v1649_v2  ;;  %vm1638_vm7 = vcmp.gt.f32.partialorder %v1626_v3, 0.0  ;;  %v1650_v42 = vmul.f32 0.2, %v1626_v3  ;;  %v1578_v32 = vpop.permute.xlu1 %1577 }
 0x228   : > { %v14481_v9 = vpack.c.bf16 %v1672_v63, %v19997_v38  ;;  %v1603_v10 = vsel %vm1599_vm13, %v1576_v54, %v1578_v32  ;;  %v1673_v60 = vmul.f32 %v14451_v31, %v1661_v24  ;;  %v1410_v23 = vadd.f32 %v1386_v25, %v1190_v56 }
 0x229   : > { %v1662_v5 = vsel %vm1638_vm7, %v1626_v3, %v1650_v42  ;;  %v1580_v14 = vpop.permute.xlu0 %1579  ;;  %v1627_v58 = vadd.f32 %v1603_v10, %v1407_v7  ;;  %vm2229_vm7 = vcmask 384000  }
 0x22a   : > { %v1674_v61 = vmul.f32 %v14461_v30, %v1662_v5  ;;  %v1604_v20 = vsel %vm1599_vm13, %v1578_v32, %v1580_v14  ;;  %2192 = vrot.lane.b32.xlu0 %v14481_v9, %s13724_s23 }
 0x22b   : > { %v1628_v57 = vadd.f32 %v1604_v20, %v1408_v4  ;;  %v1582_v15 = vpop.permute.xlu1 %1581  ;;  %v1651_v19 = vmul.f32 0.2, %v1627_v58  ;;  %vm1639_vm12 = vcmp.gt.f32.partialorder %v1627_v58, 0.0 }
 0x22c   : > { %v14496_v33 = vpack.c.bf16 %v1674_v61, %v1673_v60  ;;  %v1605_v59 = vsel %vm1599_vm13, %v1580_v14, %v1582_v15  ;;  %v20074_v60 = vld [vmem:[#allocation20_spill] sm:$0xff] }
 0x22d   : > { %v1629_v62 = vadd.f32 %v1605_v59, %v1409_v22  ;;  %v1584_v41 = vpop.permute.xlu0 %1583  ;;  %v1652_v49 = vmul.f32 0.2, %v1628_v57  ;;  %vm1640_vm10 = vcmp.gt.f32.partialorder %v1628_v57, 0.0  ;;  %v1663_v55 = vsel %vm1639_vm12, %v1627_v58, %v1651_v19  ;;  %v20076_v22 = vld [vmem:[#allocation11_spill] sm:$0xff]  ;;  %v20078_v59 = vld [vmem:[#allocation24_spill] sm:$0xff] }
 0x22e   : > { %2051 = vrot.lane.b32.xlu0 %v14481_v9, %s13725_s24  ;;  %2194 = vrot.lane.b32.xlu1 %v14496_v33, %s13724_s23  ;;  %v1675_v50 = vmul.f32 %v14438_v46, %v1663_v55  ;;  %v951_v61 = vsel %vm939_vm4, %v20074_v60, %v14259_v53  ;;  %v950_v58 = vsel %vm939_vm4, %v20077_v35, %v20074_v60  ;;  %v20080_v53 = vld [vmem:[#allocation10_spill] sm:$0xff]  ;;  %vm1806_vm12 = vcmask 408576  }
 0x22f   : > { %vm1641_vm9 = vcmp.gt.f32.partialorder %v1629_v62, 0.0  ;;  %v1653_v47 = vmul.f32 0.2, %v1629_v62  ;;  %v1586_v40 = vpop.permute.xlu1 %1585  ;;  %v1664_v28 = vsel %vm1640_vm10, %v1628_v57, %v1652_v49  ;;  %v755_v57 = vadd.f32 %v20076_v22, %v20075_v52 }
 0x230   : > { %v1606_v2 = vsel %vm1599_vm13, %v1584_v41, %v1586_v40  ;;  %v1676_v42 = vmul.f32 %v14451_v31, %v1664_v28  ;;  %v14545_v34 = vpack.c.bf16 %v1675_v50, %v19997_v38  ;;  %v1171_v44 = vsel %vm1159_vm8, %v20079_v36, %v20078_v59  ;;  %v20084_v28 = vld [vmem:[#allocation21_spill] sm:$0xff] }
 0x231   : > { %v1665_v11 = vsel %vm1641_vm9, %v1629_v62, %v1653_v47  ;;  %v1588_v1 = vpop.permute.xlu0 %1587  ;;  %v1630_v63 = vadd.f32 %v1606_v2, %v1410_v23  ;;  %v754_v62 = vadd.f32 %v20076_v22, %v20080_v53  ;;  %v975_v41 = vadd.f32 %v951_v61, %v755_v57  ;;  %v13566_v61 = vld [vmem:[%s19978_s1 + $0xa4] ss:$8 sps:$4 sm:$0xff]  }
 0x232   : > { %v1607_v3 = vsel %vm1599_vm13, %v1586_v40, %v1588_v1  ;;  %1910 = vrot.lane.b32.xlu0 %v14481_v9, %s13730_s29  ;;  %2053 = vrot.lane.b32.xlu1 %v14496_v33, %s13725_s24  ;;  %v1677_v51 = vmul.f32 %v14461_v30, %v1665_v11  ;;  %v949_v11 = vsel %vm939_vm4, %v20082_v26, %v20077_v35  ;;  %vm2088_vm9 = vcmask 392192  }
 0x233   : > { %v1631_v39 = vadd.f32 %v1607_v3, %v1411_v12  ;;  %v1590_v54 = vpop.permute.xlu1 %1589  ;;  %v1654_v45 = vmul.f32 0.2, %v1630_v63  ;;  %vm1642_vm2 = vcmp.gt.f32.partialorder %v1630_v63, 0.0  ;;  %v974_v47 = vadd.f32 %v950_v58, %v754_v62  ;;  %v20083_v3 = vld [vmem:[#allocation9_spill] sm:$0xff]  ;;  %12424 = vmatprep.mubr.msk.bf16.mxu0 %vm602_vm0, %v13566_v61  ;;  %12427 = vmatprep.mubr.msk.bf16.mxu1 %vm602_vm0, %v13566_v61 }
 0x234   : > { %v1608_v17 = vsel %vm1599_vm13, %v1588_v1, %v1590_v54  ;;  %v14531_v8 = vpack.c.bf16 %v1677_v51, %v1676_v42  ;;  %v1195_v40 = vadd.f32 %v1171_v44, %v975_v41  ;;  %v753_v48 = vadd.f32 %v20076_v22, %v20083_v3  ;;  %v12368_v22 = vld [vmem:[%s19979_s2 + $0x28] sm:$0xff] }
 0x235   : > { %vm1643_vm14 = vcmp.gt.f32.partialorder %v1631_v39, 0.0  ;;  %v1655_v6 = vmul.f32 0.2, %v1631_v39  ;;  %v1632_v24 = vadd.f32 %v1608_v17, %v1412_v43  ;;  %v1592_v7 = vpop.permute.xlu0 %1591  ;;  %v1666_v15 = vsel %vm1642_vm2, %v1630_v63, %v1654_v45 }
 0x236   : > { %1768 = vrot.lane.b32.xlu0 %v14481_v9, %s13731_s30  ;;  %1912 = vrot.lane.b32.xlu1 %v14496_v33, %s13730_s29  ;;  %v1678_v49 = vmul.f32 %v14438_v46, %v1666_v15  ;;  %v1194_v0 = vadd.f32 %v1170_v16, %v974_v47  ;;  %v1415_v12 = vadd.f32 %v1391_v27, %v1195_v40  ;;  %vm1947_vm10 = vcmask 400384  }
 0x237   : > { %v1667_v32 = vsel %vm1643_vm14, %v1631_v39, %v1655_v6  ;;  %vm1644_vm15 = vcmp.gt.f32.partialorder %v1632_v24, 0.0  ;;  %v1656_v37 = vmul.f32 0.2, %v1632_v24  ;;  %v1594_v5 = vpop.permute.xlu1 %1593  ;;  %v1169_v39 = vsel %vm1159_vm8, %v20084_v28, %v20081_v13  ;;  %v20087_v28 = vld [vmem:[#allocation15_spill] sm:$0xff] }
 0x238   : > { %v1679_v10 = vmul.f32 %v14451_v31, %v1667_v32  ;;  %v13206_v2 = vpack.c.bf16 %v1678_v49, %v19997_v38  ;;  %v1414_v23 = vadd.f32 %v1390_v18, %v1194_v0  ;;  %v973_v54 = vadd.f32 %v949_v11, %v753_v48 }
 0x239   : > { %v1668_v4 = vsel %vm1644_vm15, %v1632_v24, %v1656_v37  ;;  %v1596_v25 = vpop.permute.xlu0 %1595  ;;  %v1389_v51 = vsel %vm1379_vm11, %v14351_v21, %v14359_v29  ;;  %v1609_v6 = vsel %vm1599_vm13, %v1592_v7, %v1594_v5  ;;  %v20085_v7 = vmov 0.0|0.0  }
 0x23a   : > { %v1680_v14 = vmul.f32 %v14461_v30, %v1668_v4  ;;  %2200 = vrot.lane.b32.xlu0 %v14531_v8, %s13724_s23  ;;  %1770 = vrot.lane.b32.xlu1 %v14496_v33, %s13731_s30  ;;  %v1610_v1 = vsel %vm1599_vm13, %v1594_v5, %v1596_v25  ;;  %v1193_v17 = vadd.f32 %v1169_v39, %v973_v54  ;;  %v2221_v39 = vrot.slane %v20087_v28, 4 }
 0x23b   : > { %v1598_v56 = vpop.permute.xlu1 %1597  ;;  %v1634_v55 = vadd.f32 %v1610_v1, %v1414_v23  ;;  %v20086_v23 = vld [vmem:[#allocation12_spill] sm:$0xff]  ;;  %vm2370_vm14 = vcmask 375808  }
 0x23c   : > { %v14542_v20 = vpack.c.bf16 %v1680_v14, %v1679_v10  ;;  %v1611_v19 = vsel %vm1599_vm13, %v1596_v25, %v1598_v56  ;;  %v1413_v24 = vadd.f32 %v1389_v51, %v1193_v17  ;;  %v20089_v17 = vld [vmem:[#allocation14_spill] sm:$0xff] }
 0x23d   : > { %v1635_v43 = vadd.f32 %v1611_v19, %v1415_v12  ;;  %v1658_v42 = vmul.f32 0.2, %v1634_v55  ;;  %vm1646_vm5 = vcmp.gt.f32.partialorder %v1634_v55, 0.0  ;;  %v14640_v60 = vpop.permute.xlu0 %2055 }
 0x23e   : > { %2059 = vrot.lane.b32.xlu0 %v14531_v8, %s13725_s24  ;;  %2198 = vrot.lane.b32.xlu1 %v14545_v34, %s13724_s23  ;;  %v1633_v32 = vadd.f32 %v1609_v6, %v1413_v24  ;;  %v20090_v6 = vld [vmem:[#allocation16_spill] sm:$0xff] }
 0x23f   : > { %v1659_v63 = vmul.f32 0.2, %v1635_v43  ;;  %vm1647_vm3 = vcmp.gt.f32.partialorder %v1635_v43, 0.0  ;;  %v1670_v21 = vsel %vm1646_vm5, %v1634_v55, %v1658_v42  ;;  %v20088_v55 = vld [vmem:[#allocation13_spill] sm:$0xff]  ;;  %v2083_v24 = vrot.slane %v20090_v6, 4 }
 0x240   : > { %v1657_v50 = vmul.f32 0.2, %v1633_v32  ;;  %vm1645_vm6 = vcmp.gt.f32.partialorder %v1633_v32, 0.0  ;;  %v1682_v45 = vmul.f32 %v14451_v31, %v1670_v21  ;;  %v2227_v51 = vrot.slane %v20088_v55, 4  ;;  %v20091_v42 = vld [vmem:[#allocation17_spill] sm:$0xff] }
 0x241   : > { %v1671_v37 = vsel %vm1647_vm3, %v1635_v43, %v1659_v63  ;;  %v2224_v43 = vrot.slane %v20086_v23, 4  ;;  %v2218_v63 = vrot.slane %v20089_v17, 4 }
 0x242   : > { %1918 = vrot.lane.b32.xlu0 %v14531_v8, %s13730_s29  ;;  %2057 = vrot.lane.b32.xlu1 %v14545_v34, %s13725_s24  ;;  %v1683_v29 = vmul.f32 %v14461_v30, %v1671_v37  ;;  %v1669_v5 = vsel %vm1645_vm6, %v1633_v32, %v1657_v50  ;;  %v2086_v32 = vrot.slane %v20091_v42, 4 }
 0x243   : > { %v1681_v10 = vmul.f32 %v14438_v46, %v1669_v5  ;;  %v2077_v5 = vrot.slane %v14640_v60, 4 }
 0x244   : > { %v13210_v4 = vpack.c.bf16 %v1683_v29, %v1682_v45 }
 0x245   : > { %v13209_v14 = vpack.c.bf16 %v1681_v10, %v19997_v38  ;;  %v20095_v38 = vld [vmem:[#allocation6_spill] sm:$0xff] }
 0x246   : > { %2204 = vrot.lane.b32.xlu0 %v13206_v2, %s13724_s23  ;;  %1916 = vrot.lane.b32.xlu1 %v14545_v34, %s13730_s29 }
 0x24a   : > { %2063 = vrot.lane.b32.xlu0 %v13206_v2, %s13725_s24  ;;  %1774 = vrot.lane.b32.xlu1 %v14545_v34, %s13731_s30 }
 0x24e   : > { %1922 = vrot.lane.b32.xlu0 %v13206_v2, %s13730_s29  ;;  %2206 = vrot.lane.b32.xlu1 %v14542_v20, %s13724_s23 }
 0x252   : > { %1780 = vrot.lane.b32.xlu0 %v13206_v2, %s13731_s30  ;;  %2065 = vrot.lane.b32.xlu1 %v14542_v20, %s13725_s24 }
 0x256   : > { %1924 = vrot.lane.b32.xlu1 %v14542_v20, %s13730_s29  ;;  %2212 = vrot.lane.b32.xlu0 %v13210_v4, %s13724_s23 }
 0x25a   : > { %1782 = vrot.lane.b32.xlu1 %v14542_v20, %s13731_s30  ;;  %1776 = vrot.lane.b32.xlu0 %v14531_v8, %s13731_s30 }
 0x25e   : > { %2210 = vrot.lane.b32.xlu1 %v13209_v14, %s13724_s23  ;;  %2071 = vrot.lane.b32.xlu0 %v13210_v4, %s13725_s24 }
 0x262   : > { %1778 = vrot.lane.b32.xlu1 %v20085_v7, %s13731_s30  ;;  %2345 = vrot.lane.b32.xlu0 %v13206_v2, %s13733_s5 }
 0x266   : > { %2069 = vrot.lane.b32.xlu1 %v13209_v14, %s13725_s24  ;;  %1930 = vrot.lane.b32.xlu0 %v13210_v4, %s13730_s29 }
 0x26a   : > { %2347 = vrot.lane.b32.xlu1 %v14542_v20, %s13733_s5  ;;  %2349 = vrot.lane.b32.xlu0 %v20085_v7, %s13733_s5  ;;  %v12370_v20 = vld [vmem:[%s19979_s2 + $0x38] sm:$0xff] }
 0x26e   : > { %1928 = vrot.lane.b32.xlu1 %v13209_v14, %s13730_s29  ;;  %1788 = vrot.lane.b32.xlu0 %v13210_v4, %s13731_s30 }
 0x272   : > { %2355 = vrot.lane.b32.xlu1 %v20085_v7, %s13733_s5  ;;  %2333 = vrot.lane.b32.xlu0 %v14481_v9, %s13733_s5  ;;  %v12369_v9 = vld [vmem:[%s19979_s2 + $0x30] sm:$0xff] }
 0x276   : > { %1786 = vrot.lane.b32.xlu1 %v13209_v14, %s13731_s30  ;;  %2337 = vrot.lane.b32.xlu0 %v20085_v7, %s13733_s5 }
 0x27a   : > { %2335 = vrot.lane.b32.xlu1 %v14496_v33, %s13733_s5  ;;  %2353 = vrot.lane.b32.xlu0 %v13210_v4, %s13733_s5  ;;  %v12367_v33 = vld [vmem:[%s19979_s2 + $0x20] sm:$0xff] }
 0x27e   : > { %2339 = vrot.lane.b32.xlu1 %v14545_v34, %s13733_s5  ;;  %2341 = vrot.lane.b32.xlu0 %v14531_v8, %s13733_s5  ;;  %v14654_v8 = vpop.permute.xlu0 %1926  ;;  %v14661_v34 = vpop.permute.xlu1 %2061 }
 0x27f   : > { %v2080_v10 = vrot.slane %v14661_v34, 4 }
 0x282   : > { %2351 = vrot.lane.b32.xlu1 %v13209_v14, %s13733_s5  ;;  %2814 = vperm.xlu0 %13528, %v12369_v9   ;;  %v14663_v52 = vpop.permute.xlu0 %1914  ;;  %v14670_v57 = vpop.permute.xlu1 %1932 }
 0x283   : > { %v1936_v6 = vrot.slane %v14663_v52, 4 }
 0x286   : > { %2343 = vrot.lane.b32.xlu1 %v20085_v7, %s13733_s5  ;;  %2804 = vperm.xlu0 %13528, %v12367_v33   ;;  %v14674_v15 = vpop.permute.xlu0 %1784  ;;  %v14680_v35 = vpop.permute.xlu1 %1920 }
 0x28a   : > { %2819 = vperm.xlu1 %13529, %v12370_v20   ;;  %4278 = vrot.lane.b32.xlu0 %v20085_v7, %s13724_s23  ;;  %v14682_v58 = vpop.permute.xlu0 %1772  ;;  %v14686_v59 = vpop.permute.xlu1 %1790  ;;  %v1942_v20 = vrot.slane %v14654_v8, 4 }
 0x28e   : > { %2809 = vperm.xlu1 %13529, %v12368_v22   ;;  %4266 = vrot.lane.b32.xlu0 %v20085_v7, %s13724_s23 }
 0x292   : > { %4284 = vrot.lane.b32.xlu1 %v20085_v7, %s13724_s23  ;;  %4138 = vrot.lane.b32.xlu0 %v20085_v7, %s13725_s24 }
 0x296   : > { %4272 = vrot.lane.b32.xlu1 %v20085_v7, %s13724_s23 }
 0x29a   : > { %4144 = vrot.lane.b32.xlu1 %v20085_v7, %s13725_s24 }
 0x29c   : > { %v14690_v36 = vpop.permute.xlu0 %2192 }
 0x2a0   : > { %v14692_v44 = vpop.permute.xlu0 %2051  ;;  %v14694_v53 = vpop.permute.xlu1 %2194 }
 0x2a1   : > { %v2217_v54 = vrot.slane %v14694_v53, 4 }
 0x2a3   : > { %v2231_v14 = vsel %vm609_vm1, %v2217_v54, %v2218_v63 }
 0x2a4   : > { %v14696_v62 = vpop.permute.xlu0 %1910  ;;  %v14698_v41 = vpop.permute.xlu1 %2053  ;;  %v2232_v17 = vsel %vm2229_vm7, %v14694_v53, %v2231_v14 }
 0x2a5   : > { %v2076_v29 = vrot.slane %v14698_v41, 4 }
 0x2a7   : > { %v2090_v28 = vsel %vm609_vm1, %v2076_v29, %v2077_v5 }
 0x2a8   : > { %v14700_v56 = vpop.permute.xlu0 %1768  ;;  %v14702_v13 = vpop.permute.xlu1 %1912  ;;  %v2091_v5 = vsel %vm2088_vm9, %v14698_v41, %v2090_v28 }
 0x2ac   : > { %v2201_v16 = vpop.permute.xlu0 %2200  ;;  %v14704_v27 = vpop.permute.xlu1 %1770 }
 0x2ad   : > { %v2220_v3 = vrot.slane %v2201_v16, 4 }
 0x2af   : > { %v2235_v50 = vsel %vm609_vm1, %v2220_v3, %v2221_v39 }
 0x2b0   : > { %v14706_v49 = vpop.permute.xlu0 %2059  ;;  %v14708_v47 = vpop.permute.xlu1 %2198  ;;  %v2236_v22 = vsel %vm2229_vm7, %v2201_v16, %v2235_v50  ;;  %v1945_v16 = vrot.slane %v14670_v57, 4 }
 0x2b1   : > { %v2079_v9 = vrot.slane %v14706_v49, 4  ;;  %v2219_v61 = vrot.slane %v14708_v47, 4  ;;  %v14768_v42 = vcombine.high %v2232_v17, %v2236_v22 }
 0x2b3   : > { %v2233_v50 = vsel %vm609_vm1, %v2219_v61, %v2220_v3 }
 0x2b4   : > { %v14710_v40 = vpop.permute.xlu0 %1918  ;;  %v14712_v25 = vpop.permute.xlu1 %2057 }
 0x2b5   : > { %v2078_v28 = vrot.slane %v14712_v25, 4 }
 0x2b8   : > { %v14714_v18 = vpop.permute.xlu0 %2204  ;;  %v14716_v19 = vpop.permute.xlu1 %1916 }
 0x2b9   : > { %v2222_v63 = vrot.slane %v14714_v18, 4 }
 0x2bc   : > { %v14718_v0 = vpop.permute.xlu0 %2063  ;;  %v14720_v12 = vpop.permute.xlu1 %1774 }
 0x2c0   : > { %v14722_v26 = vpop.permute.xlu0 %1922  ;;  %v2207_v11 = vpop.permute.xlu1 %2206 }
 0x2c1   : > { %v2223_v48 = vrot.slane %v2207_v11, 4 }
 0x2c3   : > { %v2239_v45 = vsel %vm609_vm1, %v2223_v48, %v2224_v43  ;;  %v2237_v53 = vsel %vm609_vm1, %v2222_v63, %v2223_v48  ;;  %v2234_v48 = vsel %vm2229_vm7, %v14708_v47, %v2233_v50 }
 0x2c4   : > { %v14724_v1 = vpop.permute.xlu0 %1780  ;;  %v14726_v2 = vpop.permute.xlu1 %2065  ;;  %v2240_v23 = vsel %vm2229_vm7, %v2207_v11, %v2239_v45  ;;  %v2216_v11 = vrot.slane %v14690_v36, 4  ;;  %v1939_v45 = vrot.slane %v14680_v35, 4  ;;  %v14782_v35 = vcombine.low %v2232_v17, %v2236_v22 }
 0x2c5   : > { %v2082_v39 = vrot.slane %v14726_v2, 4 }
 0x2c7   : > { %v2098_v3 = vsel %vm609_vm1, %v2082_v39, %v2083_v24 }
 0x2c8   : > { %v14735_v37 = vpop.permute.xlu1 %1924  ;;  %v2213_v21 = vpop.permute.xlu0 %2212  ;;  %v2099_v22 = vsel %vm2088_vm9, %v14726_v2, %v2098_v3  ;;  %v2075_v2 = vrot.slane %v14692_v44, 4 }
 0x2c9   : > { %v2226_v4 = vrot.slane %v2213_v21, 4  ;;  %v1941_v17 = vrot.slane %v14735_v37, 4 }
 0x2cb   : > { %v2243_v33 = vsel %vm609_vm1, %v2226_v4, %v2227_v51 }
 0x2cc   : > { %v2244_v60 = vsel %vm2229_vm7, %v2213_v21, %v2243_v33  ;;  %v14750_v43 = vpop.permute.xlu1 %1782  ;;  %v14752_v34 = vpop.permute.xlu0 %1776  ;;  %v2094_v21 = vsel %vm609_vm1, %v2079_v9, %v2080_v10  ;;  %v2228_v33 = vsel %vm609_vm1, %v2216_v11, %v2217_v54  ;;  %v1935_v10 = vrot.slane %v14702_v13, 4 }
 0x2cd   : > { %v14758_v55 = vcombine.low %v2240_v23, %v2244_v60  ;;  %v14760_v51 = vcombine.high %v2240_v23, %v2244_v60  ;;  %v2095_v54 = vsel %vm2088_vm9, %v14706_v49, %v2094_v21  ;;  %v1938_v60 = vrot.slane %v14710_v40, 4 }
 0x2ce   : > { %v2238_v11 = vsel %vm2229_vm7, %v14714_v18, %v2237_v53  ;;  %v14813_v3 = vcombine.high %v2091_v5, %v2095_v54  ;;  %v1949_v41 = vsel %vm609_vm1, %v1935_v10, %v1936_v6 }
 0x2cf   : > { %2753 = vmatprep.subr.bf16.mxu1 %v14760_v51 }
 0x2d0   : > { %v2211_v14 = vpop.permute.xlu1 %2210  ;;  %2754 = vmatpush1.bf16.msra.mxu1 %v14758_v55  ;;  %v2072_v52 = vpop.permute.xlu0 %2071 }
 0x2d1   : > { %v2225_v61 = vrot.slane %v2211_v14, 4  ;;  %v2085_v23 = vrot.slane %v2072_v52, 4  ;;  %2755 = vmatprep.subr.bf16.mxu1 %v14768_v42 }
 0x2d3   : > { %v2241_v24 = vsel %vm609_vm1, %v2225_v61, %v2226_v4  ;;  %v2102_v63 = vsel %vm609_vm1, %v2085_v23, %v2086_v32  ;;  %v1800_v61 = vrot.slane %v14674_v15, 4  ;;  %v1957_v15 = vsel %vm609_vm1, %v1941_v17, %v1942_v20 }
 0x2d4   : > { %v2242_v49 = vsel %vm2229_vm7, %v2211_v14, %v2241_v24  ;;  %v2103_v47 = vsel %vm2088_vm9, %v2072_v52, %v2102_v63  ;;  %v14799_v21 = vpop.permute.xlu1 %1778  ;;  %2756 = vmatpush1.bf16.msra.mxu1 %v14782_v35  ;;  %v14802_v50 = vpop.permute.xlu0 %2345  ;;  %v2230_v14 = vsel %vm2229_vm7, %v14690_v36, %v2228_v33  ;;  %v2081_v52 = vrot.slane %v14718_v0, 4 }
 0x2d5   : > { %v14804_v18 = vcombine.low %v2238_v11, %v2242_v49  ;;  %v14806_v4 = vcombine.high %v2238_v11, %v2242_v49  ;;  %v14808_v32 = vcombine.low %v2099_v22, %v2103_v47  ;;  %v14810_v53 = vcombine.high %v2099_v22, %v2103_v47 }
 0x2d6   : > { %v14819_v24 = vcombine.high %v2230_v14, %v2234_v48  ;;  %v1953_v11 = vsel %vm609_vm1, %v1938_v60, %v1939_v45  ;;  %v2092_v63 = vsel %vm609_vm1, %v2078_v28, %v2079_v9  ;;  %v1934_v22 = vrot.slane %v14696_v62, 4 }
 0x2d7   : > { %2700 = vmatprep.subr.bf16.mxu0 %v14806_v4  ;;  %2757 = vmatprep.subr.bf16.mxu1 %v14810_v53  ;;  %v2087_v36 = vsel %vm609_vm1, %v2075_v2, %v2076_v29  ;;  %v2096_v45 = vsel %vm609_vm1, %v2081_v52, %v2082_v39  ;;  %v14842_v28 = vcombine.low %v2091_v5, %v2095_v54  ;;  %v1937_v47 = vrot.slane %v14716_v19, 4 }
 0x2d8   : > { %v2070_v33 = vpop.permute.xlu1 %2069  ;;  %2701 = vmatpush1.bf16.msra.mxu0 %v14804_v18  ;;  %2758 = vmatpush1.bf16.msra.mxu1 %v14808_v32  ;;  %v1931_v9 = vpop.permute.xlu0 %1930  ;;  %v14846_v20 = vcombine.low %v2230_v14, %v2234_v48  ;;  %v1954_v39 = vsel %vm1947_vm10, %v14710_v40, %v1953_v11  ;;  %v2093_v49 = vsel %vm2088_vm9, %v14712_v25, %v2092_v63  ;;  %v1799_v2 = vrot.slane %v14750_v43, 4 }
 0x2d9   : > { %v2084_v29 = vrot.slane %v2070_v33, 4  ;;  %v1944_v8 = vrot.slane %v1931_v9, 4  ;;  %2702 = vmatprep.subr.bf16.mxu0 %v14819_v24  ;;  %2759 = vmatprep.subr.bf16.mxu1 %v14813_v3  ;;  %v1958_v6 = vsel %vm1947_vm10, %v14735_v37, %v1957_v15  ;;  %v2097_v5 = vsel %vm2088_vm9, %v14718_v0, %v2096_v45 }
 0x2da   : > { %v1797_v14 = vrot.slane %v14799_v21, 4  ;;  %v1950_v21 = vsel %vm1947_vm10, %v14702_v13, %v1949_v41  ;;  %v1793_v15 = vrot.slane %v14704_v27, 4  ;;  %v2089_v45 = vsel %vm2088_vm9, %v14692_v44, %v2087_v36 }
 0x2db   : > { %v2100_v54 = vsel %vm609_vm1, %v2084_v29, %v2085_v23  ;;  %v1961_v48 = vsel %vm609_vm1, %v1944_v8, %v1945_v16  ;;  %v14887_v29 = vcombine.high %v2089_v45, %v2093_v49  ;;  %v1794_v41 = vrot.slane %v14682_v58, 4 }
 0x2dc   : > { %v2101_v25 = vsel %vm2088_vm9, %v2070_v33, %v2100_v54  ;;  %v1962_v52 = vsel %vm1947_vm10, %v1931_v9, %v1961_v48  ;;  %v14865_v11 = vpop.permute.xlu1 %2347  ;;  %2703 = vmatpush1.bf16.msra.mxu0 %v14846_v20  ;;  %2760 = vmatpush1.bf16.msra.mxu1 %v14842_v28  ;;  %v14869_v0 = vpop.permute.xlu0 %2349  ;;  %v1940_v33 = vrot.slane %v14722_v26, 4  ;;  %v14885_v9 = vcombine.high %v1950_v21, %v1954_v39 }
 0x2dd   : > { %v14871_v23 = vcombine.low %v2097_v5, %v2101_v25  ;;  %v14873_v57 = vcombine.high %v2097_v5, %v2101_v25  ;;  %v14875_v16 = vcombine.low %v1958_v6, %v1962_v52  ;;  %v14877_v63 = vcombine.high %v1958_v6, %v1962_v52 }
 0x2de   : > { %v1951_v5 = vsel %vm609_vm1, %v1937_v47, %v1938_v60  ;;  %v1796_v6 = vrot.slane %v14752_v34, 4  ;;  %v1803_v44 = vrot.slane %v14686_v59, 4  ;;  %v1816_v36 = vsel %vm609_vm1, %v1799_v2, %v1800_v61 }
 0x2df   : > { %2704 = vmatprep.subr.bf16.mxu0 %v14873_v57  ;;  %2761 = vmatprep.subr.bf16.mxu1 %v14877_v63  ;;  %v1955_v40 = vsel %vm609_vm1, %v1940_v33, %v1941_v17  ;;  %v1946_v58 = vsel %vm609_vm1, %v1934_v22, %v1935_v10  ;;  %v1808_v37 = vsel %vm609_vm1, %v1793_v15, %v1794_v41  ;;  %v1795_v41 = vrot.slane %v14720_v12, 4 }
 0x2e0   : > { %v1929_v54 = vpop.permute.xlu1 %1928  ;;  %2705 = vmatpush1.bf16.msra.mxu0 %v14871_v23  ;;  %2762 = vmatpush1.bf16.msra.mxu1 %v14875_v16  ;;  %v1789_v60 = vpop.permute.xlu0 %1788  ;;  %v1812_v59 = vsel %vm609_vm1, %v1796_v6, %v1797_v14  ;;  %v14914_v17 = vcombine.low %v1950_v21, %v1954_v39  ;;  %v14916_v61 = vcombine.low %v2089_v45, %v2093_v49 }
 0x2e1   : > { %v1943_v47 = vrot.slane %v1929_v54, 4  ;;  %v1802_v48 = vrot.slane %v1789_v60, 4  ;;  %2706 = vmatprep.subr.bf16.mxu0 %v14887_v29  ;;  %2763 = vmatprep.subr.bf16.mxu1 %v14885_v9  ;;  %v1952_v13 = vsel %vm1947_vm10, %v14716_v19, %v1951_v5  ;;  %v1817_v10 = vsel %vm1806_vm12, %v14750_v43, %v1816_v36 }
 0x2e2   : > { %v1956_v22 = vsel %vm1947_vm10, %v14722_v26, %v1955_v40  ;;  %v1813_v52 = vsel %vm1806_vm12, %v14752_v34, %v1812_v59  ;;  %v1809_v34 = vsel %vm1806_vm12, %v14704_v27, %v1808_v37  ;;  %v1948_v5 = vsel %vm1947_vm10, %v14696_v62, %v1946_v58 }
 0x2e3   : > { %v1959_v14 = vsel %vm609_vm1, %v1943_v47, %v1944_v8  ;;  %v1820_v25 = vsel %vm609_vm1, %v1802_v48, %v1803_v44  ;;  %v14947_v44 = vcombine.high %v1948_v5, %v1952_v13  ;;  %v1798_v36 = vrot.slane %v14724_v1, 4 }
 0x2e4   : > { %v1960_v39 = vsel %vm1947_vm10, %v1929_v54, %v1959_v14  ;;  %v1821_v49 = vsel %vm1806_vm12, %v1789_v60, %v1820_v25  ;;  %v2356_v21 = vpop.permute.xlu1 %2355  ;;  %2707 = vmatpush1.bf16.msra.mxu0 %v14916_v61  ;;  %2764 = vmatpush1.bf16.msra.mxu1 %v14914_v17  ;;  %v14932_v19 = vpop.permute.xlu0 %2333  ;;  %v14950_v40 = vcombine.high %v1809_v34, %v1813_v52  ;;  %v2364_v60 = vrot.slane %v14865_v11, 4 }
 0x2e5   : > { %v14934_v45 = vcombine.low %v1956_v22, %v1960_v39  ;;  %v14936_v26 = vcombine.high %v1956_v22, %v1960_v39  ;;  %v14938_v8 = vcombine.low %v1817_v10, %v1821_v49  ;;  %v14940_v33 = vcombine.high %v1817_v10, %v1821_v49  ;;  %v20092_v49 = vld [vmem:[#allocation5_spill] sm:$0xff] }
 0x2e6   : > { %v1810_v54 = vsel %vm609_vm1, %v1795_v41, %v1796_v6  ;;  %v2365_v59 = vrot.slane %v14869_v0, 4  ;;  %v1792_v58 = vrot.slane %v14700_v56, 4  ;;  %v1814_v37 = vsel %vm609_vm1, %v1798_v36, %v1799_v2 }
 0x2e7   : > { %2708 = vmatprep.subr.bf16.mxu0 %v14936_v26  ;;  %2765 = vmatprep.subr.bf16.mxu1 %v14940_v33  ;;  %v14965_v6 = vcombine.low %v1948_v5, %v1952_v13  ;;  %v14967_v0 = vcombine.low %v1809_v34, %v1813_v52  ;;  %v1811_v14 = vsel %vm1806_vm12, %v14720_v12, %v1810_v54  ;;  %v20093_v54 = vld [vmem:[#allocation7_spill] sm:$0xff] }
 0x2e8   : > { %v1787_v47 = vpop.permute.xlu1 %1786  ;;  %2709 = vmatpush1.bf16.msra.mxu0 %v14934_v45  ;;  %2766 = vmatpush1.bf16.msra.mxu1 %v14938_v8  ;;  %v2338_v62 = vpop.permute.xlu0 %2337  ;;  %v1805_v22 = vsel %vm609_vm1, %v1792_v58, %v1793_v15  ;;  %v2380_v2 = vsel %vm609_vm1, %v2364_v60, %v2365_v59  ;;  %v1815_v25 = vsel %vm1806_vm12, %v14724_v1, %v1814_v37  ;;  %v2368_v15 = vrot.slane %v2356_v21, 4 }
 0x2e9   : > { %v1801_v10 = vrot.slane %v1787_v47, 4  ;;  %2710 = vmatprep.subr.bf16.mxu0 %v14947_v44  ;;  %2767 = vmatprep.subr.bf16.mxu1 %v14950_v40  ;;  %v1807_v1 = vsel %vm1806_vm12, %v14700_v56, %v1805_v22  ;;  %v2381_v21 = vsel %vm2370_vm14, %v14865_v11, %v2380_v2  ;;  %v2363_v11 = vrot.slane %v14802_v50, 4 }
 0x2ea   : > { %v14989_v34 = vcombine.high %v1807_v1, %v1811_v14 }
 0x2eb   : > { %v1818_v43 = vsel %vm609_vm1, %v1801_v10, %v1802_v48  ;;  %v15003_v10 = vcombine.low %v1807_v1, %v1811_v14  ;;  %v2378_v2 = vsel %vm609_vm1, %v2363_v11, %v2364_v60  ;;  %v20094_v14 = vld [vmem:[#allocation4_spill] sm:$0xff] }
 0x2ec   : > { %v1819_v39 = vsel %vm1806_vm12, %v1787_v47, %v1818_v43  ;;  %v2336_v13 = vpop.permute.xlu1 %2335  ;;  %2711 = vmatpush1.bf16.msra.mxu0 %v14965_v6  ;;  %2768 = vmatpush1.bf16.msra.mxu1 %v14967_v0  ;;  %v2354_v27 = vpop.permute.xlu0 %2353  ;;  %v2379_v60 = vsel %vm2370_vm14, %v14802_v50, %v2378_v2 }
 0x2ed   : > { %v14981_v52 = vcombine.low %v1815_v25, %v1819_v39  ;;  %v14983_v12 = vcombine.high %v1815_v25, %v1819_v39  ;;  %v2367_v48 = vrot.slane %v2354_v27, 4  ;;  %12426 = vmatprep.subr.msk.bf16.mxu1 %vm609_vm1, %v20092_v49  ;;  %v2358_v22 = vrot.slane %v2336_v13, 4 }
 0x2ee   : > { %v2357_v25 = vrot.slane %v14932_v19, 4  ;;  %v2359_v39 = vrot.slane %v2338_v62, 4 }
 0x2ef   : > { %v2384_v5 = vsel %vm609_vm1, %v2367_v48, %v2368_v15  ;;  %2712 = vmatprep.subr.bf16.mxu0 %v14983_v12 }
 0x2f0   : > { %v2385_v41 = vsel %vm2370_vm14, %v2354_v27, %v2384_v5  ;;  %v2340_v36 = vpop.permute.xlu1 %2339  ;;  %2713 = vmatpush1.bf16.msra.mxu0 %v14981_v52  ;;  %2780 = vmatpush2.bf16.msra.mxu1 %v20093_v54  ;;  %v2342_v59 = vpop.permute.xlu0 %2341  ;;  %v2369_v1 = vsel %vm609_vm1, %v2357_v25, %v2358_v22  ;;  %v2372_v62 = vsel %vm609_vm1, %v2358_v22, %v2359_v39 }
 0x2f1   : > { %v14998_v47 = vcombine.low %v2381_v21, %v2385_v41  ;;  %v15000_v56 = vcombine.high %v2381_v21, %v2385_v41  ;;  %v2360_v58 = vrot.slane %v2340_v36, 4  ;;  %v2361_v37 = vrot.slane %v2342_v59, 4  ;;  %2714 = vmatprep.subr.bf16.mxu0 %v14989_v34 }
 0x2f2   : > { %v2373_v50 = vsel %vm2370_vm14, %v2336_v13, %v2372_v62  ;;  %v13569_v13 = vld [vmem:[%s19978_s1 + $0xb0] ss:$8 sps:$4 sm:$0xff]   ;;  %v13585_v62 = vld [vmem:[%s19978_s1 + $0x114] ss:$8 sps:$4 sm:$0xff]  }
 0x2f3   : > { %2781 = vmatprep.subr.bf16.mxu1 %v15000_v56  ;;  %v2374_v27 = vsel %vm609_vm1, %v2360_v58, %v2361_v37 }
 0x2f4   : > { %v2352_v43 = vpop.permute.xlu1 %2351  ;;  %2715 = vmatpush1.bf16.msra.mxu0 %v15003_v10  ;;  %2782 = vmatpush2.bf16.msra.mxu1 %v14998_v47  ;;  %v2375_v21 = vsel %vm2370_vm14, %v2340_v36, %v2374_v27  ;;  %v13573_v27 = vld [vmem:[%s19978_s1 + $0xd4] ss:$8 sps:$4 sm:$0xff]  }
 0x2f5   : > { %v2366_v15 = vrot.slane %v2352_v43, 4  ;;  %12423 = vmatprep.subr.msk.bf16.mxu0 %vm609_vm1, %v20094_v14 }
 0x2f7   : > { %v2382_v5 = vsel %vm609_vm1, %v2366_v15, %v2367_v48  ;;  %v2371_v48 = vsel %vm2370_vm14, %v14932_v19, %v2369_v1  ;;  %v13567_v19 = vld [vmem:[%s19978_s1 + $0xb4] ss:$8 sps:$4 sm:$0xff]   ;;  %v13575_v15 = vld [vmem:[%s19978_s1 + $0xd0] ss:$8 sps:$4 sm:$0xff]   ;;  %v13578_v1 = vld [vmem:[%s19978_s1 + $0xe4] ss:$8 sps:$4 sm:$0xff]  }
 0x2f8   : > { %v2383_v41 = vsel %vm2370_vm14, %v2352_v43, %v2382_v5  ;;  %v2344_v11 = vpop.permute.xlu1 %2343  ;;  %2727 = vmatpush2.bf16.msra.mxu0 %v20095_v38  ;;  %v15028_v25 = vcombine.high %v2371_v48, %v2375_v21  ;;  %v15040_v39 = vcombine.low %v2371_v48, %v2375_v21  ;;  %v13576_v5 = vld [vmem:[%s19978_s1 + $0xe0] ss:$8 sps:$4 sm:$0xff]   ;;  %v13579_v21 = vld [vmem:[%s19978_s1 + $0xf4] ss:$8 sps:$4 sm:$0xff]  }
 0x2f9   : > { %v15022_v58 = vcombine.low %v2379_v60, %v2383_v41  ;;  %v15024_v30 = vcombine.high %v2379_v60, %v2383_v41  ;;  %v2362_v31 = vrot.slane %v2344_v11, 4  ;;  %v13581_v60 = vld [vmem:[%s19978_s1 + $0xf0] ss:$8 sps:$4 sm:$0xff]   ;;  %v13584_v41 = vld [vmem:[%s19978_s1 + $0x104] ss:$8 sps:$4 sm:$0xff]  }
 0x2fa   : > { %v13582_v11 = vld [vmem:[%s19978_s1 + $0x100] ss:$8 sps:$4 sm:$0xff]  }
 0x2fb   : > { %v2376_v36 = vsel %vm609_vm1, %v2361_v37, %v2362_v31  ;;  %2728 = vmatprep.subr.bf16.mxu0 %v15024_v30  ;;  %v13564_v31 = vld [vmem:[%s19978_s1 + $0xa0] ss:$8 sps:$4 sm:$0xff]  }
 0x2fc   : > { %v2377_v43 = vsel %vm2370_vm14, %v2342_v59, %v2376_v36  ;;  %2729 = vmatpush2.bf16.msra.mxu0 %v15022_v58  ;;  %v13572_v59 = vld [vmem:[%s19978_s1 + $0xc4] ss:$8 sps:$4 sm:$0xff]   ;;  %v13570_v37 = vld [vmem:[%s19978_s1 + $0xc0] ss:$8 sps:$4 sm:$0xff]  }
 0x2fd   : > { %v15035_v22 = vcombine.low %v2373_v50, %v2377_v43  ;;  %v15037_v2 = vcombine.high %v2373_v50, %v2377_v43  ;;  %2730 = vmatprep.subr.bf16.mxu0 %v15028_v25 }
 0x2ff   : > { %2783 = vmatprep.subr.bf16.mxu1 %v15037_v2 }
 0x300   : > { %2731 = vmatpush2.bf16.msra.mxu0 %v15040_v39  ;;  %2784 = vmatpush2.bf16.msra.mxu1 %v15035_v22 }
 0x301   : > { %2863 = vmatprep.subr.bf16.mxu0 %v14806_v4  ;;  %2916 = vmatprep.subr.bf16.mxu1 %v14760_v51 }
 0x303   : > { %2733 = vmatmul.mubr.bf16.vlgmr.msra.gmra.mxu0 %v13564_v31  ;;  %2786 = vmatmul.mubr.bf16.vlgmr.msra.gmra.mxu1 %v13564_v31 }
 0x304   : > { %2864 = vmatpush1.bf16.msra.mxu0 %v14804_v18  ;;  %2917 = vmatpush1.bf16.msra.mxu1 %v14758_v55 }
 0x305   : > { %2865 = vmatprep.subr.bf16.mxu0 %v14819_v24  ;;  %2918 = vmatprep.subr.bf16.mxu1 %v14768_v42 }
 0x306   : > { %12425 = vmatprep.mubr.msk.bf16.mxu0 %vm602_vm0, %v13567_v19  ;;  %12428 = vmatprep.mubr.msk.bf16.mxu1 %vm602_vm0, %v13567_v19 }
 0x308   : > { %2866 = vmatpush1.bf16.msra.mxu0 %v14846_v20  ;;  %2919 = vmatpush1.bf16.msra.mxu1 %v14782_v35 }
 0x309   : > { %2867 = vmatprep.subr.bf16.mxu0 %v14873_v57  ;;  %2920 = vmatprep.subr.bf16.mxu1 %v14810_v53 }
 0x30b   : > { %2743 = vmatmul.mubr.bf16.gmra.mxu0 %v13569_v13  ;;  %2794 = vmatmul.mubr.bf16.gmra.mxu1 %v13569_v13 }
 0x30c   : > { %2868 = vmatpush1.bf16.msra.mxu0 %v14871_v23  ;;  %2921 = vmatpush1.bf16.msra.mxu1 %v14808_v32 }
 0x30d   : > { %2869 = vmatprep.subr.bf16.mxu0 %v14887_v29  ;;  %2922 = vmatprep.subr.bf16.mxu1 %v14813_v3 }
 0x30e   : > { %12438 = vmatprep.mubr.msk.bf16.mxu0 %vm602_vm0, %v13572_v59  ;;  %12441 = vmatprep.mubr.msk.bf16.mxu1 %vm602_vm0, %v13572_v59 }
 0x310   : > { %2870 = vmatpush1.bf16.msra.mxu0 %v14916_v61  ;;  %2923 = vmatpush1.bf16.msra.mxu1 %v14842_v28 }
 0x311   : > { %2871 = vmatprep.subr.bf16.mxu0 %v14936_v26  ;;  %2924 = vmatprep.subr.bf16.mxu1 %v14877_v63 }
 0x314   : > { %2872 = vmatpush1.bf16.msra.mxu0 %v14934_v45  ;;  %2925 = vmatpush1.bf16.msra.mxu1 %v14875_v16 }
 0x315   : > { %2873 = vmatprep.subr.bf16.mxu0 %v14947_v44  ;;  %2926 = vmatprep.subr.bf16.mxu1 %v14885_v9 }
 0x318   : > { %2874 = vmatpush1.bf16.msra.mxu0 %v14965_v6  ;;  %2927 = vmatpush1.bf16.msra.mxu1 %v14914_v17 }
 0x319   : > { %2875 = vmatprep.subr.bf16.mxu0 %v14983_v12  ;;  %2928 = vmatprep.subr.bf16.mxu1 %v14940_v33 }
 0x31c   : > { %2876 = vmatpush1.bf16.msra.mxu0 %v14981_v52  ;;  %2929 = vmatpush1.bf16.msra.mxu1 %v14938_v8 }
 0x31d   : > { %2877 = vmatprep.subr.bf16.mxu0 %v14989_v34  ;;  %2930 = vmatprep.subr.bf16.mxu1 %v14950_v40 }
 0x320   : > { %2878 = vmatpush1.bf16.msra.mxu0 %v15003_v10  ;;  %2931 = vmatpush1.bf16.msra.mxu1 %v14967_v0 }
 0x321   : > { %12437 = vmatprep.subr.msk.bf16.mxu0 %vm609_vm1, %v20094_v14  ;;  %12440 = vmatprep.subr.msk.bf16.mxu1 %vm609_vm1, %v20092_v49 }
 0x324   : > { %2890 = vmatpush2.bf16.msra.mxu0 %v20095_v38  ;;  %2943 = vmatpush2.bf16.msra.mxu1 %v20093_v54 }
 0x325   : > { %2891 = vmatprep.subr.bf16.mxu0 %v15024_v30  ;;  %2944 = vmatprep.subr.bf16.mxu1 %v15000_v56 }
 0x328   : > { %2892 = vmatpush2.bf16.msra.mxu0 %v15022_v58  ;;  %2945 = vmatpush2.bf16.msra.mxu1 %v14998_v47 }
 0x329   : > { %2893 = vmatprep.subr.bf16.mxu0 %v15028_v25  ;;  %2946 = vmatprep.subr.bf16.mxu1 %v15037_v2 }
 0x32c   : > { %2894 = vmatpush2.bf16.msra.mxu0 %v15040_v39  ;;  %2947 = vmatpush2.bf16.msra.mxu1 %v15035_v22 }
 0x32d   : > { %3082 = vmatprep.subr.bf16.mxu0 %v14806_v4  ;;  %3135 = vmatprep.subr.bf16.mxu1 %v14760_v51 }
 0x32f   : > { %2896 = vmatmul.mubr.bf16.vlgmr.msra.gmra.mxu0 %v13570_v37  ;;  %2949 = vmatmul.mubr.bf16.vlgmr.msra.gmra.mxu1 %v13570_v37 }
 0x330   : > { %3083 = vmatpush1.bf16.msra.mxu0 %v14804_v18  ;;  %3136 = vmatpush1.bf16.msra.mxu1 %v14758_v55 }
 0x331   : > { %3084 = vmatprep.subr.bf16.mxu0 %v14819_v24  ;;  %3137 = vmatprep.subr.bf16.mxu1 %v14768_v42 }
 0x332   : > { %12439 = vmatprep.mubr.msk.bf16.mxu0 %vm602_vm0, %v13573_v27  ;;  %12442 = vmatprep.mubr.msk.bf16.mxu1 %vm602_vm0, %v13573_v27 }
 0x334   : > { %3085 = vmatpush1.bf16.msra.mxu0 %v14846_v20  ;;  %3138 = vmatpush1.bf16.msra.mxu1 %v14782_v35 }
 0x335   : > { %3086 = vmatprep.subr.bf16.mxu0 %v14873_v57  ;;  %3139 = vmatprep.subr.bf16.mxu1 %v14810_v53 }
 0x337   : > { %2906 = vmatmul.mubr.bf16.gmra.mxu0 %v13575_v15  ;;  %2959 = vmatmul.mubr.bf16.gmra.mxu1 %v13575_v15 }
 0x338   : > { %3087 = vmatpush1.bf16.msra.mxu0 %v14871_v23  ;;  %3140 = vmatpush1.bf16.msra.mxu1 %v14808_v32 }
 0x339   : > { %3088 = vmatprep.subr.bf16.mxu0 %v14887_v29  ;;  %3141 = vmatprep.subr.bf16.mxu1 %v14813_v3 }
 0x33a   : > { %12452 = vmatprep.mubr.msk.bf16.mxu0 %vm602_vm0, %v13578_v1  ;;  %12455 = vmatprep.mubr.msk.bf16.mxu1 %vm602_vm0, %v13578_v1 }
 0x33c   : > { %3089 = vmatpush1.bf16.msra.mxu0 %v14916_v61  ;;  %3142 = vmatpush1.bf16.msra.mxu1 %v14842_v28 }
 0x33d   : > { %3090 = vmatprep.subr.bf16.mxu0 %v14936_v26  ;;  %3143 = vmatprep.subr.bf16.mxu1 %v14877_v63 }
 0x340   : > { %3091 = vmatpush1.bf16.msra.mxu0 %v14934_v45  ;;  %3144 = vmatpush1.bf16.msra.mxu1 %v14875_v16 }
 0x341   : > { %3092 = vmatprep.subr.bf16.mxu0 %v14947_v44  ;;  %3145 = vmatprep.subr.bf16.mxu1 %v14885_v9 }
 0x344   : > { %3093 = vmatpush1.bf16.msra.mxu0 %v14965_v6  ;;  %3146 = vmatpush1.bf16.msra.mxu1 %v14914_v17 }
 0x345   : > { %3094 = vmatprep.subr.bf16.mxu0 %v14983_v12  ;;  %3147 = vmatprep.subr.bf16.mxu1 %v14940_v33 }
 0x348   : > { %3095 = vmatpush1.bf16.msra.mxu0 %v14981_v52  ;;  %3148 = vmatpush1.bf16.msra.mxu1 %v14938_v8 }
 0x349   : > { %3096 = vmatprep.subr.bf16.mxu0 %v14989_v34  ;;  %3149 = vmatprep.subr.bf16.mxu1 %v14950_v40 }
 0x34c   : > { %3097 = vmatpush1.bf16.msra.mxu0 %v15003_v10  ;;  %3150 = vmatpush1.bf16.msra.mxu1 %v14967_v0 }
 0x34d   : > { %12451 = vmatprep.subr.msk.bf16.mxu0 %vm609_vm1, %v20094_v14  ;;  %12454 = vmatprep.subr.msk.bf16.mxu1 %vm609_vm1, %v20092_v49 }
 0x350   : > { %3109 = vmatpush2.bf16.msra.mxu0 %v20095_v38  ;;  %3162 = vmatpush2.bf16.msra.mxu1 %v20093_v54 }
 0x351   : > { %3110 = vmatprep.subr.bf16.mxu0 %v15024_v30  ;;  %3163 = vmatprep.subr.bf16.mxu1 %v15000_v56 }
 0x354   : > { %3111 = vmatpush2.bf16.msra.mxu0 %v15022_v58  ;;  %3164 = vmatpush2.bf16.msra.mxu1 %v14998_v47 }
 0x355   : > { %3112 = vmatprep.subr.bf16.mxu0 %v15028_v25  ;;  %3165 = vmatprep.subr.bf16.mxu1 %v15037_v2 }
 0x358   : > { %3113 = vmatpush2.bf16.msra.mxu0 %v15040_v39  ;;  %3166 = vmatpush2.bf16.msra.mxu1 %v15035_v22 }
 0x359   : > { %3301 = vmatprep.subr.bf16.mxu0 %v14806_v4  ;;  %3354 = vmatprep.subr.bf16.mxu1 %v14760_v51 }
 0x35b   : > { %3115 = vmatmul.mubr.bf16.vlgmr.msra.gmra.mxu0 %v13576_v5  ;;  %3168 = vmatmul.mubr.bf16.vlgmr.msra.gmra.mxu1 %v13576_v5 }
 0x35c   : > { %3302 = vmatpush1.bf16.msra.mxu0 %v14804_v18  ;;  %3355 = vmatpush1.bf16.msra.mxu1 %v14758_v55 }
 0x35d   : > { %3303 = vmatprep.subr.bf16.mxu0 %v14819_v24  ;;  %3356 = vmatprep.subr.bf16.mxu1 %v14768_v42 }
 0x35e   : > { %12453 = vmatprep.mubr.msk.bf16.mxu0 %vm602_vm0, %v13579_v21  ;;  %12456 = vmatprep.mubr.msk.bf16.mxu1 %vm602_vm0, %v13579_v21  ;;  %v15360_v21 = vpop.permute.xlu0 %2814 }
 0x360   : > { %3304 = vmatpush1.bf16.msra.mxu0 %v14846_v20  ;;  %3357 = vmatpush1.bf16.msra.mxu1 %v14782_v35 }
 0x361   : > { %3305 = vmatprep.subr.bf16.mxu0 %v14873_v57  ;;  %3358 = vmatprep.subr.bf16.mxu1 %v14810_v53 }
 0x363   : > { %3125 = vmatmul.mubr.bf16.gmra.mxu0 %v13581_v60  ;;  %3178 = vmatmul.mubr.bf16.gmra.mxu1 %v13581_v60 }
 0x364   : > { %3306 = vmatpush1.bf16.msra.mxu0 %v14871_v23  ;;  %3359 = vmatpush1.bf16.msra.mxu1 %v14808_v32 }
 0x365   : > { %3307 = vmatprep.subr.bf16.mxu0 %v14887_v29  ;;  %3360 = vmatprep.subr.bf16.mxu1 %v14813_v3 }
 0x366   : > { %12466 = vmatprep.mubr.msk.bf16.mxu0 %vm602_vm0, %v13584_v41  ;;  %12469 = vmatprep.mubr.msk.bf16.mxu1 %vm602_vm0, %v13584_v41  ;;  %v15362_v41 = vpop.permute.xlu1 %2819 }
 0x368   : > { %3308 = vmatpush1.bf16.msra.mxu0 %v14916_v61  ;;  %3361 = vmatpush1.bf16.msra.mxu1 %v14842_v28 }
 0x369   : > { %3309 = vmatprep.subr.bf16.mxu0 %v14936_v26  ;;  %3362 = vmatprep.subr.bf16.mxu1 %v14877_v63 }
 0x36c   : > { %3310 = vmatpush1.bf16.msra.mxu0 %v14934_v45  ;;  %3363 = vmatpush1.bf16.msra.mxu1 %v14875_v16 }
 0x36d   : > { %3311 = vmatprep.subr.bf16.mxu0 %v14947_v44  ;;  %3364 = vmatprep.subr.bf16.mxu1 %v14885_v9 }
 0x370   : > { %3312 = vmatpush1.bf16.msra.mxu0 %v14965_v6  ;;  %3365 = vmatpush1.bf16.msra.mxu1 %v14914_v17 }
 0x371   : > { %3313 = vmatprep.subr.bf16.mxu0 %v14983_v12  ;;  %3366 = vmatprep.subr.bf16.mxu1 %v14940_v33 }
 0x374   : > { %3314 = vmatpush1.bf16.msra.mxu0 %v14981_v52  ;;  %3367 = vmatpush1.bf16.msra.mxu1 %v14938_v8 }
 0x375   : > { %3315 = vmatprep.subr.bf16.mxu0 %v14989_v34  ;;  %3368 = vmatprep.subr.bf16.mxu1 %v14950_v40 }
 0x378   : > { %3316 = vmatpush1.bf16.msra.mxu0 %v15003_v10  ;;  %3369 = vmatpush1.bf16.msra.mxu1 %v14967_v0 }
 0x379   : > { %12465 = vmatprep.subr.msk.bf16.mxu0 %vm609_vm1, %v20094_v14  ;;  %12468 = vmatprep.subr.msk.bf16.mxu1 %vm609_vm1, %v20092_v49 }
 0x37c   : > { %3328 = vmatpush2.bf16.msra.mxu0 %v20095_v38  ;;  %3381 = vmatpush2.bf16.msra.mxu1 %v20093_v54 }
 0x37d   : > { %3329 = vmatprep.subr.bf16.mxu0 %v15024_v30  ;;  %3382 = vmatprep.subr.bf16.mxu1 %v15000_v56 }
 0x380   : > { %3330 = vmatpush2.bf16.msra.mxu0 %v15022_v58  ;;  %3383 = vmatpush2.bf16.msra.mxu1 %v14998_v47 }
 0x381   : > { %3331 = vmatprep.subr.bf16.mxu0 %v15028_v25  ;;  %3384 = vmatprep.subr.bf16.mxu1 %v15037_v2 }
 0x384   : > { %3332 = vmatpush2.bf16.msra.mxu0 %v15040_v39  ;;  %3385 = vmatpush2.bf16.msra.mxu1 %v15035_v22 }
 0x385   : > { %3520 = vmatprep.subr.bf16.mxu0 %v14806_v4  ;;  %3573 = vmatprep.subr.bf16.mxu1 %v14760_v51  ;;  %v13587_v51 = vld [vmem:[%s19978_s1 + $0x110] ss:$8 sps:$4 sm:$0xff]  }
 0x387   : > { %3334 = vmatmul.mubr.bf16.vlgmr.msra.gmra.mxu0 %v13582_v11  ;;  %3387 = vmatmul.mubr.bf16.vlgmr.msra.gmra.mxu1 %v13582_v11 }
 0x388   : > { %3521 = vmatpush1.bf16.msra.mxu0 %v14804_v18  ;;  %3574 = vmatpush1.bf16.msra.mxu1 %v14758_v55  ;;  %v13590_v55 = vld [vmem:[%s19978_s1 + $0x124] ss:$8 sps:$4 sm:$0xff]  }
 0x389   : > { %3522 = vmatprep.subr.bf16.mxu0 %v14819_v24  ;;  %3575 = vmatprep.subr.bf16.mxu1 %v14768_v42  ;;  %v13588_v42 = vld [vmem:[%s19978_s1 + $0x120] ss:$8 sps:$4 sm:$0xff]  }
 0x38a   : > { %12467 = vmatprep.mubr.msk.bf16.mxu0 %vm602_vm0, %v13585_v62  ;;  %12470 = vmatprep.mubr.msk.bf16.mxu1 %vm602_vm0, %v13585_v62 }
 0x38c   : > { %3523 = vmatpush1.bf16.msra.mxu0 %v14846_v20  ;;  %3576 = vmatpush1.bf16.msra.mxu1 %v14782_v35  ;;  %v13593_v35 = vld [vmem:[%s19978_s1 + $0x130] ss:$8 sps:$4 sm:$0xff]  }
 0x38d   : > { %3524 = vmatprep.subr.bf16.mxu0 %v14873_v57  ;;  %3577 = vmatprep.subr.bf16.mxu1 %v14810_v53 }
 0x38f   : > { %3344 = vmatmul.mubr.bf16.gmra.mxu0 %v13587_v51  ;;  %3397 = vmatmul.mubr.bf16.gmra.mxu1 %v13587_v51  ;;  %v15366_v51 = vpop.permute.xlu0 %2804 }
 0x390   : > { %3525 = vmatpush1.bf16.msra.mxu0 %v14871_v23  ;;  %3578 = vmatpush1.bf16.msra.mxu1 %v14808_v32 }
 0x391   : > { %3526 = vmatprep.subr.bf16.mxu0 %v14887_v29  ;;  %3579 = vmatprep.subr.bf16.mxu1 %v14813_v3 }
 0x392   : > { %12480 = vmatprep.mubr.msk.bf16.mxu0 %vm602_vm0, %v13590_v55  ;;  %12483 = vmatprep.mubr.msk.bf16.mxu1 %vm602_vm0, %v13590_v55 }
 0x394   : > { %3527 = vmatpush1.bf16.msra.mxu0 %v14916_v61  ;;  %3580 = vmatpush1.bf16.msra.mxu1 %v14842_v28 }
 0x395   : > { %3528 = vmatprep.subr.bf16.mxu0 %v14936_v26  ;;  %3581 = vmatprep.subr.bf16.mxu1 %v14877_v63 }
 0x398   : > { %3529 = vmatpush1.bf16.msra.mxu0 %v14934_v45  ;;  %3582 = vmatpush1.bf16.msra.mxu1 %v14875_v16 }
 0x399   : > { %3530 = vmatprep.subr.bf16.mxu0 %v14947_v44  ;;  %3583 = vmatprep.subr.bf16.mxu1 %v14885_v9 }
 0x39c   : > { %3531 = vmatpush1.bf16.msra.mxu0 %v14965_v6  ;;  %3584 = vmatpush1.bf16.msra.mxu1 %v14914_v17 }
 0x39d   : > { %3532 = vmatprep.subr.bf16.mxu0 %v14983_v12  ;;  %3585 = vmatprep.subr.bf16.mxu1 %v14940_v33 }
 0x3a0   : > { %3533 = vmatpush1.bf16.msra.mxu0 %v14981_v52  ;;  %3586 = vmatpush1.bf16.msra.mxu1 %v14938_v8 }
 0x3a1   : > { %3534 = vmatprep.subr.bf16.mxu0 %v14989_v34  ;;  %3587 = vmatprep.subr.bf16.mxu1 %v14950_v40 }
 0x3a4   : > { %3535 = vmatpush1.bf16.msra.mxu0 %v15003_v10  ;;  %3588 = vmatpush1.bf16.msra.mxu1 %v14967_v0 }
 0x3a5   : > { %12479 = vmatprep.subr.msk.bf16.mxu0 %vm609_vm1, %v20094_v14  ;;  %12482 = vmatprep.subr.msk.bf16.mxu1 %vm609_vm1, %v20092_v49 }
 0x3a8   : > { %3547 = vmatpush2.bf16.msra.mxu0 %v20095_v38  ;;  %3600 = vmatpush2.bf16.msra.mxu1 %v20093_v54 }
 0x3a9   : > { %3548 = vmatprep.subr.bf16.mxu0 %v15024_v30  ;;  %3601 = vmatprep.subr.bf16.mxu1 %v15000_v56  ;;  %v13591_v30 = vld [vmem:[%s19978_s1 + $0x134] ss:$8 sps:$4 sm:$0xff]  }
 0x3ac   : > { %3549 = vmatpush2.bf16.msra.mxu0 %v15022_v58  ;;  %3602 = vmatpush2.bf16.msra.mxu1 %v14998_v47 }
 0x3ad   : > { %3550 = vmatprep.subr.bf16.mxu0 %v15028_v25  ;;  %3603 = vmatprep.subr.bf16.mxu1 %v15037_v2 }
 0x3b0   : > { %3551 = vmatpush2.bf16.msra.mxu0 %v15040_v39  ;;  %3604 = vmatpush2.bf16.msra.mxu1 %v15035_v22 }
 0x3b3   : > { %3553 = vmatmul.mubr.bf16.vlgmr.msra.gmra.mxu0 %v13588_v42  ;;  %3606 = vmatmul.mubr.bf16.vlgmr.msra.gmra.mxu1 %v13588_v42 }
 0x3b4   : > { %12481 = vmatprep.mubr.msk.bf16.mxu0 %vm602_vm0, %v13591_v30  ;;  %12484 = vmatprep.mubr.msk.bf16.mxu1 %vm602_vm0, %v13591_v30  ;;  %v15369_v30 = vpop.permute.xlu1 %2809 }
 0x3bb   : > { %3563 = vmatmul.mubr.bf16.gmra.mxu0 %v13593_v35  ;;  %3616 = vmatmul.mubr.bf16.gmra.mxu1 %v13593_v35  ;;  %v15373_v35 = vpop.permute.xlu0 %4278 }
 0x3bc   : > { %20098 = vst [vmem:[#allocation11_spill] sm:$0xff] %v15373_v35 }
 0x3c3   : > { %v15304_v18 = vpop.f32.mrf.mxu1  ;;  %v15312_v20 = vpop.f32.mrf.mxu0 }
 0x3c5   : > { %v2789_v4 = vpop.f32.mrf.mxu1  ;;  %v15314_v57 = vpop.f32.mrf.mxu0 }
 0x3c7   : > { %v15306_v32 = vpop.f32.mrf.mxu1  ;;  %v15316_v16 = vpop.f32.mrf.mxu0 }
 0x3c9   : > { %v2792_v53 = vpop.f32.mrf.mxu1  ;;  %v15318_v63 = vpop.f32.mrf.mxu0 }
 0x3cb   : > { %v15308_v3 = vpop.f32.mrf.mxu1  ;;  %v15320_v9 = vpop.f32.mrf.mxu0 }
 0x3cd   : > { %v2797_v24 = vpop.f32.mrf.mxu1  ;;  %v15322_v29 = vpop.f32.mrf.mxu0 }
 0x3ce   : > { %v15376_v24 = vpop.permute.xlu1 %4284 }
 0x3cf   : > { %v15310_v28 = vpop.f32.mrf.mxu1  ;;  %v15324_v17 = vpop.f32.mrf.mxu0  ;;  %20099 = vst [vmem:[#allocation19_spill] sm:$0xff] %v15376_v24 }
 0x3d0   : > { %20096 = vst [vmem:[#allocation20_spill] sm:$0xff] %v15324_v17 }
 0x3d1   : > { %v2800_v23 = vpop.f32.mrf.mxu1  ;;  %v15326_v61 = vpop.f32.mrf.mxu0 }
 0x3d2   : > { %20097 = vst [vmem:[#allocation8_spill] sm:$0xff] %v15326_v61 }
 0x3ef   : > { %v2897_v45 = vpop.f32.mrf.mxu0  ;;  %v2950_v26 = vpop.f32.mrf.mxu1 }
 0x3f0   : > { %2985 = vrot.lane.b32.xlu0 %v2897_v45, %s13726_s25 }
 0x3f1   : > { %v2899_v8 = vpop.f32.mrf.mxu0  ;;  %v2952_v33 = vpop.f32.mrf.mxu1 }
 0x3f2   : > { %2987 = vrot.lane.b32.xlu1 %v2899_v8, %s13726_s25 }
 0x3f3   : > { %v2901_v44 = vpop.f32.mrf.mxu0  ;;  %v2954_v40 = vpop.f32.mrf.mxu1 }
 0x3f4   : > { %2989 = vrot.lane.b32.xlu0 %v2950_v26, %s13726_s25  ;;  %v15380_v26 = vpop.permute.xlu0 %4266 }
 0x3f5   : > { %v2903_v6 = vpop.f32.mrf.mxu0  ;;  %v2956_v52 = vpop.f32.mrf.mxu1  ;;  %20100 = vst [vmem:[#allocation24_spill] sm:$0xff] %v15380_v26 }
 0x3f6   : > { %2991 = vrot.lane.b32.xlu1 %v2952_v33, %s13726_s25 }
 0x3f7   : > { %v2907_v0 = vpop.f32.mrf.mxu0  ;;  %v2960_v34 = vpop.f32.mrf.mxu1 }
 0x3f8   : > { %2993 = vrot.lane.b32.xlu0 %v2901_v44, %s13726_s25  ;;  %v15383_v44 = vpop.permute.xlu1 %4272 }
 0x3f9   : > { %v2909_v12 = vpop.f32.mrf.mxu0  ;;  %v2962_v47 = vpop.f32.mrf.mxu1  ;;  %20101 = vst [vmem:[#allocation23_spill] sm:$0xff] %v15383_v44 }
 0x3fa   : > { %2995 = vrot.lane.b32.xlu1 %v2903_v6, %s13726_s25 }
 0x3fb   : > { %v2911_v56 = vpop.f32.mrf.mxu0  ;;  %v2964_v58 = vpop.f32.mrf.mxu1 }
 0x3fc   : > { %2997 = vrot.lane.b32.xlu0 %v2954_v40, %s13726_s25 }
 0x3fd   : > { %v2913_v10 = vpop.f32.mrf.mxu0  ;;  %v2966_v48 = vpop.f32.mrf.mxu1 }
 0x3fe   : > { %2999 = vrot.lane.b32.xlu1 %v2956_v52, %s13726_s25  ;;  %v15390_v52 = vpop.permute.xlu1 %4144 }
 0x3ff   : > { %20103 = vst [vmem:[#allocation22_spill] sm:$0xff] %v15390_v52 }
 0x400   : > { %3001 = vrot.lane.b32.xlu0 %v2907_v0, %s13726_s25  ;;  %v15387_v0 = vpop.permute.xlu0 %4138 }
 0x401   : > { %20102 = vst [vmem:[#allocation10_spill] sm:$0xff] %v15387_v0 }
 0x402   : > { %3003 = vrot.lane.b32.xlu1 %v2909_v12, %s13726_s25 }
 0x404   : > { %3005 = vrot.lane.b32.xlu0 %v2960_v34, %s13726_s25 }
 0x406   : > { %3007 = vrot.lane.b32.xlu1 %v2962_v47, %s13726_s25 }
 0x408   : > { %3009 = vrot.lane.b32.xlu0 %v2911_v56, %s13726_s25 }
 0x40a   : > { %3011 = vrot.lane.b32.xlu1 %v2913_v10, %s13726_s25 }
 0x40c   : > { %3013 = vrot.lane.b32.xlu0 %v2964_v58, %s13726_s25 }
 0x40e   : > { %3015 = vrot.lane.b32.xlu1 %v2966_v48, %s13726_s25 }
 0x41b   : > { %v3116_v25 = vpop.f32.mrf.mxu0  ;;  %v3169_v36 = vpop.f32.mrf.mxu1 }
 0x41c   : > { %3204 = vrot.lane.b32.xlu0 %v3116_v25, %s13727_s26 }
 0x41d   : > { %v3118_v50 = vpop.f32.mrf.mxu0  ;;  %v3171_v43 = vpop.f32.mrf.mxu1 }
 0x41e   : > { %3206 = vrot.lane.b32.xlu1 %v3118_v50, %s13727_s26 }
 0x41f   : > { %v3120_v22 = vpop.f32.mrf.mxu0  ;;  %v3173_v2 = vpop.f32.mrf.mxu1 }
 0x420   : > { %3208 = vrot.lane.b32.xlu0 %v3169_v36, %s13727_s26 }
 0x421   : > { %v3122_v39 = vpop.f32.mrf.mxu0  ;;  %v3175_v19 = vpop.f32.mrf.mxu1 }
 0x422   : > { %3210 = vrot.lane.b32.xlu1 %v3171_v43, %s13727_s26 }
 0x423   : > { %v3126_v31 = vpop.f32.mrf.mxu0  ;;  %v3179_v59 = vpop.f32.mrf.mxu1 }
 0x424   : > { %3212 = vrot.lane.b32.xlu0 %v3120_v22, %s13727_s26 }
 0x425   : > { %v3128_v13 = vpop.f32.mrf.mxu0  ;;  %v3181_v37 = vpop.f32.mrf.mxu1 }
 0x426   : > { %3214 = vrot.lane.b32.xlu1 %v3122_v39, %s13727_s26 }
 0x427   : > { %v3130_v27 = vpop.f32.mrf.mxu0  ;;  %v3183_v1 = vpop.f32.mrf.mxu1 }
 0x428   : > { %3216 = vrot.lane.b32.xlu0 %v3173_v2, %s13727_s26 }
 0x429   : > { %v3132_v15 = vpop.f32.mrf.mxu0  ;;  %v3185_v5 = vpop.f32.mrf.mxu1 }
 0x42a   : > { %3218 = vrot.lane.b32.xlu1 %v3175_v19, %s13727_s26 }
 0x42c   : > { %3220 = vrot.lane.b32.xlu0 %v3126_v31, %s13727_s26 }
 0x42e   : > { %3222 = vrot.lane.b32.xlu1 %v3128_v13, %s13727_s26 }
 0x430   : > { %3224 = vrot.lane.b32.xlu0 %v3179_v59, %s13727_s26 }
 0x432   : > { %3226 = vrot.lane.b32.xlu1 %v3181_v37, %s13727_s26 }
 0x434   : > { %3228 = vrot.lane.b32.xlu0 %v3130_v27, %s13727_s26 }
 0x436   : > { %3230 = vrot.lane.b32.xlu1 %v3132_v15, %s13727_s26 }
 0x438   : > { %3232 = vrot.lane.b32.xlu0 %v3183_v1, %s13727_s26 }
 0x43a   : > { %3234 = vrot.lane.b32.xlu1 %v3185_v5, %s13727_s26 }
 0x447   : > { %v3335_v60 = vpop.f32.mrf.mxu0  ;;  %v3388_v11 = vpop.f32.mrf.mxu1 }
 0x448   : > { %3423 = vrot.lane.b32.xlu0 %v3335_v60, %s13728_s27 }
 0x449   : > { %v3337_v62 = vpop.f32.mrf.mxu0  ;;  %v3390_v55 = vpop.f32.mrf.mxu1 }
 0x44a   : > { %3425 = vrot.lane.b32.xlu1 %v3337_v62, %s13728_s27 }
 0x44b   : > { %v3339_v42 = vpop.f32.mrf.mxu0  ;;  %v3392_v4 = vpop.f32.mrf.mxu1 }
 0x44c   : > { %3427 = vrot.lane.b32.xlu0 %v3388_v11, %s13728_s27 }
 0x44d   : > { %v3341_v53 = vpop.f32.mrf.mxu0  ;;  %v3394_v45 = vpop.f32.mrf.mxu1 }
 0x44e   : > { %3429 = vrot.lane.b32.xlu1 %v3390_v55, %s13728_s27 }
 0x44f   : > { %v3345_v23 = vpop.f32.mrf.mxu0  ;;  %v3398_v33 = vpop.f32.mrf.mxu1 }
 0x450   : > { %3431 = vrot.lane.b32.xlu0 %v3339_v42, %s13728_s27 }
 0x451   : > { %v3347_v8 = vpop.f32.mrf.mxu0  ;;  %v3400_v40 = vpop.f32.mrf.mxu1 }
 0x452   : > { %3433 = vrot.lane.b32.xlu1 %v3341_v53, %s13728_s27 }
 0x453   : > { %v3349_v6 = vpop.f32.mrf.mxu0  ;;  %v3402_v34 = vpop.f32.mrf.mxu1 }
 0x454   : > { %3435 = vrot.lane.b32.xlu0 %v3392_v4, %s13728_s27 }
 0x455   : > { %v3351_v12 = vpop.f32.mrf.mxu0  ;;  %v3404_v56 = vpop.f32.mrf.mxu1 }
 0x456   : > { %3437 = vrot.lane.b32.xlu1 %v3394_v45, %s13728_s27 }
 0x458   : > { %3439 = vrot.lane.b32.xlu0 %v3345_v23, %s13728_s27 }
 0x45a   : > { %3441 = vrot.lane.b32.xlu1 %v3347_v8, %s13728_s27 }
 0x45c   : > { %3443 = vrot.lane.b32.xlu0 %v3398_v33, %s13728_s27 }
 0x45e   : > { %3445 = vrot.lane.b32.xlu1 %v3400_v40, %s13728_s27 }
 0x460   : > { %3447 = vrot.lane.b32.xlu0 %v3349_v6, %s13728_s27 }
 0x462   : > { %3449 = vrot.lane.b32.xlu1 %v3351_v12, %s13728_s27  ;;  %v15394_v47 = vpop.permute.xlu0 %2985 }
 0x464   : > { %v15396_v10 = vpop.permute.xlu1 %2987  ;;  %3451 = vrot.lane.b32.xlu0 %v3402_v34, %s13728_s27 }
 0x466   : > { %3453 = vrot.lane.b32.xlu1 %v3404_v56, %s13728_s27  ;;  %v15400_v58 = vpop.permute.xlu0 %2989 }
 0x468   : > { %v15402_v48 = vpop.permute.xlu1 %2991 }
 0x46a   : > { %v15404_v25 = vpop.permute.xlu0 %2993 }
 0x46c   : > { %v15406_v36 = vpop.permute.xlu1 %2995 }
 0x46e   : > { %v15408_v50 = vpop.permute.xlu0 %2997 }
 0x470   : > { %v15410_v22 = vpop.permute.xlu1 %2999 }
 0x472   : > { %v15414_v31 = vpop.permute.xlu0 %3001 }
 0x473   : > { %v3554_v43 = vpop.f32.mrf.mxu0  ;;  %v3607_v2 = vpop.f32.mrf.mxu1 }
 0x474   : > { %3642 = vrot.lane.b32.xlu0 %v3554_v43, %s13729_s28  ;;  %v15417_v59 = vpop.permute.xlu1 %3003 }
 0x475   : > { %v3556_v39 = vpop.f32.mrf.mxu0  ;;  %v3609_v19 = vpop.f32.mrf.mxu1 }
 0x476   : > { %3644 = vrot.lane.b32.xlu1 %v3556_v39, %s13729_s28  ;;  %v15421_v15 = vpop.permute.xlu0 %3005 }
 0x477   : > { %v3558_v13 = vpop.f32.mrf.mxu0  ;;  %v3611_v37 = vpop.f32.mrf.mxu1 }
 0x478   : > { %3646 = vrot.lane.b32.xlu0 %v3607_v2, %s13729_s28  ;;  %v15424_v5 = vpop.permute.xlu1 %3007 }
 0x479   : > { %v3560_v27 = vpop.f32.mrf.mxu0  ;;  %v3613_v60 = vpop.f32.mrf.mxu1 }
 0x47a   : > { %3648 = vrot.lane.b32.xlu1 %v3609_v19, %s13729_s28  ;;  %v15428_v55 = vpop.permute.xlu0 %3009 }
 0x47b   : > { %v3564_v1 = vpop.f32.mrf.mxu0  ;;  %v3617_v62 = vpop.f32.mrf.mxu1  ;;  %20104 = vst [vmem:[#allocation18_spill] sm:$0xff] %v15428_v55  ;;  %v3018_v55 = vsel %vm939_vm4, %v15396_v10, %v15400_v58 }
 0x47c   : > { %3650 = vrot.lane.b32.xlu0 %v3558_v13, %s13729_s28  ;;  %v15431_v42 = vpop.permute.xlu1 %3011 }
 0x47d   : > { %v3566_v11 = vpop.f32.mrf.mxu0  ;;  %v3619_v4 = vpop.f32.mrf.mxu1 }
 0x47e   : > { %3652 = vrot.lane.b32.xlu1 %v3560_v27, %s13729_s28  ;;  %v15435_v23 = vpop.permute.xlu0 %3013 }
 0x47f   : > { %v3568_v53 = vpop.f32.mrf.mxu0  ;;  %v3621_v8 = vpop.f32.mrf.mxu1 }
 0x480   : > { %3654 = vrot.lane.b32.xlu0 %v3611_v37, %s13729_s28  ;;  %v15438_v33 = vpop.permute.xlu1 %3015 }
 0x481   : > { %v3570_v45 = vpop.f32.mrf.mxu0  ;;  %v3623_v6 = vpop.f32.mrf.mxu1 }
 0x482   : > { %3656 = vrot.lane.b32.xlu1 %v3613_v60, %s13729_s28 }
 0x484   : > { %3658 = vrot.lane.b32.xlu0 %v3564_v1, %s13729_s28 }
 0x486   : > { %3660 = vrot.lane.b32.xlu1 %v3566_v11, %s13729_s28 }
 0x488   : > { %3662 = vrot.lane.b32.xlu0 %v3617_v62, %s13729_s28 }
 0x48a   : > { %3664 = vrot.lane.b32.xlu1 %v3619_v4, %s13729_s28 }
 0x48c   : > { %3666 = vrot.lane.b32.xlu0 %v3568_v53, %s13729_s28 }
 0x48e   : > { %3668 = vrot.lane.b32.xlu1 %v3570_v45, %s13729_s28  ;;  %v3205_v40 = vpop.permute.xlu0 %3204 }
 0x490   : > { %v3207_v12 = vpop.permute.xlu1 %3206  ;;  %3670 = vrot.lane.b32.xlu0 %v3621_v8, %s13729_s28 }
 0x492   : > { %3672 = vrot.lane.b32.xlu1 %v3623_v6, %s13729_s28  ;;  %v3209_v34 = vpop.permute.xlu0 %3208 }
 0x494   : > { %v3211_v56 = vpop.permute.xlu1 %3210  ;;  %4126 = vrot.lane.b32.xlu0 %v20085_v7, %s13725_s24 }
 0x496   : > { %4132 = vrot.lane.b32.xlu1 %v20085_v7, %s13725_s24  ;;  %v15448_v43 = vpop.permute.xlu0 %3212 }
 0x498   : > { %3998 = vrot.lane.b32.xlu0 %v20085_v7, %s13730_s29  ;;  %v15452_v2 = vpop.permute.xlu1 %3214 }
 0x49a   : > { %4004 = vrot.lane.b32.xlu1 %v20085_v7, %s13730_s29  ;;  %v15458_v39 = vpop.permute.xlu0 %3216 }
 0x49c   : > { %3986 = vrot.lane.b32.xlu0 %v20085_v7, %s13730_s29  ;;  %v15462_v19 = vpop.permute.xlu1 %3218 }
 0x49e   : > { %3992 = vrot.lane.b32.xlu1 %v20085_v7, %s13730_s29  ;;  %v15468_v13 = vpop.permute.xlu0 %3220 }
 0x4a0   : > { %3858 = vrot.lane.b32.xlu0 %v20085_v7, %s13731_s30  ;;  %v15472_v37 = vpop.permute.xlu1 %3222 }
 0x4a2   : > { %3864 = vrot.lane.b32.xlu1 %v20085_v7, %s13731_s30  ;;  %v15474_v27 = vpop.permute.xlu0 %3224 }
 0x4a4   : > { %3846 = vrot.lane.b32.xlu0 %v20085_v7, %s13731_s30  ;;  %v15476_v1 = vpop.permute.xlu1 %3226  ;;  %v3017_v7 = vsel %vm939_vm4, %v15394_v47, %v15396_v10  ;;  %v3019_v47 = vsel %vm939_vm4, %v15400_v58, %v15402_v48  ;;  %v2827_v10 = vadd.f32 %v15369_v30, %v15306_v32  ;;  %v3238_v32 = vsel %vm1159_vm8, %v3209_v34, %v3211_v56 }
 0x4a6   : > { %v15478_v60 = vpop.permute.xlu0 %3228 }
 0x4a7   : > { %20105 = vst [vmem:[#allocation9_spill] sm:$0xff] %v15478_v60  ;;  %v2822_v60 = vadd.f32 %v15366_v51, %v15312_v20 }
 0x4a8   : > { %v15480_v11 = vpop.permute.xlu1 %3230 }
 0x4a9   : > { %20106 = vst [vmem:[#allocation21_spill] sm:$0xff] %v15480_v11  ;;  %v3236_v11 = vsel %vm1159_vm8, %v3205_v40, %v3207_v12  ;;  %v3041_v61 = vadd.f32 %v3017_v7, %v2822_v60  ;;  %v3237_v40 = vsel %vm1159_vm8, %v3207_v12, %v3209_v34  ;;  %v15536_v7 = vadd.f32 %v15360_v21, %v15320_v9 }
 0x4aa   : > { %v15482_v62 = vpop.permute.xlu0 %3232  ;;  %v3022_v9 = vsel %vm939_vm4, %v15408_v50, %v15410_v22  ;;  %v3240_v22 = vsel %vm1159_vm8, %v15452_v2, %v15458_v39 }
 0x4ab   : > { %v3260_v58 = vadd.f32 %v3236_v11, %v3041_v61 }
 0x4ac   : > { %v15484_v4 = vpop.permute.xlu1 %3234 }
 0x4ba   : > { %v3424_v53 = vpop.permute.xlu0 %3423 }
 0x4bc   : > { %v3426_v45 = vpop.permute.xlu1 %3425 }
 0x4be   : > { %v3428_v8 = vpop.permute.xlu0 %3427 }
 0x4bf   : > { %v3456_v12 = vsel %vm1379_vm11, %v3426_v45, %v3428_v8 }
 0x4c0   : > { %v3430_v6 = vpop.permute.xlu1 %3429 }
 0x4c2   : > { %v15486_v38 = vpop.permute.xlu0 %3431 }
 0x4c4   : > { %v15488_v14 = vpop.permute.xlu1 %3433 }
 0x4c6   : > { %v15490_v54 = vpop.permute.xlu0 %3435 }
 0x4c8   : > { %v15492_v49 = vpop.permute.xlu1 %3437 }
 0x4ca   : > { %v15494_v52 = vpop.permute.xlu0 %3439 }
 0x4cc   : > { %v15496_v0 = vpop.permute.xlu1 %3441 }
 0x4ce   : > { %v15498_v26 = vpop.permute.xlu0 %3443 }
 0x4d0   : > { %v15500_v24 = vpop.permute.xlu1 %3445 }
 0x4d2   : > { %v15502_v44 = vpop.permute.xlu0 %3447 }
 0x4d3   : > { %20107 = vst [vmem:[#allocation12_spill] sm:$0xff] %v15502_v44  ;;  %v2824_v44 = vadd.f32 %v15366_v51, %v15304_v18  ;;  %v3455_v18 = vsel %vm1379_vm11, %v3424_v53, %v3426_v45 }
 0x4d4   : > { %v15504_v35 = vpop.permute.xlu1 %3449  ;;  %v3479_v61 = vadd.f32 %v3455_v18, %v3260_v58 }
 0x4d5   : > { %20108 = vst [vmem:[#allocation15_spill] sm:$0xff] %v15504_v35  ;;  %v2823_v35 = vadd.f32 %v15366_v51, %v15314_v57  ;;  %v2826_v57 = vadd.f32 %v15369_v30, %v15318_v63  ;;  %v3043_v60 = vadd.f32 %v3019_v47, %v2824_v44  ;;  %v3021_v63 = vsel %vm939_vm4, %v15406_v36, %v15408_v50 }
 0x4d6   : > { %v15511_v17 = vpop.permute.xlu0 %3451  ;;  %v2830_v44 = vadd.f32 %v15360_v21, %v15308_v3  ;;  %v3046_v50 = vadd.f32 %v3022_v9, %v2827_v10  ;;  %v3239_v10 = vsel %vm1159_vm8, %v15448_v43, %v15452_v2  ;;  %v3458_v43 = vsel %vm1379_vm11, %v15486_v38, %v15488_v14 }
 0x4d7   : > { %20109 = vst [vmem:[#allocation13_spill] sm:$0xff] %v15511_v17  ;;  %v2825_v17 = vadd.f32 %v15369_v30, %v15316_v16  ;;  %v3042_v51 = vadd.f32 %v3018_v55, %v2823_v35  ;;  %v3020_v16 = vsel %vm939_vm4, %v15404_v25, %v15406_v36  ;;  %v2829_v25 = vadd.f32 %v15360_v21, %v15322_v29 }
 0x4d8   : > { %v15524_v20 = vpop.permute.xlu1 %3453  ;;  %v3457_v55 = vsel %vm1379_vm11, %v3428_v8, %v3430_v6  ;;  %v3262_v11 = vadd.f32 %v3238_v32, %v3043_v60  ;;  %v3045_v47 = vadd.f32 %v3021_v63, %v2826_v57  ;;  %v3024_v6 = vsel %vm939_vm4, %v15417_v59, %v15421_v15 }
 0x4d9   : > { %v3261_v30 = vadd.f32 %v3237_v40, %v3042_v51  ;;  %v3044_v56 = vadd.f32 %v3020_v16, %v2825_v17  ;;  %v3023_v17 = vsel %vm939_vm4, %v15414_v31, %v15417_v59  ;;  %v3241_v31 = vsel %vm1159_vm8, %v15458_v39, %v15462_v19 }
 0x4da   : > { %v3481_v40 = vadd.f32 %v3457_v55, %v3262_v11  ;;  %v3264_v60 = vadd.f32 %v3240_v22, %v3045_v47  ;;  %v3459_v59 = vsel %vm1379_vm11, %v15488_v14, %v15490_v54  ;;  %v3025_v63 = vsel %vm939_vm4, %v15421_v15, %v15424_v5  ;;  %v20111_v11 = vld [vmem:[#allocation25_spill] sm:$0xff] }
 0x4db   : > { %v3480_v36 = vadd.f32 %v3456_v12, %v3261_v30  ;;  %v3263_v9 = vadd.f32 %v3239_v10, %v3044_v56  ;;  %v3460_v39 = vsel %vm1379_vm11, %v15490_v54, %v15492_v49  ;;  %v20110_v19 = vmov 0.0  }
 0x4dc   : > { %v3047_v49 = vadd.f32 %v3023_v17, %v15536_v7  ;;  %v3242_v54 = vsel %vm1159_vm8, %v15468_v13, %v15472_v37  ;;  %v3244_v13 = vsel %vm1159_vm8, %v15474_v27, %v15476_v1  ;;  %v3462_v10 = vsel %vm1379_vm11, %v15496_v0, %v15498_v26 }
 0x4de   : > { %v3266_v17 = vadd.f32 %v3242_v54, %v3047_v49  ;;  %v3028_v49 = vsel %vm939_vm4, %v15435_v23, %v15438_v33  ;;  %v20113_v33 = vld [vmem:[#allocation8_spill] sm:$0xff] }
 0x4e6   : > { %v3643_v48 = vpop.permute.xlu0 %3642 }
 0x4e8   : > { %v3645_v35 = vpop.permute.xlu1 %3644 }
 0x4e9   : > { %v3674_v34 = vsel %vm1599_vm13, %v3643_v48, %v3645_v35 }
 0x4ea   : > { %v3698_v53 = vadd.f32 %v3674_v34, %v3479_v61  ;;  %v3647_v45 = vpop.permute.xlu0 %3646  ;;  %v3265_v61 = vadd.f32 %v3241_v31, %v3046_v50  ;;  %v3482_v34 = vadd.f32 %v3458_v43, %v3263_v9  ;;  %v3243_v50 = vsel %vm1159_vm8, %v15472_v37, %v15474_v27 }
 0x4eb   : > { %v3675_v3 = vsel %vm1599_vm13, %v3645_v35, %v3647_v45  ;;  %v3483_v35 = vadd.f32 %v3459_v59, %v3264_v60  ;;  %v3463_v27 = vsel %vm1379_vm11, %v15498_v26, %v15500_v24 }
 0x4ec   : > { %vm3710_vm15 = vcmp.gt.f32.partialorder %v3698_v53, 0.0  ;;  %v3722_v29 = vmul.f32 0.2, %v3698_v53  ;;  %v3699_v21 = vadd.f32 %v3675_v3, %v3480_v36  ;;  %v3649_v8 = vpop.permute.xlu1 %3648  ;;  %v3484_v5 = vadd.f32 %v3460_v39, %v3265_v61 }
 0x4ed   : > { %v3676_v18 = vsel %vm1599_vm13, %v3647_v45, %v3649_v8 }
 0x4ee   : > { %v3734_v57 = vsel %vm3710_vm15, %v3698_v53, %v3722_v29  ;;  %vm3711_vm2 = vcmp.gt.f32.partialorder %v3699_v21, 0.0  ;;  %v3723_v51 = vmul.f32 0.2, %v3699_v21  ;;  %v3700_v58 = vadd.f32 %v3676_v18, %v3481_v40  ;;  %v3651_v48 = vpop.permute.xlu0 %3650  ;;  %v20112_v53 = vld [vmem:[#allocation26_spill] sm:$0xff] }
 0x4ef   : > { %v3746_v16 = vmul.f32 %v14438_v46, %v3734_v57  ;;  %v3048_v29 = vadd.f32 %v3024_v6, %v2829_v25  ;;  %v3461_v18 = vsel %vm1379_vm11, %v15494_v52, %v15496_v0 }
 0x4f0   : > { %v3735_v2 = vsel %vm3711_vm2, %v3699_v21, %v3723_v51  ;;  %vm3712_vm3 = vcmp.gt.f32.partialorder %v3700_v58, 0.0  ;;  %v3724_v32 = vmul.f32 0.2, %v3700_v58  ;;  %v3653_v12 = vpop.permute.xlu1 %3652  ;;  %v3049_v21 = vadd.f32 %v3025_v63, %v2830_v44 }
 0x4f1   : > { %v15586_v30 = vpack.c.bf16 %v3746_v16, %v20110_v19  ;;  %v3677_v38 = vsel %vm1599_vm13, %v3651_v48, %v3653_v12  ;;  %v3747_v36 = vmul.f32 %v20111_v11, %v3735_v2  ;;  %v3267_v37 = vadd.f32 %v3243_v50, %v3048_v29 }
 0x4f2   : > { %v3736_v55 = vsel %vm3712_vm3, %v3700_v58, %v3724_v32  ;;  %v3655_v14 = vpop.permute.xlu0 %3654  ;;  %v3701_v3 = vadd.f32 %v3677_v38, %v3482_v34  ;;  %v3268_v57 = vadd.f32 %v3244_v13, %v3049_v21  ;;  %v3485_v0 = vadd.f32 %v3461_v18, %v3266_v17  ;;  %v20114_v21 = vld [vmem:[#allocation21_spill] sm:$0xff] }
 0x4f3   : > { %v3748_v45 = vmul.f32 %v20112_v53, %v3736_v55  ;;  %v3678_v15 = vsel %vm1599_vm13, %v3653_v12, %v3655_v14  ;;  %4262 = vrot.lane.b32.xlu0 %v15586_v30, %s13724_s23  ;;  %v3486_v51 = vadd.f32 %v3462_v10, %v3267_v37  ;;  %v3027_v50 = vsel %vm939_vm4, %v15431_v42, %v15435_v23  ;;  %v20115_v23 = vld [vmem:[#allocation13_spill] sm:$0xff]  ;;  %v20116_v37 = vld [vmem:[#allocation15_spill] sm:$0xff] }
 0x4f4   : > { %v3702_v56 = vadd.f32 %v3678_v15, %v3483_v35  ;;  %v3657_v47 = vpop.permute.xlu1 %3656  ;;  %v3725_v1 = vmul.f32 0.2, %v3701_v3  ;;  %vm3713_vm15 = vcmp.gt.f32.partialorder %v3701_v3, 0.0  ;;  %v3487_v52 = vadd.f32 %v3463_v27, %v3268_v57  ;;  %v20118_v57 = vld [vmem:[#allocation20_spill] sm:$0xff] }
 0x4f5   : > { %v15601_v22 = vpack.c.bf16 %v3748_v45, %v3747_v36  ;;  %v3679_v40 = vsel %vm1599_vm13, %v3655_v14, %v3657_v47 }
 0x4f6   : > { %v3703_v8 = vadd.f32 %v3679_v40, %v3484_v5  ;;  %v3659_v7 = vpop.permute.xlu0 %3658  ;;  %v3726_v25 = vmul.f32 0.2, %v3702_v56  ;;  %vm3714_vm6 = vcmp.gt.f32.partialorder %v3702_v56, 0.0  ;;  %v3737_v16 = vsel %vm3713_vm15, %v3701_v3, %v3725_v1 }
 0x4f7   : > { %4122 = vrot.lane.b32.xlu0 %v15586_v30, %s13725_s24  ;;  %4264 = vrot.lane.b32.xlu1 %v15601_v22, %s13724_s23  ;;  %v3749_v35 = vmul.f32 %v14438_v46, %v3737_v16  ;;  %v3247_v3 = vsel %vm1159_vm8, %v15482_v62, %v15484_v4  ;;  %v2832_v40 = vadd.f32 %v15362_v41, %v20113_v33 }
 0x4f8   : > { %vm3715_vm5 = vcmp.gt.f32.partialorder %v3703_v8, 0.0  ;;  %v3727_v44 = vmul.f32 0.2, %v3703_v8  ;;  %v3661_v6 = vpop.permute.xlu1 %3660  ;;  %v3738_v24 = vsel %vm3714_vm6, %v3702_v56, %v3726_v25  ;;  %v2833_v56 = vadd.f32 %v15362_v41, %v15310_v28 }
 0x4f9   : > { %v3680_v60 = vsel %vm1599_vm13, %v3659_v7, %v3661_v6  ;;  %v3750_v9 = vmul.f32 %v20111_v11, %v3738_v24  ;;  %v15648_v5 = vpack.c.bf16 %v3749_v35, %v20110_v19  ;;  %v3466_v7 = vsel %vm1379_vm11, %v20115_v23, %v15524_v20  ;;  %v20117_v20 = vld [vmem:[#allocation18_spill] sm:$0xff] }
 0x4fa   : > { %v3739_v58 = vsel %vm3715_vm5, %v3703_v8, %v3727_v44  ;;  %v3663_v48 = vpop.permute.xlu0 %3662  ;;  %v3704_v32 = vadd.f32 %v3680_v60, %v3485_v0  ;;  %v3052_v29 = vadd.f32 %v3028_v49, %v2833_v56  ;;  %v3246_v8 = vsel %vm1159_vm8, %v20114_v21, %v15482_v62  ;;  %v20119_v60 = vld [vmem:[#allocation9_spill] sm:$0xff] }
 0x4fb   : > { %v3681_v31 = vsel %vm1599_vm13, %v3661_v6, %v3663_v48  ;;  %3982 = vrot.lane.b32.xlu0 %v15586_v30, %s13730_s29  ;;  %4124 = vrot.lane.b32.xlu1 %v15601_v22, %s13725_s24  ;;  %v3751_v43 = vmul.f32 %v20112_v53, %v3739_v58  ;;  %v3051_v17 = vadd.f32 %v3027_v50, %v2832_v40 }
 0x4fc   : > { %v3705_v26 = vadd.f32 %v3681_v31, %v3486_v51  ;;  %v3665_v59 = vpop.permute.xlu1 %3664  ;;  %v3728_v38 = vmul.f32 0.2, %v3704_v32  ;;  %vm3716_vm5 = vcmp.gt.f32.partialorder %v3704_v32, 0.0  ;;  %v3271_v13 = vadd.f32 %v3247_v3, %v3052_v29 }
 0x4fd   : > { %v3682_v2 = vsel %vm1599_vm13, %v3663_v48, %v3665_v59  ;;  %v15634_v55 = vpack.c.bf16 %v3751_v43, %v3750_v9  ;;  %v3465_v25 = vsel %vm1379_vm11, %v20116_v37, %v20115_v23  ;;  %v3270_v62 = vadd.f32 %v3246_v8, %v3051_v17 }
 0x4fe   : > { %vm3717_vm2 = vcmp.gt.f32.partialorder %v3705_v26, 0.0  ;;  %v3729_v12 = vmul.f32 0.2, %v3705_v26  ;;  %v3706_v63 = vadd.f32 %v3682_v2, %v3487_v52  ;;  %v3667_v15 = vpop.permute.xlu0 %3666  ;;  %v3740_v47 = vsel %vm3716_vm5, %v3704_v32, %v3728_v38  ;;  %v20120_v52 = vld [vmem:[#allocation12_spill] sm:$0xff] }
 0x4ff   : > { %3842 = vrot.lane.b32.xlu0 %v15586_v30, %s13731_s30  ;;  %3984 = vrot.lane.b32.xlu1 %v15601_v22, %s13730_s29  ;;  %v3752_v4 = vmul.f32 %v14438_v46, %v3740_v47  ;;  %v3490_v6 = vadd.f32 %v3466_v7, %v3271_v13  ;;  %v3026_v18 = vsel %vm939_vm4, %v20117_v20, %v15431_v42 }
 0x500   : > { %v3741_v39 = vsel %vm3717_vm2, %v3705_v26, %v3729_v12  ;;  %vm3718_vm3 = vcmp.gt.f32.partialorder %v3706_v63, 0.0  ;;  %v3730_v61 = vmul.f32 0.2, %v3706_v63  ;;  %v3669_v34 = vpop.permute.xlu1 %3668  ;;  %v2831_v51 = vadd.f32 %v15362_v41, %v20118_v57 }
 0x501   : > { %v3753_v36 = vmul.f32 %v20111_v11, %v3741_v39  ;;  %v13266_v1 = vpack.c.bf16 %v3752_v4, %v20110_v19  ;;  %v3489_v58 = vadd.f32 %v3465_v25, %v3270_v62  ;;  %v3245_v31 = vsel %vm1159_vm8, %v20119_v60, %v20114_v21 }
 0x502   : > { %v3742_v14 = vsel %vm3718_vm3, %v3706_v63, %v3730_v61  ;;  %v3671_v10 = vpop.permute.xlu0 %3670  ;;  %v3050_v0 = vadd.f32 %v3026_v18, %v2831_v51  ;;  %v3464_v24 = vsel %vm1379_vm11, %v20120_v52, %v20116_v37  ;;  %v3683_v41 = vsel %vm1599_vm13, %v3667_v15, %v3669_v34  ;;  %v12548_v15 = vld [vmem:[%s19979_s2 + $0x58] sm:$0xff] }
 0x503   : > { %v3754_v45 = vmul.f32 %v20112_v53, %v3742_v14  ;;  %3844 = vrot.lane.b32.xlu1 %v15601_v22, %s13731_s30  ;;  %4270 = vrot.lane.b32.xlu0 %v15634_v55, %s13724_s23  ;;  %v3684_v27 = vsel %vm1599_vm13, %v3669_v34, %v3671_v10  ;;  %v20121_v34 = vmov 0.0|0.0   ;;  %v20124_v52 = vld [vmem:[#allocation19_spill] sm:$0xff] }
 0x504   : > { %v3673_v28 = vpop.permute.xlu1 %3672  ;;  %v3708_v42 = vadd.f32 %v3684_v27, %v3489_v58  ;;  %v3269_v26 = vadd.f32 %v3245_v31, %v3050_v0  ;;  %v20123_v31 = vld [vmem:[#allocation23_spill] sm:$0xff] }
 0x505   : > { %v15645_v54 = vpack.c.bf16 %v3754_v45, %v3753_v36  ;;  %v3685_v44 = vsel %vm1599_vm13, %v3671_v10, %v3673_v28  ;;  %v13596_v45 = vld [vmem:[%s19978_s1 + $0x144] ss:$8 sps:$4 sm:$0xff]   ;;  %v4291_v0 = vrot.slane %v20123_v31, 4 }
 0x506   : > { %v3709_v48 = vadd.f32 %v3685_v44, %v3490_v6  ;;  %v3488_v16 = vadd.f32 %v3464_v24, %v3269_v26  ;;  %v3732_v43 = vmul.f32 0.2, %v3708_v42  ;;  %vm3720_vm15 = vcmp.gt.f32.partialorder %v3708_v42, 0.0  ;;  %v15743_v36 = vpop.permute.xlu0 %4126  ;;  %12602 = vmatprep.mubr.msk.bf16.mxu0 %vm602_vm0, %v13596_v45  ;;  %12605 = vmatprep.mubr.msk.bf16.mxu1 %vm602_vm0, %v13596_v45  ;;  %v20125_v26 = vld [vmem:[#allocation24_spill] sm:$0xff] }
 0x507   : > { %4268 = vrot.lane.b32.xlu1 %v15648_v5, %s13724_s23  ;;  %4130 = vrot.lane.b32.xlu0 %v15634_v55, %s13725_s24  ;;  %v4297_v24 = vrot.slane %v20124_v52, 4 }
 0x508   : > { %v3733_v59 = vmul.f32 0.2, %v3709_v48  ;;  %vm3721_vm6 = vcmp.gt.f32.partialorder %v3709_v48, 0.0  ;;  %v3707_v2 = vadd.f32 %v3683_v41, %v3488_v16  ;;  %v3744_v12 = vsel %vm3720_vm15, %v3708_v42, %v3732_v43  ;;  %v15764_v49 = vpop.permute.xlu1 %4132  ;;  %v20126_v43 = vld [vmem:[#allocation10_spill] sm:$0xff] }
 0x509   : > { %v3756_v39 = vmul.f32 %v20111_v11, %v3744_v12 }
 0x50a   : > { %v3745_v32 = vsel %vm3721_vm6, %v3709_v48, %v3733_v59  ;;  %v3731_v9 = vmul.f32 0.2, %v3707_v2  ;;  %vm3719_vm2 = vcmp.gt.f32.partialorder %v3707_v2, 0.0  ;;  %v20122_v48 = vld [vmem:[#allocation11_spill] sm:$0xff]  ;;  %v4288_v59 = vrot.slane %v20125_v26, 4 }
 0x50b   : > { %4128 = vrot.lane.b32.xlu1 %v15648_v5, %s13725_s24  ;;  %3990 = vrot.lane.b32.xlu0 %v15634_v55, %s13730_s29  ;;  %v3757_v63 = vmul.f32 %v20112_v53, %v3745_v32  ;;  %v4294_v60 = vrot.slane %v20122_v48, 4  ;;  %v20131_v53 = vld [vmem:[#allocation6_spill] sm:$0xff] }
 0x50c   : > { %v3743_v35 = vsel %vm3719_vm2, %v3707_v2, %v3731_v9  ;;  %v15773_v56 = vpop.permute.xlu1 %4004  ;;  %v4154_v2 = vrot.slane %v20126_v43, 4  ;;  %v20127_v9 = vld [vmem:[#allocation22_spill] sm:$0xff] }
 0x50d   : > { %v13270_v61 = vpack.c.bf16 %v3757_v63, %v3756_v39  ;;  %v3755_v38 = vmul.f32 %v14438_v46, %v3743_v35  ;;  %v4157_v39 = vrot.slane %v20127_v9, 4  ;;  %v4151_v35 = vrot.slane %v15764_v49, 4 }
 0x50f   : > { %3988 = vrot.lane.b32.xlu1 %v15648_v5, %s13730_s29  ;;  %4274 = vrot.lane.b32.xlu0 %v13266_v1, %s13724_s23  ;;  %v13269_v14 = vpack.c.bf16 %v3755_v38, %v20110_v19 }
 0x510   : > { %v15783_v50 = vpop.permute.xlu1 %3992 }
 0x513   : > { %3848 = vrot.lane.b32.xlu1 %v15648_v5, %s13731_s30  ;;  %4134 = vrot.lane.b32.xlu0 %v13266_v1, %s13725_s24 }
 0x514   : > { %v15789_v33 = vpop.permute.xlu1 %3864 }
 0x517   : > { %3994 = vrot.lane.b32.xlu0 %v13266_v1, %s13730_s29  ;;  %4276 = vrot.lane.b32.xlu1 %v15645_v54, %s13724_s23 }
 0x51b   : > { %3854 = vrot.lane.b32.xlu0 %v13266_v1, %s13731_s30  ;;  %4136 = vrot.lane.b32.xlu1 %v15645_v54, %s13725_s24 }
 0x51f   : > { %3996 = vrot.lane.b32.xlu1 %v15645_v54, %s13730_s29  ;;  %4282 = vrot.lane.b32.xlu0 %v13270_v61, %s13724_s23 }
 0x523   : > { %3856 = vrot.lane.b32.xlu1 %v15645_v54, %s13731_s30  ;;  %3850 = vrot.lane.b32.xlu0 %v15634_v55, %s13731_s30 }
 0x527   : > { %4280 = vrot.lane.b32.xlu1 %v13269_v14, %s13724_s23  ;;  %4142 = vrot.lane.b32.xlu0 %v13270_v61, %s13725_s24 }
 0x52b   : > { %3852 = vrot.lane.b32.xlu1 %v20121_v34, %s13731_s30  ;;  %4414 = vrot.lane.b32.xlu0 %v13266_v1, %s13733_s5 }
 0x52f   : > { %4140 = vrot.lane.b32.xlu1 %v13269_v14, %s13725_s24  ;;  %4002 = vrot.lane.b32.xlu0 %v13270_v61, %s13730_s29 }
 0x533   : > { %4416 = vrot.lane.b32.xlu1 %v15645_v54, %s13733_s5  ;;  %4418 = vrot.lane.b32.xlu0 %v20121_v34, %s13733_s5 }
 0x537   : > { %4000 = vrot.lane.b32.xlu1 %v13269_v14, %s13730_s29  ;;  %3862 = vrot.lane.b32.xlu0 %v13270_v61, %s13731_s30 }
 0x53b   : > { %4424 = vrot.lane.b32.xlu1 %v20121_v34, %s13733_s5  ;;  %4402 = vrot.lane.b32.xlu0 %v15586_v30, %s13733_s5  ;;  %v12547_v30 = vld [vmem:[%s19979_s2 + $0x50] sm:$0xff] }
 0x53f   : > { %3860 = vrot.lane.b32.xlu1 %v13269_v14, %s13731_s30  ;;  %4406 = vrot.lane.b32.xlu0 %v20121_v34, %s13733_s5 }
 0x543   : > { %4404 = vrot.lane.b32.xlu1 %v15601_v22, %s13733_s5  ;;  %4422 = vrot.lane.b32.xlu0 %v13270_v61, %s13733_s5  ;;  %v12545_v22 = vld [vmem:[%s19979_s2 + $0x40] sm:$0xff]  ;;  %v4148_v61 = vrot.slane %v15743_v36, 4 }
 0x547   : > { %4408 = vrot.lane.b32.xlu1 %v15648_v5, %s13733_s5  ;;  %4410 = vrot.lane.b32.xlu0 %v15634_v55, %s13733_s5  ;;  %v15757_v55 = vpop.permute.xlu0 %3998  ;;  %v12546_v5 = vld [vmem:[%s19979_s2 + $0x48] sm:$0xff] }
 0x54b   : > { %4420 = vrot.lane.b32.xlu1 %v13269_v14, %s13733_s5  ;;  %4882 = vperm.xlu0 %13528, %v12547_v30   ;;  %v15766_v54 = vpop.permute.xlu0 %3986 }
 0x54f   : > { %4412 = vrot.lane.b32.xlu1 %v20121_v34, %s13733_s5  ;;  %4872 = vperm.xlu0 %13528, %v12545_v22   ;;  %v15777_v47 = vpop.permute.xlu0 %3858 }
 0x553   : > { %4887 = vperm.xlu1 %13529, %v12548_v15   ;;  %6346 = vrot.lane.b32.xlu0 %v20121_v34, %s13724_s23  ;;  %v15785_v3 = vpop.permute.xlu0 %3846 }
 0x557   : > { %4877 = vperm.xlu1 %13529, %v12546_v5   ;;  %6334 = vrot.lane.b32.xlu0 %v20121_v34, %s13724_s23 }
 0x55b   : > { %6352 = vrot.lane.b32.xlu1 %v20121_v34, %s13724_s23  ;;  %6206 = vrot.lane.b32.xlu0 %v20121_v34, %s13725_s24 }
 0x55f   : > { %6340 = vrot.lane.b32.xlu1 %v20121_v34, %s13724_s23 }
 0x563   : > { %6212 = vrot.lane.b32.xlu1 %v20121_v34, %s13725_s24 }
 0x565   : > { %v15793_v40 = vpop.permute.xlu0 %4262 }
 0x566   : > { %v4286_v38 = vrot.slane %v15793_v40, 4 }
 0x569   : > { %v4265_v29 = vpop.permute.xlu1 %4264  ;;  %v15795_v28 = vpop.permute.xlu0 %4122 }
 0x56a   : > { %v4287_v42 = vrot.slane %v4265_v29, 4 }
 0x56c   : > { %v4300_v14 = vsel %vm609_vm1, %v4287_v42, %v4288_v59  ;;  %v4298_v31 = vsel %vm609_vm1, %v4286_v38, %v4287_v42 }
 0x56d   : > { %v15797_v21 = vpop.permute.xlu1 %4124  ;;  %v15799_v8 = vpop.permute.xlu0 %3982  ;;  %v4299_v9 = vsel %vm2229_vm7, %v15793_v40, %v4298_v31 }
 0x56e   : > { %v4147_v15 = vrot.slane %v15797_v21, 4 }
 0x571   : > { %v15801_v23 = vpop.permute.xlu1 %3984  ;;  %v15803_v7 = vpop.permute.xlu0 %3842 }
 0x575   : > { %v15805_v4 = vpop.permute.xlu1 %3844  ;;  %v4271_v17 = vpop.permute.xlu0 %4270 }
 0x576   : > { %v4290_v51 = vrot.slane %v4271_v17, 4 }
 0x578   : > { %v4304_v32 = vsel %vm609_vm1, %v4290_v51, %v4291_v0 }
 0x579   : > { %v15807_v13 = vpop.permute.xlu1 %4268  ;;  %v15809_v10 = vpop.permute.xlu0 %4130  ;;  %v4305_v5 = vsel %vm2229_vm7, %v4271_v17, %v4304_v32  ;;  %v4017_v17 = vrot.slane %v15773_v56, 4 }
 0x57a   : > { %v4289_v30 = vrot.slane %v15807_v13, 4  ;;  %v4150_v45 = vrot.slane %v15809_v10, 4 }
 0x57c   : > { %v4302_v42 = vsel %vm609_vm1, %v4289_v30, %v4290_v51  ;;  %v4164_v32 = vsel %vm609_vm1, %v4150_v45, %v4151_v35 }
 0x57d   : > { %v15811_v37 = vpop.permute.xlu1 %4128  ;;  %v15813_v25 = vpop.permute.xlu0 %3990  ;;  %v4165_v40 = vsel %vm2088_vm9, %v15809_v10, %v4164_v32 }
 0x581   : > { %v15815_v44 = vpop.permute.xlu1 %3988  ;;  %v15817_v62 = vpop.permute.xlu0 %4274 }
 0x582   : > { %v4292_v59 = vrot.slane %v15817_v62, 4 }
 0x585   : > { %v15819_v6 = vpop.permute.xlu1 %3848  ;;  %v15821_v20 = vpop.permute.xlu0 %4134 }
 0x589   : > { %v4277_v18 = vpop.permute.xlu1 %4276  ;;  %v15823_v27 = vpop.permute.xlu0 %3994 }
 0x58a   : > { %v4293_v58 = vrot.slane %v4277_v18, 4 }
 0x58c   : > { %v4308_v12 = vsel %vm609_vm1, %v4293_v58, %v4294_v60  ;;  %v4306_v38 = vsel %vm609_vm1, %v4292_v59, %v4293_v58  ;;  %v4149_v58 = vrot.slane %v15811_v37, 4 }
 0x58d   : > { %v15825_v1 = vpop.permute.xlu1 %4136  ;;  %v15827_v57 = vpop.permute.xlu0 %3854  ;;  %v4309_v48 = vsel %vm2229_vm7, %v4277_v18, %v4308_v12  ;;  %v4301_v18 = vsel %vm2229_vm7, %v4265_v29, %v4300_v14  ;;  %v4011_v12 = vrot.slane %v15783_v50, 4  ;;  %v4007_v14 = vrot.slane %v15801_v23, 4 }
 0x58e   : > { %v4153_v0 = vrot.slane %v15825_v1, 4  ;;  %v15865_v43 = vcombine.high %v4301_v18, %v4305_v5  ;;  %v15879_v50 = vcombine.low %v4301_v18, %v4305_v5 }
 0x590   : > { %v4168_v51 = vsel %vm609_vm1, %v4153_v0, %v4154_v2 }
 0x591   : > { %v15833_v41 = vpop.permute.xlu1 %3996  ;;  %v4283_v16 = vpop.permute.xlu0 %4282  ;;  %v4169_v5 = vsel %vm2088_vm9, %v15825_v1, %v4168_v51  ;;  %v4146_v1 = vrot.slane %v15795_v28, 4 }
 0x592   : > { %v4296_v63 = vrot.slane %v4283_v16, 4  ;;  %v4013_v31 = vrot.slane %v15833_v41, 4 }
 0x594   : > { %v4312_v22 = vsel %vm609_vm1, %v4296_v63, %v4297_v24  ;;  %v4014_v24 = vrot.slane %v15757_v55, 4  ;;  %v4160_v55 = vsel %vm609_vm1, %v4147_v15, %v4148_v61  ;;  %v4303_v61 = vsel %vm2229_vm7, %v15807_v13, %v4302_v42 }
 0x595   : > { %v4313_v36 = vsel %vm2229_vm7, %v4283_v16, %v4312_v22  ;;  %v15850_v60 = vpop.permute.xlu1 %3856  ;;  %v15852_v49 = vpop.permute.xlu0 %3850  ;;  %v4008_v16 = vrot.slane %v15766_v54, 4  ;;  %v4010_v22 = vrot.slane %v15813_v25, 4  ;;  %v4161_v32 = vsel %vm2088_vm9, %v15797_v21, %v4160_v55 }
 0x596   : > { %v15856_v52 = vcombine.low %v4309_v48, %v4313_v36  ;;  %v15858_v26 = vcombine.high %v4309_v48, %v4313_v36  ;;  %v4307_v48 = vsel %vm2229_vm7, %v15817_v62, %v4306_v38  ;;  %v4152_v38 = vrot.slane %v15821_v20, 4 }
 0x597   : > { %v15916_v51 = vcombine.high %v4161_v32, %v4165_v40  ;;  %v4006_v21 = vrot.slane %v15799_v8, 4  ;;  %v4158_v55 = vsel %vm609_vm1, %v4146_v1, %v4147_v15  ;;  %v3873_v1 = vrot.slane %v15850_v60, 4 }
 0x598   : > { %4821 = vmatprep.subr.bf16.mxu1 %v15858_v26 }
 0x599   : > { %v4281_v29 = vpop.permute.xlu1 %4280  ;;  %4822 = vmatpush1.bf16.msra.mxu1 %v15856_v52  ;;  %v4143_v54 = vpop.permute.xlu0 %4142 }
 0x59a   : > { %v4295_v35 = vrot.slane %v4281_v29, 4  ;;  %v4156_v30 = vrot.slane %v4143_v54, 4  ;;  %4823 = vmatprep.subr.bf16.mxu1 %v15865_v43 }
 0x59c   : > { %v4310_v2 = vsel %vm609_vm1, %v4295_v35, %v4296_v63  ;;  %v4172_v36 = vsel %vm609_vm1, %v4156_v30, %v4157_v39  ;;  %v4162_v35 = vsel %vm609_vm1, %v4149_v58, %v4150_v45  ;;  %v15935_v58 = vcombine.low %v4299_v9, %v4303_v61 }
 0x59d   : > { %v4311_v13 = vsel %vm2229_vm7, %v4281_v29, %v4310_v2  ;;  %v4173_v10 = vsel %vm2088_vm9, %v4143_v54, %v4172_v36  ;;  %v15896_v18 = vpop.permute.xlu1 %3852  ;;  %4824 = vmatpush1.bf16.msra.mxu1 %v15879_v50  ;;  %v15899_v59 = vpop.permute.xlu0 %4414  ;;  %v15912_v29 = vcombine.high %v4299_v9, %v4303_v61  ;;  %v3874_v54 = vrot.slane %v15777_v47, 4 }
 0x59e   : > { %v15901_v62 = vcombine.low %v4307_v48, %v4311_v13  ;;  %v15903_v63 = vcombine.high %v4307_v48, %v4311_v13  ;;  %v15905_v39 = vcombine.low %v4169_v5, %v4173_v10  ;;  %v15907_v42 = vcombine.high %v4169_v5, %v4173_v10 }
 0x59f   : > { %v4024_v48 = vsel %vm609_vm1, %v4010_v22, %v4011_v12  ;;  %v4028_v47 = vsel %vm609_vm1, %v4013_v31, %v4014_v24  ;;  %v4166_v36 = vsel %vm609_vm1, %v4152_v38, %v4153_v0  ;;  %v4020_v12 = vsel %vm609_vm1, %v4007_v14, %v4008_v16 }
 0x5a0   : > { %4768 = vmatprep.subr.bf16.mxu0 %v15903_v63  ;;  %4825 = vmatprep.subr.bf16.mxu1 %v15907_v42  ;;  %v15939_v24 = vcombine.low %v4161_v32, %v4165_v40  ;;  %v4163_v0 = vsel %vm2088_vm9, %v15811_v37, %v4162_v35  ;;  %v4025_v13 = vsel %vm1947_vm10, %v15813_v25, %v4024_v48  ;;  %v4009_v10 = vrot.slane %v15815_v44, 4 }
 0x5a1   : > { %v4141_v2 = vpop.permute.xlu1 %4140  ;;  %4769 = vmatpush1.bf16.msra.mxu0 %v15901_v62  ;;  %4826 = vmatpush1.bf16.msra.mxu1 %v15905_v39  ;;  %v4003_v45 = vpop.permute.xlu0 %4002  ;;  %v4029_v16 = vsel %vm1947_vm10, %v15833_v41, %v4028_v47  ;;  %v4167_v9 = vsel %vm2088_vm9, %v15821_v20, %v4166_v36  ;;  %v3871_v37 = vrot.slane %v15896_v18, 4  ;;  %v4021_v18 = vsel %vm1947_vm10, %v15801_v23, %v4020_v12 }
 0x5a2   : > { %v4155_v5 = vrot.slane %v4141_v2, 4  ;;  %v4016_v15 = vrot.slane %v4003_v45, 4  ;;  %4770 = vmatprep.subr.bf16.mxu0 %v15912_v29  ;;  %4827 = vmatprep.subr.bf16.mxu1 %v15916_v51  ;;  %v3867_v47 = vrot.slane %v15805_v4, 4  ;;  %v4012_v36 = vrot.slane %v15823_v27, 4 }
 0x5a3   : > { %v3868_v12 = vrot.slane %v15785_v3, 4  ;;  %v4018_v3 = vsel %vm609_vm1, %v4006_v21, %v4007_v14 }
 0x5a4   : > { %v4170_v61 = vsel %vm609_vm1, %v4155_v5, %v4156_v30  ;;  %v4032_v40 = vsel %vm609_vm1, %v4016_v15, %v4017_v17  ;;  %v15980_v5 = vcombine.high %v4021_v18, %v4025_v13  ;;  %v4026_v25 = vsel %vm609_vm1, %v4012_v36, %v4013_v31 }
 0x5a5   : > { %v4171_v32 = vsel %vm2088_vm9, %v4141_v2, %v4170_v61  ;;  %v4033_v38 = vsel %vm1947_vm10, %v4003_v45, %v4032_v40  ;;  %v15958_v35 = vpop.permute.xlu1 %4416  ;;  %4771 = vmatpush1.bf16.msra.mxu0 %v15935_v58  ;;  %4828 = vmatpush1.bf16.msra.mxu1 %v15939_v24  ;;  %v15962_v20 = vpop.permute.xlu0 %4418  ;;  %v4159_v2 = vsel %vm2088_vm9, %v15795_v28, %v4158_v55  ;;  %v3877_v28 = vrot.slane %v15789_v33, 4 }
 0x5a6   : > { %v15964_v30 = vcombine.low %v4167_v9, %v4171_v32  ;;  %v15966_v56 = vcombine.high %v4167_v9, %v4171_v32  ;;  %v15968_v17 = vcombine.low %v4029_v16, %v4033_v38  ;;  %v15970_v48 = vcombine.high %v4029_v16, %v4033_v38 }
 0x5a7   : > { %v15978_v45 = vcombine.high %v4159_v2, %v4163_v0  ;;  %v4022_v9 = vsel %vm609_vm1, %v4009_v10, %v4010_v22  ;;  %v3870_v16 = vrot.slane %v15852_v49, 4  ;;  %v3888_v55 = vsel %vm609_vm1, %v3873_v1, %v3874_v54 }
 0x5a8   : > { %4772 = vmatprep.subr.bf16.mxu0 %v15966_v56  ;;  %4829 = vmatprep.subr.bf16.mxu1 %v15970_v48  ;;  %v3880_v41 = vsel %vm609_vm1, %v3867_v47, %v3868_v12  ;;  %v16007_v31 = vcombine.low %v4159_v2, %v4163_v0  ;;  %v16009_v54 = vcombine.low %v4021_v18, %v4025_v13  ;;  %v3869_v12 = vrot.slane %v15819_v6, 4 }
 0x5a9   : > { %v4001_v61 = vpop.permute.xlu1 %4000  ;;  %4773 = vmatpush1.bf16.msra.mxu0 %v15964_v30  ;;  %4830 = vmatpush1.bf16.msra.mxu1 %v15968_v17  ;;  %v3863_v22 = vpop.permute.xlu0 %3862  ;;  %v3884_v33 = vsel %vm609_vm1, %v3870_v16, %v3871_v37  ;;  %v4023_v23 = vsel %vm1947_vm10, %v15815_v44, %v4022_v9  ;;  %v3889_v14 = vsel %vm1806_vm12, %v15850_v60, %v3888_v55  ;;  %v3872_v55 = vrot.slane %v15827_v57, 4 }
 0x5aa   : > { %v4015_v10 = vrot.slane %v4001_v61, 4  ;;  %v3876_v40 = vrot.slane %v3863_v22, 4  ;;  %4774 = vmatprep.subr.bf16.mxu0 %v15978_v45  ;;  %4831 = vmatprep.subr.bf16.mxu1 %v15980_v5  ;;  %v4027_v21 = vsel %vm1947_vm10, %v15823_v27, %v4026_v25  ;;  %v3885_v38 = vsel %vm1806_vm12, %v15852_v49, %v3884_v33 }
 0x5ab   : > { %v3881_v49 = vsel %vm1806_vm12, %v15805_v4, %v3880_v41  ;;  %v4019_v9 = vsel %vm1947_vm10, %v15799_v8, %v4018_v3  ;;  %v3882_v25 = vsel %vm609_vm1, %v3869_v12, %v3870_v16  ;;  %v4434_v33 = vrot.slane %v15962_v20, 4 }
 0x5ac   : > { %v4030_v37 = vsel %vm609_vm1, %v4015_v10, %v4016_v15  ;;  %v3892_v32 = vsel %vm609_vm1, %v3876_v40, %v3877_v28  ;;  %v16040_v28 = vcombine.high %v4019_v9, %v4023_v23  ;;  %v3866_v3 = vrot.slane %v15803_v7, 4 }
 0x5ad   : > { %v4031_v0 = vsel %vm1947_vm10, %v4001_v61, %v4030_v37  ;;  %v3893_v13 = vsel %vm1806_vm12, %v3863_v22, %v3892_v32  ;;  %v4425_v18 = vpop.permute.xlu1 %4424  ;;  %4775 = vmatpush1.bf16.msra.mxu0 %v16007_v31  ;;  %4832 = vmatpush1.bf16.msra.mxu1 %v16009_v54  ;;  %v16025_v44 = vpop.permute.xlu0 %4402  ;;  %v16043_v61 = vcombine.high %v3881_v49, %v3885_v38  ;;  %v4433_v22 = vrot.slane %v15958_v35, 4 }
 0x5ae   : > { %v16027_v2 = vcombine.low %v4027_v21, %v4031_v0  ;;  %v16029_v27 = vcombine.high %v4027_v21, %v4031_v0  ;;  %v16031_v15 = vcombine.low %v3889_v14, %v3893_v13  ;;  %v16033_v36 = vcombine.high %v3889_v14, %v3893_v13 }
 0x5af   : > { %v3886_v14 = vsel %vm609_vm1, %v3872_v55, %v3873_v1  ;;  %v16058_v16 = vcombine.low %v4019_v9, %v4023_v23  ;;  %v16060_v20 = vcombine.low %v3881_v49, %v3885_v38  ;;  %v3878_v21 = vsel %vm609_vm1, %v3866_v3, %v3867_v47 }
 0x5b0   : > { %4776 = vmatprep.subr.bf16.mxu0 %v16029_v27  ;;  %4833 = vmatprep.subr.bf16.mxu1 %v16033_v36  ;;  %v3883_v37 = vsel %vm1806_vm12, %v15819_v6, %v3882_v25  ;;  %v4448_v60 = vsel %vm609_vm1, %v4433_v22, %v4434_v33  ;;  %v3887_v1 = vsel %vm1806_vm12, %v15827_v57, %v3886_v14  ;;  %v4437_v38 = vrot.slane %v4425_v18, 4  ;;  %v20129_v25 = vld [vmem:[#allocation7_spill] sm:$0xff] }
 0x5b1   : > { %v3861_v10 = vpop.permute.xlu1 %3860  ;;  %4777 = vmatpush1.bf16.msra.mxu0 %v16027_v2  ;;  %4834 = vmatpush1.bf16.msra.mxu1 %v16031_v15  ;;  %v4407_v8 = vpop.permute.xlu0 %4406  ;;  %v3879_v57 = vsel %vm1806_vm12, %v15803_v7, %v3878_v21  ;;  %v4449_v18 = vsel %vm2370_vm14, %v15958_v35, %v4448_v60  ;;  %v4432_v35 = vrot.slane %v15899_v59, 4 }
 0x5b2   : > { %v3875_v41 = vrot.slane %v3861_v10, 4  ;;  %4778 = vmatprep.subr.bf16.mxu0 %v16040_v28  ;;  %4835 = vmatprep.subr.bf16.mxu1 %v16043_v61  ;;  %v16082_v49 = vcombine.high %v3879_v57, %v3883_v37  ;;  %v16096_v14 = vcombine.low %v3879_v57, %v3883_v37  ;;  %v20130_v37 = vld [vmem:[#allocation4_spill] sm:$0xff] }
 0x5b3   : > { %v4446_v60 = vsel %vm609_vm1, %v4432_v35, %v4433_v22 }
 0x5b4   : > { %v3890_v32 = vsel %vm609_vm1, %v3875_v41, %v3876_v40  ;;  %v20128_v40 = vld [vmem:[#allocation5_spill] sm:$0xff]  ;;  %v4447_v22 = vsel %vm2370_vm14, %v15899_v59, %v4446_v60 }
 0x5b5   : > { %v3891_v0 = vsel %vm1806_vm12, %v3861_v10, %v3890_v32  ;;  %v4405_v23 = vpop.permute.xlu1 %4404  ;;  %4779 = vmatpush1.bf16.msra.mxu0 %v16058_v16  ;;  %4836 = vmatpush1.bf16.msra.mxu1 %v16060_v20  ;;  %v4423_v4 = vpop.permute.xlu0 %4422 }
 0x5b6   : > { %v16074_v47 = vcombine.low %v3887_v1, %v3891_v0  ;;  %v16076_v13 = vcombine.high %v3887_v1, %v3891_v0  ;;  %v4436_v6 = vrot.slane %v4423_v4, 4  ;;  %12604 = vmatprep.subr.msk.bf16.mxu1 %vm609_vm1, %v20128_v40  ;;  %v4427_v21 = vrot.slane %v4405_v23, 4 }
 0x5b7   : > { %v4426_v1 = vrot.slane %v16025_v44, 4  ;;  %v4428_v0 = vrot.slane %v4407_v8, 4 }
 0x5b8   : > { %v4452_v9 = vsel %vm609_vm1, %v4436_v6, %v4437_v38  ;;  %4780 = vmatprep.subr.bf16.mxu0 %v16076_v13 }
 0x5b9   : > { %v4453_v12 = vsel %vm2370_vm14, %v4423_v4, %v4452_v9  ;;  %v4409_v55 = vpop.permute.xlu1 %4408  ;;  %4781 = vmatpush1.bf16.msra.mxu0 %v16074_v47  ;;  %4848 = vmatpush2.bf16.msra.mxu1 %v20129_v25  ;;  %v4411_v33 = vpop.permute.xlu0 %4410  ;;  %v4438_v57 = vsel %vm609_vm1, %v4426_v1, %v4427_v21  ;;  %v4440_v8 = vsel %vm609_vm1, %v4427_v21, %v4428_v0 }
 0x5ba   : > { %v16091_v10 = vcombine.low %v4449_v18, %v4453_v12  ;;  %v16093_v7 = vcombine.high %v4449_v18, %v4453_v12  ;;  %v4429_v3 = vrot.slane %v4409_v55, 4  ;;  %v4430_v41 = vrot.slane %v4411_v33, 4  ;;  %4782 = vmatprep.subr.bf16.mxu0 %v16082_v49 }
 0x5bb   : > { %v4441_v59 = vsel %vm2370_vm14, %v4405_v23, %v4440_v8  ;;  %v13599_v23 = vld [vmem:[%s19978_s1 + $0x150] ss:$8 sps:$4 sm:$0xff]   ;;  %v13615_v8 = vld [vmem:[%s19978_s1 + $0x1b4] ss:$8 sps:$4 sm:$0xff]  }
 0x5bc   : > { %4849 = vmatprep.subr.bf16.mxu1 %v16093_v7  ;;  %v4442_v4 = vsel %vm609_vm1, %v4429_v3, %v4430_v41 }
 0x5bd   : > { %v4421_v32 = vpop.permute.xlu1 %4420  ;;  %4783 = vmatpush1.bf16.msra.mxu0 %v16096_v14  ;;  %4850 = vmatpush2.bf16.msra.mxu1 %v16091_v10  ;;  %v4443_v18 = vsel %vm2370_vm14, %v4409_v55, %v4442_v4  ;;  %v13603_v4 = vld [vmem:[%s19978_s1 + $0x174] ss:$8 sps:$4 sm:$0xff]  }
 0x5be   : > { %v4435_v38 = vrot.slane %v4421_v32, 4  ;;  %12601 = vmatprep.subr.msk.bf16.mxu0 %vm609_vm1, %v20130_v37 }
 0x5c0   : > { %v4450_v9 = vsel %vm609_vm1, %v4435_v38, %v4436_v6  ;;  %v4439_v6 = vsel %vm2370_vm14, %v16025_v44, %v4438_v57  ;;  %v13597_v44 = vld [vmem:[%s19978_s1 + $0x154] ss:$8 sps:$4 sm:$0xff]   ;;  %v13605_v38 = vld [vmem:[%s19978_s1 + $0x170] ss:$8 sps:$4 sm:$0xff]   ;;  %v13608_v57 = vld [vmem:[%s19978_s1 + $0x184] ss:$8 sps:$4 sm:$0xff]  }
 0x5c1   : > { %v4451_v12 = vsel %vm2370_vm14, %v4421_v32, %v4450_v9  ;;  %v4413_v35 = vpop.permute.xlu1 %4412  ;;  %4795 = vmatpush2.bf16.msra.mxu0 %v20131_v53  ;;  %v16121_v1 = vcombine.high %v4439_v6, %v4443_v18  ;;  %v16133_v0 = vcombine.low %v4439_v6, %v4443_v18  ;;  %v13606_v9 = vld [vmem:[%s19978_s1 + $0x180] ss:$8 sps:$4 sm:$0xff]   ;;  %v13609_v18 = vld [vmem:[%s19978_s1 + $0x194] ss:$8 sps:$4 sm:$0xff]  }
 0x5c2   : > { %v16115_v3 = vcombine.low %v4447_v22, %v4451_v12  ;;  %v16117_v11 = vcombine.high %v4447_v22, %v4451_v12  ;;  %v4431_v19 = vrot.slane %v4413_v35, 4  ;;  %v13611_v22 = vld [vmem:[%s19978_s1 + $0x190] ss:$8 sps:$4 sm:$0xff]   ;;  %v13614_v12 = vld [vmem:[%s19978_s1 + $0x1a4] ss:$8 sps:$4 sm:$0xff]  }
 0x5c3   : > { %v13612_v35 = vld [vmem:[%s19978_s1 + $0x1a0] ss:$8 sps:$4 sm:$0xff]  }
 0x5c4   : > { %v4444_v55 = vsel %vm609_vm1, %v4430_v41, %v4431_v19  ;;  %4796 = vmatprep.subr.bf16.mxu0 %v16117_v11  ;;  %v13594_v19 = vld [vmem:[%s19978_s1 + $0x140] ss:$8 sps:$4 sm:$0xff]  }
 0x5c5   : > { %v4445_v32 = vsel %vm2370_vm14, %v4411_v33, %v4444_v55  ;;  %4797 = vmatpush2.bf16.msra.mxu0 %v16115_v3  ;;  %v13602_v33 = vld [vmem:[%s19978_s1 + $0x164] ss:$8 sps:$4 sm:$0xff]   ;;  %v13600_v41 = vld [vmem:[%s19978_s1 + $0x160] ss:$8 sps:$4 sm:$0xff]  }
 0x5c6   : > { %v16128_v21 = vcombine.low %v4441_v59, %v4445_v32  ;;  %v16130_v60 = vcombine.high %v4441_v59, %v4445_v32  ;;  %4798 = vmatprep.subr.bf16.mxu0 %v16121_v1 }
 0x5c8   : > { %4851 = vmatprep.subr.bf16.mxu1 %v16130_v60 }
 0x5c9   : > { %4799 = vmatpush2.bf16.msra.mxu0 %v16133_v0  ;;  %4852 = vmatpush2.bf16.msra.mxu1 %v16128_v21 }
 0x5ca   : > { %4931 = vmatprep.subr.bf16.mxu0 %v15903_v63  ;;  %4984 = vmatprep.subr.bf16.mxu1 %v15858_v26 }
 0x5cc   : > { %4801 = vmatmul.mubr.bf16.vlgmr.msra.gmra.mxu0 %v13594_v19  ;;  %4854 = vmatmul.mubr.bf16.vlgmr.msra.gmra.mxu1 %v13594_v19 }
 0x5cd   : > { %4932 = vmatpush1.bf16.msra.mxu0 %v15901_v62  ;;  %4985 = vmatpush1.bf16.msra.mxu1 %v15856_v52 }
 0x5ce   : > { %4933 = vmatprep.subr.bf16.mxu0 %v15912_v29  ;;  %4986 = vmatprep.subr.bf16.mxu1 %v15865_v43 }
 0x5cf   : > { %12603 = vmatprep.mubr.msk.bf16.mxu0 %vm602_vm0, %v13597_v44  ;;  %12606 = vmatprep.mubr.msk.bf16.mxu1 %vm602_vm0, %v13597_v44 }
 0x5d1   : > { %4934 = vmatpush1.bf16.msra.mxu0 %v15935_v58  ;;  %4987 = vmatpush1.bf16.msra.mxu1 %v15879_v50 }
 0x5d2   : > { %4935 = vmatprep.subr.bf16.mxu0 %v15966_v56  ;;  %4988 = vmatprep.subr.bf16.mxu1 %v15907_v42 }
 0x5d4   : > { %4811 = vmatmul.mubr.bf16.gmra.mxu0 %v13599_v23  ;;  %4862 = vmatmul.mubr.bf16.gmra.mxu1 %v13599_v23 }
 0x5d5   : > { %4936 = vmatpush1.bf16.msra.mxu0 %v15964_v30  ;;  %4989 = vmatpush1.bf16.msra.mxu1 %v15905_v39 }
 0x5d6   : > { %4937 = vmatprep.subr.bf16.mxu0 %v15978_v45  ;;  %4990 = vmatprep.subr.bf16.mxu1 %v15916_v51 }
 0x5d7   : > { %12616 = vmatprep.mubr.msk.bf16.mxu0 %vm602_vm0, %v13602_v33  ;;  %12619 = vmatprep.mubr.msk.bf16.mxu1 %vm602_vm0, %v13602_v33 }
 0x5d9   : > { %4938 = vmatpush1.bf16.msra.mxu0 %v16007_v31  ;;  %4991 = vmatpush1.bf16.msra.mxu1 %v15939_v24 }
 0x5da   : > { %4939 = vmatprep.subr.bf16.mxu0 %v16029_v27  ;;  %4992 = vmatprep.subr.bf16.mxu1 %v15970_v48 }
 0x5dd   : > { %4940 = vmatpush1.bf16.msra.mxu0 %v16027_v2  ;;  %4993 = vmatpush1.bf16.msra.mxu1 %v15968_v17 }
 0x5de   : > { %4941 = vmatprep.subr.bf16.mxu0 %v16040_v28  ;;  %4994 = vmatprep.subr.bf16.mxu1 %v15980_v5 }
 0x5e1   : > { %4942 = vmatpush1.bf16.msra.mxu0 %v16058_v16  ;;  %4995 = vmatpush1.bf16.msra.mxu1 %v16009_v54 }
 0x5e2   : > { %4943 = vmatprep.subr.bf16.mxu0 %v16076_v13  ;;  %4996 = vmatprep.subr.bf16.mxu1 %v16033_v36 }
 0x5e5   : > { %4944 = vmatpush1.bf16.msra.mxu0 %v16074_v47  ;;  %4997 = vmatpush1.bf16.msra.mxu1 %v16031_v15 }
 0x5e6   : > { %4945 = vmatprep.subr.bf16.mxu0 %v16082_v49  ;;  %4998 = vmatprep.subr.bf16.mxu1 %v16043_v61 }
 0x5e9   : > { %4946 = vmatpush1.bf16.msra.mxu0 %v16096_v14  ;;  %4999 = vmatpush1.bf16.msra.mxu1 %v16060_v20 }
 0x5ea   : > { %12615 = vmatprep.subr.msk.bf16.mxu0 %vm609_vm1, %v20130_v37  ;;  %12618 = vmatprep.subr.msk.bf16.mxu1 %vm609_vm1, %v20128_v40 }
 0x5ed   : > { %4958 = vmatpush2.bf16.msra.mxu0 %v20131_v53  ;;  %5011 = vmatpush2.bf16.msra.mxu1 %v20129_v25 }
 0x5ee   : > { %4959 = vmatprep.subr.bf16.mxu0 %v16117_v11  ;;  %5012 = vmatprep.subr.bf16.mxu1 %v16093_v7 }
 0x5f1   : > { %4960 = vmatpush2.bf16.msra.mxu0 %v16115_v3  ;;  %5013 = vmatpush2.bf16.msra.mxu1 %v16091_v10 }
 0x5f2   : > { %4961 = vmatprep.subr.bf16.mxu0 %v16121_v1  ;;  %5014 = vmatprep.subr.bf16.mxu1 %v16130_v60 }
 0x5f5   : > { %4962 = vmatpush2.bf16.msra.mxu0 %v16133_v0  ;;  %5015 = vmatpush2.bf16.msra.mxu1 %v16128_v21 }
 0x5f6   : > { %5150 = vmatprep.subr.bf16.mxu0 %v15903_v63  ;;  %5203 = vmatprep.subr.bf16.mxu1 %v15858_v26 }
 0x5f8   : > { %4964 = vmatmul.mubr.bf16.vlgmr.msra.gmra.mxu0 %v13600_v41  ;;  %5017 = vmatmul.mubr.bf16.vlgmr.msra.gmra.mxu1 %v13600_v41 }
 0x5f9   : > { %5151 = vmatpush1.bf16.msra.mxu0 %v15901_v62  ;;  %5204 = vmatpush1.bf16.msra.mxu1 %v15856_v52 }
 0x5fa   : > { %5152 = vmatprep.subr.bf16.mxu0 %v15912_v29  ;;  %5205 = vmatprep.subr.bf16.mxu1 %v15865_v43 }
 0x5fb   : > { %12617 = vmatprep.mubr.msk.bf16.mxu0 %vm602_vm0, %v13603_v4  ;;  %12620 = vmatprep.mubr.msk.bf16.mxu1 %vm602_vm0, %v13603_v4 }
 0x5fd   : > { %5153 = vmatpush1.bf16.msra.mxu0 %v15935_v58  ;;  %5206 = vmatpush1.bf16.msra.mxu1 %v15879_v50 }
 0x5fe   : > { %5154 = vmatprep.subr.bf16.mxu0 %v15966_v56  ;;  %5207 = vmatprep.subr.bf16.mxu1 %v15907_v42 }
 0x600   : > { %4974 = vmatmul.mubr.bf16.gmra.mxu0 %v13605_v38  ;;  %5027 = vmatmul.mubr.bf16.gmra.mxu1 %v13605_v38 }
 0x601   : > { %5155 = vmatpush1.bf16.msra.mxu0 %v15964_v30  ;;  %5208 = vmatpush1.bf16.msra.mxu1 %v15905_v39 }
 0x602   : > { %5156 = vmatprep.subr.bf16.mxu0 %v15978_v45  ;;  %5209 = vmatprep.subr.bf16.mxu1 %v15916_v51 }
 0x603   : > { %12630 = vmatprep.mubr.msk.bf16.mxu0 %vm602_vm0, %v13608_v57  ;;  %12633 = vmatprep.mubr.msk.bf16.mxu1 %vm602_vm0, %v13608_v57 }
 0x605   : > { %5157 = vmatpush1.bf16.msra.mxu0 %v16007_v31  ;;  %5210 = vmatpush1.bf16.msra.mxu1 %v15939_v24 }
 0x606   : > { %5158 = vmatprep.subr.bf16.mxu0 %v16029_v27  ;;  %5211 = vmatprep.subr.bf16.mxu1 %v15970_v48 }
 0x609   : > { %5159 = vmatpush1.bf16.msra.mxu0 %v16027_v2  ;;  %5212 = vmatpush1.bf16.msra.mxu1 %v15968_v17 }
 0x60a   : > { %5160 = vmatprep.subr.bf16.mxu0 %v16040_v28  ;;  %5213 = vmatprep.subr.bf16.mxu1 %v15980_v5 }
 0x60d   : > { %5161 = vmatpush1.bf16.msra.mxu0 %v16058_v16  ;;  %5214 = vmatpush1.bf16.msra.mxu1 %v16009_v54 }
 0x60e   : > { %5162 = vmatprep.subr.bf16.mxu0 %v16076_v13  ;;  %5215 = vmatprep.subr.bf16.mxu1 %v16033_v36 }
 0x611   : > { %5163 = vmatpush1.bf16.msra.mxu0 %v16074_v47  ;;  %5216 = vmatpush1.bf16.msra.mxu1 %v16031_v15 }
 0x612   : > { %5164 = vmatprep.subr.bf16.mxu0 %v16082_v49  ;;  %5217 = vmatprep.subr.bf16.mxu1 %v16043_v61 }
 0x615   : > { %5165 = vmatpush1.bf16.msra.mxu0 %v16096_v14  ;;  %5218 = vmatpush1.bf16.msra.mxu1 %v16060_v20 }
 0x616   : > { %12629 = vmatprep.subr.msk.bf16.mxu0 %vm609_vm1, %v20130_v37  ;;  %12632 = vmatprep.subr.msk.bf16.mxu1 %vm609_vm1, %v20128_v40 }
 0x619   : > { %5177 = vmatpush2.bf16.msra.mxu0 %v20131_v53  ;;  %5230 = vmatpush2.bf16.msra.mxu1 %v20129_v25 }
 0x61a   : > { %5178 = vmatprep.subr.bf16.mxu0 %v16117_v11  ;;  %5231 = vmatprep.subr.bf16.mxu1 %v16093_v7 }
 0x61d   : > { %5179 = vmatpush2.bf16.msra.mxu0 %v16115_v3  ;;  %5232 = vmatpush2.bf16.msra.mxu1 %v16091_v10 }
 0x61e   : > { %5180 = vmatprep.subr.bf16.mxu0 %v16121_v1  ;;  %5233 = vmatprep.subr.bf16.mxu1 %v16130_v60 }
 0x621   : > { %5181 = vmatpush2.bf16.msra.mxu0 %v16133_v0  ;;  %5234 = vmatpush2.bf16.msra.mxu1 %v16128_v21 }
 0x622   : > { %5369 = vmatprep.subr.bf16.mxu0 %v15903_v63  ;;  %5422 = vmatprep.subr.bf16.mxu1 %v15858_v26 }
 0x624   : > { %5183 = vmatmul.mubr.bf16.vlgmr.msra.gmra.mxu0 %v13606_v9  ;;  %5236 = vmatmul.mubr.bf16.vlgmr.msra.gmra.mxu1 %v13606_v9 }
 0x625   : > { %5370 = vmatpush1.bf16.msra.mxu0 %v15901_v62  ;;  %5423 = vmatpush1.bf16.msra.mxu1 %v15856_v52 }
 0x626   : > { %5371 = vmatprep.subr.bf16.mxu0 %v15912_v29  ;;  %5424 = vmatprep.subr.bf16.mxu1 %v15865_v43 }
 0x627   : > { %12631 = vmatprep.mubr.msk.bf16.mxu0 %vm602_vm0, %v13609_v18  ;;  %12634 = vmatprep.mubr.msk.bf16.mxu1 %vm602_vm0, %v13609_v18  ;;  %v16453_v18 = vpop.permute.xlu0 %4882 }
 0x629   : > { %5372 = vmatpush1.bf16.msra.mxu0 %v15935_v58  ;;  %5425 = vmatpush1.bf16.msra.mxu1 %v15879_v50 }
 0x62a   : > { %5373 = vmatprep.subr.bf16.mxu0 %v15966_v56  ;;  %5426 = vmatprep.subr.bf16.mxu1 %v15907_v42 }
 0x62c   : > { %5193 = vmatmul.mubr.bf16.gmra.mxu0 %v13611_v22  ;;  %5246 = vmatmul.mubr.bf16.gmra.mxu1 %v13611_v22 }
 0x62d   : > { %5374 = vmatpush1.bf16.msra.mxu0 %v15964_v30  ;;  %5427 = vmatpush1.bf16.msra.mxu1 %v15905_v39 }
 0x62e   : > { %5375 = vmatprep.subr.bf16.mxu0 %v15978_v45  ;;  %5428 = vmatprep.subr.bf16.mxu1 %v15916_v51 }
 0x62f   : > { %12644 = vmatprep.mubr.msk.bf16.mxu0 %vm602_vm0, %v13614_v12  ;;  %12647 = vmatprep.mubr.msk.bf16.mxu1 %vm602_vm0, %v13614_v12  ;;  %v16455_v12 = vpop.permute.xlu1 %4887 }
 0x631   : > { %5376 = vmatpush1.bf16.msra.mxu0 %v16007_v31  ;;  %5429 = vmatpush1.bf16.msra.mxu1 %v15939_v24 }
 0x632   : > { %5377 = vmatprep.subr.bf16.mxu0 %v16029_v27  ;;  %5430 = vmatprep.subr.bf16.mxu1 %v15970_v48 }
 0x635   : > { %5378 = vmatpush1.bf16.msra.mxu0 %v16027_v2  ;;  %5431 = vmatpush1.bf16.msra.mxu1 %v15968_v17 }
 0x636   : > { %5379 = vmatprep.subr.bf16.mxu0 %v16040_v28  ;;  %5432 = vmatprep.subr.bf16.mxu1 %v15980_v5 }
 0x639   : > { %5380 = vmatpush1.bf16.msra.mxu0 %v16058_v16  ;;  %5433 = vmatpush1.bf16.msra.mxu1 %v16009_v54 }
 0x63a   : > { %5381 = vmatprep.subr.bf16.mxu0 %v16076_v13  ;;  %5434 = vmatprep.subr.bf16.mxu1 %v16033_v36 }
 0x63d   : > { %5382 = vmatpush1.bf16.msra.mxu0 %v16074_v47  ;;  %5435 = vmatpush1.bf16.msra.mxu1 %v16031_v15 }
 0x63e   : > { %5383 = vmatprep.subr.bf16.mxu0 %v16082_v49  ;;  %5436 = vmatprep.subr.bf16.mxu1 %v16043_v61 }
 0x641   : > { %5384 = vmatpush1.bf16.msra.mxu0 %v16096_v14  ;;  %5437 = vmatpush1.bf16.msra.mxu1 %v16060_v20 }
 0x642   : > { %12643 = vmatprep.subr.msk.bf16.mxu0 %vm609_vm1, %v20130_v37  ;;  %12646 = vmatprep.subr.msk.bf16.mxu1 %vm609_vm1, %v20128_v40 }
 0x645   : > { %5396 = vmatpush2.bf16.msra.mxu0 %v20131_v53  ;;  %5449 = vmatpush2.bf16.msra.mxu1 %v20129_v25 }
 0x646   : > { %5397 = vmatprep.subr.bf16.mxu0 %v16117_v11  ;;  %5450 = vmatprep.subr.bf16.mxu1 %v16093_v7 }
 0x649   : > { %5398 = vmatpush2.bf16.msra.mxu0 %v16115_v3  ;;  %5451 = vmatpush2.bf16.msra.mxu1 %v16091_v10 }
 0x64a   : > { %5399 = vmatprep.subr.bf16.mxu0 %v16121_v1  ;;  %5452 = vmatprep.subr.bf16.mxu1 %v16130_v60 }
 0x64d   : > { %5400 = vmatpush2.bf16.msra.mxu0 %v16133_v0  ;;  %5453 = vmatpush2.bf16.msra.mxu1 %v16128_v21 }
 0x64e   : > { %5588 = vmatprep.subr.bf16.mxu0 %v15903_v63  ;;  %5641 = vmatprep.subr.bf16.mxu1 %v15858_v26  ;;  %v13617_v26 = vld [vmem:[%s19978_s1 + $0x1b0] ss:$8 sps:$4 sm:$0xff]  }
 0x650   : > { %5402 = vmatmul.mubr.bf16.vlgmr.msra.gmra.mxu0 %v13612_v35  ;;  %5455 = vmatmul.mubr.bf16.vlgmr.msra.gmra.mxu1 %v13612_v35 }
 0x651   : > { %5589 = vmatpush1.bf16.msra.mxu0 %v15901_v62  ;;  %5642 = vmatpush1.bf16.msra.mxu1 %v15856_v52  ;;  %v13620_v52 = vld [vmem:[%s19978_s1 + $0x1c4] ss:$8 sps:$4 sm:$0xff]  }
 0x652   : > { %5590 = vmatprep.subr.bf16.mxu0 %v15912_v29  ;;  %5643 = vmatprep.subr.bf16.mxu1 %v15865_v43  ;;  %v13618_v43 = vld [vmem:[%s19978_s1 + $0x1c0] ss:$8 sps:$4 sm:$0xff]  }
 0x653   : > { %12645 = vmatprep.mubr.msk.bf16.mxu0 %vm602_vm0, %v13615_v8  ;;  %12648 = vmatprep.mubr.msk.bf16.mxu1 %vm602_vm0, %v13615_v8 }
 0x655   : > { %5591 = vmatpush1.bf16.msra.mxu0 %v15935_v58  ;;  %5644 = vmatpush1.bf16.msra.mxu1 %v15879_v50  ;;  %v13623_v50 = vld [vmem:[%s19978_s1 + $0x1d0] ss:$8 sps:$4 sm:$0xff]  }
 0x656   : > { %5592 = vmatprep.subr.bf16.mxu0 %v15966_v56  ;;  %5645 = vmatprep.subr.bf16.mxu1 %v15907_v42 }
 0x658   : > { %5412 = vmatmul.mubr.bf16.gmra.mxu0 %v13617_v26  ;;  %5465 = vmatmul.mubr.bf16.gmra.mxu1 %v13617_v26  ;;  %v16459_v26 = vpop.permute.xlu0 %4872 }
 0x659   : > { %5593 = vmatpush1.bf16.msra.mxu0 %v15964_v30  ;;  %5646 = vmatpush1.bf16.msra.mxu1 %v15905_v39 }
 0x65a   : > { %5594 = vmatprep.subr.bf16.mxu0 %v15978_v45  ;;  %5647 = vmatprep.subr.bf16.mxu1 %v15916_v51 }
 0x65b   : > { %12658 = vmatprep.mubr.msk.bf16.mxu0 %vm602_vm0, %v13620_v52  ;;  %12661 = vmatprep.mubr.msk.bf16.mxu1 %vm602_vm0, %v13620_v52 }
 0x65d   : > { %5595 = vmatpush1.bf16.msra.mxu0 %v16007_v31  ;;  %5648 = vmatpush1.bf16.msra.mxu1 %v15939_v24 }
 0x65e   : > { %5596 = vmatprep.subr.bf16.mxu0 %v16029_v27  ;;  %5649 = vmatprep.subr.bf16.mxu1 %v15970_v48 }
 0x661   : > { %5597 = vmatpush1.bf16.msra.mxu0 %v16027_v2  ;;  %5650 = vmatpush1.bf16.msra.mxu1 %v15968_v17 }
 0x662   : > { %5598 = vmatprep.subr.bf16.mxu0 %v16040_v28  ;;  %5651 = vmatprep.subr.bf16.mxu1 %v15980_v5 }
 0x665   : > { %5599 = vmatpush1.bf16.msra.mxu0 %v16058_v16  ;;  %5652 = vmatpush1.bf16.msra.mxu1 %v16009_v54 }
 0x666   : > { %5600 = vmatprep.subr.bf16.mxu0 %v16076_v13  ;;  %5653 = vmatprep.subr.bf16.mxu1 %v16033_v36 }
 0x669   : > { %5601 = vmatpush1.bf16.msra.mxu0 %v16074_v47  ;;  %5654 = vmatpush1.bf16.msra.mxu1 %v16031_v15 }
 0x66a   : > { %5602 = vmatprep.subr.bf16.mxu0 %v16082_v49  ;;  %5655 = vmatprep.subr.bf16.mxu1 %v16043_v61 }
 0x66d   : > { %5603 = vmatpush1.bf16.msra.mxu0 %v16096_v14  ;;  %5656 = vmatpush1.bf16.msra.mxu1 %v16060_v20 }
 0x66e   : > { %12657 = vmatprep.subr.msk.bf16.mxu0 %vm609_vm1, %v20130_v37  ;;  %12660 = vmatprep.subr.msk.bf16.mxu1 %vm609_vm1, %v20128_v40 }
 0x671   : > { %5615 = vmatpush2.bf16.msra.mxu0 %v20131_v53  ;;  %5668 = vmatpush2.bf16.msra.mxu1 %v20129_v25 }
 0x672   : > { %5616 = vmatprep.subr.bf16.mxu0 %v16117_v11  ;;  %5669 = vmatprep.subr.bf16.mxu1 %v16093_v7  ;;  %v13621_v11 = vld [vmem:[%s19978_s1 + $0x1d4] ss:$8 sps:$4 sm:$0xff]  }
 0x675   : > { %5617 = vmatpush2.bf16.msra.mxu0 %v16115_v3  ;;  %5670 = vmatpush2.bf16.msra.mxu1 %v16091_v10 }
 0x676   : > { %5618 = vmatprep.subr.bf16.mxu0 %v16121_v1  ;;  %5671 = vmatprep.subr.bf16.mxu1 %v16130_v60 }
 0x679   : > { %5619 = vmatpush2.bf16.msra.mxu0 %v16133_v0  ;;  %5672 = vmatpush2.bf16.msra.mxu1 %v16128_v21 }
 0x67c   : > { %5621 = vmatmul.mubr.bf16.vlgmr.msra.gmra.mxu0 %v13618_v43  ;;  %5674 = vmatmul.mubr.bf16.vlgmr.msra.gmra.mxu1 %v13618_v43 }
 0x67d   : > { %12659 = vmatprep.mubr.msk.bf16.mxu0 %vm602_vm0, %v13621_v11  ;;  %12662 = vmatprep.mubr.msk.bf16.mxu1 %vm602_vm0, %v13621_v11  ;;  %v16462_v11 = vpop.permute.xlu1 %4877 }
 0x684   : > { %5631 = vmatmul.mubr.bf16.gmra.mxu0 %v13623_v50  ;;  %5684 = vmatmul.mubr.bf16.gmra.mxu1 %v13623_v50  ;;  %v16466_v50 = vpop.permute.xlu0 %6346 }
 0x685   : > { %20134 = vst [vmem:[#allocation17_spill] sm:$0xff] %v16466_v50 }
 0x68c   : > { %v16397_v62 = vpop.f32.mrf.mxu1  ;;  %v16405_v24 = vpop.f32.mrf.mxu0 }
 0x68e   : > { %v4857_v63 = vpop.f32.mrf.mxu1  ;;  %v16407_v56 = vpop.f32.mrf.mxu0 }
 0x690   : > { %v16399_v39 = vpop.f32.mrf.mxu1  ;;  %v16409_v17 = vpop.f32.mrf.mxu0 }
 0x692   : > { %v4860_v42 = vpop.f32.mrf.mxu1  ;;  %v16411_v48 = vpop.f32.mrf.mxu0 }
 0x694   : > { %v16401_v29 = vpop.f32.mrf.mxu1  ;;  %v16413_v45 = vpop.f32.mrf.mxu0 }
 0x696   : > { %v4865_v51 = vpop.f32.mrf.mxu1  ;;  %v16415_v5 = vpop.f32.mrf.mxu0 }
 0x697   : > { %v16469_v51 = vpop.permute.xlu1 %6352 }
 0x698   : > { %v16403_v58 = vpop.f32.mrf.mxu1  ;;  %v16417_v31 = vpop.f32.mrf.mxu0  ;;  %20135 = vst [vmem:[#allocation8_spill] sm:$0xff] %v16469_v51 }
 0x699   : > { %20132 = vst [vmem:[#allocation14_spill] sm:$0xff] %v16417_v31 }
 0x69a   : > { %v4868_v30 = vpop.f32.mrf.mxu1  ;;  %v16419_v54 = vpop.f32.mrf.mxu0 }
 0x69b   : > { %20133 = vst [vmem:[#allocation16_spill] sm:$0xff] %v16419_v54 }
 0x6b8   : > { %v4965_v2 = vpop.f32.mrf.mxu0  ;;  %v5018_v27 = vpop.f32.mrf.mxu1 }
 0x6b9   : > { %5053 = vrot.lane.b32.xlu0 %v4965_v2, %s13726_s25 }
 0x6ba   : > { %v4967_v15 = vpop.f32.mrf.mxu0  ;;  %v5020_v36 = vpop.f32.mrf.mxu1 }
 0x6bb   : > { %5055 = vrot.lane.b32.xlu1 %v4967_v15, %s13726_s25 }
 0x6bc   : > { %v4969_v28 = vpop.f32.mrf.mxu0  ;;  %v5022_v61 = vpop.f32.mrf.mxu1 }
 0x6bd   : > { %5057 = vrot.lane.b32.xlu0 %v5018_v27, %s13726_s25  ;;  %v16473_v27 = vpop.permute.xlu0 %6334 }
 0x6be   : > { %v4971_v16 = vpop.f32.mrf.mxu0  ;;  %v5024_v47 = vpop.f32.mrf.mxu1  ;;  %20136 = vst [vmem:[#allocation21_spill] sm:$0xff] %v16473_v27 }
 0x6bf   : > { %5059 = vrot.lane.b32.xlu1 %v5020_v36, %s13726_s25 }
 0x6c0   : > { %v4975_v20 = vpop.f32.mrf.mxu0  ;;  %v5028_v49 = vpop.f32.mrf.mxu1 }
 0x6c1   : > { %5061 = vrot.lane.b32.xlu0 %v4969_v28, %s13726_s25  ;;  %v16476_v28 = vpop.permute.xlu1 %6340 }
 0x6c2   : > { %v4977_v13 = vpop.f32.mrf.mxu0  ;;  %v5030_v10 = vpop.f32.mrf.mxu1  ;;  %20137 = vst [vmem:[#allocation13_spill] sm:$0xff] %v16476_v28 }
 0x6c3   : > { %5063 = vrot.lane.b32.xlu1 %v4971_v16, %s13726_s25 }
 0x6c4   : > { %v4979_v7 = vpop.f32.mrf.mxu0  ;;  %v5032_v3 = vpop.f32.mrf.mxu1 }
 0x6c5   : > { %5065 = vrot.lane.b32.xlu0 %v5022_v61, %s13726_s25 }
 0x6c6   : > { %v4981_v14 = vpop.f32.mrf.mxu0  ;;  %v5034_v6 = vpop.f32.mrf.mxu1 }
 0x6c7   : > { %5067 = vrot.lane.b32.xlu1 %v5024_v47, %s13726_s25  ;;  %v16483_v47 = vpop.permute.xlu1 %6212 }
 0x6c8   : > { %20139 = vst [vmem:[#allocation18_spill] sm:$0xff] %v16483_v47 }
 0x6c9   : > { %5069 = vrot.lane.b32.xlu0 %v4975_v20, %s13726_s25  ;;  %v16480_v20 = vpop.permute.xlu0 %6206 }
 0x6ca   : > { %20138 = vst [vmem:[#allocation15_spill] sm:$0xff] %v16480_v20 }
 0x6cb   : > { %5071 = vrot.lane.b32.xlu1 %v4977_v13, %s13726_s25 }
 0x6cd   : > { %5073 = vrot.lane.b32.xlu0 %v5028_v49, %s13726_s25 }
 0x6cf   : > { %5075 = vrot.lane.b32.xlu1 %v5030_v10, %s13726_s25 }
 0x6d1   : > { %5077 = vrot.lane.b32.xlu0 %v4979_v7, %s13726_s25 }
 0x6d3   : > { %5079 = vrot.lane.b32.xlu1 %v4981_v14, %s13726_s25 }
 0x6d5   : > { %5081 = vrot.lane.b32.xlu0 %v5032_v3, %s13726_s25 }
 0x6d7   : > { %5083 = vrot.lane.b32.xlu1 %v5034_v6, %s13726_s25 }
 0x6e4   : > { %v5184_v1 = vpop.f32.mrf.mxu0  ;;  %v5237_v55 = vpop.f32.mrf.mxu1 }
 0x6e5   : > { %5272 = vrot.lane.b32.xlu0 %v5184_v1, %s13727_s26 }
 0x6e6   : > { %v5186_v59 = vpop.f32.mrf.mxu0  ;;  %v5239_v32 = vpop.f32.mrf.mxu1 }
 0x6e7   : > { %5274 = vrot.lane.b32.xlu1 %v5186_v59, %s13727_s26 }
 0x6e8   : > { %v5188_v21 = vpop.f32.mrf.mxu0  ;;  %v5241_v60 = vpop.f32.mrf.mxu1 }
 0x6e9   : > { %5276 = vrot.lane.b32.xlu0 %v5237_v55, %s13727_s26 }
 0x6ea   : > { %v5190_v0 = vpop.f32.mrf.mxu0  ;;  %v5243_v44 = vpop.f32.mrf.mxu1 }
 0x6eb   : > { %5278 = vrot.lane.b32.xlu1 %v5239_v32, %s13727_s26 }
 0x6ec   : > { %v5194_v19 = vpop.f32.mrf.mxu0  ;;  %v5247_v33 = vpop.f32.mrf.mxu1 }
 0x6ed   : > { %5280 = vrot.lane.b32.xlu0 %v5188_v21, %s13727_s26 }
 0x6ee   : > { %v5196_v23 = vpop.f32.mrf.mxu0  ;;  %v5249_v41 = vpop.f32.mrf.mxu1 }
 0x6ef   : > { %5282 = vrot.lane.b32.xlu1 %v5190_v0, %s13727_s26 }
 0x6f0   : > { %v5198_v4 = vpop.f32.mrf.mxu0  ;;  %v5251_v57 = vpop.f32.mrf.mxu1 }
 0x6f1   : > { %5284 = vrot.lane.b32.xlu0 %v5241_v60, %s13727_s26 }
 0x6f2   : > { %v5200_v38 = vpop.f32.mrf.mxu0  ;;  %v5253_v9 = vpop.f32.mrf.mxu1 }
 0x6f3   : > { %5286 = vrot.lane.b32.xlu1 %v5243_v44, %s13727_s26 }
 0x6f5   : > { %5288 = vrot.lane.b32.xlu0 %v5194_v19, %s13727_s26 }
 0x6f7   : > { %5290 = vrot.lane.b32.xlu1 %v5196_v23, %s13727_s26 }
 0x6f9   : > { %5292 = vrot.lane.b32.xlu0 %v5247_v33, %s13727_s26 }
 0x6fb   : > { %5294 = vrot.lane.b32.xlu1 %v5249_v41, %s13727_s26 }
 0x6fd   : > { %5296 = vrot.lane.b32.xlu0 %v5198_v4, %s13727_s26 }
 0x6ff   : > { %5298 = vrot.lane.b32.xlu1 %v5200_v38, %s13727_s26 }
 0x701   : > { %5300 = vrot.lane.b32.xlu0 %v5251_v57, %s13727_s26 }
 0x703   : > { %5302 = vrot.lane.b32.xlu1 %v5253_v9, %s13727_s26 }
 0x710   : > { %v5403_v22 = vpop.f32.mrf.mxu0  ;;  %v5456_v35 = vpop.f32.mrf.mxu1 }
 0x711   : > { %5491 = vrot.lane.b32.xlu0 %v5403_v22, %s13728_s27 }
 0x712   : > { %v5405_v8 = vpop.f32.mrf.mxu0  ;;  %v5458_v52 = vpop.f32.mrf.mxu1 }
 0x713   : > { %5493 = vrot.lane.b32.xlu1 %v5405_v8, %s13728_s27 }
 0x714   : > { %v5407_v43 = vpop.f32.mrf.mxu0  ;;  %v5460_v63 = vpop.f32.mrf.mxu1 }
 0x715   : > { %5495 = vrot.lane.b32.xlu0 %v5456_v35, %s13728_s27 }
 0x716   : > { %v5409_v42 = vpop.f32.mrf.mxu0  ;;  %v5462_v2 = vpop.f32.mrf.mxu1 }
 0x717   : > { %5497 = vrot.lane.b32.xlu1 %v5458_v52, %s13728_s27 }
 0x718   : > { %v5413_v30 = vpop.f32.mrf.mxu0  ;;  %v5466_v36 = vpop.f32.mrf.mxu1 }
 0x719   : > { %5499 = vrot.lane.b32.xlu0 %v5407_v43, %s13728_s27 }
 0x71a   : > { %v5415_v15 = vpop.f32.mrf.mxu0  ;;  %v5468_v61 = vpop.f32.mrf.mxu1 }
 0x71b   : > { %5501 = vrot.lane.b32.xlu1 %v5409_v42, %s13728_s27 }
 0x71c   : > { %v5417_v16 = vpop.f32.mrf.mxu0  ;;  %v5470_v49 = vpop.f32.mrf.mxu1 }
 0x71d   : > { %5503 = vrot.lane.b32.xlu0 %v5460_v63, %s13728_s27 }
 0x71e   : > { %v5419_v13 = vpop.f32.mrf.mxu0  ;;  %v5472_v7 = vpop.f32.mrf.mxu1 }
 0x71f   : > { %5505 = vrot.lane.b32.xlu1 %v5462_v2, %s13728_s27 }
 0x721   : > { %5507 = vrot.lane.b32.xlu0 %v5413_v30, %s13728_s27 }
 0x723   : > { %5509 = vrot.lane.b32.xlu1 %v5415_v15, %s13728_s27 }
 0x725   : > { %5511 = vrot.lane.b32.xlu0 %v5466_v36, %s13728_s27 }
 0x727   : > { %5513 = vrot.lane.b32.xlu1 %v5468_v61, %s13728_s27 }
 0x729   : > { %5515 = vrot.lane.b32.xlu0 %v5417_v16, %s13728_s27 }
 0x72b   : > { %5517 = vrot.lane.b32.xlu1 %v5419_v13, %s13728_s27  ;;  %v16487_v10 = vpop.permute.xlu0 %5053 }
 0x72d   : > { %v16489_v14 = vpop.permute.xlu1 %5055  ;;  %5519 = vrot.lane.b32.xlu0 %v5470_v49, %s13728_s27 }
 0x72f   : > { %5521 = vrot.lane.b32.xlu1 %v5472_v7, %s13728_s27  ;;  %v16493_v3 = vpop.permute.xlu0 %5057 }
 0x731   : > { %v16495_v6 = vpop.permute.xlu1 %5059 }
 0x733   : > { %v16497_v1 = vpop.permute.xlu0 %5061 }
 0x735   : > { %v16499_v55 = vpop.permute.xlu1 %5063 }
 0x737   : > { %v16501_v59 = vpop.permute.xlu0 %5065 }
 0x739   : > { %v16503_v21 = vpop.permute.xlu1 %5067 }
 0x73b   : > { %v16507_v19 = vpop.permute.xlu0 %5069 }
 0x73c   : > { %v5622_v32 = vpop.f32.mrf.mxu0  ;;  %v5675_v60 = vpop.f32.mrf.mxu1 }
 0x73d   : > { %5710 = vrot.lane.b32.xlu0 %v5622_v32, %s13729_s28  ;;  %v16510_v33 = vpop.permute.xlu1 %5071 }
 0x73e   : > { %v5624_v0 = vpop.f32.mrf.mxu0  ;;  %v5677_v44 = vpop.f32.mrf.mxu1 }
 0x73f   : > { %5712 = vrot.lane.b32.xlu1 %v5624_v0, %s13729_s28  ;;  %v16514_v38 = vpop.permute.xlu0 %5073 }
 0x740   : > { %v5626_v23 = vpop.f32.mrf.mxu0  ;;  %v5679_v41 = vpop.f32.mrf.mxu1 }
 0x741   : > { %5714 = vrot.lane.b32.xlu0 %v5675_v60, %s13729_s28  ;;  %v16517_v9 = vpop.permute.xlu1 %5075 }
 0x742   : > { %v5628_v4 = vpop.f32.mrf.mxu0  ;;  %v5681_v22 = vpop.f32.mrf.mxu1 }
 0x743   : > { %5716 = vrot.lane.b32.xlu1 %v5677_v44, %s13729_s28  ;;  %v16521_v52 = vpop.permute.xlu0 %5077 }
 0x744   : > { %v5632_v57 = vpop.f32.mrf.mxu0  ;;  %v5685_v8 = vpop.f32.mrf.mxu1  ;;  %20140 = vst [vmem:[#allocation20_spill] sm:$0xff] %v16521_v52  ;;  %v5086_v52 = vsel %vm939_vm4, %v16489_v14, %v16493_v3 }
 0x745   : > { %5718 = vrot.lane.b32.xlu0 %v5626_v23, %s13729_s28  ;;  %v16524_v43 = vpop.permute.xlu1 %5079 }
 0x746   : > { %v5634_v35 = vpop.f32.mrf.mxu0  ;;  %v5687_v63 = vpop.f32.mrf.mxu1 }
 0x747   : > { %5720 = vrot.lane.b32.xlu1 %v5628_v4, %s13729_s28  ;;  %v16528_v30 = vpop.permute.xlu0 %5081 }
 0x748   : > { %v5636_v42 = vpop.f32.mrf.mxu0  ;;  %v5689_v15 = vpop.f32.mrf.mxu1 }
 0x749   : > { %5722 = vrot.lane.b32.xlu0 %v5679_v41, %s13729_s28  ;;  %v16531_v36 = vpop.permute.xlu1 %5083 }
 0x74a   : > { %v5638_v2 = vpop.f32.mrf.mxu0  ;;  %v5691_v16 = vpop.f32.mrf.mxu1 }
 0x74b   : > { %5724 = vrot.lane.b32.xlu1 %v5681_v22, %s13729_s28 }
 0x74d   : > { %5726 = vrot.lane.b32.xlu0 %v5632_v57, %s13729_s28 }
 0x74f   : > { %5728 = vrot.lane.b32.xlu1 %v5634_v35, %s13729_s28 }
 0x751   : > { %5730 = vrot.lane.b32.xlu0 %v5685_v8, %s13729_s28 }
 0x753   : > { %5732 = vrot.lane.b32.xlu1 %v5687_v63, %s13729_s28 }
 0x755   : > { %5734 = vrot.lane.b32.xlu0 %v5636_v42, %s13729_s28 }
 0x757   : > { %5736 = vrot.lane.b32.xlu1 %v5638_v2, %s13729_s28  ;;  %v5273_v61 = vpop.permute.xlu0 %5272 }
 0x759   : > { %v5275_v13 = vpop.permute.xlu1 %5274  ;;  %5738 = vrot.lane.b32.xlu0 %v5689_v15, %s13729_s28 }
 0x75b   : > { %5740 = vrot.lane.b32.xlu1 %v5691_v16, %s13729_s28  ;;  %v5277_v49 = vpop.permute.xlu0 %5276 }
 0x75d   : > { %v5279_v7 = vpop.permute.xlu1 %5278  ;;  %6194 = vrot.lane.b32.xlu0 %v20121_v34, %s13725_s24 }
 0x75f   : > { %6200 = vrot.lane.b32.xlu1 %v20121_v34, %s13725_s24  ;;  %v16541_v32 = vpop.permute.xlu0 %5280 }
 0x761   : > { %6066 = vrot.lane.b32.xlu0 %v20121_v34, %s13730_s29  ;;  %v16545_v60 = vpop.permute.xlu1 %5282 }
 0x763   : > { %6072 = vrot.lane.b32.xlu1 %v20121_v34, %s13730_s29  ;;  %v16551_v0 = vpop.permute.xlu0 %5284 }
 0x765   : > { %6054 = vrot.lane.b32.xlu0 %v20121_v34, %s13730_s29  ;;  %v16555_v44 = vpop.permute.xlu1 %5286 }
 0x767   : > { %6060 = vrot.lane.b32.xlu1 %v20121_v34, %s13730_s29  ;;  %v16561_v23 = vpop.permute.xlu0 %5288 }
 0x769   : > { %5926 = vrot.lane.b32.xlu0 %v20121_v34, %s13731_s30  ;;  %v16565_v41 = vpop.permute.xlu1 %5290 }
 0x76b   : > { %5932 = vrot.lane.b32.xlu1 %v20121_v34, %s13731_s30  ;;  %v16567_v4 = vpop.permute.xlu0 %5292 }
 0x76d   : > { %5914 = vrot.lane.b32.xlu0 %v20121_v34, %s13731_s30  ;;  %v16569_v57 = vpop.permute.xlu1 %5294  ;;  %v5085_v34 = vsel %vm939_vm4, %v16487_v10, %v16489_v14  ;;  %v5087_v10 = vsel %vm939_vm4, %v16493_v3, %v16495_v6  ;;  %v4895_v14 = vadd.f32 %v16462_v11, %v16399_v39  ;;  %v5306_v39 = vsel %vm1159_vm8, %v5277_v49, %v5279_v7 }
 0x76f   : > { %v16571_v22 = vpop.permute.xlu0 %5296 }
 0x770   : > { %20141 = vst [vmem:[#allocation9_spill] sm:$0xff] %v16571_v22  ;;  %v4890_v22 = vadd.f32 %v16459_v26, %v16405_v24 }
 0x771   : > { %v16573_v35 = vpop.permute.xlu1 %5298 }
 0x772   : > { %20142 = vst [vmem:[#allocation12_spill] sm:$0xff] %v16573_v35  ;;  %v5304_v35 = vsel %vm1159_vm8, %v5273_v61, %v5275_v13  ;;  %v5109_v54 = vadd.f32 %v5085_v34, %v4890_v22  ;;  %v5305_v61 = vsel %vm1159_vm8, %v5275_v13, %v5277_v49  ;;  %v16629_v34 = vadd.f32 %v16453_v18, %v16413_v45 }
 0x773   : > { %v16575_v8 = vpop.permute.xlu0 %5300  ;;  %v5090_v45 = vsel %vm939_vm4, %v16501_v59, %v16503_v21  ;;  %v5308_v21 = vsel %vm1159_vm8, %v16545_v60, %v16551_v0 }
 0x774   : > { %v5328_v3 = vadd.f32 %v5304_v35, %v5109_v54 }
 0x775   : > { %v16577_v63 = vpop.permute.xlu1 %5302 }
 0x783   : > { %v5492_v42 = vpop.permute.xlu0 %5491 }
 0x785   : > { %v5494_v2 = vpop.permute.xlu1 %5493 }
 0x787   : > { %v5496_v15 = vpop.permute.xlu0 %5495 }
 0x788   : > { %v5524_v13 = vsel %vm1379_vm11, %v5494_v2, %v5496_v15 }
 0x789   : > { %v5498_v16 = vpop.permute.xlu1 %5497 }
 0x78b   : > { %v16579_v53 = vpop.permute.xlu0 %5499 }
 0x78d   : > { %v16581_v37 = vpop.permute.xlu1 %5501 }
 0x78f   : > { %v16583_v25 = vpop.permute.xlu0 %5503 }
 0x791   : > { %v16585_v40 = vpop.permute.xlu1 %5505 }
 0x793   : > { %v16587_v47 = vpop.permute.xlu0 %5507 }
 0x795   : > { %v16589_v20 = vpop.permute.xlu1 %5509 }
 0x797   : > { %v16591_v27 = vpop.permute.xlu0 %5511 }
 0x799   : > { %v16593_v51 = vpop.permute.xlu1 %5513 }
 0x79b   : > { %v16595_v28 = vpop.permute.xlu0 %5515 }
 0x79c   : > { %20143 = vst [vmem:[#allocation11_spill] sm:$0xff] %v16595_v28  ;;  %v4892_v28 = vadd.f32 %v16459_v26, %v16397_v62  ;;  %v5523_v62 = vsel %vm1379_vm11, %v5492_v42, %v5494_v2 }
 0x79d   : > { %v16597_v50 = vpop.permute.xlu1 %5517  ;;  %v5547_v54 = vadd.f32 %v5523_v62, %v5328_v3 }
 0x79e   : > { %20144 = vst [vmem:[#allocation23_spill] sm:$0xff] %v16597_v50  ;;  %v4891_v50 = vadd.f32 %v16459_v26, %v16407_v56  ;;  %v4894_v56 = vadd.f32 %v16462_v11, %v16411_v48  ;;  %v5111_v22 = vadd.f32 %v5087_v10, %v4892_v28  ;;  %v5089_v48 = vsel %vm939_vm4, %v16499_v55, %v16501_v59 }
 0x79f   : > { %v16604_v31 = vpop.permute.xlu0 %5519  ;;  %v4898_v28 = vadd.f32 %v16453_v18, %v16401_v29  ;;  %v5114_v59 = vadd.f32 %v5090_v45, %v4895_v14  ;;  %v5307_v14 = vsel %vm1159_vm8, %v16541_v32, %v16545_v60  ;;  %v5526_v32 = vsel %vm1379_vm11, %v16579_v53, %v16581_v37 }
 0x7a0   : > { %20145 = vst [vmem:[#allocation19_spill] sm:$0xff] %v16604_v31  ;;  %v4893_v31 = vadd.f32 %v16462_v11, %v16409_v17  ;;  %v5110_v26 = vadd.f32 %v5086_v52, %v4891_v50  ;;  %v5088_v17 = vsel %vm939_vm4, %v16497_v1, %v16499_v55  ;;  %v4897_v1 = vadd.f32 %v16453_v18, %v16415_v5 }
 0x7a1   : > { %v16617_v24 = vpop.permute.xlu1 %5521  ;;  %v5525_v52 = vsel %vm1379_vm11, %v5496_v15, %v5498_v16  ;;  %v5330_v35 = vadd.f32 %v5306_v39, %v5111_v22  ;;  %v5113_v10 = vadd.f32 %v5089_v48, %v4894_v56  ;;  %v5092_v16 = vsel %vm939_vm4, %v16510_v33, %v16514_v38 }
 0x7a2   : > { %v5329_v11 = vadd.f32 %v5305_v61, %v5110_v26  ;;  %v5112_v7 = vadd.f32 %v5088_v17, %v4893_v31  ;;  %v5091_v31 = vsel %vm939_vm4, %v16507_v19, %v16510_v33  ;;  %v5309_v19 = vsel %vm1159_vm8, %v16551_v0, %v16555_v44 }
 0x7a3   : > { %v5549_v61 = vadd.f32 %v5525_v52, %v5330_v35  ;;  %v5332_v22 = vadd.f32 %v5308_v21, %v5113_v10  ;;  %v5527_v33 = vsel %vm1379_vm11, %v16581_v37, %v16583_v25  ;;  %v5093_v48 = vsel %vm939_vm4, %v16514_v38, %v16517_v9  ;;  %v20147_v35 = vld [vmem:[#allocation25_spill] sm:$0xff] }
 0x7a4   : > { %v5548_v55 = vadd.f32 %v5524_v13, %v5329_v11  ;;  %v5331_v45 = vadd.f32 %v5307_v14, %v5112_v7  ;;  %v5528_v0 = vsel %vm1379_vm11, %v16583_v25, %v16585_v40  ;;  %v20146_v44 = vmov 0.0  }
 0x7a5   : > { %v5115_v40 = vadd.f32 %v5091_v31, %v16629_v34  ;;  %v5310_v25 = vsel %vm1159_vm8, %v16561_v23, %v16565_v41  ;;  %v5312_v23 = vsel %vm1159_vm8, %v16567_v4, %v16569_v57  ;;  %v5530_v14 = vsel %vm1379_vm11, %v16589_v20, %v16591_v27 }
 0x7a7   : > { %v5334_v31 = vadd.f32 %v5310_v25, %v5115_v40  ;;  %v5096_v40 = vsel %vm939_vm4, %v16528_v30, %v16531_v36  ;;  %v20149_v36 = vld [vmem:[#allocation16_spill] sm:$0xff] }
 0x7af   : > { %v5711_v6 = vpop.permute.xlu0 %5710 }
 0x7b1   : > { %v5713_v50 = vpop.permute.xlu1 %5712 }
 0x7b2   : > { %v5742_v49 = vsel %vm1599_vm13, %v5711_v6, %v5713_v50 }
 0x7b3   : > { %v5766_v42 = vadd.f32 %v5742_v49, %v5547_v54  ;;  %v5715_v2 = vpop.permute.xlu0 %5714  ;;  %v5333_v54 = vadd.f32 %v5309_v19, %v5114_v59  ;;  %v5550_v49 = vadd.f32 %v5526_v32, %v5331_v45  ;;  %v5311_v59 = vsel %vm1159_vm8, %v16565_v41, %v16567_v4 }
 0x7b4   : > { %v5743_v29 = vsel %vm1599_vm13, %v5713_v50, %v5715_v2  ;;  %v5551_v50 = vadd.f32 %v5527_v33, %v5332_v22  ;;  %v5531_v4 = vsel %vm1379_vm11, %v16591_v27, %v16593_v51 }
 0x7b5   : > { %vm5778_vm3 = vcmp.gt.f32.partialorder %v5766_v42, 0.0  ;;  %v5790_v5 = vmul.f32 0.2, %v5766_v42  ;;  %v5767_v18 = vadd.f32 %v5743_v29, %v5548_v55  ;;  %v5717_v15 = vpop.permute.xlu1 %5716  ;;  %v5552_v9 = vadd.f32 %v5528_v0, %v5333_v54 }
 0x7b6   : > { %v5744_v62 = vsel %vm1599_vm13, %v5715_v2, %v5717_v15 }
 0x7b7   : > { %v5802_v56 = vsel %vm5778_vm3, %v5766_v42, %v5790_v5  ;;  %vm5779_vm5 = vcmp.gt.f32.partialorder %v5767_v18, 0.0  ;;  %v5791_v26 = vmul.f32 0.2, %v5767_v18  ;;  %v5768_v3 = vadd.f32 %v5744_v62, %v5549_v61  ;;  %v5719_v6 = vpop.permute.xlu0 %5718  ;;  %v20148_v42 = vld [vmem:[#allocation26_spill] sm:$0xff] }
 0x7b8   : > { %v5814_v17 = vmul.f32 %v14438_v46, %v5802_v56  ;;  %v5116_v5 = vadd.f32 %v5092_v16, %v4897_v1  ;;  %v5529_v62 = vsel %vm1379_vm11, %v16587_v47, %v16589_v20 }
 0x7b9   : > { %v5803_v60 = vsel %vm5779_vm5, %v5767_v18, %v5791_v26  ;;  %vm5780_vm6 = vcmp.gt.f32.partialorder %v5768_v3, 0.0  ;;  %v5792_v39 = vmul.f32 0.2, %v5768_v3  ;;  %v5721_v13 = vpop.permute.xlu1 %5720  ;;  %v5117_v18 = vadd.f32 %v5093_v48, %v4898_v28 }
 0x7ba   : > { %v16679_v11 = vpack.c.bf16 %v5814_v17, %v20146_v44  ;;  %v5745_v53 = vsel %vm1599_vm13, %v5719_v6, %v5721_v13  ;;  %v5815_v55 = vmul.f32 %v20147_v35, %v5803_v60  ;;  %v5335_v41 = vadd.f32 %v5311_v59, %v5116_v5 }
 0x7bb   : > { %v5804_v52 = vsel %vm5780_vm6, %v5768_v3, %v5792_v39  ;;  %v5723_v37 = vpop.permute.xlu0 %5722  ;;  %v5769_v29 = vadd.f32 %v5745_v53, %v5550_v49  ;;  %v5336_v56 = vadd.f32 %v5312_v23, %v5117_v18  ;;  %v5553_v20 = vadd.f32 %v5529_v62, %v5334_v31  ;;  %v20150_v18 = vld [vmem:[#allocation12_spill] sm:$0xff] }
 0x7bc   : > { %v5816_v2 = vmul.f32 %v20148_v42, %v5804_v52  ;;  %v5746_v38 = vsel %vm1599_vm13, %v5721_v13, %v5723_v37  ;;  %6330 = vrot.lane.b32.xlu0 %v16679_v11, %s13724_s23  ;;  %v5554_v26 = vadd.f32 %v5530_v14, %v5335_v41  ;;  %v5095_v59 = vsel %vm939_vm4, %v16524_v43, %v16528_v30  ;;  %v20151_v30 = vld [vmem:[#allocation19_spill] sm:$0xff] }
 0x7bd   : > { %v5770_v7 = vadd.f32 %v5746_v38, %v5551_v50  ;;  %v5725_v10 = vpop.permute.xlu1 %5724  ;;  %v5793_v57 = vmul.f32 0.2, %v5769_v29  ;;  %vm5781_vm3 = vcmp.gt.f32.partialorder %v5769_v29, 0.0  ;;  %v5555_v47 = vadd.f32 %v5531_v4, %v5336_v56  ;;  %v20152_v41 = vld [vmem:[#allocation23_spill] sm:$0xff]  ;;  %v20154_v56 = vld [vmem:[#allocation14_spill] sm:$0xff] }
 0x7be   : > { %v16694_v21 = vpack.c.bf16 %v5816_v2, %v5815_v55  ;;  %v5747_v61 = vsel %vm1599_vm13, %v5723_v37, %v5725_v10 }
 0x7bf   : > { %v5771_v15 = vadd.f32 %v5747_v61, %v5552_v9  ;;  %v5727_v34 = vpop.permute.xlu0 %5726  ;;  %v5794_v1 = vmul.f32 0.2, %v5770_v7  ;;  %vm5782_vm2 = vcmp.gt.f32.partialorder %v5770_v7, 0.0  ;;  %v5805_v17 = vsel %vm5781_vm3, %v5769_v29, %v5793_v57 }
 0x7c0   : > { %6190 = vrot.lane.b32.xlu0 %v16679_v11, %s13725_s24  ;;  %6332 = vrot.lane.b32.xlu1 %v16694_v21, %s13724_s23  ;;  %v5817_v50 = vmul.f32 %v14438_v46, %v5805_v17  ;;  %v5315_v29 = vsel %vm1159_vm8, %v16575_v8, %v16577_v63  ;;  %v4900_v61 = vadd.f32 %v16455_v12, %v20149_v36 }
 0x7c1   : > { %vm5783_vm15 = vcmp.gt.f32.partialorder %v5771_v15, 0.0  ;;  %v5795_v28 = vmul.f32 0.2, %v5771_v15  ;;  %v5729_v16 = vpop.permute.xlu1 %5728  ;;  %v5806_v51 = vsel %vm5782_vm2, %v5770_v7, %v5794_v1  ;;  %v4901_v7 = vadd.f32 %v16455_v12, %v16403_v58 }
 0x7c2   : > { %v5748_v22 = vsel %vm1599_vm13, %v5727_v34, %v5729_v16  ;;  %v5818_v45 = vmul.f32 %v20147_v35, %v5806_v51  ;;  %v16741_v9 = vpack.c.bf16 %v5817_v50, %v20146_v44  ;;  %v5534_v34 = vsel %vm1379_vm11, %v20151_v30, %v16617_v24  ;;  %v20153_v24 = vld [vmem:[#allocation20_spill] sm:$0xff] }
 0x7c3   : > { %v5807_v3 = vsel %vm5783_vm15, %v5771_v15, %v5795_v28  ;;  %v5731_v6 = vpop.permute.xlu0 %5730  ;;  %v5772_v39 = vadd.f32 %v5748_v22, %v5553_v20  ;;  %v5120_v5 = vadd.f32 %v5096_v40, %v4901_v7  ;;  %v5314_v15 = vsel %vm1159_vm8, %v20150_v18, %v16575_v8  ;;  %v20155_v22 = vld [vmem:[#allocation9_spill] sm:$0xff] }
 0x7c4   : > { %v5749_v19 = vsel %vm1599_vm13, %v5729_v16, %v5731_v6  ;;  %6050 = vrot.lane.b32.xlu0 %v16679_v11, %s13730_s29  ;;  %6192 = vrot.lane.b32.xlu1 %v16694_v21, %s13725_s24  ;;  %v5819_v32 = vmul.f32 %v20148_v42, %v5807_v3  ;;  %v5119_v31 = vadd.f32 %v5095_v59, %v4900_v61 }
 0x7c5   : > { %v5773_v27 = vadd.f32 %v5749_v19, %v5554_v26  ;;  %v5733_v33 = vpop.permute.xlu1 %5732  ;;  %v5796_v53 = vmul.f32 0.2, %v5772_v39  ;;  %vm5784_vm15 = vcmp.gt.f32.partialorder %v5772_v39, 0.0  ;;  %v5339_v23 = vadd.f32 %v5315_v29, %v5120_v5 }
 0x7c6   : > { %v5750_v60 = vsel %vm1599_vm13, %v5731_v6, %v5733_v33  ;;  %v16727_v52 = vpack.c.bf16 %v5819_v32, %v5818_v45  ;;  %v5533_v1 = vsel %vm1379_vm11, %v20152_v41, %v20151_v30  ;;  %v5338_v8 = vadd.f32 %v5314_v15, %v5119_v31 }
 0x7c7   : > { %vm5785_vm5 = vcmp.gt.f32.partialorder %v5773_v27, 0.0  ;;  %v5797_v13 = vmul.f32 0.2, %v5773_v27  ;;  %v5774_v48 = vadd.f32 %v5750_v60, %v5555_v47  ;;  %v5735_v38 = vpop.permute.xlu0 %5734  ;;  %v5808_v10 = vsel %vm5784_vm15, %v5772_v39, %v5796_v53  ;;  %v20156_v47 = vld [vmem:[#allocation11_spill] sm:$0xff] }
 0x7c8   : > { %5910 = vrot.lane.b32.xlu0 %v16679_v11, %s13731_s30  ;;  %6052 = vrot.lane.b32.xlu1 %v16694_v21, %s13730_s29  ;;  %v5820_v63 = vmul.f32 %v14438_v46, %v5808_v10  ;;  %v5558_v16 = vadd.f32 %v5534_v34, %v5339_v23  ;;  %v5094_v62 = vsel %vm939_vm4, %v20153_v24, %v16524_v43 }
 0x7c9   : > { %v5809_v0 = vsel %vm5785_vm5, %v5773_v27, %v5797_v13  ;;  %vm5786_vm6 = vcmp.gt.f32.partialorder %v5774_v48, 0.0  ;;  %v5798_v54 = vmul.f32 0.2, %v5774_v48  ;;  %v5737_v49 = vpop.permute.xlu1 %5736  ;;  %v4899_v26 = vadd.f32 %v16455_v12, %v20154_v56 }
 0x7ca   : > { %v5821_v55 = vmul.f32 %v20147_v35, %v5809_v0  ;;  %v13326_v57 = vpack.c.bf16 %v5820_v63, %v20146_v44  ;;  %v5557_v3 = vadd.f32 %v5533_v1, %v5338_v8  ;;  %v5313_v19 = vsel %vm1159_vm8, %v20155_v22, %v20150_v18 }
 0x7cb   : > { %v5810_v37 = vsel %vm5786_vm6, %v5774_v48, %v5798_v54  ;;  %v5739_v14 = vpop.permute.xlu0 %5738  ;;  %v5118_v20 = vadd.f32 %v5094_v62, %v4899_v26  ;;  %v5532_v51 = vsel %vm1379_vm11, %v20156_v47, %v20152_v41  ;;  %v5751_v12 = vsel %vm1599_vm13, %v5735_v38, %v5737_v49  ;;  %v12726_v38 = vld [vmem:[%s19979_s2 + $0x78] sm:$0xff]  ;;  %v20160_v47 = vld [vmem:[#allocation8_spill] sm:$0xff] }
 0x7cc   : > { %v5822_v2 = vmul.f32 %v20148_v42, %v5810_v37  ;;  %5912 = vrot.lane.b32.xlu1 %v16694_v21, %s13731_s30  ;;  %6338 = vrot.lane.b32.xlu0 %v16727_v52, %s13724_s23  ;;  %v5752_v4 = vsel %vm1599_vm13, %v5737_v49, %v5739_v14  ;;  %v20157_v49 = vmov 0.0|0.0  }
 0x7cd   : > { %v5741_v58 = vpop.permute.xlu1 %5740  ;;  %v5776_v43 = vadd.f32 %v5752_v4, %v5557_v3  ;;  %v5337_v27 = vadd.f32 %v5313_v19, %v5118_v20  ;;  %v20159_v19 = vld [vmem:[#allocation13_spill] sm:$0xff] }
 0x7ce   : > { %v16738_v25 = vpack.c.bf16 %v5822_v2, %v5821_v55  ;;  %v5753_v28 = vsel %vm1599_vm13, %v5739_v14, %v5741_v58  ;;  %v13626_v2 = vld [vmem:[%s19978_s1 + $0x1e4] ss:$8 sps:$4 sm:$0xff]   ;;  %v6359_v20 = vrot.slane %v20159_v19, 4 }
 0x7cf   : > { %v5777_v6 = vadd.f32 %v5753_v28, %v5558_v16  ;;  %v5556_v17 = vadd.f32 %v5532_v51, %v5337_v27  ;;  %v5800_v32 = vmul.f32 0.2, %v5776_v43  ;;  %vm5788_vm3 = vcmp.gt.f32.partialorder %v5776_v43, 0.0  ;;  %v16836_v55 = vpop.permute.xlu0 %6194  ;;  %12780 = vmatprep.mubr.msk.bf16.mxu0 %vm602_vm0, %v13626_v2  ;;  %12783 = vmatprep.mubr.msk.bf16.mxu1 %vm602_vm0, %v13626_v2  ;;  %v20161_v27 = vld [vmem:[#allocation21_spill] sm:$0xff] }
 0x7d0   : > { %6336 = vrot.lane.b32.xlu1 %v16741_v9, %s13724_s23  ;;  %6198 = vrot.lane.b32.xlu0 %v16727_v52, %s13725_s24  ;;  %v6365_v51 = vrot.slane %v20160_v47, 4 }
 0x7d1   : > { %v5801_v33 = vmul.f32 0.2, %v5777_v6  ;;  %vm5789_vm2 = vcmp.gt.f32.partialorder %v5777_v6, 0.0  ;;  %v5775_v60 = vadd.f32 %v5751_v12, %v5556_v17  ;;  %v5812_v13 = vsel %vm5788_vm3, %v5776_v43, %v5800_v32  ;;  %v16857_v40 = vpop.permute.xlu1 %6200  ;;  %v20162_v32 = vld [vmem:[#allocation15_spill] sm:$0xff] }
 0x7d2   : > { %v5824_v0 = vmul.f32 %v20147_v35, %v5812_v13 }
 0x7d3   : > { %v5813_v39 = vsel %vm5789_vm2, %v5777_v6, %v5801_v33  ;;  %v5799_v45 = vmul.f32 0.2, %v5775_v60  ;;  %vm5787_vm5 = vcmp.gt.f32.partialorder %v5775_v60, 0.0  ;;  %v20158_v6 = vld [vmem:[#allocation17_spill] sm:$0xff]  ;;  %v6356_v33 = vrot.slane %v20161_v27, 4 }
 0x7d4   : > { %6196 = vrot.lane.b32.xlu1 %v16741_v9, %s13725_s24  ;;  %6058 = vrot.lane.b32.xlu0 %v16727_v52, %s13730_s29  ;;  %v5825_v48 = vmul.f32 %v20148_v42, %v5813_v39  ;;  %v6362_v22 = vrot.slane %v20158_v6, 4  ;;  %v20167_v42 = vld [vmem:[#allocation6_spill] sm:$0xff] }
 0x7d5   : > { %v5811_v50 = vsel %vm5787_vm5, %v5775_v60, %v5799_v45  ;;  %v16866_v7 = vpop.permute.xlu1 %6072  ;;  %v6222_v60 = vrot.slane %v20162_v32, 4  ;;  %v20163_v45 = vld [vmem:[#allocation18_spill] sm:$0xff] }
 0x7d6   : > { %v13330_v54 = vpack.c.bf16 %v5825_v48, %v5824_v0  ;;  %v5823_v53 = vmul.f32 %v14438_v46, %v5811_v50  ;;  %v6225_v0 = vrot.slane %v20163_v45, 4  ;;  %v6219_v50 = vrot.slane %v16857_v40, 4 }
 0x7d8   : > { %6056 = vrot.lane.b32.xlu1 %v16741_v9, %s13730_s29  ;;  %6342 = vrot.lane.b32.xlu0 %v13326_v57, %s13724_s23  ;;  %v13329_v37 = vpack.c.bf16 %v5823_v53, %v20146_v44 }
 0x7d9   : > { %v16876_v59 = vpop.permute.xlu1 %6060 }
 0x7dc   : > { %5916 = vrot.lane.b32.xlu1 %v16741_v9, %s13731_s30  ;;  %6202 = vrot.lane.b32.xlu0 %v13326_v57, %s13725_s24 }
 0x7dd   : > { %v16882_v36 = vpop.permute.xlu1 %5932 }
 0x7e0   : > { %6062 = vrot.lane.b32.xlu0 %v13326_v57, %s13730_s29  ;;  %6344 = vrot.lane.b32.xlu1 %v16738_v25, %s13724_s23 }
 0x7e4   : > { %5922 = vrot.lane.b32.xlu0 %v13326_v57, %s13731_s30  ;;  %6204 = vrot.lane.b32.xlu1 %v16738_v25, %s13725_s24 }
 0x7e8   : > { %6064 = vrot.lane.b32.xlu1 %v16738_v25, %s13730_s29  ;;  %6350 = vrot.lane.b32.xlu0 %v13330_v54, %s13724_s23 }
 0x7ec   : > { %5924 = vrot.lane.b32.xlu1 %v16738_v25, %s13731_s30  ;;  %5918 = vrot.lane.b32.xlu0 %v16727_v52, %s13731_s30 }
 0x7f0   : > { %6348 = vrot.lane.b32.xlu1 %v13329_v37, %s13724_s23  ;;  %6210 = vrot.lane.b32.xlu0 %v13330_v54, %s13725_s24 }
 0x7f4   : > { %5920 = vrot.lane.b32.xlu1 %v20157_v49, %s13731_s30  ;;  %6482 = vrot.lane.b32.xlu0 %v13326_v57, %s13733_s5 }
 0x7f8   : > { %6208 = vrot.lane.b32.xlu1 %v13329_v37, %s13725_s24  ;;  %6070 = vrot.lane.b32.xlu0 %v13330_v54, %s13730_s29 }
 0x7fc   : > { %6484 = vrot.lane.b32.xlu1 %v16738_v25, %s13733_s5  ;;  %6486 = vrot.lane.b32.xlu0 %v20157_v49, %s13733_s5 }
 0x800   : > { %6068 = vrot.lane.b32.xlu1 %v13329_v37, %s13730_s29  ;;  %5930 = vrot.lane.b32.xlu0 %v13330_v54, %s13731_s30 }
 0x804   : > { %6492 = vrot.lane.b32.xlu1 %v20157_v49, %s13733_s5  ;;  %6470 = vrot.lane.b32.xlu0 %v16679_v11, %s13733_s5  ;;  %v12725_v11 = vld [vmem:[%s19979_s2 + $0x70] sm:$0xff] }
 0x808   : > { %5928 = vrot.lane.b32.xlu1 %v13329_v37, %s13731_s30  ;;  %6474 = vrot.lane.b32.xlu0 %v20157_v49, %s13733_s5 }
 0x80c   : > { %6472 = vrot.lane.b32.xlu1 %v16694_v21, %s13733_s5  ;;  %6490 = vrot.lane.b32.xlu0 %v13330_v54, %s13733_s5  ;;  %v12723_v21 = vld [vmem:[%s19979_s2 + $0x60] sm:$0xff]  ;;  %v6216_v54 = vrot.slane %v16836_v55, 4 }
 0x810   : > { %6476 = vrot.lane.b32.xlu1 %v16741_v9, %s13733_s5  ;;  %6478 = vrot.lane.b32.xlu0 %v16727_v52, %s13733_s5  ;;  %v16850_v52 = vpop.permute.xlu0 %6066  ;;  %v12724_v9 = vld [vmem:[%s19979_s2 + $0x68] sm:$0xff] }
 0x814   : > { %6488 = vrot.lane.b32.xlu1 %v13329_v37, %s13733_s5  ;;  %6950 = vperm.xlu0 %13528, %v12725_v11   ;;  %v16859_v25 = vpop.permute.xlu0 %6054 }
 0x818   : > { %6480 = vrot.lane.b32.xlu1 %v20157_v49, %s13733_s5  ;;  %6940 = vperm.xlu0 %13528, %v12723_v21   ;;  %v16870_v10 = vpop.permute.xlu0 %5926 }
 0x81c   : > { %6955 = vperm.xlu1 %13529, %v12726_v38   ;;  %8414 = vrot.lane.b32.xlu0 %v20157_v49, %s13724_s23  ;;  %v16878_v29 = vpop.permute.xlu0 %5914 }
 0x820   : > { %6945 = vperm.xlu1 %13529, %v12724_v9   ;;  %8402 = vrot.lane.b32.xlu0 %v20157_v49, %s13724_s23 }
 0x824   : > { %8420 = vrot.lane.b32.xlu1 %v20157_v49, %s13724_s23  ;;  %8274 = vrot.lane.b32.xlu0 %v20157_v49, %s13725_s24 }
 0x828   : > { %8408 = vrot.lane.b32.xlu1 %v20157_v49, %s13724_s23 }
 0x82c   : > { %8280 = vrot.lane.b32.xlu1 %v20157_v49, %s13725_s24 }
 0x82e   : > { %v16886_v61 = vpop.permute.xlu0 %6330 }
 0x82f   : > { %v6354_v53 = vrot.slane %v16886_v61, 4 }
 0x832   : > { %v6333_v5 = vpop.permute.xlu1 %6332  ;;  %v16888_v58 = vpop.permute.xlu0 %6190 }
 0x833   : > { %v6355_v43 = vrot.slane %v6333_v5, 4 }
 0x835   : > { %v6368_v37 = vsel %vm609_vm1, %v6355_v43, %v6356_v33  ;;  %v6366_v19 = vsel %vm609_vm1, %v6354_v53, %v6355_v43 }
 0x836   : > { %v16890_v18 = vpop.permute.xlu1 %6192  ;;  %v16892_v15 = vpop.permute.xlu0 %6050  ;;  %v6367_v45 = vsel %vm2229_vm7, %v16886_v61, %v6366_v19 }
 0x837   : > { %v6215_v38 = vrot.slane %v16890_v18, 4 }
 0x83a   : > { %v16894_v30 = vpop.permute.xlu1 %6052  ;;  %v16896_v34 = vpop.permute.xlu0 %5910 }
 0x83e   : > { %v16898_v63 = vpop.permute.xlu1 %5912  ;;  %v6339_v31 = vpop.permute.xlu0 %6338 }
 0x83f   : > { %v6358_v26 = vrot.slane %v6339_v31, 4 }
 0x841   : > { %v6372_v39 = vsel %vm609_vm1, %v6358_v26, %v6359_v20 }
 0x842   : > { %v16900_v23 = vpop.permute.xlu1 %6336  ;;  %v16902_v14 = vpop.permute.xlu0 %6198  ;;  %v6373_v9 = vsel %vm2229_vm7, %v6339_v31, %v6372_v39  ;;  %v6085_v31 = vrot.slane %v16866_v7, 4 }
 0x843   : > { %v6357_v11 = vrot.slane %v16900_v23, 4  ;;  %v6218_v2 = vrot.slane %v16902_v14, 4 }
 0x845   : > { %v6370_v43 = vsel %vm609_vm1, %v6357_v11, %v6358_v26  ;;  %v6232_v39 = vsel %vm609_vm1, %v6218_v2, %v6219_v50 }
 0x846   : > { %v16904_v41 = vpop.permute.xlu1 %6196  ;;  %v16906_v1 = vpop.permute.xlu0 %6058  ;;  %v6233_v61 = vsel %vm2088_vm9, %v16902_v14, %v6232_v39 }
 0x84a   : > { %v16908_v28 = vpop.permute.xlu1 %6056  ;;  %v16910_v8 = vpop.permute.xlu0 %6342 }
 0x84b   : > { %v6360_v33 = vrot.slane %v16910_v8, 4 }
 0x84e   : > { %v16912_v16 = vpop.permute.xlu1 %5916  ;;  %v16914_v24 = vpop.permute.xlu0 %6202 }
 0x852   : > { %v6345_v62 = vpop.permute.xlu1 %6344  ;;  %v16916_v4 = vpop.permute.xlu0 %6062 }
 0x853   : > { %v6361_v3 = vrot.slane %v6345_v62, 4 }
 0x855   : > { %v6376_v13 = vsel %vm609_vm1, %v6361_v3, %v6362_v22  ;;  %v6374_v53 = vsel %vm609_vm1, %v6360_v33, %v6361_v3  ;;  %v6217_v3 = vrot.slane %v16904_v41, 4 }
 0x856   : > { %v16918_v57 = vpop.permute.xlu1 %6204  ;;  %v16920_v56 = vpop.permute.xlu0 %5922  ;;  %v6377_v6 = vsel %vm2229_vm7, %v6345_v62, %v6376_v13  ;;  %v6369_v62 = vsel %vm2229_vm7, %v6333_v5, %v6368_v37  ;;  %v6079_v13 = vrot.slane %v16876_v59, 4  ;;  %v6075_v37 = vrot.slane %v16894_v30, 4 }
 0x857   : > { %v6221_v20 = vrot.slane %v16918_v57, 4  ;;  %v16958_v32 = vcombine.high %v6369_v62, %v6373_v9  ;;  %v16972_v59 = vcombine.low %v6369_v62, %v6373_v9 }
 0x859   : > { %v6236_v26 = vsel %vm609_vm1, %v6221_v20, %v6222_v60 }
 0x85a   : > { %v16926_v12 = vpop.permute.xlu1 %6064  ;;  %v6351_v17 = vpop.permute.xlu0 %6350  ;;  %v6237_v9 = vsel %vm2088_vm9, %v16918_v57, %v6236_v26  ;;  %v6214_v57 = vrot.slane %v16888_v58, 4 }
 0x85b   : > { %v6364_v48 = vrot.slane %v6351_v17, 4  ;;  %v6081_v19 = vrot.slane %v16926_v12, 4 }
 0x85d   : > { %v6380_v21 = vsel %vm609_vm1, %v6364_v48, %v6365_v51  ;;  %v6082_v51 = vrot.slane %v16850_v52, 4  ;;  %v6228_v52 = vsel %vm609_vm1, %v6215_v38, %v6216_v54  ;;  %v6371_v54 = vsel %vm2229_vm7, %v16900_v23, %v6370_v43 }
 0x85e   : > { %v6381_v55 = vsel %vm2229_vm7, %v6351_v17, %v6380_v21  ;;  %v16943_v22 = vpop.permute.xlu1 %5924  ;;  %v16945_v40 = vpop.permute.xlu0 %5918  ;;  %v6076_v17 = vrot.slane %v16859_v25, 4  ;;  %v6078_v21 = vrot.slane %v16906_v1, 4  ;;  %v6229_v39 = vsel %vm2088_vm9, %v16890_v18, %v6228_v52 }
 0x85f   : > { %v16949_v47 = vcombine.low %v6377_v6, %v6381_v55  ;;  %v16951_v27 = vcombine.high %v6377_v6, %v6381_v55  ;;  %v6375_v6 = vsel %vm2229_vm7, %v16910_v8, %v6374_v53  ;;  %v6220_v53 = vrot.slane %v16914_v24, 4 }
 0x860   : > { %v17009_v26 = vcombine.high %v6229_v39, %v6233_v61  ;;  %v6074_v18 = vrot.slane %v16892_v15, 4  ;;  %v6226_v52 = vsel %vm609_vm1, %v6214_v57, %v6215_v38  ;;  %v5941_v57 = vrot.slane %v16943_v22, 4 }
 0x861   : > { %6889 = vmatprep.subr.bf16.mxu1 %v16951_v27 }
 0x862   : > { %v6349_v5 = vpop.permute.xlu1 %6348  ;;  %6890 = vmatpush1.bf16.msra.mxu1 %v16949_v47  ;;  %v6211_v25 = vpop.permute.xlu0 %6210 }
 0x863   : > { %v6363_v50 = vrot.slane %v6349_v5, 4  ;;  %v6224_v11 = vrot.slane %v6211_v25, 4  ;;  %6891 = vmatprep.subr.bf16.mxu1 %v16958_v32 }
 0x865   : > { %v6378_v60 = vsel %vm609_vm1, %v6363_v50, %v6364_v48  ;;  %v6240_v55 = vsel %vm609_vm1, %v6224_v11, %v6225_v0  ;;  %v6230_v50 = vsel %vm609_vm1, %v6217_v3, %v6218_v2  ;;  %v17028_v3 = vcombine.low %v6367_v45, %v6371_v54 }
 0x866   : > { %v6379_v23 = vsel %vm2229_vm7, %v6349_v5, %v6378_v60  ;;  %v6241_v14 = vsel %vm2088_vm9, %v6211_v25, %v6240_v55  ;;  %v16989_v62 = vpop.permute.xlu1 %5920  ;;  %6892 = vmatpush1.bf16.msra.mxu1 %v16972_v59  ;;  %v16992_v33 = vpop.permute.xlu0 %6482  ;;  %v17005_v5 = vcombine.high %v6367_v45, %v6371_v54  ;;  %v5942_v25 = vrot.slane %v16870_v10, 4 }
 0x867   : > { %v16994_v8 = vcombine.low %v6375_v6, %v6379_v23  ;;  %v16996_v48 = vcombine.high %v6375_v6, %v6379_v23  ;;  %v16998_v0 = vcombine.low %v6237_v9, %v6241_v14  ;;  %v17000_v43 = vcombine.high %v6237_v9, %v6241_v14 }
 0x868   : > { %v6092_v6 = vsel %vm609_vm1, %v6078_v21, %v6079_v13  ;;  %v6096_v10 = vsel %vm609_vm1, %v6081_v19, %v6082_v51  ;;  %v6234_v55 = vsel %vm609_vm1, %v6220_v53, %v6221_v20  ;;  %v6088_v13 = vsel %vm609_vm1, %v6075_v37, %v6076_v17 }
 0x869   : > { %6836 = vmatprep.subr.bf16.mxu0 %v16996_v48  ;;  %6893 = vmatprep.subr.bf16.mxu1 %v17000_v43  ;;  %v17032_v51 = vcombine.low %v6229_v39, %v6233_v61  ;;  %v6231_v20 = vsel %vm2088_vm9, %v16904_v41, %v6230_v50  ;;  %v6093_v23 = vsel %vm1947_vm10, %v16906_v1, %v6092_v6  ;;  %v6077_v14 = vrot.slane %v16908_v28, 4 }
 0x86a   : > { %v6209_v60 = vpop.permute.xlu1 %6208  ;;  %6837 = vmatpush1.bf16.msra.mxu0 %v16994_v8  ;;  %6894 = vmatpush1.bf16.msra.mxu1 %v16998_v0  ;;  %v6071_v2 = vpop.permute.xlu0 %6070  ;;  %v6097_v17 = vsel %vm1947_vm10, %v16926_v12, %v6096_v10  ;;  %v6235_v45 = vsel %vm2088_vm9, %v16914_v24, %v6234_v55  ;;  %v5939_v41 = vrot.slane %v16989_v62, 4  ;;  %v6089_v62 = vsel %vm1947_vm10, %v16894_v30, %v6088_v13 }
 0x86b   : > { %v6223_v9 = vrot.slane %v6209_v60, 4  ;;  %v6084_v38 = vrot.slane %v6071_v2, 4  ;;  %6838 = vmatprep.subr.bf16.mxu0 %v17005_v5  ;;  %6895 = vmatprep.subr.bf16.mxu1 %v17009_v26  ;;  %v5935_v10 = vrot.slane %v16898_v63, 4  ;;  %v6080_v55 = vrot.slane %v16916_v4, 4 }
 0x86c   : > { %v5936_v13 = vrot.slane %v16878_v29, 4  ;;  %v6086_v29 = vsel %vm609_vm1, %v6074_v18, %v6075_v37 }
 0x86d   : > { %v6238_v54 = vsel %vm609_vm1, %v6223_v9, %v6224_v11  ;;  %v6100_v61 = vsel %vm609_vm1, %v6084_v38, %v6085_v31  ;;  %v17073_v9 = vcombine.high %v6089_v62, %v6093_v23  ;;  %v6094_v1 = vsel %vm609_vm1, %v6080_v55, %v6081_v19 }
 0x86e   : > { %v6239_v39 = vsel %vm2088_vm9, %v6209_v60, %v6238_v54  ;;  %v6101_v53 = vsel %vm1947_vm10, %v6071_v2, %v6100_v61  ;;  %v17051_v50 = vpop.permute.xlu1 %6484  ;;  %6839 = vmatpush1.bf16.msra.mxu0 %v17028_v3  ;;  %6896 = vmatpush1.bf16.msra.mxu1 %v17032_v51  ;;  %v17055_v24 = vpop.permute.xlu0 %6486  ;;  %v6227_v60 = vsel %vm2088_vm9, %v16888_v58, %v6226_v52  ;;  %v5945_v58 = vrot.slane %v16882_v36, 4 }
 0x86f   : > { %v17057_v11 = vcombine.low %v6235_v45, %v6239_v39  ;;  %v17059_v7 = vcombine.high %v6235_v45, %v6239_v39  ;;  %v17061_v31 = vcombine.low %v6097_v17, %v6101_v53  ;;  %v17063_v6 = vcombine.high %v6097_v17, %v6101_v53 }
 0x870   : > { %v17071_v2 = vcombine.high %v6227_v60, %v6231_v20  ;;  %v6090_v45 = vsel %vm609_vm1, %v6077_v14, %v6078_v21  ;;  %v5938_v17 = vrot.slane %v16945_v40, 4  ;;  %v5956_v52 = vsel %vm609_vm1, %v5941_v57, %v5942_v25 }
 0x871   : > { %6840 = vmatprep.subr.bf16.mxu0 %v17059_v7  ;;  %6897 = vmatprep.subr.bf16.mxu1 %v17063_v6  ;;  %v5948_v12 = vsel %vm609_vm1, %v5935_v10, %v5936_v13  ;;  %v17100_v19 = vcombine.low %v6227_v60, %v6231_v20  ;;  %v17102_v25 = vcombine.low %v6089_v62, %v6093_v23  ;;  %v5937_v13 = vrot.slane %v16912_v16, 4 }
 0x872   : > { %v6069_v54 = vpop.permute.xlu1 %6068  ;;  %6841 = vmatpush1.bf16.msra.mxu0 %v17057_v11  ;;  %6898 = vmatpush1.bf16.msra.mxu1 %v17061_v31  ;;  %v5931_v21 = vpop.permute.xlu0 %5930  ;;  %v5952_v36 = vsel %vm609_vm1, %v5938_v17, %v5939_v41  ;;  %v6091_v30 = vsel %vm1947_vm10, %v16908_v28, %v6090_v45  ;;  %v5957_v37 = vsel %vm1806_vm12, %v16943_v22, %v5956_v52  ;;  %v5940_v52 = vrot.slane %v16920_v56, 4 }
 0x873   : > { %v6083_v14 = vrot.slane %v6069_v54, 4  ;;  %v5944_v61 = vrot.slane %v5931_v21, 4  ;;  %6842 = vmatprep.subr.bf16.mxu0 %v17071_v2  ;;  %6899 = vmatprep.subr.bf16.mxu1 %v17073_v9  ;;  %v6095_v18 = vsel %vm1947_vm10, %v16916_v4, %v6094_v1  ;;  %v5953_v53 = vsel %vm1806_vm12, %v16945_v40, %v5952_v36 }
 0x874   : > { %v5949_v40 = vsel %vm1806_vm12, %v16898_v63, %v5948_v12  ;;  %v6087_v45 = vsel %vm1947_vm10, %v16892_v15, %v6086_v29  ;;  %v5950_v1 = vsel %vm609_vm1, %v5937_v13, %v5938_v17  ;;  %v6502_v36 = vrot.slane %v17055_v24, 4 }
 0x875   : > { %v6098_v41 = vsel %vm609_vm1, %v6083_v14, %v6084_v38  ;;  %v5960_v39 = vsel %vm609_vm1, %v5944_v61, %v5945_v58  ;;  %v17133_v58 = vcombine.high %v6087_v45, %v6091_v30  ;;  %v5934_v29 = vrot.slane %v16896_v34, 4 }
 0x876   : > { %v6099_v20 = vsel %vm1947_vm10, %v6069_v54, %v6098_v41  ;;  %v5961_v23 = vsel %vm1806_vm12, %v5931_v21, %v5960_v39  ;;  %v6493_v62 = vpop.permute.xlu1 %6492  ;;  %6843 = vmatpush1.bf16.msra.mxu0 %v17100_v19  ;;  %6900 = vmatpush1.bf16.msra.mxu1 %v17102_v25  ;;  %v17118_v28 = vpop.permute.xlu0 %6470  ;;  %v17136_v54 = vcombine.high %v5949_v40, %v5953_v53  ;;  %v6501_v21 = vrot.slane %v17051_v50, 4 }
 0x877   : > { %v17120_v60 = vcombine.low %v6095_v18, %v6099_v20  ;;  %v17122_v4 = vcombine.high %v6095_v18, %v6099_v20  ;;  %v17124_v38 = vcombine.low %v5957_v37, %v5961_v23  ;;  %v17126_v55 = vcombine.high %v5957_v37, %v5961_v23 }
 0x878   : > { %v5954_v37 = vsel %vm609_vm1, %v5940_v52, %v5941_v57  ;;  %v17151_v17 = vcombine.low %v6087_v45, %v6091_v30  ;;  %v17153_v24 = vcombine.low %v5949_v40, %v5953_v53  ;;  %v5946_v18 = vsel %vm609_vm1, %v5934_v29, %v5935_v10 }
 0x879   : > { %6844 = vmatprep.subr.bf16.mxu0 %v17122_v4  ;;  %6901 = vmatprep.subr.bf16.mxu1 %v17126_v55  ;;  %v5951_v41 = vsel %vm1806_vm12, %v16912_v16, %v5950_v1  ;;  %v6516_v22 = vsel %vm609_vm1, %v6501_v21, %v6502_v36  ;;  %v5955_v57 = vsel %vm1806_vm12, %v16920_v56, %v5954_v37  ;;  %v6505_v53 = vrot.slane %v6493_v62, 4  ;;  %v20165_v1 = vld [vmem:[#allocation7_spill] sm:$0xff] }
 0x87a   : > { %v5929_v14 = vpop.permute.xlu1 %5928  ;;  %6845 = vmatpush1.bf16.msra.mxu0 %v17120_v60  ;;  %6902 = vmatpush1.bf16.msra.mxu1 %v17124_v38  ;;  %v6475_v15 = vpop.permute.xlu0 %6474  ;;  %v5947_v56 = vsel %vm1806_vm12, %v16896_v34, %v5946_v18  ;;  %v6517_v62 = vsel %vm2370_vm14, %v17051_v50, %v6516_v22  ;;  %v6500_v50 = vrot.slane %v16992_v33, 4 }
 0x87b   : > { %v5943_v12 = vrot.slane %v5929_v14, 4  ;;  %6846 = vmatprep.subr.bf16.mxu0 %v17133_v58  ;;  %6903 = vmatprep.subr.bf16.mxu1 %v17136_v54  ;;  %v17175_v40 = vcombine.high %v5947_v56, %v5951_v41  ;;  %v17189_v37 = vcombine.low %v5947_v56, %v5951_v41  ;;  %v20166_v41 = vld [vmem:[#allocation4_spill] sm:$0xff] }
 0x87c   : > { %v6514_v22 = vsel %vm609_vm1, %v6500_v50, %v6501_v21 }
 0x87d   : > { %v5958_v39 = vsel %vm609_vm1, %v5943_v12, %v5944_v61  ;;  %v20164_v61 = vld [vmem:[#allocation5_spill] sm:$0xff]  ;;  %v6515_v21 = vsel %vm2370_vm14, %v16992_v33, %v6514_v22 }
 0x87e   : > { %v5959_v20 = vsel %vm1806_vm12, %v5929_v14, %v5958_v39  ;;  %v6473_v30 = vpop.permute.xlu1 %6472  ;;  %6847 = vmatpush1.bf16.msra.mxu0 %v17151_v17  ;;  %6904 = vmatpush1.bf16.msra.mxu1 %v17153_v24  ;;  %v6491_v63 = vpop.permute.xlu0 %6490 }
 0x87f   : > { %v17167_v10 = vcombine.low %v5955_v57, %v5959_v20  ;;  %v17169_v23 = vcombine.high %v5955_v57, %v5959_v20  ;;  %v6504_v16 = vrot.slane %v6491_v63, 4  ;;  %12782 = vmatprep.subr.msk.bf16.mxu1 %vm609_vm1, %v20164_v61  ;;  %v6495_v18 = vrot.slane %v6473_v30, 4 }
 0x880   : > { %v6494_v57 = vrot.slane %v17118_v28, 4  ;;  %v6496_v20 = vrot.slane %v6475_v15, 4 }
 0x881   : > { %v6520_v45 = vsel %vm609_vm1, %v6504_v16, %v6505_v53  ;;  %6848 = vmatprep.subr.bf16.mxu0 %v17169_v23 }
 0x882   : > { %v6521_v13 = vsel %vm2370_vm14, %v6491_v63, %v6520_v45  ;;  %v6477_v52 = vpop.permute.xlu1 %6476  ;;  %6849 = vmatpush1.bf16.msra.mxu0 %v17167_v10  ;;  %6916 = vmatpush2.bf16.msra.mxu1 %v20165_v1  ;;  %v6479_v36 = vpop.permute.xlu0 %6478  ;;  %v6506_v56 = vsel %vm609_vm1, %v6494_v57, %v6495_v18  ;;  %v6508_v15 = vsel %vm609_vm1, %v6495_v18, %v6496_v20 }
 0x883   : > { %v17184_v14 = vcombine.low %v6517_v62, %v6521_v13  ;;  %v17186_v34 = vcombine.high %v6517_v62, %v6521_v13  ;;  %v6497_v29 = vrot.slane %v6477_v52, 4  ;;  %v6498_v12 = vrot.slane %v6479_v36, 4  ;;  %6850 = vmatprep.subr.bf16.mxu0 %v17175_v40 }
 0x884   : > { %v6509_v33 = vsel %vm2370_vm14, %v6473_v30, %v6508_v15  ;;  %v13629_v30 = vld [vmem:[%s19978_s1 + $0x1f0] ss:$8 sps:$4 sm:$0xff]   ;;  %v13645_v15 = vld [vmem:[%s19978_s1 + $0x254] ss:$8 sps:$4 sm:$0xff]  }
 0x885   : > { %6917 = vmatprep.subr.bf16.mxu1 %v17186_v34  ;;  %v6510_v63 = vsel %vm609_vm1, %v6497_v29, %v6498_v12 }
 0x886   : > { %v6489_v39 = vpop.permute.xlu1 %6488  ;;  %6851 = vmatpush1.bf16.msra.mxu0 %v17189_v37  ;;  %6918 = vmatpush2.bf16.msra.mxu1 %v17184_v14  ;;  %v6511_v62 = vsel %vm2370_vm14, %v6477_v52, %v6510_v63  ;;  %v13633_v63 = vld [vmem:[%s19978_s1 + $0x214] ss:$8 sps:$4 sm:$0xff]  }
 0x887   : > { %v6503_v53 = vrot.slane %v6489_v39, 4  ;;  %12779 = vmatprep.subr.msk.bf16.mxu0 %vm609_vm1, %v20166_v41 }
 0x889   : > { %v6518_v45 = vsel %vm609_vm1, %v6503_v53, %v6504_v16  ;;  %v6507_v16 = vsel %vm2370_vm14, %v17118_v28, %v6506_v56  ;;  %v13627_v28 = vld [vmem:[%s19978_s1 + $0x1f4] ss:$8 sps:$4 sm:$0xff]   ;;  %v13635_v53 = vld [vmem:[%s19978_s1 + $0x210] ss:$8 sps:$4 sm:$0xff]   ;;  %v13638_v56 = vld [vmem:[%s19978_s1 + $0x224] ss:$8 sps:$4 sm:$0xff]  }
 0x88a   : > { %v6519_v13 = vsel %vm2370_vm14, %v6489_v39, %v6518_v45  ;;  %v6481_v50 = vpop.permute.xlu1 %6480  ;;  %6863 = vmatpush2.bf16.msra.mxu0 %v20167_v42  ;;  %v17214_v57 = vcombine.high %v6507_v16, %v6511_v62  ;;  %v17226_v20 = vcombine.low %v6507_v16, %v6511_v62  ;;  %v13636_v45 = vld [vmem:[%s19978_s1 + $0x220] ss:$8 sps:$4 sm:$0xff]   ;;  %v13639_v62 = vld [vmem:[%s19978_s1 + $0x234] ss:$8 sps:$4 sm:$0xff]  }
 0x88b   : > { %v17208_v29 = vcombine.low %v6515_v21, %v6519_v13  ;;  %v17210_v35 = vcombine.high %v6515_v21, %v6519_v13  ;;  %v6499_v44 = vrot.slane %v6481_v50, 4  ;;  %v13641_v21 = vld [vmem:[%s19978_s1 + $0x230] ss:$8 sps:$4 sm:$0xff]   ;;  %v13644_v13 = vld [vmem:[%s19978_s1 + $0x244] ss:$8 sps:$4 sm:$0xff]  }
 0x88c   : > { %v13642_v50 = vld [vmem:[%s19978_s1 + $0x240] ss:$8 sps:$4 sm:$0xff]  }
 0x88d   : > { %v6512_v52 = vsel %vm609_vm1, %v6498_v12, %v6499_v44  ;;  %6864 = vmatprep.subr.bf16.mxu0 %v17210_v35  ;;  %v13624_v44 = vld [vmem:[%s19978_s1 + $0x1e0] ss:$8 sps:$4 sm:$0xff]  }
 0x88e   : > { %v6513_v39 = vsel %vm2370_vm14, %v6479_v36, %v6512_v52  ;;  %6865 = vmatpush2.bf16.msra.mxu0 %v17208_v29  ;;  %v13632_v36 = vld [vmem:[%s19978_s1 + $0x204] ss:$8 sps:$4 sm:$0xff]   ;;  %v13630_v12 = vld [vmem:[%s19978_s1 + $0x200] ss:$8 sps:$4 sm:$0xff]  }
 0x88f   : > { %v17221_v18 = vcombine.low %v6509_v33, %v6513_v39  ;;  %v17223_v22 = vcombine.high %v6509_v33, %v6513_v39  ;;  %6866 = vmatprep.subr.bf16.mxu0 %v17214_v57 }
 0x891   : > { %6919 = vmatprep.subr.bf16.mxu1 %v17223_v22 }
 0x892   : > { %6867 = vmatpush2.bf16.msra.mxu0 %v17226_v20  ;;  %6920 = vmatpush2.bf16.msra.mxu1 %v17221_v18 }
 0x893   : > { %6999 = vmatprep.subr.bf16.mxu0 %v16996_v48  ;;  %7052 = vmatprep.subr.bf16.mxu1 %v16951_v27 }
 0x895   : > { %6869 = vmatmul.mubr.bf16.vlgmr.msra.gmra.mxu0 %v13624_v44  ;;  %6922 = vmatmul.mubr.bf16.vlgmr.msra.gmra.mxu1 %v13624_v44 }
 0x896   : > { %7000 = vmatpush1.bf16.msra.mxu0 %v16994_v8  ;;  %7053 = vmatpush1.bf16.msra.mxu1 %v16949_v47 }
 0x897   : > { %7001 = vmatprep.subr.bf16.mxu0 %v17005_v5  ;;  %7054 = vmatprep.subr.bf16.mxu1 %v16958_v32 }
 0x898   : > { %12781 = vmatprep.mubr.msk.bf16.mxu0 %vm602_vm0, %v13627_v28  ;;  %12784 = vmatprep.mubr.msk.bf16.mxu1 %vm602_vm0, %v13627_v28 }
 0x89a   : > { %7002 = vmatpush1.bf16.msra.mxu0 %v17028_v3  ;;  %7055 = vmatpush1.bf16.msra.mxu1 %v16972_v59 }
 0x89b   : > { %7003 = vmatprep.subr.bf16.mxu0 %v17059_v7  ;;  %7056 = vmatprep.subr.bf16.mxu1 %v17000_v43 }
 0x89d   : > { %6879 = vmatmul.mubr.bf16.gmra.mxu0 %v13629_v30  ;;  %6930 = vmatmul.mubr.bf16.gmra.mxu1 %v13629_v30 }
 0x89e   : > { %7004 = vmatpush1.bf16.msra.mxu0 %v17057_v11  ;;  %7057 = vmatpush1.bf16.msra.mxu1 %v16998_v0 }
 0x89f   : > { %7005 = vmatprep.subr.bf16.mxu0 %v17071_v2  ;;  %7058 = vmatprep.subr.bf16.mxu1 %v17009_v26 }
 0x8a0   : > { %12794 = vmatprep.mubr.msk.bf16.mxu0 %vm602_vm0, %v13632_v36  ;;  %12797 = vmatprep.mubr.msk.bf16.mxu1 %vm602_vm0, %v13632_v36 }
 0x8a2   : > { %7006 = vmatpush1.bf16.msra.mxu0 %v17100_v19  ;;  %7059 = vmatpush1.bf16.msra.mxu1 %v17032_v51 }
 0x8a3   : > { %7007 = vmatprep.subr.bf16.mxu0 %v17122_v4  ;;  %7060 = vmatprep.subr.bf16.mxu1 %v17063_v6 }
 0x8a6   : > { %7008 = vmatpush1.bf16.msra.mxu0 %v17120_v60  ;;  %7061 = vmatpush1.bf16.msra.mxu1 %v17061_v31 }
 0x8a7   : > { %7009 = vmatprep.subr.bf16.mxu0 %v17133_v58  ;;  %7062 = vmatprep.subr.bf16.mxu1 %v17073_v9 }
 0x8aa   : > { %7010 = vmatpush1.bf16.msra.mxu0 %v17151_v17  ;;  %7063 = vmatpush1.bf16.msra.mxu1 %v17102_v25 }
 0x8ab   : > { %7011 = vmatprep.subr.bf16.mxu0 %v17169_v23  ;;  %7064 = vmatprep.subr.bf16.mxu1 %v17126_v55 }
 0x8ae   : > { %7012 = vmatpush1.bf16.msra.mxu0 %v17167_v10  ;;  %7065 = vmatpush1.bf16.msra.mxu1 %v17124_v38 }
 0x8af   : > { %7013 = vmatprep.subr.bf16.mxu0 %v17175_v40  ;;  %7066 = vmatprep.subr.bf16.mxu1 %v17136_v54 }
 0x8b2   : > { %7014 = vmatpush1.bf16.msra.mxu0 %v17189_v37  ;;  %7067 = vmatpush1.bf16.msra.mxu1 %v17153_v24 }
 0x8b3   : > { %12793 = vmatprep.subr.msk.bf16.mxu0 %vm609_vm1, %v20166_v41  ;;  %12796 = vmatprep.subr.msk.bf16.mxu1 %vm609_vm1, %v20164_v61 }
 0x8b6   : > { %7026 = vmatpush2.bf16.msra.mxu0 %v20167_v42  ;;  %7079 = vmatpush2.bf16.msra.mxu1 %v20165_v1 }
 0x8b7   : > { %7027 = vmatprep.subr.bf16.mxu0 %v17210_v35  ;;  %7080 = vmatprep.subr.bf16.mxu1 %v17186_v34 }
 0x8ba   : > { %7028 = vmatpush2.bf16.msra.mxu0 %v17208_v29  ;;  %7081 = vmatpush2.bf16.msra.mxu1 %v17184_v14 }
 0x8bb   : > { %7029 = vmatprep.subr.bf16.mxu0 %v17214_v57  ;;  %7082 = vmatprep.subr.bf16.mxu1 %v17223_v22 }
 0x8be   : > { %7030 = vmatpush2.bf16.msra.mxu0 %v17226_v20  ;;  %7083 = vmatpush2.bf16.msra.mxu1 %v17221_v18 }
 0x8bf   : > { %7218 = vmatprep.subr.bf16.mxu0 %v16996_v48  ;;  %7271 = vmatprep.subr.bf16.mxu1 %v16951_v27 }
 0x8c1   : > { %7032 = vmatmul.mubr.bf16.vlgmr.msra.gmra.mxu0 %v13630_v12  ;;  %7085 = vmatmul.mubr.bf16.vlgmr.msra.gmra.mxu1 %v13630_v12 }
 0x8c2   : > { %7219 = vmatpush1.bf16.msra.mxu0 %v16994_v8  ;;  %7272 = vmatpush1.bf16.msra.mxu1 %v16949_v47 }
 0x8c3   : > { %7220 = vmatprep.subr.bf16.mxu0 %v17005_v5  ;;  %7273 = vmatprep.subr.bf16.mxu1 %v16958_v32 }
 0x8c4   : > { %12795 = vmatprep.mubr.msk.bf16.mxu0 %vm602_vm0, %v13633_v63  ;;  %12798 = vmatprep.mubr.msk.bf16.mxu1 %vm602_vm0, %v13633_v63 }
 0x8c6   : > { %7221 = vmatpush1.bf16.msra.mxu0 %v17028_v3  ;;  %7274 = vmatpush1.bf16.msra.mxu1 %v16972_v59 }
 0x8c7   : > { %7222 = vmatprep.subr.bf16.mxu0 %v17059_v7  ;;  %7275 = vmatprep.subr.bf16.mxu1 %v17000_v43 }
 0x8c9   : > { %7042 = vmatmul.mubr.bf16.gmra.mxu0 %v13635_v53  ;;  %7095 = vmatmul.mubr.bf16.gmra.mxu1 %v13635_v53 }
 0x8ca   : > { %7223 = vmatpush1.bf16.msra.mxu0 %v17057_v11  ;;  %7276 = vmatpush1.bf16.msra.mxu1 %v16998_v0 }
 0x8cb   : > { %7224 = vmatprep.subr.bf16.mxu0 %v17071_v2  ;;  %7277 = vmatprep.subr.bf16.mxu1 %v17009_v26 }
 0x8cc   : > { %12808 = vmatprep.mubr.msk.bf16.mxu0 %vm602_vm0, %v13638_v56  ;;  %12811 = vmatprep.mubr.msk.bf16.mxu1 %vm602_vm0, %v13638_v56 }
 0x8ce   : > { %7225 = vmatpush1.bf16.msra.mxu0 %v17100_v19  ;;  %7278 = vmatpush1.bf16.msra.mxu1 %v17032_v51 }
 0x8cf   : > { %7226 = vmatprep.subr.bf16.mxu0 %v17122_v4  ;;  %7279 = vmatprep.subr.bf16.mxu1 %v17063_v6 }
 0x8d2   : > { %7227 = vmatpush1.bf16.msra.mxu0 %v17120_v60  ;;  %7280 = vmatpush1.bf16.msra.mxu1 %v17061_v31 }
 0x8d3   : > { %7228 = vmatprep.subr.bf16.mxu0 %v17133_v58  ;;  %7281 = vmatprep.subr.bf16.mxu1 %v17073_v9 }
 0x8d6   : > { %7229 = vmatpush1.bf16.msra.mxu0 %v17151_v17  ;;  %7282 = vmatpush1.bf16.msra.mxu1 %v17102_v25 }
 0x8d7   : > { %7230 = vmatprep.subr.bf16.mxu0 %v17169_v23  ;;  %7283 = vmatprep.subr.bf16.mxu1 %v17126_v55 }
 0x8da   : > { %7231 = vmatpush1.bf16.msra.mxu0 %v17167_v10  ;;  %7284 = vmatpush1.bf16.msra.mxu1 %v17124_v38 }
 0x8db   : > { %7232 = vmatprep.subr.bf16.mxu0 %v17175_v40  ;;  %7285 = vmatprep.subr.bf16.mxu1 %v17136_v54 }
 0x8de   : > { %7233 = vmatpush1.bf16.msra.mxu0 %v17189_v37  ;;  %7286 = vmatpush1.bf16.msra.mxu1 %v17153_v24 }
 0x8df   : > { %12807 = vmatprep.subr.msk.bf16.mxu0 %vm609_vm1, %v20166_v41  ;;  %12810 = vmatprep.subr.msk.bf16.mxu1 %vm609_vm1, %v20164_v61 }
 0x8e2   : > { %7245 = vmatpush2.bf16.msra.mxu0 %v20167_v42  ;;  %7298 = vmatpush2.bf16.msra.mxu1 %v20165_v1 }
 0x8e3   : > { %7246 = vmatprep.subr.bf16.mxu0 %v17210_v35  ;;  %7299 = vmatprep.subr.bf16.mxu1 %v17186_v34 }
 0x8e6   : > { %7247 = vmatpush2.bf16.msra.mxu0 %v17208_v29  ;;  %7300 = vmatpush2.bf16.msra.mxu1 %v17184_v14 }
 0x8e7   : > { %7248 = vmatprep.subr.bf16.mxu0 %v17214_v57  ;;  %7301 = vmatprep.subr.bf16.mxu1 %v17223_v22 }
 0x8ea   : > { %7249 = vmatpush2.bf16.msra.mxu0 %v17226_v20  ;;  %7302 = vmatpush2.bf16.msra.mxu1 %v17221_v18 }
 0x8eb   : > { %7437 = vmatprep.subr.bf16.mxu0 %v16996_v48  ;;  %7490 = vmatprep.subr.bf16.mxu1 %v16951_v27 }
 0x8ed   : > { %7251 = vmatmul.mubr.bf16.vlgmr.msra.gmra.mxu0 %v13636_v45  ;;  %7304 = vmatmul.mubr.bf16.vlgmr.msra.gmra.mxu1 %v13636_v45 }
 0x8ee   : > { %7438 = vmatpush1.bf16.msra.mxu0 %v16994_v8  ;;  %7491 = vmatpush1.bf16.msra.mxu1 %v16949_v47 }
 0x8ef   : > { %7439 = vmatprep.subr.bf16.mxu0 %v17005_v5  ;;  %7492 = vmatprep.subr.bf16.mxu1 %v16958_v32 }
 0x8f0   : > { %12809 = vmatprep.mubr.msk.bf16.mxu0 %vm602_vm0, %v13639_v62  ;;  %12812 = vmatprep.mubr.msk.bf16.mxu1 %vm602_vm0, %v13639_v62  ;;  %v17546_v62 = vpop.permute.xlu0 %6950 }
 0x8f2   : > { %7440 = vmatpush1.bf16.msra.mxu0 %v17028_v3  ;;  %7493 = vmatpush1.bf16.msra.mxu1 %v16972_v59 }
 0x8f3   : > { %7441 = vmatprep.subr.bf16.mxu0 %v17059_v7  ;;  %7494 = vmatprep.subr.bf16.mxu1 %v17000_v43 }
 0x8f5   : > { %7261 = vmatmul.mubr.bf16.gmra.mxu0 %v13641_v21  ;;  %7314 = vmatmul.mubr.bf16.gmra.mxu1 %v13641_v21 }
 0x8f6   : > { %7442 = vmatpush1.bf16.msra.mxu0 %v17057_v11  ;;  %7495 = vmatpush1.bf16.msra.mxu1 %v16998_v0 }
 0x8f7   : > { %7443 = vmatprep.subr.bf16.mxu0 %v17071_v2  ;;  %7496 = vmatprep.subr.bf16.mxu1 %v17009_v26 }
 0x8f8   : > { %12822 = vmatprep.mubr.msk.bf16.mxu0 %vm602_vm0, %v13644_v13  ;;  %12825 = vmatprep.mubr.msk.bf16.mxu1 %vm602_vm0, %v13644_v13  ;;  %v17548_v13 = vpop.permute.xlu1 %6955 }
 0x8fa   : > { %7444 = vmatpush1.bf16.msra.mxu0 %v17100_v19  ;;  %7497 = vmatpush1.bf16.msra.mxu1 %v17032_v51 }
 0x8fb   : > { %7445 = vmatprep.subr.bf16.mxu0 %v17122_v4  ;;  %7498 = vmatprep.subr.bf16.mxu1 %v17063_v6 }
 0x8fe   : > { %7446 = vmatpush1.bf16.msra.mxu0 %v17120_v60  ;;  %7499 = vmatpush1.bf16.msra.mxu1 %v17061_v31 }
 0x8ff   : > { %7447 = vmatprep.subr.bf16.mxu0 %v17133_v58  ;;  %7500 = vmatprep.subr.bf16.mxu1 %v17073_v9 }
 0x902   : > { %7448 = vmatpush1.bf16.msra.mxu0 %v17151_v17  ;;  %7501 = vmatpush1.bf16.msra.mxu1 %v17102_v25 }
 0x903   : > { %7449 = vmatprep.subr.bf16.mxu0 %v17169_v23  ;;  %7502 = vmatprep.subr.bf16.mxu1 %v17126_v55 }
 0x906   : > { %7450 = vmatpush1.bf16.msra.mxu0 %v17167_v10  ;;  %7503 = vmatpush1.bf16.msra.mxu1 %v17124_v38 }
 0x907   : > { %7451 = vmatprep.subr.bf16.mxu0 %v17175_v40  ;;  %7504 = vmatprep.subr.bf16.mxu1 %v17136_v54 }
 0x90a   : > { %7452 = vmatpush1.bf16.msra.mxu0 %v17189_v37  ;;  %7505 = vmatpush1.bf16.msra.mxu1 %v17153_v24 }
 0x90b   : > { %12821 = vmatprep.subr.msk.bf16.mxu0 %vm609_vm1, %v20166_v41  ;;  %12824 = vmatprep.subr.msk.bf16.mxu1 %vm609_vm1, %v20164_v61 }
 0x90e   : > { %7464 = vmatpush2.bf16.msra.mxu0 %v20167_v42  ;;  %7517 = vmatpush2.bf16.msra.mxu1 %v20165_v1 }
 0x90f   : > { %7465 = vmatprep.subr.bf16.mxu0 %v17210_v35  ;;  %7518 = vmatprep.subr.bf16.mxu1 %v17186_v34 }
 0x912   : > { %7466 = vmatpush2.bf16.msra.mxu0 %v17208_v29  ;;  %7519 = vmatpush2.bf16.msra.mxu1 %v17184_v14 }
 0x913   : > { %7467 = vmatprep.subr.bf16.mxu0 %v17214_v57  ;;  %7520 = vmatprep.subr.bf16.mxu1 %v17223_v22 }
 0x916   : > { %7468 = vmatpush2.bf16.msra.mxu0 %v17226_v20  ;;  %7521 = vmatpush2.bf16.msra.mxu1 %v17221_v18 }
 0x917   : > { %7656 = vmatprep.subr.bf16.mxu0 %v16996_v48  ;;  %7709 = vmatprep.subr.bf16.mxu1 %v16951_v27  ;;  %v13647_v27 = vld [vmem:[%s19978_s1 + $0x250] ss:$8 sps:$4 sm:$0xff]  }
 0x919   : > { %7470 = vmatmul.mubr.bf16.vlgmr.msra.gmra.mxu0 %v13642_v50  ;;  %7523 = vmatmul.mubr.bf16.vlgmr.msra.gmra.mxu1 %v13642_v50 }
 0x91a   : > { %7657 = vmatpush1.bf16.msra.mxu0 %v16994_v8  ;;  %7710 = vmatpush1.bf16.msra.mxu1 %v16949_v47  ;;  %v13650_v47 = vld [vmem:[%s19978_s1 + $0x264] ss:$8 sps:$4 sm:$0xff]  }
 0x91b   : > { %7658 = vmatprep.subr.bf16.mxu0 %v17005_v5  ;;  %7711 = vmatprep.subr.bf16.mxu1 %v16958_v32  ;;  %v13648_v32 = vld [vmem:[%s19978_s1 + $0x260] ss:$8 sps:$4 sm:$0xff]  }
 0x91c   : > { %12823 = vmatprep.mubr.msk.bf16.mxu0 %vm602_vm0, %v13645_v15  ;;  %12826 = vmatprep.mubr.msk.bf16.mxu1 %vm602_vm0, %v13645_v15 }
 0x91e   : > { %7659 = vmatpush1.bf16.msra.mxu0 %v17028_v3  ;;  %7712 = vmatpush1.bf16.msra.mxu1 %v16972_v59  ;;  %v13653_v59 = vld [vmem:[%s19978_s1 + $0x270] ss:$8 sps:$4 sm:$0xff]  }
 0x91f   : > { %7660 = vmatprep.subr.bf16.mxu0 %v17059_v7  ;;  %7713 = vmatprep.subr.bf16.mxu1 %v17000_v43 }
 0x921   : > { %7480 = vmatmul.mubr.bf16.gmra.mxu0 %v13647_v27  ;;  %7533 = vmatmul.mubr.bf16.gmra.mxu1 %v13647_v27  ;;  %v17552_v27 = vpop.permute.xlu0 %6940 }
 0x922   : > { %7661 = vmatpush1.bf16.msra.mxu0 %v17057_v11  ;;  %7714 = vmatpush1.bf16.msra.mxu1 %v16998_v0 }
 0x923   : > { %7662 = vmatprep.subr.bf16.mxu0 %v17071_v2  ;;  %7715 = vmatprep.subr.bf16.mxu1 %v17009_v26 }
 0x924   : > { %12836 = vmatprep.mubr.msk.bf16.mxu0 %vm602_vm0, %v13650_v47  ;;  %12839 = vmatprep.mubr.msk.bf16.mxu1 %vm602_vm0, %v13650_v47 }
 0x926   : > { %7663 = vmatpush1.bf16.msra.mxu0 %v17100_v19  ;;  %7716 = vmatpush1.bf16.msra.mxu1 %v17032_v51 }
 0x927   : > { %7664 = vmatprep.subr.bf16.mxu0 %v17122_v4  ;;  %7717 = vmatprep.subr.bf16.mxu1 %v17063_v6 }
 0x92a   : > { %7665 = vmatpush1.bf16.msra.mxu0 %v17120_v60  ;;  %7718 = vmatpush1.bf16.msra.mxu1 %v17061_v31 }
 0x92b   : > { %7666 = vmatprep.subr.bf16.mxu0 %v17133_v58  ;;  %7719 = vmatprep.subr.bf16.mxu1 %v17073_v9 }
 0x92e   : > { %7667 = vmatpush1.bf16.msra.mxu0 %v17151_v17  ;;  %7720 = vmatpush1.bf16.msra.mxu1 %v17102_v25 }
 0x92f   : > { %7668 = vmatprep.subr.bf16.mxu0 %v17169_v23  ;;  %7721 = vmatprep.subr.bf16.mxu1 %v17126_v55 }
 0x932   : > { %7669 = vmatpush1.bf16.msra.mxu0 %v17167_v10  ;;  %7722 = vmatpush1.bf16.msra.mxu1 %v17124_v38 }
 0x933   : > { %7670 = vmatprep.subr.bf16.mxu0 %v17175_v40  ;;  %7723 = vmatprep.subr.bf16.mxu1 %v17136_v54 }
 0x936   : > { %7671 = vmatpush1.bf16.msra.mxu0 %v17189_v37  ;;  %7724 = vmatpush1.bf16.msra.mxu1 %v17153_v24 }
 0x937   : > { %12835 = vmatprep.subr.msk.bf16.mxu0 %vm609_vm1, %v20166_v41  ;;  %12838 = vmatprep.subr.msk.bf16.mxu1 %vm609_vm1, %v20164_v61 }
 0x93a   : > { %7683 = vmatpush2.bf16.msra.mxu0 %v20167_v42  ;;  %7736 = vmatpush2.bf16.msra.mxu1 %v20165_v1 }
 0x93b   : > { %7684 = vmatprep.subr.bf16.mxu0 %v17210_v35  ;;  %7737 = vmatprep.subr.bf16.mxu1 %v17186_v34  ;;  %v13651_v35 = vld [vmem:[%s19978_s1 + $0x274] ss:$8 sps:$4 sm:$0xff]  }
 0x93e   : > { %7685 = vmatpush2.bf16.msra.mxu0 %v17208_v29  ;;  %7738 = vmatpush2.bf16.msra.mxu1 %v17184_v14 }
 0x93f   : > { %7686 = vmatprep.subr.bf16.mxu0 %v17214_v57  ;;  %7739 = vmatprep.subr.bf16.mxu1 %v17223_v22 }
 0x942   : > { %7687 = vmatpush2.bf16.msra.mxu0 %v17226_v20  ;;  %7740 = vmatpush2.bf16.msra.mxu1 %v17221_v18 }
 0x945   : > { %7689 = vmatmul.mubr.bf16.vlgmr.msra.gmra.mxu0 %v13648_v32  ;;  %7742 = vmatmul.mubr.bf16.vlgmr.msra.gmra.mxu1 %v13648_v32 }
 0x946   : > { %12837 = vmatprep.mubr.msk.bf16.mxu0 %vm602_vm0, %v13651_v35  ;;  %12840 = vmatprep.mubr.msk.bf16.mxu1 %vm602_vm0, %v13651_v35  ;;  %v17555_v35 = vpop.permute.xlu1 %6945 }
 0x94d   : > { %7699 = vmatmul.mubr.bf16.gmra.mxu0 %v13653_v59  ;;  %7752 = vmatmul.mubr.bf16.gmra.mxu1 %v13653_v59  ;;  %v17559_v59 = vpop.permute.xlu0 %8414 }
 0x94e   : > { %20170 = vst [vmem:[#allocation22_spill] sm:$0xff] %v17559_v59 }
 0x955   : > { %v17490_v8 = vpop.f32.mrf.mxu1  ;;  %v17498_v51 = vpop.f32.mrf.mxu0 }
 0x957   : > { %v6925_v48 = vpop.f32.mrf.mxu1  ;;  %v17500_v7 = vpop.f32.mrf.mxu0 }
 0x959   : > { %v17492_v0 = vpop.f32.mrf.mxu1  ;;  %v17502_v31 = vpop.f32.mrf.mxu0 }
 0x95b   : > { %v6928_v43 = vpop.f32.mrf.mxu1  ;;  %v17504_v6 = vpop.f32.mrf.mxu0 }
 0x95d   : > { %v17494_v5 = vpop.f32.mrf.mxu1  ;;  %v17506_v2 = vpop.f32.mrf.mxu0 }
 0x95f   : > { %v6933_v26 = vpop.f32.mrf.mxu1  ;;  %v17508_v9 = vpop.f32.mrf.mxu0 }
 0x960   : > { %v17562_v26 = vpop.permute.xlu1 %8420 }
 0x961   : > { %v17496_v3 = vpop.f32.mrf.mxu1  ;;  %v17510_v19 = vpop.f32.mrf.mxu0  ;;  %20171 = vst [vmem:[#allocation16_spill] sm:$0xff] %v17562_v26 }
 0x962   : > { %20168 = vst [vmem:[#allocation24_spill] sm:$0xff] %v17510_v19 }
 0x963   : > { %v6936_v11 = vpop.f32.mrf.mxu1  ;;  %v17512_v25 = vpop.f32.mrf.mxu0 }
 0x964   : > { %20169 = vst [vmem:[#allocation10_spill] sm:$0xff] %v17512_v25 }
 0x981   : > { %v7033_v60 = vpop.f32.mrf.mxu0  ;;  %v7086_v4 = vpop.f32.mrf.mxu1 }
 0x982   : > { %7121 = vrot.lane.b32.xlu0 %v7033_v60, %s13726_s25 }
 0x983   : > { %v7035_v38 = vpop.f32.mrf.mxu0  ;;  %v7088_v55 = vpop.f32.mrf.mxu1 }
 0x984   : > { %7123 = vrot.lane.b32.xlu1 %v7035_v38, %s13726_s25 }
 0x985   : > { %v7037_v58 = vpop.f32.mrf.mxu0  ;;  %v7090_v54 = vpop.f32.mrf.mxu1 }
 0x986   : > { %7125 = vrot.lane.b32.xlu0 %v7086_v4, %s13726_s25  ;;  %v17566_v4 = vpop.permute.xlu0 %8402 }
 0x987   : > { %v7039_v17 = vpop.f32.mrf.mxu0  ;;  %v7092_v10 = vpop.f32.mrf.mxu1  ;;  %20172 = vst [vmem:[#allocation12_spill] sm:$0xff] %v17566_v4 }
 0x988   : > { %7127 = vrot.lane.b32.xlu1 %v7088_v55, %s13726_s25 }
 0x989   : > { %v7043_v24 = vpop.f32.mrf.mxu0  ;;  %v7096_v40 = vpop.f32.mrf.mxu1 }
 0x98a   : > { %7129 = vrot.lane.b32.xlu0 %v7037_v58, %s13726_s25  ;;  %v17569_v58 = vpop.permute.xlu1 %8408 }
 0x98b   : > { %v7045_v23 = vpop.f32.mrf.mxu0  ;;  %v7098_v14 = vpop.f32.mrf.mxu1  ;;  %20173 = vst [vmem:[#allocation19_spill] sm:$0xff] %v17569_v58 }
 0x98c   : > { %7131 = vrot.lane.b32.xlu1 %v7039_v17, %s13726_s25 }
 0x98d   : > { %v7047_v34 = vpop.f32.mrf.mxu0  ;;  %v7100_v29 = vpop.f32.mrf.mxu1 }
 0x98e   : > { %7133 = vrot.lane.b32.xlu0 %v7090_v54, %s13726_s25 }
 0x98f   : > { %v7049_v37 = vpop.f32.mrf.mxu0  ;;  %v7102_v16 = vpop.f32.mrf.mxu1 }
 0x990   : > { %7135 = vrot.lane.b32.xlu1 %v7092_v10, %s13726_s25  ;;  %v17576_v10 = vpop.permute.xlu1 %8280 }
 0x991   : > { %20175 = vst [vmem:[#allocation20_spill] sm:$0xff] %v17576_v10 }
 0x992   : > { %7137 = vrot.lane.b32.xlu0 %v7043_v24, %s13726_s25  ;;  %v17573_v24 = vpop.permute.xlu0 %8274 }
 0x993   : > { %20174 = vst [vmem:[#allocation23_spill] sm:$0xff] %v17573_v24 }
 0x994   : > { %7139 = vrot.lane.b32.xlu1 %v7045_v23, %s13726_s25 }
 0x996   : > { %7141 = vrot.lane.b32.xlu0 %v7096_v40, %s13726_s25 }
 0x998   : > { %7143 = vrot.lane.b32.xlu1 %v7098_v14, %s13726_s25 }
 0x99a   : > { %7145 = vrot.lane.b32.xlu0 %v7047_v34, %s13726_s25 }
 0x99c   : > { %7147 = vrot.lane.b32.xlu1 %v7049_v37, %s13726_s25 }
 0x99e   : > { %7149 = vrot.lane.b32.xlu0 %v7100_v29, %s13726_s25 }
 0x9a0   : > { %7151 = vrot.lane.b32.xlu1 %v7102_v16, %s13726_s25 }
 0x9ad   : > { %v7252_v57 = vpop.f32.mrf.mxu0  ;;  %v7305_v52 = vpop.f32.mrf.mxu1 }
 0x9ae   : > { %7340 = vrot.lane.b32.xlu0 %v7252_v57, %s13727_s26 }
 0x9af   : > { %v7254_v33 = vpop.f32.mrf.mxu0  ;;  %v7307_v39 = vpop.f32.mrf.mxu1 }
 0x9b0   : > { %7342 = vrot.lane.b32.xlu1 %v7254_v33, %s13727_s26 }
 0x9b1   : > { %v7256_v18 = vpop.f32.mrf.mxu0  ;;  %v7309_v22 = vpop.f32.mrf.mxu1 }
 0x9b2   : > { %7344 = vrot.lane.b32.xlu0 %v7305_v52, %s13727_s26 }
 0x9b3   : > { %v7258_v20 = vpop.f32.mrf.mxu0  ;;  %v7311_v28 = vpop.f32.mrf.mxu1 }
 0x9b4   : > { %7346 = vrot.lane.b32.xlu1 %v7307_v39, %s13727_s26 }
 0x9b5   : > { %v7262_v44 = vpop.f32.mrf.mxu0  ;;  %v7315_v36 = vpop.f32.mrf.mxu1 }
 0x9b6   : > { %7348 = vrot.lane.b32.xlu0 %v7256_v18, %s13727_s26 }
 0x9b7   : > { %v7264_v30 = vpop.f32.mrf.mxu0  ;;  %v7317_v12 = vpop.f32.mrf.mxu1 }
 0x9b8   : > { %7350 = vrot.lane.b32.xlu1 %v7258_v20, %s13727_s26 }
 0x9b9   : > { %v7266_v63 = vpop.f32.mrf.mxu0  ;;  %v7319_v56 = vpop.f32.mrf.mxu1 }
 0x9ba   : > { %7352 = vrot.lane.b32.xlu0 %v7309_v22, %s13727_s26 }
 0x9bb   : > { %v7268_v53 = vpop.f32.mrf.mxu0  ;;  %v7321_v45 = vpop.f32.mrf.mxu1 }
 0x9bc   : > { %7354 = vrot.lane.b32.xlu1 %v7311_v28, %s13727_s26 }
 0x9be   : > { %7356 = vrot.lane.b32.xlu0 %v7262_v44, %s13727_s26 }
 0x9c0   : > { %7358 = vrot.lane.b32.xlu1 %v7264_v30, %s13727_s26 }
 0x9c2   : > { %7360 = vrot.lane.b32.xlu0 %v7315_v36, %s13727_s26 }
 0x9c4   : > { %7362 = vrot.lane.b32.xlu1 %v7317_v12, %s13727_s26 }
 0x9c6   : > { %7364 = vrot.lane.b32.xlu0 %v7266_v63, %s13727_s26 }
 0x9c8   : > { %7366 = vrot.lane.b32.xlu1 %v7268_v53, %s13727_s26 }
 0x9ca   : > { %7368 = vrot.lane.b32.xlu0 %v7319_v56, %s13727_s26 }
 0x9cc   : > { %7370 = vrot.lane.b32.xlu1 %v7321_v45, %s13727_s26 }
 0x9d9   : > { %v7471_v21 = vpop.f32.mrf.mxu0  ;;  %v7524_v50 = vpop.f32.mrf.mxu1 }
 0x9da   : > { %7559 = vrot.lane.b32.xlu0 %v7471_v21, %s13728_s27 }
 0x9db   : > { %v7473_v15 = vpop.f32.mrf.mxu0  ;;  %v7526_v47 = vpop.f32.mrf.mxu1 }
 0x9dc   : > { %7561 = vrot.lane.b32.xlu1 %v7473_v15, %s13728_s27 }
 0x9dd   : > { %v7475_v32 = vpop.f32.mrf.mxu0  ;;  %v7528_v48 = vpop.f32.mrf.mxu1 }
 0x9de   : > { %7563 = vrot.lane.b32.xlu0 %v7524_v50, %s13728_s27 }
 0x9df   : > { %v7477_v43 = vpop.f32.mrf.mxu0  ;;  %v7530_v60 = vpop.f32.mrf.mxu1 }
 0x9e0   : > { %7565 = vrot.lane.b32.xlu1 %v7526_v47, %s13728_s27 }
 0x9e1   : > { %v7481_v11 = vpop.f32.mrf.mxu0  ;;  %v7534_v55 = vpop.f32.mrf.mxu1 }
 0x9e2   : > { %7567 = vrot.lane.b32.xlu0 %v7475_v32, %s13728_s27 }
 0x9e3   : > { %v7483_v38 = vpop.f32.mrf.mxu0  ;;  %v7536_v54 = vpop.f32.mrf.mxu1 }
 0x9e4   : > { %7569 = vrot.lane.b32.xlu1 %v7477_v43, %s13728_s27 }
 0x9e5   : > { %v7485_v17 = vpop.f32.mrf.mxu0  ;;  %v7538_v40 = vpop.f32.mrf.mxu1 }
 0x9e6   : > { %7571 = vrot.lane.b32.xlu0 %v7528_v48, %s13728_s27 }
 0x9e7   : > { %v7487_v23 = vpop.f32.mrf.mxu0  ;;  %v7540_v34 = vpop.f32.mrf.mxu1 }
 0x9e8   : > { %7573 = vrot.lane.b32.xlu1 %v7530_v60, %s13728_s27 }
 0x9ea   : > { %7575 = vrot.lane.b32.xlu0 %v7481_v11, %s13728_s27 }
 0x9ec   : > { %7577 = vrot.lane.b32.xlu1 %v7483_v38, %s13728_s27 }
 0x9ee   : > { %7579 = vrot.lane.b32.xlu0 %v7534_v55, %s13728_s27 }
 0x9f0   : > { %7581 = vrot.lane.b32.xlu1 %v7536_v54, %s13728_s27 }
 0x9f2   : > { %7583 = vrot.lane.b32.xlu0 %v7485_v17, %s13728_s27 }
 0x9f4   : > { %7585 = vrot.lane.b32.xlu1 %v7487_v23, %s13728_s27  ;;  %v17580_v14 = vpop.permute.xlu0 %7121 }
 0x9f6   : > { %v17582_v37 = vpop.permute.xlu1 %7123  ;;  %7587 = vrot.lane.b32.xlu0 %v7538_v40, %s13728_s27 }
 0x9f8   : > { %7589 = vrot.lane.b32.xlu1 %v7540_v34, %s13728_s27  ;;  %v17586_v29 = vpop.permute.xlu0 %7125 }
 0x9fa   : > { %v17588_v16 = vpop.permute.xlu1 %7127 }
 0x9fc   : > { %v17590_v57 = vpop.permute.xlu0 %7129 }
 0x9fe   : > { %v17592_v52 = vpop.permute.xlu1 %7131 }
 0xa00   : > { %v17594_v33 = vpop.permute.xlu0 %7133 }
 0xa02   : > { %v17596_v18 = vpop.permute.xlu1 %7135 }
 0xa04   : > { %v17600_v44 = vpop.permute.xlu0 %7137 }
 0xa05   : > { %v7690_v39 = vpop.f32.mrf.mxu0  ;;  %v7743_v22 = vpop.f32.mrf.mxu1 }
 0xa06   : > { %7778 = vrot.lane.b32.xlu0 %v7690_v39, %s13729_s28  ;;  %v17603_v36 = vpop.permute.xlu1 %7139 }
 0xa07   : > { %v7692_v20 = vpop.f32.mrf.mxu0  ;;  %v7745_v28 = vpop.f32.mrf.mxu1 }
 0xa08   : > { %7780 = vrot.lane.b32.xlu1 %v7692_v20, %s13729_s28  ;;  %v17607_v53 = vpop.permute.xlu0 %7141 }
 0xa09   : > { %v7694_v30 = vpop.f32.mrf.mxu0  ;;  %v7747_v12 = vpop.f32.mrf.mxu1 }
 0xa0a   : > { %7782 = vrot.lane.b32.xlu0 %v7743_v22, %s13729_s28  ;;  %v17610_v45 = vpop.permute.xlu1 %7143 }
 0xa0b   : > { %v7696_v63 = vpop.f32.mrf.mxu0  ;;  %v7749_v21 = vpop.f32.mrf.mxu1 }
 0xa0c   : > { %7784 = vrot.lane.b32.xlu1 %v7745_v28, %s13729_s28  ;;  %v17614_v47 = vpop.permute.xlu0 %7145 }
 0xa0d   : > { %v7700_v56 = vpop.f32.mrf.mxu0  ;;  %v7753_v15 = vpop.f32.mrf.mxu1  ;;  %20176 = vst [vmem:[#allocation14_spill] sm:$0xff] %v17614_v47  ;;  %v7154_v47 = vsel %vm939_vm4, %v17582_v37, %v17586_v29 }
 0xa0e   : > { %7786 = vrot.lane.b32.xlu0 %v7694_v30, %s13729_s28  ;;  %v17617_v32 = vpop.permute.xlu1 %7147 }
 0xa0f   : > { %v7702_v50 = vpop.f32.mrf.mxu0  ;;  %v7755_v48 = vpop.f32.mrf.mxu1 }
 0xa10   : > { %7788 = vrot.lane.b32.xlu1 %v7696_v63, %s13729_s28  ;;  %v17621_v11 = vpop.permute.xlu0 %7149 }
 0xa11   : > { %v7704_v43 = vpop.f32.mrf.mxu0  ;;  %v7757_v38 = vpop.f32.mrf.mxu1 }
 0xa12   : > { %7790 = vrot.lane.b32.xlu0 %v7747_v12, %s13729_s28  ;;  %v17624_v55 = vpop.permute.xlu1 %7151 }
 0xa13   : > { %v7706_v60 = vpop.f32.mrf.mxu0  ;;  %v7759_v17 = vpop.f32.mrf.mxu1 }
 0xa14   : > { %7792 = vrot.lane.b32.xlu1 %v7749_v21, %s13729_s28 }
 0xa16   : > { %7794 = vrot.lane.b32.xlu0 %v7700_v56, %s13729_s28 }
 0xa18   : > { %7796 = vrot.lane.b32.xlu1 %v7702_v50, %s13729_s28 }
 0xa1a   : > { %7798 = vrot.lane.b32.xlu0 %v7753_v15, %s13729_s28 }
 0xa1c   : > { %7800 = vrot.lane.b32.xlu1 %v7755_v48, %s13729_s28 }
 0xa1e   : > { %7802 = vrot.lane.b32.xlu0 %v7704_v43, %s13729_s28 }
 0xa20   : > { %7804 = vrot.lane.b32.xlu1 %v7706_v60, %s13729_s28  ;;  %v7341_v54 = vpop.permute.xlu0 %7340 }
 0xa22   : > { %v7343_v23 = vpop.permute.xlu1 %7342  ;;  %7806 = vrot.lane.b32.xlu0 %v7757_v38, %s13729_s28 }
 0xa24   : > { %7808 = vrot.lane.b32.xlu1 %v7759_v17, %s13729_s28  ;;  %v7345_v40 = vpop.permute.xlu0 %7344 }
 0xa26   : > { %v7347_v34 = vpop.permute.xlu1 %7346  ;;  %8262 = vrot.lane.b32.xlu0 %v20157_v49, %s13725_s24 }
 0xa28   : > { %8268 = vrot.lane.b32.xlu1 %v20157_v49, %s13725_s24  ;;  %v17634_v39 = vpop.permute.xlu0 %7348 }
 0xa2a   : > { %8134 = vrot.lane.b32.xlu0 %v20157_v49, %s13730_s29  ;;  %v17638_v22 = vpop.permute.xlu1 %7350 }
 0xa2c   : > { %8140 = vrot.lane.b32.xlu1 %v20157_v49, %s13730_s29  ;;  %v17644_v20 = vpop.permute.xlu0 %7352 }
 0xa2e   : > { %8122 = vrot.lane.b32.xlu0 %v20157_v49, %s13730_s29  ;;  %v17648_v28 = vpop.permute.xlu1 %7354 }
 0xa30   : > { %8128 = vrot.lane.b32.xlu1 %v20157_v49, %s13730_s29  ;;  %v17654_v30 = vpop.permute.xlu0 %7356 }
 0xa32   : > { %7994 = vrot.lane.b32.xlu0 %v20157_v49, %s13731_s30  ;;  %v17658_v12 = vpop.permute.xlu1 %7358 }
 0xa34   : > { %8000 = vrot.lane.b32.xlu1 %v20157_v49, %s13731_s30  ;;  %v17660_v63 = vpop.permute.xlu0 %7360 }
 0xa36   : > { %7982 = vrot.lane.b32.xlu0 %v20157_v49, %s13731_s30  ;;  %v17662_v56 = vpop.permute.xlu1 %7362  ;;  %v7153_v49 = vsel %vm939_vm4, %v17580_v14, %v17582_v37  ;;  %v7155_v14 = vsel %vm939_vm4, %v17586_v29, %v17588_v16  ;;  %v6963_v37 = vadd.f32 %v17555_v35, %v17492_v0  ;;  %v7374_v0 = vsel %vm1159_vm8, %v7345_v40, %v7347_v34 }
 0xa38   : > { %v17664_v21 = vpop.permute.xlu0 %7364 }
 0xa39   : > { %20177 = vst [vmem:[#allocation9_spill] sm:$0xff] %v17664_v21  ;;  %v6958_v21 = vadd.f32 %v17552_v27, %v17498_v51 }
 0xa3a   : > { %v17666_v50 = vpop.permute.xlu1 %7366 }
 0xa3b   : > { %20178 = vst [vmem:[#allocation11_spill] sm:$0xff] %v17666_v50  ;;  %v7372_v50 = vsel %vm1159_vm8, %v7341_v54, %v7343_v23  ;;  %v7177_v25 = vadd.f32 %v7153_v49, %v6958_v21  ;;  %v7373_v54 = vsel %vm1159_vm8, %v7343_v23, %v7345_v40  ;;  %v17722_v49 = vadd.f32 %v17546_v62, %v17506_v2 }
 0xa3c   : > { %v17668_v15 = vpop.permute.xlu0 %7368  ;;  %v7158_v2 = vsel %vm939_vm4, %v17594_v33, %v17596_v18  ;;  %v7376_v18 = vsel %vm1159_vm8, %v17638_v22, %v17644_v20 }
 0xa3d   : > { %v7396_v29 = vadd.f32 %v7372_v50, %v7177_v25 }
 0xa3e   : > { %v17670_v48 = vpop.permute.xlu1 %7370 }
 0xa4c   : > { %v7560_v43 = vpop.permute.xlu0 %7559 }
 0xa4e   : > { %v7562_v60 = vpop.permute.xlu1 %7561 }
 0xa50   : > { %v7564_v38 = vpop.permute.xlu0 %7563 }
 0xa51   : > { %v7592_v23 = vsel %vm1379_vm11, %v7562_v60, %v7564_v38 }
 0xa52   : > { %v7566_v17 = vpop.permute.xlu1 %7565 }
 0xa54   : > { %v17672_v42 = vpop.permute.xlu0 %7567 }
 0xa56   : > { %v17674_v41 = vpop.permute.xlu1 %7569 }
 0xa58   : > { %v17676_v1 = vpop.permute.xlu0 %7571 }
 0xa5a   : > { %v17678_v61 = vpop.permute.xlu1 %7573 }
 0xa5c   : > { %v17680_v10 = vpop.permute.xlu0 %7575 }
 0xa5e   : > { %v17682_v24 = vpop.permute.xlu1 %7577 }
 0xa60   : > { %v17684_v4 = vpop.permute.xlu0 %7579 }
 0xa62   : > { %v17686_v26 = vpop.permute.xlu1 %7581 }
 0xa64   : > { %v17688_v58 = vpop.permute.xlu0 %7583 }
 0xa65   : > { %20179 = vst [vmem:[#allocation17_spill] sm:$0xff] %v17688_v58  ;;  %v6960_v58 = vadd.f32 %v17552_v27, %v17490_v8  ;;  %v7591_v8 = vsel %vm1379_vm11, %v7560_v43, %v7562_v60 }
 0xa66   : > { %v17690_v59 = vpop.permute.xlu1 %7585  ;;  %v7615_v25 = vadd.f32 %v7591_v8, %v7396_v29 }
 0xa67   : > { %20180 = vst [vmem:[#allocation13_spill] sm:$0xff] %v17690_v59  ;;  %v6959_v59 = vadd.f32 %v17552_v27, %v17500_v7  ;;  %v6962_v7 = vadd.f32 %v17555_v35, %v17504_v6  ;;  %v7179_v21 = vadd.f32 %v7155_v14, %v6960_v58  ;;  %v7157_v6 = vsel %vm939_vm4, %v17592_v52, %v17594_v33 }
 0xa68   : > { %v17697_v19 = vpop.permute.xlu0 %7587  ;;  %v6966_v58 = vadd.f32 %v17546_v62, %v17494_v5  ;;  %v7182_v33 = vadd.f32 %v7158_v2, %v6963_v37  ;;  %v7375_v37 = vsel %vm1159_vm8, %v17634_v39, %v17638_v22  ;;  %v7594_v39 = vsel %vm1379_vm11, %v17672_v42, %v17674_v41 }
 0xa69   : > { %20181 = vst [vmem:[#allocation8_spill] sm:$0xff] %v17697_v19  ;;  %v6961_v19 = vadd.f32 %v17555_v35, %v17502_v31  ;;  %v7178_v27 = vadd.f32 %v7154_v47, %v6959_v59  ;;  %v7156_v31 = vsel %vm939_vm4, %v17590_v57, %v17592_v52  ;;  %v6965_v57 = vadd.f32 %v17546_v62, %v17508_v9 }
 0xa6a   : > { %v17710_v51 = vpop.permute.xlu1 %7589  ;;  %v7593_v47 = vsel %vm1379_vm11, %v7564_v38, %v7566_v17  ;;  %v7398_v50 = vadd.f32 %v7374_v0, %v7179_v21  ;;  %v7181_v14 = vadd.f32 %v7157_v6, %v6962_v7  ;;  %v7160_v17 = vsel %vm939_vm4, %v17603_v36, %v17607_v53 }
 0xa6b   : > { %v7397_v35 = vadd.f32 %v7373_v54, %v7178_v27  ;;  %v7180_v34 = vadd.f32 %v7156_v31, %v6961_v19  ;;  %v7159_v19 = vsel %vm939_vm4, %v17600_v44, %v17603_v36  ;;  %v7377_v44 = vsel %vm1159_vm8, %v17644_v20, %v17648_v28 }
 0xa6c   : > { %v7617_v54 = vadd.f32 %v7593_v47, %v7398_v50  ;;  %v7400_v21 = vadd.f32 %v7376_v18, %v7181_v14  ;;  %v7595_v36 = vsel %vm1379_vm11, %v17674_v41, %v17676_v1  ;;  %v7161_v6 = vsel %vm939_vm4, %v17607_v53, %v17610_v45  ;;  %v20183_v50 = vld [vmem:[#allocation25_spill] sm:$0xff] }
 0xa6d   : > { %v7616_v52 = vadd.f32 %v7592_v23, %v7397_v35  ;;  %v7399_v2 = vadd.f32 %v7375_v37, %v7180_v34  ;;  %v7596_v20 = vsel %vm1379_vm11, %v17676_v1, %v17678_v61  ;;  %v20182_v28 = vmov 0.0  }
 0xa6e   : > { %v7183_v61 = vadd.f32 %v7159_v19, %v17722_v49  ;;  %v7378_v1 = vsel %vm1159_vm8, %v17654_v30, %v17658_v12  ;;  %v7380_v30 = vsel %vm1159_vm8, %v17660_v63, %v17662_v56  ;;  %v7598_v37 = vsel %vm1379_vm11, %v17682_v24, %v17684_v4 }
 0xa70   : > { %v7402_v19 = vadd.f32 %v7378_v1, %v7183_v61  ;;  %v7164_v61 = vsel %vm939_vm4, %v17621_v11, %v17624_v55  ;;  %v20185_v55 = vld [vmem:[#allocation10_spill] sm:$0xff] }
 0xa78   : > { %v7779_v16 = vpop.permute.xlu0 %7778 }
 0xa7a   : > { %v7781_v59 = vpop.permute.xlu1 %7780 }
 0xa7b   : > { %v7810_v40 = vsel %vm1599_vm13, %v7779_v16, %v7781_v59 }
 0xa7c   : > { %v7834_v43 = vadd.f32 %v7810_v40, %v7615_v25  ;;  %v7783_v60 = vpop.permute.xlu0 %7782  ;;  %v7401_v25 = vadd.f32 %v7377_v44, %v7182_v33  ;;  %v7618_v40 = vadd.f32 %v7594_v39, %v7399_v2  ;;  %v7379_v33 = vsel %vm1159_vm8, %v17658_v12, %v17660_v63 }
 0xa7d   : > { %v7811_v5 = vsel %vm1599_vm13, %v7781_v59, %v7783_v60  ;;  %v7619_v59 = vadd.f32 %v7595_v36, %v7400_v21  ;;  %v7599_v63 = vsel %vm1379_vm11, %v17684_v4, %v17686_v26 }
 0xa7e   : > { %vm7846_vm6 = vcmp.gt.f32.partialorder %v7834_v43, 0.0  ;;  %v7858_v9 = vmul.f32 0.2, %v7834_v43  ;;  %v7835_v62 = vadd.f32 %v7811_v5, %v7616_v52  ;;  %v7785_v38 = vpop.permute.xlu1 %7784  ;;  %v7620_v45 = vadd.f32 %v7596_v20, %v7401_v25 }
 0xa7f   : > { %v7812_v8 = vsel %vm1599_vm13, %v7783_v60, %v7785_v38 }
 0xa80   : > { %v7870_v7 = vsel %vm7846_vm6, %v7834_v43, %v7858_v9  ;;  %vm7847_vm15 = vcmp.gt.f32.partialorder %v7835_v62, 0.0  ;;  %v7859_v27 = vmul.f32 0.2, %v7835_v62  ;;  %v7836_v29 = vadd.f32 %v7812_v8, %v7617_v54  ;;  %v7787_v16 = vpop.permute.xlu0 %7786  ;;  %v20184_v43 = vld [vmem:[#allocation26_spill] sm:$0xff] }
 0xa81   : > { %v7882_v31 = vmul.f32 %v14438_v46, %v7870_v7  ;;  %v7184_v9 = vadd.f32 %v7160_v17, %v6965_v57  ;;  %v7597_v8 = vsel %vm1379_vm11, %v17680_v10, %v17682_v24 }
 0xa82   : > { %v7871_v22 = vsel %vm7847_vm15, %v7835_v62, %v7859_v27  ;;  %vm7848_vm2 = vcmp.gt.f32.partialorder %v7836_v29, 0.0  ;;  %v7860_v0 = vmul.f32 0.2, %v7836_v29  ;;  %v7789_v23 = vpop.permute.xlu1 %7788  ;;  %v7185_v62 = vadd.f32 %v7161_v6, %v6966_v58 }
 0xa83   : > { %v17772_v35 = vpack.c.bf16 %v7882_v31, %v20182_v28  ;;  %v7813_v42 = vsel %vm1599_vm13, %v7787_v16, %v7789_v23  ;;  %v7883_v52 = vmul.f32 %v20183_v50, %v7871_v22  ;;  %v7403_v12 = vadd.f32 %v7379_v33, %v7184_v9 }
 0xa84   : > { %v7872_v47 = vsel %vm7848_vm2, %v7836_v29, %v7860_v0  ;;  %v7791_v41 = vpop.permute.xlu0 %7790  ;;  %v7837_v5 = vadd.f32 %v7813_v42, %v7618_v40  ;;  %v7404_v7 = vadd.f32 %v7380_v30, %v7185_v62  ;;  %v7621_v24 = vadd.f32 %v7597_v8, %v7402_v19  ;;  %v20186_v62 = vld [vmem:[#allocation11_spill] sm:$0xff] }
 0xa85   : > { %v7884_v60 = vmul.f32 %v20184_v43, %v7872_v47  ;;  %v7814_v53 = vsel %vm1599_vm13, %v7789_v23, %v7791_v41  ;;  %8398 = vrot.lane.b32.xlu0 %v17772_v35, %s13724_s23  ;;  %v7622_v27 = vadd.f32 %v7598_v37, %v7403_v12  ;;  %v7163_v33 = vsel %vm939_vm4, %v17617_v32, %v17621_v11  ;;  %v20187_v11 = vld [vmem:[#allocation8_spill] sm:$0xff]  ;;  %v20188_v12 = vld [vmem:[#allocation13_spill] sm:$0xff] }
 0xa86   : > { %v7838_v34 = vadd.f32 %v7814_v53, %v7619_v59  ;;  %v7793_v14 = vpop.permute.xlu1 %7792  ;;  %v7861_v56 = vmul.f32 0.2, %v7837_v5  ;;  %vm7849_vm6 = vcmp.gt.f32.partialorder %v7837_v5, 0.0  ;;  %v7623_v10 = vadd.f32 %v7599_v63, %v7404_v7  ;;  %v20190_v7 = vld [vmem:[#allocation24_spill] sm:$0xff] }
 0xa87   : > { %v17787_v18 = vpack.c.bf16 %v7884_v60, %v7883_v52  ;;  %v7815_v54 = vsel %vm1599_vm13, %v7791_v41, %v7793_v14 }
 0xa88   : > { %v7839_v38 = vadd.f32 %v7815_v54, %v7620_v45  ;;  %v7795_v49 = vpop.permute.xlu0 %7794  ;;  %v7862_v57 = vmul.f32 0.2, %v7838_v34  ;;  %vm7850_vm5 = vcmp.gt.f32.partialorder %v7838_v34, 0.0  ;;  %v7873_v31 = vsel %vm7849_vm6, %v7837_v5, %v7861_v56 }
 0xa89   : > { %8258 = vrot.lane.b32.xlu0 %v17772_v35, %s13725_s24  ;;  %8400 = vrot.lane.b32.xlu1 %v17787_v18, %s13724_s23  ;;  %v7885_v59 = vmul.f32 %v14438_v46, %v7873_v31  ;;  %v7383_v5 = vsel %vm1159_vm8, %v17668_v15, %v17670_v48  ;;  %v6968_v54 = vadd.f32 %v17548_v13, %v20185_v55 }
 0xa8a   : > { %vm7851_vm3 = vcmp.gt.f32.partialorder %v7839_v38, 0.0  ;;  %v7863_v58 = vmul.f32 0.2, %v7839_v38  ;;  %v7797_v17 = vpop.permute.xlu1 %7796  ;;  %v7874_v26 = vsel %vm7850_vm5, %v7838_v34, %v7862_v57  ;;  %v6969_v34 = vadd.f32 %v17548_v13, %v17496_v3 }
 0xa8b   : > { %v7816_v21 = vsel %vm1599_vm13, %v7795_v49, %v7797_v17  ;;  %v7886_v2 = vmul.f32 %v20183_v50, %v7874_v26  ;;  %v17834_v45 = vpack.c.bf16 %v7885_v59, %v20182_v28  ;;  %v7602_v49 = vsel %vm1379_vm11, %v20187_v11, %v17710_v51  ;;  %v20189_v51 = vld [vmem:[#allocation14_spill] sm:$0xff] }
 0xa8c   : > { %v7875_v29 = vsel %vm7851_vm3, %v7839_v38, %v7863_v58  ;;  %v7799_v16 = vpop.permute.xlu0 %7798  ;;  %v7840_v0 = vadd.f32 %v7816_v21, %v7621_v24  ;;  %v7188_v9 = vadd.f32 %v7164_v61, %v6969_v34  ;;  %v7382_v38 = vsel %vm1159_vm8, %v20186_v62, %v17668_v15  ;;  %v20191_v21 = vld [vmem:[#allocation9_spill] sm:$0xff] }
 0xa8d   : > { %v7817_v44 = vsel %vm1599_vm13, %v7797_v17, %v7799_v16  ;;  %8118 = vrot.lane.b32.xlu0 %v17772_v35, %s13730_s29  ;;  %8260 = vrot.lane.b32.xlu1 %v17787_v18, %s13725_s24  ;;  %v7887_v39 = vmul.f32 %v20184_v43, %v7875_v29  ;;  %v7187_v19 = vadd.f32 %v7163_v33, %v6968_v54 }
 0xa8e   : > { %v7841_v4 = vadd.f32 %v7817_v44, %v7622_v27  ;;  %v7801_v36 = vpop.permute.xlu1 %7800  ;;  %v7864_v42 = vmul.f32 0.2, %v7840_v0  ;;  %vm7852_vm3 = vcmp.gt.f32.partialorder %v7840_v0, 0.0  ;;  %v7407_v30 = vadd.f32 %v7383_v5, %v7188_v9 }
 0xa8f   : > { %v7818_v22 = vsel %vm1599_vm13, %v7799_v16, %v7801_v36  ;;  %v17820_v47 = vpack.c.bf16 %v7887_v39, %v7886_v2  ;;  %v7601_v57 = vsel %vm1379_vm11, %v20188_v12, %v20187_v11  ;;  %v7406_v15 = vadd.f32 %v7382_v38, %v7187_v19 }
 0xa90   : > { %vm7853_vm15 = vcmp.gt.f32.partialorder %v7841_v4, 0.0  ;;  %v7865_v23 = vmul.f32 0.2, %v7841_v4  ;;  %v7842_v6 = vadd.f32 %v7818_v22, %v7623_v10  ;;  %v7803_v53 = vpop.permute.xlu0 %7802  ;;  %v7876_v14 = vsel %vm7852_vm3, %v7840_v0, %v7864_v42  ;;  %v20192_v10 = vld [vmem:[#allocation17_spill] sm:$0xff] }
 0xa91   : > { %7978 = vrot.lane.b32.xlu0 %v17772_v35, %s13731_s30  ;;  %8120 = vrot.lane.b32.xlu1 %v17787_v18, %s13730_s29  ;;  %v7888_v48 = vmul.f32 %v14438_v46, %v7876_v14  ;;  %v7626_v17 = vadd.f32 %v7602_v49, %v7407_v30  ;;  %v7162_v8 = vsel %vm939_vm4, %v20189_v51, %v17617_v32 }
 0xa92   : > { %v7877_v20 = vsel %vm7853_vm15, %v7841_v4, %v7865_v23  ;;  %vm7854_vm2 = vcmp.gt.f32.partialorder %v7842_v6, 0.0  ;;  %v7866_v25 = vmul.f32 0.2, %v7842_v6  ;;  %v7805_v40 = vpop.permute.xlu1 %7804  ;;  %v6967_v27 = vadd.f32 %v17548_v13, %v20190_v7 }
 0xa93   : > { %v7889_v52 = vmul.f32 %v20183_v50, %v7877_v20  ;;  %v13386_v56 = vpack.c.bf16 %v7888_v48, %v20182_v28  ;;  %v7625_v29 = vadd.f32 %v7601_v57, %v7406_v15  ;;  %v7381_v44 = vsel %vm1159_vm8, %v20191_v21, %v20186_v62 }
 0xa94   : > { %v7878_v41 = vsel %vm7854_vm2, %v7842_v6, %v7866_v25  ;;  %v7807_v37 = vpop.permute.xlu0 %7806  ;;  %v7186_v24 = vadd.f32 %v7162_v8, %v6967_v27  ;;  %v7600_v26 = vsel %vm1379_vm11, %v20192_v10, %v20188_v12  ;;  %v7819_v13 = vsel %vm1599_vm13, %v7803_v53, %v7805_v40  ;;  %v12904_v53 = vld [vmem:[%s19979_s2 + $0x98] sm:$0xff]  ;;  %v20196_v10 = vld [vmem:[#allocation16_spill] sm:$0xff] }
 0xa95   : > { %v7890_v60 = vmul.f32 %v20184_v43, %v7878_v41  ;;  %7980 = vrot.lane.b32.xlu1 %v17787_v18, %s13731_s30  ;;  %8406 = vrot.lane.b32.xlu0 %v17820_v47, %s13724_s23  ;;  %v7820_v63 = vsel %vm1599_vm13, %v7805_v40, %v7807_v37  ;;  %v20193_v40 = vmov 0.0|0.0  }
 0xa96   : > { %v7809_v3 = vpop.permute.xlu1 %7808  ;;  %v7844_v32 = vadd.f32 %v7820_v63, %v7625_v29  ;;  %v7405_v4 = vadd.f32 %v7381_v44, %v7186_v24  ;;  %v20195_v44 = vld [vmem:[#allocation19_spill] sm:$0xff] }
 0xa97   : > { %v17831_v1 = vpack.c.bf16 %v7890_v60, %v7889_v52  ;;  %v7821_v58 = vsel %vm1599_vm13, %v7807_v37, %v7809_v3  ;;  %v13656_v60 = vld [vmem:[%s19978_s1 + $0x284] ss:$8 sps:$4 sm:$0xff]   ;;  %v8427_v24 = vrot.slane %v20195_v44, 4 }
 0xa98   : > { %v7845_v16 = vadd.f32 %v7821_v58, %v7626_v17  ;;  %v7624_v31 = vadd.f32 %v7600_v26, %v7405_v4  ;;  %v7868_v39 = vmul.f32 0.2, %v7844_v32  ;;  %vm7856_vm6 = vcmp.gt.f32.partialorder %v7844_v32, 0.0  ;;  %v17929_v52 = vpop.permute.xlu0 %8262  ;;  %12958 = vmatprep.mubr.msk.bf16.mxu0 %vm602_vm0, %v13656_v60  ;;  %12961 = vmatprep.mubr.msk.bf16.mxu1 %vm602_vm0, %v13656_v60  ;;  %v20197_v4 = vld [vmem:[#allocation12_spill] sm:$0xff] }
 0xa99   : > { %8404 = vrot.lane.b32.xlu1 %v17834_v45, %s13724_s23  ;;  %8266 = vrot.lane.b32.xlu0 %v17820_v47, %s13725_s24  ;;  %v8433_v26 = vrot.slane %v20196_v10, 4 }
 0xa9a   : > { %v7869_v36 = vmul.f32 0.2, %v7845_v16  ;;  %vm7857_vm5 = vcmp.gt.f32.partialorder %v7845_v16, 0.0  ;;  %v7843_v22 = vadd.f32 %v7819_v13, %v7624_v31  ;;  %v7880_v23 = vsel %vm7856_vm6, %v7844_v32, %v7868_v39  ;;  %v17950_v61 = vpop.permute.xlu1 %8268  ;;  %v20198_v39 = vld [vmem:[#allocation23_spill] sm:$0xff] }
 0xa9b   : > { %v7892_v20 = vmul.f32 %v20183_v50, %v7880_v23 }
 0xa9c   : > { %v7881_v0 = vsel %vm7857_vm5, %v7845_v16, %v7869_v36  ;;  %v7867_v2 = vmul.f32 0.2, %v7843_v22  ;;  %vm7855_vm15 = vcmp.gt.f32.partialorder %v7843_v22, 0.0  ;;  %v20194_v16 = vld [vmem:[#allocation22_spill] sm:$0xff]  ;;  %v8424_v36 = vrot.slane %v20197_v4, 4 }
 0xa9d   : > { %8264 = vrot.lane.b32.xlu1 %v17834_v45, %s13725_s24  ;;  %8126 = vrot.lane.b32.xlu0 %v17820_v47, %s13730_s29  ;;  %v7893_v6 = vmul.f32 %v20184_v43, %v7881_v0  ;;  %v8430_v21 = vrot.slane %v20194_v16, 4  ;;  %v20203_v43 = vld [vmem:[#allocation6_spill] sm:$0xff] }
 0xa9e   : > { %v7879_v59 = vsel %vm7855_vm15, %v7843_v22, %v7867_v2  ;;  %v17959_v34 = vpop.permute.xlu1 %8140  ;;  %v8290_v22 = vrot.slane %v20198_v39, 4  ;;  %v20199_v2 = vld [vmem:[#allocation20_spill] sm:$0xff] }
 0xa9f   : > { %v13390_v25 = vpack.c.bf16 %v7893_v6, %v7892_v20  ;;  %v7891_v42 = vmul.f32 %v14438_v46, %v7879_v59  ;;  %v8293_v20 = vrot.slane %v20199_v2, 4  ;;  %v8287_v59 = vrot.slane %v17950_v61, 4 }
 0xaa1   : > { %8124 = vrot.lane.b32.xlu1 %v17834_v45, %s13730_s29  ;;  %8410 = vrot.lane.b32.xlu0 %v13386_v56, %s13724_s23  ;;  %v13389_v41 = vpack.c.bf16 %v7891_v42, %v20182_v28 }
 0xaa2   : > { %v17967_v33 = vpop.permute.xlu1 %8128 }
 0xaa5   : > { %7984 = vrot.lane.b32.xlu1 %v17834_v45, %s13731_s30  ;;  %8270 = vrot.lane.b32.xlu0 %v13386_v56, %s13725_s24 }
 0xaa6   : > { %v17973_v55 = vpop.permute.xlu1 %8000 }
 0xaa9   : > { %8130 = vrot.lane.b32.xlu0 %v13386_v56, %s13730_s29  ;;  %8412 = vrot.lane.b32.xlu1 %v17831_v1, %s13724_s23 }
 0xaad   : > { %7990 = vrot.lane.b32.xlu0 %v13386_v56, %s13731_s30  ;;  %8272 = vrot.lane.b32.xlu1 %v17831_v1, %s13725_s24 }
 0xab1   : > { %8132 = vrot.lane.b32.xlu1 %v17831_v1, %s13730_s29  ;;  %8418 = vrot.lane.b32.xlu0 %v13390_v25, %s13724_s23 }
 0xab5   : > { %7992 = vrot.lane.b32.xlu1 %v17831_v1, %s13731_s30  ;;  %7986 = vrot.lane.b32.xlu0 %v17820_v47, %s13731_s30 }
 0xab9   : > { %8416 = vrot.lane.b32.xlu1 %v13389_v41, %s13724_s23  ;;  %8278 = vrot.lane.b32.xlu0 %v13390_v25, %s13725_s24 }
 0xabd   : > { %7988 = vrot.lane.b32.xlu1 %v20193_v40, %s13731_s30  ;;  %8550 = vrot.lane.b32.xlu0 %v13386_v56, %s13733_s5 }
 0xac1   : > { %8276 = vrot.lane.b32.xlu1 %v13389_v41, %s13725_s24  ;;  %8138 = vrot.lane.b32.xlu0 %v13390_v25, %s13730_s29 }
 0xac5   : > { %8552 = vrot.lane.b32.xlu1 %v17831_v1, %s13733_s5  ;;  %8554 = vrot.lane.b32.xlu0 %v20193_v40, %s13733_s5 }
 0xac9   : > { %8136 = vrot.lane.b32.xlu1 %v13389_v41, %s13730_s29  ;;  %7998 = vrot.lane.b32.xlu0 %v13390_v25, %s13731_s30 }
 0xacd   : > { %8560 = vrot.lane.b32.xlu1 %v20193_v40, %s13733_s5  ;;  %8538 = vrot.lane.b32.xlu0 %v17772_v35, %s13733_s5  ;;  %v12903_v35 = vld [vmem:[%s19979_s2 + $0x90] sm:$0xff] }
 0xad1   : > { %7996 = vrot.lane.b32.xlu1 %v13389_v41, %s13731_s30  ;;  %8542 = vrot.lane.b32.xlu0 %v20193_v40, %s13733_s5 }
 0xad5   : > { %8540 = vrot.lane.b32.xlu1 %v17787_v18, %s13733_s5  ;;  %8558 = vrot.lane.b32.xlu0 %v13390_v25, %s13733_s5  ;;  %v12901_v18 = vld [vmem:[%s19979_s2 + $0x80] sm:$0xff]  ;;  %v8284_v25 = vrot.slane %v17929_v52, 4 }
 0xad9   : > { %8544 = vrot.lane.b32.xlu1 %v17834_v45, %s13733_s5  ;;  %8546 = vrot.lane.b32.xlu0 %v17820_v47, %s13733_s5  ;;  %v17943_v47 = vpop.permute.xlu0 %8134  ;;  %v12902_v45 = vld [vmem:[%s19979_s2 + $0x88] sm:$0xff] }
 0xadd   : > { %8556 = vrot.lane.b32.xlu1 %v13389_v41, %s13733_s5  ;;  %9018 = vperm.xlu0 %13528, %v12903_v35   ;;  %v17952_v1 = vpop.permute.xlu0 %8122 }
 0xae1   : > { %8548 = vrot.lane.b32.xlu1 %v20193_v40, %s13733_s5  ;;  %9008 = vperm.xlu0 %13528, %v12901_v18   ;;  %v17963_v14 = vpop.permute.xlu0 %7994 }
 0xae5   : > { %9023 = vperm.xlu1 %13529, %v12904_v53   ;;  %10482 = vrot.lane.b32.xlu0 %v20193_v40, %s13724_s23  ;;  %v17969_v5 = vpop.permute.xlu0 %7982 }
 0xae9   : > { %9013 = vperm.xlu1 %13529, %v12902_v45   ;;  %10470 = vrot.lane.b32.xlu0 %v20193_v40, %s13724_s23 }
 0xaed   : > { %10488 = vrot.lane.b32.xlu1 %v20193_v40, %s13724_s23 }
 0xaf1   : > { %10476 = vrot.lane.b32.xlu1 %v20193_v40, %s13724_s23 }
 0xaf7   : > { %v17975_v54 = vpop.permute.xlu0 %8398 }
 0xaf8   : > { %v8422_v42 = vrot.slane %v17975_v54, 4 }
 0xafb   : > { %v8401_v9 = vpop.permute.xlu1 %8400  ;;  %v17977_v3 = vpop.permute.xlu0 %8258 }
 0xafc   : > { %v8423_v32 = vrot.slane %v8401_v9, 4 }
 0xafe   : > { %v8436_v41 = vsel %vm609_vm1, %v8423_v32, %v8424_v36  ;;  %v8434_v44 = vsel %vm609_vm1, %v8422_v42, %v8423_v32 }
 0xaff   : > { %v17979_v62 = vpop.permute.xlu1 %8260  ;;  %v17981_v38 = vpop.permute.xlu0 %8118  ;;  %v8435_v2 = vsel %vm2229_vm7, %v17975_v54, %v8434_v44 }
 0xb00   : > { %v8283_v53 = vrot.slane %v17979_v62, 4 }
 0xb03   : > { %v17983_v11 = vpop.permute.xlu1 %8120  ;;  %v17985_v49 = vpop.permute.xlu0 %7978 }
 0xb07   : > { %v17987_v48 = vpop.permute.xlu1 %7980  ;;  %v8407_v19 = vpop.permute.xlu0 %8406 }
 0xb08   : > { %v8426_v27 = vrot.slane %v8407_v19, 4 }
 0xb0a   : > { %v8440_v0 = vsel %vm609_vm1, %v8426_v27, %v8427_v24 }
 0xb0b   : > { %v17989_v30 = vpop.permute.xlu1 %8404  ;;  %v17991_v37 = vpop.permute.xlu0 %8266  ;;  %v8441_v45 = vsel %vm2229_vm7, %v8407_v19, %v8440_v0  ;;  %v8153_v19 = vrot.slane %v17959_v34, 4 }
 0xb0c   : > { %v8425_v35 = vrot.slane %v17989_v30, 4  ;;  %v8286_v60 = vrot.slane %v17991_v37, 4 }
 0xb0e   : > { %v8438_v32 = vsel %vm609_vm1, %v8425_v35, %v8426_v27  ;;  %v8300_v0 = vsel %vm609_vm1, %v8286_v60, %v8287_v59 }
 0xb0f   : > { %v17993_v12 = vpop.permute.xlu1 %8264  ;;  %v17995_v57 = vpop.permute.xlu0 %8126  ;;  %v8301_v54 = vsel %vm2088_vm9, %v17991_v37, %v8300_v0 }
 0xb13   : > { %v17997_v58 = vpop.permute.xlu1 %8124  ;;  %v17999_v15 = vpop.permute.xlu0 %8410 }
 0xb14   : > { %v8428_v36 = vrot.slane %v17999_v15, 4 }
 0xb17   : > { %v18001_v17 = vpop.permute.xlu1 %7984  ;;  %v18003_v51 = vpop.permute.xlu0 %8270 }
 0xb1b   : > { %v8413_v8 = vpop.permute.xlu1 %8412  ;;  %v18005_v63 = vpop.permute.xlu0 %8130 }
 0xb1c   : > { %v8429_v29 = vrot.slane %v8413_v8, 4 }
 0xb1e   : > { %v8444_v23 = vsel %vm609_vm1, %v8429_v29, %v8430_v21  ;;  %v8442_v42 = vsel %vm609_vm1, %v8428_v36, %v8429_v29  ;;  %v8285_v29 = vrot.slane %v17993_v12, 4 }
 0xb1f   : > { %v18007_v56 = vpop.permute.xlu1 %8272  ;;  %v18009_v7 = vpop.permute.xlu0 %7990  ;;  %v8445_v16 = vsel %vm2229_vm7, %v8413_v8, %v8444_v23  ;;  %v8437_v8 = vsel %vm2229_vm7, %v8401_v9, %v8436_v41  ;;  %v8147_v23 = vrot.slane %v17967_v33, 4  ;;  %v8143_v41 = vrot.slane %v17983_v11, 4 }
 0xb20   : > { %v8289_v24 = vrot.slane %v18007_v56, 4  ;;  %v18047_v39 = vcombine.high %v8437_v8, %v8441_v45  ;;  %v18061_v33 = vcombine.low %v8437_v8, %v8441_v45 }
 0xb22   : > { %v8304_v27 = vsel %vm609_vm1, %v8289_v24, %v8290_v22 }
 0xb23   : > { %v18015_v13 = vpop.permute.xlu1 %8132  ;;  %v8419_v31 = vpop.permute.xlu0 %8418  ;;  %v8305_v45 = vsel %vm2088_vm9, %v18007_v56, %v8304_v27  ;;  %v8282_v56 = vrot.slane %v17977_v3, 4 }
 0xb24   : > { %v8432_v6 = vrot.slane %v8419_v31, 4  ;;  %v8149_v44 = vrot.slane %v18015_v13, 4 }
 0xb26   : > { %v8448_v18 = vsel %vm609_vm1, %v8432_v6, %v8433_v26  ;;  %v8150_v26 = vrot.slane %v17943_v47, 4  ;;  %v8296_v47 = vsel %vm609_vm1, %v8283_v53, %v8284_v25  ;;  %v8439_v25 = vsel %vm2229_vm7, %v17989_v30, %v8438_v32 }
 0xb27   : > { %v8449_v52 = vsel %vm2229_vm7, %v8419_v31, %v8448_v18  ;;  %v18032_v21 = vpop.permute.xlu1 %7992  ;;  %v18034_v61 = vpop.permute.xlu0 %7986  ;;  %v8144_v31 = vrot.slane %v17952_v1, 4  ;;  %v8146_v18 = vrot.slane %v17995_v57, 4  ;;  %v8297_v0 = vsel %vm2088_vm9, %v17979_v62, %v8296_v47 }
 0xb28   : > { %v18038_v10 = vcombine.low %v8445_v16, %v8449_v52  ;;  %v18040_v4 = vcombine.high %v8445_v16, %v8449_v52  ;;  %v8443_v16 = vsel %vm2229_vm7, %v17999_v15, %v8442_v42  ;;  %v8288_v42 = vrot.slane %v18003_v51, 4 }
 0xb29   : > { %v18098_v27 = vcombine.high %v8297_v0, %v8301_v54  ;;  %v8142_v62 = vrot.slane %v17981_v38, 4  ;;  %v8294_v47 = vsel %vm609_vm1, %v8282_v56, %v8283_v53  ;;  %v8009_v56 = vrot.slane %v18032_v21, 4 }
 0xb2a   : > { %8957 = vmatprep.subr.bf16.mxu1 %v18040_v4 }
 0xb2b   : > { %v8417_v9 = vpop.permute.xlu1 %8416  ;;  %8958 = vmatpush1.bf16.msra.mxu1 %v18038_v10  ;;  %v8279_v1 = vpop.permute.xlu0 %8278 }
 0xb2c   : > { %v8431_v59 = vrot.slane %v8417_v9, 4  ;;  %v8292_v35 = vrot.slane %v8279_v1, 4  ;;  %8959 = vmatprep.subr.bf16.mxu1 %v18047_v39 }
 0xb2e   : > { %v8446_v22 = vsel %vm609_vm1, %v8431_v59, %v8432_v6  ;;  %v8308_v52 = vsel %vm609_vm1, %v8292_v35, %v8293_v20  ;;  %v8298_v59 = vsel %vm609_vm1, %v8285_v29, %v8286_v60  ;;  %v18117_v29 = vcombine.low %v8435_v2, %v8439_v25 }
 0xb2f   : > { %v8447_v30 = vsel %vm2229_vm7, %v8417_v9, %v8446_v22  ;;  %v8309_v37 = vsel %vm2088_vm9, %v8279_v1, %v8308_v52  ;;  %v18078_v8 = vpop.permute.xlu1 %7988  ;;  %8960 = vmatpush1.bf16.msra.mxu1 %v18061_v33  ;;  %v18081_v36 = vpop.permute.xlu0 %8550  ;;  %v18094_v9 = vcombine.high %v8435_v2, %v8439_v25  ;;  %v8010_v1 = vrot.slane %v17963_v14, 4 }
 0xb30   : > { %v18083_v15 = vcombine.low %v8443_v16, %v8447_v30  ;;  %v18085_v6 = vcombine.high %v8443_v16, %v8447_v30  ;;  %v18087_v20 = vcombine.low %v8305_v45, %v8309_v37  ;;  %v18089_v32 = vcombine.high %v8305_v45, %v8309_v37 }
 0xb31   : > { %v8160_v16 = vsel %vm609_vm1, %v8146_v18, %v8147_v23  ;;  %v8164_v14 = vsel %vm609_vm1, %v8149_v44, %v8150_v26  ;;  %v8302_v52 = vsel %vm609_vm1, %v8288_v42, %v8289_v24  ;;  %v8156_v23 = vsel %vm609_vm1, %v8143_v41, %v8144_v31 }
 0xb32   : > { %8904 = vmatprep.subr.bf16.mxu0 %v18085_v6  ;;  %8961 = vmatprep.subr.bf16.mxu1 %v18089_v32  ;;  %v18121_v26 = vcombine.low %v8297_v0, %v8301_v54  ;;  %v8299_v24 = vsel %vm2088_vm9, %v17993_v12, %v8298_v59  ;;  %v8161_v30 = vsel %vm1947_vm10, %v17995_v57, %v8160_v16  ;;  %v8145_v37 = vrot.slane %v17997_v58, 4 }
 0xb33   : > { %v8277_v22 = vpop.permute.xlu1 %8276  ;;  %8905 = vmatpush1.bf16.msra.mxu0 %v18083_v15  ;;  %8962 = vmatpush1.bf16.msra.mxu1 %v18087_v20  ;;  %v8139_v60 = vpop.permute.xlu0 %8138  ;;  %v8165_v31 = vsel %vm1947_vm10, %v18015_v13, %v8164_v14  ;;  %v8303_v2 = vsel %vm2088_vm9, %v18003_v51, %v8302_v52  ;;  %v8007_v12 = vrot.slane %v18078_v8, 4  ;;  %v8157_v8 = vsel %vm1947_vm10, %v17983_v11, %v8156_v23 }
 0xb34   : > { %v8291_v45 = vrot.slane %v8277_v22, 4  ;;  %v8152_v53 = vrot.slane %v8139_v60, 4  ;;  %8906 = vmatprep.subr.bf16.mxu0 %v18094_v9  ;;  %8963 = vmatprep.subr.bf16.mxu1 %v18098_v27  ;;  %v8003_v14 = vrot.slane %v17987_v48, 4  ;;  %v8148_v52 = vrot.slane %v18005_v63, 4 }
 0xb35   : > { %v8004_v23 = vrot.slane %v17969_v5, 4  ;;  %v8154_v5 = vsel %vm609_vm1, %v8142_v62, %v8143_v41 }
 0xb36   : > { %v8306_v25 = vsel %vm609_vm1, %v8291_v45, %v8292_v35  ;;  %v8168_v54 = vsel %vm609_vm1, %v8152_v53, %v8153_v19  ;;  %v18162_v45 = vcombine.high %v8157_v8, %v8161_v30  ;;  %v8162_v57 = vsel %vm609_vm1, %v8148_v52, %v8149_v44 }
 0xb37   : > { %v8307_v0 = vsel %vm2088_vm9, %v8277_v22, %v8306_v25  ;;  %v8169_v42 = vsel %vm1947_vm10, %v8139_v60, %v8168_v54  ;;  %v18140_v59 = vpop.permute.xlu1 %8552  ;;  %8907 = vmatpush1.bf16.msra.mxu0 %v18117_v29  ;;  %8964 = vmatpush1.bf16.msra.mxu1 %v18121_v26  ;;  %v18144_v51 = vpop.permute.xlu0 %8554  ;;  %v8295_v22 = vsel %vm2088_vm9, %v17977_v3, %v8294_v47  ;;  %v8013_v3 = vrot.slane %v17973_v55, 4 }
 0xb38   : > { %v18146_v35 = vcombine.low %v8303_v2, %v8307_v0  ;;  %v18148_v34 = vcombine.high %v8303_v2, %v8307_v0  ;;  %v18150_v19 = vcombine.low %v8165_v31, %v8169_v42  ;;  %v18152_v16 = vcombine.high %v8165_v31, %v8169_v42 }
 0xb39   : > { %v18160_v60 = vcombine.high %v8295_v22, %v8299_v24  ;;  %v8158_v2 = vsel %vm609_vm1, %v8145_v37, %v8146_v18  ;;  %v8006_v31 = vrot.slane %v18034_v61, 4  ;;  %v8024_v47 = vsel %vm609_vm1, %v8009_v56, %v8010_v1 }
 0xb3a   : > { %8908 = vmatprep.subr.bf16.mxu0 %v18148_v34  ;;  %8965 = vmatprep.subr.bf16.mxu1 %v18152_v16  ;;  %v8016_v13 = vsel %vm609_vm1, %v8003_v14, %v8004_v23  ;;  %v18189_v44 = vcombine.low %v8295_v22, %v8299_v24  ;;  %v18191_v1 = vcombine.low %v8157_v8, %v8161_v30  ;;  %v8005_v23 = vrot.slane %v18001_v17, 4 }
 0xb3b   : > { %v8137_v25 = vpop.permute.xlu1 %8136  ;;  %8909 = vmatpush1.bf16.msra.mxu0 %v18146_v35  ;;  %8966 = vmatpush1.bf16.msra.mxu1 %v18150_v19  ;;  %v7999_v18 = vpop.permute.xlu0 %7998  ;;  %v8020_v55 = vsel %vm609_vm1, %v8006_v31, %v8007_v12  ;;  %v8159_v11 = vsel %vm1947_vm10, %v17997_v58, %v8158_v2  ;;  %v8025_v41 = vsel %vm1806_vm12, %v18032_v21, %v8024_v47  ;;  %v8008_v47 = vrot.slane %v18009_v7, 4 }
 0xb3c   : > { %v8151_v37 = vrot.slane %v8137_v25, 4  ;;  %v8012_v54 = vrot.slane %v7999_v18, 4  ;;  %8910 = vmatprep.subr.bf16.mxu0 %v18160_v60  ;;  %8967 = vmatprep.subr.bf16.mxu1 %v18162_v45  ;;  %v8163_v62 = vsel %vm1947_vm10, %v18005_v63, %v8162_v57  ;;  %v8021_v42 = vsel %vm1806_vm12, %v18034_v61, %v8020_v55 }
 0xb3d   : > { %v8017_v61 = vsel %vm1806_vm12, %v17987_v48, %v8016_v13  ;;  %v8155_v2 = vsel %vm1947_vm10, %v17981_v38, %v8154_v5  ;;  %v8018_v57 = vsel %vm609_vm1, %v8005_v23, %v8006_v31  ;;  %v8570_v55 = vrot.slane %v18144_v51, 4 }
 0xb3e   : > { %v8166_v12 = vsel %vm609_vm1, %v8151_v37, %v8152_v53  ;;  %v8028_v0 = vsel %vm609_vm1, %v8012_v54, %v8013_v3  ;;  %v18222_v3 = vcombine.high %v8155_v2, %v8159_v11  ;;  %v8002_v5 = vrot.slane %v17985_v49, 4 }
 0xb3f   : > { %v8167_v24 = vsel %vm1947_vm10, %v8137_v25, %v8166_v12  ;;  %v8029_v30 = vsel %vm1806_vm12, %v7999_v18, %v8028_v0  ;;  %v8561_v8 = vpop.permute.xlu1 %8560  ;;  %8911 = vmatpush1.bf16.msra.mxu0 %v18189_v44  ;;  %8968 = vmatpush1.bf16.msra.mxu1 %v18191_v1  ;;  %v18207_v58 = vpop.permute.xlu0 %8538  ;;  %v18225_v25 = vcombine.high %v8017_v61, %v8021_v42  ;;  %v8569_v18 = vrot.slane %v18140_v59, 4 }
 0xb40   : > { %v18209_v22 = vcombine.low %v8163_v62, %v8167_v24  ;;  %v18211_v63 = vcombine.high %v8163_v62, %v8167_v24  ;;  %v18213_v53 = vcombine.low %v8025_v41, %v8029_v30  ;;  %v18215_v52 = vcombine.high %v8025_v41, %v8029_v30 }
 0xb41   : > { %v8022_v41 = vsel %vm609_vm1, %v8008_v47, %v8009_v56  ;;  %v18240_v31 = vcombine.low %v8155_v2, %v8159_v11  ;;  %v18242_v51 = vcombine.low %v8017_v61, %v8021_v42  ;;  %v8014_v62 = vsel %vm609_vm1, %v8002_v5, %v8003_v14 }
 0xb42   : > { %8912 = vmatprep.subr.bf16.mxu0 %v18211_v63  ;;  %8969 = vmatprep.subr.bf16.mxu1 %v18215_v52  ;;  %v8019_v12 = vsel %vm1806_vm12, %v18001_v17, %v8018_v57  ;;  %v8584_v21 = vsel %vm609_vm1, %v8569_v18, %v8570_v55  ;;  %v8023_v56 = vsel %vm1806_vm12, %v18009_v7, %v8022_v41  ;;  %v8573_v42 = vrot.slane %v8561_v8, 4  ;;  %v20201_v57 = vld [vmem:[#allocation7_spill] sm:$0xff] }
 0xb43   : > { %v7997_v37 = vpop.permute.xlu1 %7996  ;;  %8913 = vmatpush1.bf16.msra.mxu0 %v18209_v22  ;;  %8970 = vmatpush1.bf16.msra.mxu1 %v18213_v53  ;;  %v8543_v38 = vpop.permute.xlu0 %8542  ;;  %v8015_v7 = vsel %vm1806_vm12, %v17985_v49, %v8014_v62  ;;  %v8585_v8 = vsel %vm2370_vm14, %v18140_v59, %v8584_v21  ;;  %v8568_v59 = vrot.slane %v18081_v36, 4 }
 0xb44   : > { %v8011_v13 = vrot.slane %v7997_v37, 4  ;;  %8914 = vmatprep.subr.bf16.mxu0 %v18222_v3  ;;  %8971 = vmatprep.subr.bf16.mxu1 %v18225_v25  ;;  %v18264_v61 = vcombine.high %v8015_v7, %v8019_v12  ;;  %v18278_v41 = vcombine.low %v8015_v7, %v8019_v12  ;;  %v20202_v12 = vld [vmem:[#allocation4_spill] sm:$0xff] }
 0xb45   : > { %v8582_v21 = vsel %vm609_vm1, %v8568_v59, %v8569_v18 }
 0xb46   : > { %v8026_v0 = vsel %vm609_vm1, %v8011_v13, %v8012_v54  ;;  %v20200_v54 = vld [vmem:[#allocation5_spill] sm:$0xff]  ;;  %v8583_v18 = vsel %vm2370_vm14, %v18081_v36, %v8582_v21 }
 0xb47   : > { %v8027_v24 = vsel %vm1806_vm12, %v7997_v37, %v8026_v0  ;;  %v8541_v11 = vpop.permute.xlu1 %8540  ;;  %8915 = vmatpush1.bf16.msra.mxu0 %v18240_v31  ;;  %8972 = vmatpush1.bf16.msra.mxu1 %v18242_v51  ;;  %v8559_v48 = vpop.permute.xlu0 %8558 }
 0xb48   : > { %v18256_v14 = vcombine.low %v8023_v56, %v8027_v24  ;;  %v18258_v30 = vcombine.high %v8023_v56, %v8027_v24  ;;  %v8572_v17 = vrot.slane %v8559_v48, 4  ;;  %12960 = vmatprep.subr.msk.bf16.mxu1 %vm609_vm1, %v20200_v54  ;;  %v8563_v62 = vrot.slane %v8541_v11, 4 }
 0xb49   : > { %v8562_v56 = vrot.slane %v18207_v58, 4  ;;  %v8564_v24 = vrot.slane %v8543_v38, 4 }
 0xb4a   : > { %v8588_v2 = vsel %vm609_vm1, %v8572_v17, %v8573_v42  ;;  %8916 = vmatprep.subr.bf16.mxu0 %v18258_v30 }
 0xb4b   : > { %v8589_v23 = vsel %vm2370_vm14, %v8559_v48, %v8588_v2  ;;  %v8545_v47 = vpop.permute.xlu1 %8544  ;;  %8917 = vmatpush1.bf16.msra.mxu0 %v18256_v14  ;;  %8984 = vmatpush2.bf16.msra.mxu1 %v20201_v57  ;;  %v8547_v55 = vpop.permute.xlu0 %8546  ;;  %v8574_v7 = vsel %vm609_vm1, %v8562_v56, %v8563_v62  ;;  %v8576_v38 = vsel %vm609_vm1, %v8563_v62, %v8564_v24 }
 0xb4c   : > { %v18273_v37 = vcombine.low %v8585_v8, %v8589_v23  ;;  %v18275_v49 = vcombine.high %v8585_v8, %v8589_v23  ;;  %v8565_v5 = vrot.slane %v8545_v47, 4  ;;  %v8566_v13 = vrot.slane %v8547_v55, 4  ;;  %8918 = vmatprep.subr.bf16.mxu0 %v18264_v61 }
 0xb4d   : > { %v8577_v36 = vsel %vm2370_vm14, %v8541_v11, %v8576_v38  ;;  %v13659_v11 = vld [vmem:[%s19978_s1 + $0x290] ss:$8 sps:$4 sm:$0xff]   ;;  %v13675_v38 = vld [vmem:[%s19978_s1 + $0x2f4] ss:$8 sps:$4 sm:$0xff]  }
 0xb4e   : > { %8985 = vmatprep.subr.bf16.mxu1 %v18275_v49  ;;  %v8578_v48 = vsel %vm609_vm1, %v8565_v5, %v8566_v13 }
 0xb4f   : > { %v8557_v0 = vpop.permute.xlu1 %8556  ;;  %8919 = vmatpush1.bf16.msra.mxu0 %v18278_v41  ;;  %8986 = vmatpush2.bf16.msra.mxu1 %v18273_v37  ;;  %v8579_v8 = vsel %vm2370_vm14, %v8545_v47, %v8578_v48  ;;  %v13663_v48 = vld [vmem:[%s19978_s1 + $0x2b4] ss:$8 sps:$4 sm:$0xff]  }
 0xb50   : > { %v8571_v42 = vrot.slane %v8557_v0, 4  ;;  %12957 = vmatprep.subr.msk.bf16.mxu0 %vm609_vm1, %v20202_v12 }
 0xb52   : > { %v8586_v2 = vsel %vm609_vm1, %v8571_v42, %v8572_v17  ;;  %v8575_v17 = vsel %vm2370_vm14, %v18207_v58, %v8574_v7  ;;  %v13657_v58 = vld [vmem:[%s19978_s1 + $0x294] ss:$8 sps:$4 sm:$0xff]   ;;  %v13665_v42 = vld [vmem:[%s19978_s1 + $0x2b0] ss:$8 sps:$4 sm:$0xff]   ;;  %v13668_v7 = vld [vmem:[%s19978_s1 + $0x2c4] ss:$8 sps:$4 sm:$0xff]  }
 0xb53   : > { %v8587_v23 = vsel %vm2370_vm14, %v8557_v0, %v8586_v2  ;;  %v8549_v59 = vpop.permute.xlu1 %8548  ;;  %8931 = vmatpush2.bf16.msra.mxu0 %v20203_v43  ;;  %v18303_v56 = vcombine.high %v8575_v17, %v8579_v8  ;;  %v18315_v24 = vcombine.low %v8575_v17, %v8579_v8  ;;  %v13666_v2 = vld [vmem:[%s19978_s1 + $0x2c0] ss:$8 sps:$4 sm:$0xff]   ;;  %v13669_v8 = vld [vmem:[%s19978_s1 + $0x2d4] ss:$8 sps:$4 sm:$0xff]  }
 0xb54   : > { %v18297_v5 = vcombine.low %v8583_v18, %v8587_v23  ;;  %v18299_v50 = vcombine.high %v8583_v18, %v8587_v23  ;;  %v8567_v28 = vrot.slane %v8549_v59, 4  ;;  %v13671_v18 = vld [vmem:[%s19978_s1 + $0x2d0] ss:$8 sps:$4 sm:$0xff]   ;;  %v13674_v23 = vld [vmem:[%s19978_s1 + $0x2e4] ss:$8 sps:$4 sm:$0xff]  }
 0xb55   : > { %v13672_v59 = vld [vmem:[%s19978_s1 + $0x2e0] ss:$8 sps:$4 sm:$0xff]  }
 0xb56   : > { %v8580_v47 = vsel %vm609_vm1, %v8566_v13, %v8567_v28  ;;  %8932 = vmatprep.subr.bf16.mxu0 %v18299_v50  ;;  %v13654_v28 = vld [vmem:[%s19978_s1 + $0x280] ss:$8 sps:$4 sm:$0xff]  }
 0xb57   : > { %v8581_v0 = vsel %vm2370_vm14, %v8547_v55, %v8580_v47  ;;  %8933 = vmatpush2.bf16.msra.mxu0 %v18297_v5  ;;  %v13662_v55 = vld [vmem:[%s19978_s1 + $0x2a4] ss:$8 sps:$4 sm:$0xff]   ;;  %v13660_v13 = vld [vmem:[%s19978_s1 + $0x2a0] ss:$8 sps:$4 sm:$0xff]  }
 0xb58   : > { %v18310_v62 = vcombine.low %v8577_v36, %v8581_v0  ;;  %v18312_v21 = vcombine.high %v8577_v36, %v8581_v0  ;;  %8934 = vmatprep.subr.bf16.mxu0 %v18303_v56 }
 0xb5a   : > { %8987 = vmatprep.subr.bf16.mxu1 %v18312_v21 }
 0xb5b   : > { %8935 = vmatpush2.bf16.msra.mxu0 %v18315_v24  ;;  %8988 = vmatpush2.bf16.msra.mxu1 %v18310_v62 }
 0xb5c   : > { %9067 = vmatprep.subr.bf16.mxu0 %v18085_v6  ;;  %9120 = vmatprep.subr.bf16.mxu1 %v18040_v4 }
 0xb5e   : > { %8937 = vmatmul.mubr.bf16.vlgmr.msra.gmra.mxu0 %v13654_v28  ;;  %8990 = vmatmul.mubr.bf16.vlgmr.msra.gmra.mxu1 %v13654_v28 }
 0xb5f   : > { %9068 = vmatpush1.bf16.msra.mxu0 %v18083_v15  ;;  %9121 = vmatpush1.bf16.msra.mxu1 %v18038_v10 }
 0xb60   : > { %9069 = vmatprep.subr.bf16.mxu0 %v18094_v9  ;;  %9122 = vmatprep.subr.bf16.mxu1 %v18047_v39 }
 0xb61   : > { %12959 = vmatprep.mubr.msk.bf16.mxu0 %vm602_vm0, %v13657_v58  ;;  %12962 = vmatprep.mubr.msk.bf16.mxu1 %vm602_vm0, %v13657_v58 }
 0xb63   : > { %9070 = vmatpush1.bf16.msra.mxu0 %v18117_v29  ;;  %9123 = vmatpush1.bf16.msra.mxu1 %v18061_v33 }
 0xb64   : > { %9071 = vmatprep.subr.bf16.mxu0 %v18148_v34  ;;  %9124 = vmatprep.subr.bf16.mxu1 %v18089_v32 }
 0xb66   : > { %8947 = vmatmul.mubr.bf16.gmra.mxu0 %v13659_v11  ;;  %8998 = vmatmul.mubr.bf16.gmra.mxu1 %v13659_v11 }
 0xb67   : > { %9072 = vmatpush1.bf16.msra.mxu0 %v18146_v35  ;;  %9125 = vmatpush1.bf16.msra.mxu1 %v18087_v20 }
 0xb68   : > { %9073 = vmatprep.subr.bf16.mxu0 %v18160_v60  ;;  %9126 = vmatprep.subr.bf16.mxu1 %v18098_v27 }
 0xb69   : > { %12972 = vmatprep.mubr.msk.bf16.mxu0 %vm602_vm0, %v13662_v55  ;;  %12975 = vmatprep.mubr.msk.bf16.mxu1 %vm602_vm0, %v13662_v55 }
 0xb6b   : > { %9074 = vmatpush1.bf16.msra.mxu0 %v18189_v44  ;;  %9127 = vmatpush1.bf16.msra.mxu1 %v18121_v26 }
 0xb6c   : > { %9075 = vmatprep.subr.bf16.mxu0 %v18211_v63  ;;  %9128 = vmatprep.subr.bf16.mxu1 %v18152_v16 }
 0xb6f   : > { %9076 = vmatpush1.bf16.msra.mxu0 %v18209_v22  ;;  %9129 = vmatpush1.bf16.msra.mxu1 %v18150_v19 }
 0xb70   : > { %9077 = vmatprep.subr.bf16.mxu0 %v18222_v3  ;;  %9130 = vmatprep.subr.bf16.mxu1 %v18162_v45 }
 0xb73   : > { %9078 = vmatpush1.bf16.msra.mxu0 %v18240_v31  ;;  %9131 = vmatpush1.bf16.msra.mxu1 %v18191_v1 }
 0xb74   : > { %9079 = vmatprep.subr.bf16.mxu0 %v18258_v30  ;;  %9132 = vmatprep.subr.bf16.mxu1 %v18215_v52 }
 0xb77   : > { %9080 = vmatpush1.bf16.msra.mxu0 %v18256_v14  ;;  %9133 = vmatpush1.bf16.msra.mxu1 %v18213_v53 }
 0xb78   : > { %9081 = vmatprep.subr.bf16.mxu0 %v18264_v61  ;;  %9134 = vmatprep.subr.bf16.mxu1 %v18225_v25 }
 0xb7b   : > { %9082 = vmatpush1.bf16.msra.mxu0 %v18278_v41  ;;  %9135 = vmatpush1.bf16.msra.mxu1 %v18242_v51 }
 0xb7c   : > { %12971 = vmatprep.subr.msk.bf16.mxu0 %vm609_vm1, %v20202_v12  ;;  %12974 = vmatprep.subr.msk.bf16.mxu1 %vm609_vm1, %v20200_v54 }
 0xb7f   : > { %9094 = vmatpush2.bf16.msra.mxu0 %v20203_v43  ;;  %9147 = vmatpush2.bf16.msra.mxu1 %v20201_v57 }
 0xb80   : > { %9095 = vmatprep.subr.bf16.mxu0 %v18299_v50  ;;  %9148 = vmatprep.subr.bf16.mxu1 %v18275_v49 }
 0xb83   : > { %9096 = vmatpush2.bf16.msra.mxu0 %v18297_v5  ;;  %9149 = vmatpush2.bf16.msra.mxu1 %v18273_v37 }
 0xb84   : > { %9097 = vmatprep.subr.bf16.mxu0 %v18303_v56  ;;  %9150 = vmatprep.subr.bf16.mxu1 %v18312_v21 }
 0xb87   : > { %9098 = vmatpush2.bf16.msra.mxu0 %v18315_v24  ;;  %9151 = vmatpush2.bf16.msra.mxu1 %v18310_v62 }
 0xb88   : > { %9286 = vmatprep.subr.bf16.mxu0 %v18085_v6  ;;  %9339 = vmatprep.subr.bf16.mxu1 %v18040_v4 }
 0xb8a   : > { %9100 = vmatmul.mubr.bf16.vlgmr.msra.gmra.mxu0 %v13660_v13  ;;  %9153 = vmatmul.mubr.bf16.vlgmr.msra.gmra.mxu1 %v13660_v13 }
 0xb8b   : > { %9287 = vmatpush1.bf16.msra.mxu0 %v18083_v15  ;;  %9340 = vmatpush1.bf16.msra.mxu1 %v18038_v10 }
 0xb8c   : > { %9288 = vmatprep.subr.bf16.mxu0 %v18094_v9  ;;  %9341 = vmatprep.subr.bf16.mxu1 %v18047_v39 }
 0xb8d   : > { %12973 = vmatprep.mubr.msk.bf16.mxu0 %vm602_vm0, %v13663_v48  ;;  %12976 = vmatprep.mubr.msk.bf16.mxu1 %vm602_vm0, %v13663_v48 }
 0xb8f   : > { %9289 = vmatpush1.bf16.msra.mxu0 %v18117_v29  ;;  %9342 = vmatpush1.bf16.msra.mxu1 %v18061_v33 }
 0xb90   : > { %9290 = vmatprep.subr.bf16.mxu0 %v18148_v34  ;;  %9343 = vmatprep.subr.bf16.mxu1 %v18089_v32 }
 0xb92   : > { %9110 = vmatmul.mubr.bf16.gmra.mxu0 %v13665_v42  ;;  %9163 = vmatmul.mubr.bf16.gmra.mxu1 %v13665_v42 }
 0xb93   : > { %9291 = vmatpush1.bf16.msra.mxu0 %v18146_v35  ;;  %9344 = vmatpush1.bf16.msra.mxu1 %v18087_v20 }
 0xb94   : > { %9292 = vmatprep.subr.bf16.mxu0 %v18160_v60  ;;  %9345 = vmatprep.subr.bf16.mxu1 %v18098_v27 }
 0xb95   : > { %12986 = vmatprep.mubr.msk.bf16.mxu0 %vm602_vm0, %v13668_v7  ;;  %12989 = vmatprep.mubr.msk.bf16.mxu1 %vm602_vm0, %v13668_v7 }
 0xb97   : > { %9293 = vmatpush1.bf16.msra.mxu0 %v18189_v44  ;;  %9346 = vmatpush1.bf16.msra.mxu1 %v18121_v26 }
 0xb98   : > { %9294 = vmatprep.subr.bf16.mxu0 %v18211_v63  ;;  %9347 = vmatprep.subr.bf16.mxu1 %v18152_v16 }
 0xb9b   : > { %9295 = vmatpush1.bf16.msra.mxu0 %v18209_v22  ;;  %9348 = vmatpush1.bf16.msra.mxu1 %v18150_v19 }
 0xb9c   : > { %9296 = vmatprep.subr.bf16.mxu0 %v18222_v3  ;;  %9349 = vmatprep.subr.bf16.mxu1 %v18162_v45 }
 0xb9f   : > { %9297 = vmatpush1.bf16.msra.mxu0 %v18240_v31  ;;  %9350 = vmatpush1.bf16.msra.mxu1 %v18191_v1 }
 0xba0   : > { %9298 = vmatprep.subr.bf16.mxu0 %v18258_v30  ;;  %9351 = vmatprep.subr.bf16.mxu1 %v18215_v52 }
 0xba3   : > { %9299 = vmatpush1.bf16.msra.mxu0 %v18256_v14  ;;  %9352 = vmatpush1.bf16.msra.mxu1 %v18213_v53 }
 0xba4   : > { %9300 = vmatprep.subr.bf16.mxu0 %v18264_v61  ;;  %9353 = vmatprep.subr.bf16.mxu1 %v18225_v25 }
 0xba7   : > { %9301 = vmatpush1.bf16.msra.mxu0 %v18278_v41  ;;  %9354 = vmatpush1.bf16.msra.mxu1 %v18242_v51 }
 0xba8   : > { %12985 = vmatprep.subr.msk.bf16.mxu0 %vm609_vm1, %v20202_v12  ;;  %12988 = vmatprep.subr.msk.bf16.mxu1 %vm609_vm1, %v20200_v54 }
 0xbab   : > { %9313 = vmatpush2.bf16.msra.mxu0 %v20203_v43  ;;  %9366 = vmatpush2.bf16.msra.mxu1 %v20201_v57 }
 0xbac   : > { %9314 = vmatprep.subr.bf16.mxu0 %v18299_v50  ;;  %9367 = vmatprep.subr.bf16.mxu1 %v18275_v49 }
 0xbaf   : > { %9315 = vmatpush2.bf16.msra.mxu0 %v18297_v5  ;;  %9368 = vmatpush2.bf16.msra.mxu1 %v18273_v37 }
 0xbb0   : > { %9316 = vmatprep.subr.bf16.mxu0 %v18303_v56  ;;  %9369 = vmatprep.subr.bf16.mxu1 %v18312_v21 }
 0xbb3   : > { %9317 = vmatpush2.bf16.msra.mxu0 %v18315_v24  ;;  %9370 = vmatpush2.bf16.msra.mxu1 %v18310_v62 }
 0xbb4   : > { %9505 = vmatprep.subr.bf16.mxu0 %v18085_v6  ;;  %9558 = vmatprep.subr.bf16.mxu1 %v18040_v4 }
 0xbb6   : > { %9319 = vmatmul.mubr.bf16.vlgmr.msra.gmra.mxu0 %v13666_v2  ;;  %9372 = vmatmul.mubr.bf16.vlgmr.msra.gmra.mxu1 %v13666_v2 }
 0xbb7   : > { %9506 = vmatpush1.bf16.msra.mxu0 %v18083_v15  ;;  %9559 = vmatpush1.bf16.msra.mxu1 %v18038_v10 }
 0xbb8   : > { %9507 = vmatprep.subr.bf16.mxu0 %v18094_v9  ;;  %9560 = vmatprep.subr.bf16.mxu1 %v18047_v39 }
 0xbb9   : > { %12987 = vmatprep.mubr.msk.bf16.mxu0 %vm602_vm0, %v13669_v8  ;;  %12990 = vmatprep.mubr.msk.bf16.mxu1 %vm602_vm0, %v13669_v8 }
 0xbbb   : > { %9508 = vmatpush1.bf16.msra.mxu0 %v18117_v29  ;;  %9561 = vmatpush1.bf16.msra.mxu1 %v18061_v33 }
 0xbbc   : > { %9509 = vmatprep.subr.bf16.mxu0 %v18148_v34  ;;  %9562 = vmatprep.subr.bf16.mxu1 %v18089_v32 }
 0xbbe   : > { %9329 = vmatmul.mubr.bf16.gmra.mxu0 %v13671_v18  ;;  %9382 = vmatmul.mubr.bf16.gmra.mxu1 %v13671_v18 }
 0xbbf   : > { %9510 = vmatpush1.bf16.msra.mxu0 %v18146_v35  ;;  %9563 = vmatpush1.bf16.msra.mxu1 %v18087_v20 }
 0xbc0   : > { %9511 = vmatprep.subr.bf16.mxu0 %v18160_v60  ;;  %9564 = vmatprep.subr.bf16.mxu1 %v18098_v27 }
 0xbc1   : > { %13000 = vmatprep.mubr.msk.bf16.mxu0 %vm602_vm0, %v13674_v23  ;;  %13003 = vmatprep.mubr.msk.bf16.mxu1 %vm602_vm0, %v13674_v23 }
 0xbc3   : > { %9512 = vmatpush1.bf16.msra.mxu0 %v18189_v44  ;;  %9565 = vmatpush1.bf16.msra.mxu1 %v18121_v26 }
 0xbc4   : > { %9513 = vmatprep.subr.bf16.mxu0 %v18211_v63  ;;  %9566 = vmatprep.subr.bf16.mxu1 %v18152_v16 }
 0xbc7   : > { %9514 = vmatpush1.bf16.msra.mxu0 %v18209_v22  ;;  %9567 = vmatpush1.bf16.msra.mxu1 %v18150_v19 }
 0xbc8   : > { %9515 = vmatprep.subr.bf16.mxu0 %v18222_v3  ;;  %9568 = vmatprep.subr.bf16.mxu1 %v18162_v45 }
 0xbcb   : > { %9516 = vmatpush1.bf16.msra.mxu0 %v18240_v31  ;;  %9569 = vmatpush1.bf16.msra.mxu1 %v18191_v1 }
 0xbcc   : > { %9517 = vmatprep.subr.bf16.mxu0 %v18258_v30  ;;  %9570 = vmatprep.subr.bf16.mxu1 %v18215_v52 }
 0xbcf   : > { %9518 = vmatpush1.bf16.msra.mxu0 %v18256_v14  ;;  %9571 = vmatpush1.bf16.msra.mxu1 %v18213_v53 }
 0xbd0   : > { %9519 = vmatprep.subr.bf16.mxu0 %v18264_v61  ;;  %9572 = vmatprep.subr.bf16.mxu1 %v18225_v25 }
 0xbd3   : > { %9520 = vmatpush1.bf16.msra.mxu0 %v18278_v41  ;;  %9573 = vmatpush1.bf16.msra.mxu1 %v18242_v51 }
 0xbd4   : > { %12999 = vmatprep.subr.msk.bf16.mxu0 %vm609_vm1, %v20202_v12  ;;  %13002 = vmatprep.subr.msk.bf16.mxu1 %vm609_vm1, %v20200_v54 }
 0xbd7   : > { %9532 = vmatpush2.bf16.msra.mxu0 %v20203_v43  ;;  %9585 = vmatpush2.bf16.msra.mxu1 %v20201_v57 }
 0xbd8   : > { %9533 = vmatprep.subr.bf16.mxu0 %v18299_v50  ;;  %9586 = vmatprep.subr.bf16.mxu1 %v18275_v49 }
 0xbdb   : > { %9534 = vmatpush2.bf16.msra.mxu0 %v18297_v5  ;;  %9587 = vmatpush2.bf16.msra.mxu1 %v18273_v37 }
 0xbdc   : > { %9535 = vmatprep.subr.bf16.mxu0 %v18303_v56  ;;  %9588 = vmatprep.subr.bf16.mxu1 %v18312_v21 }
 0xbdf   : > { %9536 = vmatpush2.bf16.msra.mxu0 %v18315_v24  ;;  %9589 = vmatpush2.bf16.msra.mxu1 %v18310_v62 }
 0xbe0   : > { %9724 = vmatprep.subr.bf16.mxu0 %v18085_v6  ;;  %9777 = vmatprep.subr.bf16.mxu1 %v18040_v4  ;;  %v13677_v4 = vld [vmem:[%s19978_s1 + $0x2f0] ss:$8 sps:$4 sm:$0xff]  }
 0xbe2   : > { %9538 = vmatmul.mubr.bf16.vlgmr.msra.gmra.mxu0 %v13672_v59  ;;  %9591 = vmatmul.mubr.bf16.vlgmr.msra.gmra.mxu1 %v13672_v59  ;;  %v18637_v59 = vpop.permute.xlu0 %9018 }
 0xbe3   : > { %9725 = vmatpush1.bf16.msra.mxu0 %v18083_v15  ;;  %9778 = vmatpush1.bf16.msra.mxu1 %v18038_v10  ;;  %v13680_v10 = vld [vmem:[%s19978_s1 + $0x304] ss:$8 sps:$4 sm:$0xff]  }
 0xbe4   : > { %9726 = vmatprep.subr.bf16.mxu0 %v18094_v9  ;;  %9779 = vmatprep.subr.bf16.mxu1 %v18047_v39  ;;  %v13678_v39 = vld [vmem:[%s19978_s1 + $0x300] ss:$8 sps:$4 sm:$0xff]  }
 0xbe5   : > { %13001 = vmatprep.mubr.msk.bf16.mxu0 %vm602_vm0, %v13675_v38  ;;  %13004 = vmatprep.mubr.msk.bf16.mxu1 %vm602_vm0, %v13675_v38 }
 0xbe7   : > { %9727 = vmatpush1.bf16.msra.mxu0 %v18117_v29  ;;  %9780 = vmatpush1.bf16.msra.mxu1 %v18061_v33  ;;  %v13683_v33 = vld [vmem:[%s19978_s1 + $0x310] ss:$8 sps:$4 sm:$0xff]  }
 0xbe8   : > { %9728 = vmatprep.subr.bf16.mxu0 %v18148_v34  ;;  %9781 = vmatprep.subr.bf16.mxu1 %v18089_v32 }
 0xbea   : > { %9548 = vmatmul.mubr.bf16.gmra.mxu0 %v13677_v4  ;;  %9601 = vmatmul.mubr.bf16.gmra.mxu1 %v13677_v4 }
 0xbeb   : > { %9729 = vmatpush1.bf16.msra.mxu0 %v18146_v35  ;;  %9782 = vmatpush1.bf16.msra.mxu1 %v18087_v20 }
 0xbec   : > { %9730 = vmatprep.subr.bf16.mxu0 %v18160_v60  ;;  %9783 = vmatprep.subr.bf16.mxu1 %v18098_v27 }
 0xbed   : > { %13014 = vmatprep.mubr.msk.bf16.mxu0 %vm602_vm0, %v13680_v10  ;;  %13017 = vmatprep.mubr.msk.bf16.mxu1 %vm602_vm0, %v13680_v10  ;;  %v18640_v10 = vpop.permute.xlu1 %9023 }
 0xbef   : > { %9731 = vmatpush1.bf16.msra.mxu0 %v18189_v44  ;;  %9784 = vmatpush1.bf16.msra.mxu1 %v18121_v26 }
 0xbf0   : > { %9732 = vmatprep.subr.bf16.mxu0 %v18211_v63  ;;  %9785 = vmatprep.subr.bf16.mxu1 %v18152_v16 }
 0xbf3   : > { %9733 = vmatpush1.bf16.msra.mxu0 %v18209_v22  ;;  %9786 = vmatpush1.bf16.msra.mxu1 %v18150_v19 }
 0xbf4   : > { %9734 = vmatprep.subr.bf16.mxu0 %v18222_v3  ;;  %9787 = vmatprep.subr.bf16.mxu1 %v18162_v45 }
 0xbf7   : > { %9735 = vmatpush1.bf16.msra.mxu0 %v18240_v31  ;;  %9788 = vmatpush1.bf16.msra.mxu1 %v18191_v1 }
 0xbf8   : > { %9736 = vmatprep.subr.bf16.mxu0 %v18258_v30  ;;  %9789 = vmatprep.subr.bf16.mxu1 %v18215_v52 }
 0xbfb   : > { %9737 = vmatpush1.bf16.msra.mxu0 %v18256_v14  ;;  %9790 = vmatpush1.bf16.msra.mxu1 %v18213_v53 }
 0xbfc   : > { %9738 = vmatprep.subr.bf16.mxu0 %v18264_v61  ;;  %9791 = vmatprep.subr.bf16.mxu1 %v18225_v25 }
 0xbff   : > { %9739 = vmatpush1.bf16.msra.mxu0 %v18278_v41  ;;  %9792 = vmatpush1.bf16.msra.mxu1 %v18242_v51 }
 0xc00   : > { %13013 = vmatprep.subr.msk.bf16.mxu0 %vm609_vm1, %v20202_v12  ;;  %13016 = vmatprep.subr.msk.bf16.mxu1 %vm609_vm1, %v20200_v54 }
 0xc03   : > { %9751 = vmatpush2.bf16.msra.mxu0 %v20203_v43  ;;  %9804 = vmatpush2.bf16.msra.mxu1 %v20201_v57 }
 0xc04   : > { %9752 = vmatprep.subr.bf16.mxu0 %v18299_v50  ;;  %9805 = vmatprep.subr.bf16.mxu1 %v18275_v49  ;;  %v13681_v50 = vld [vmem:[%s19978_s1 + $0x314] ss:$8 sps:$4 sm:$0xff]  }
 0xc07   : > { %9753 = vmatpush2.bf16.msra.mxu0 %v18297_v5  ;;  %9806 = vmatpush2.bf16.msra.mxu1 %v18273_v37 }
 0xc08   : > { %9754 = vmatprep.subr.bf16.mxu0 %v18303_v56  ;;  %9807 = vmatprep.subr.bf16.mxu1 %v18312_v21 }
 0xc0b   : > { %9755 = vmatpush2.bf16.msra.mxu0 %v18315_v24  ;;  %9808 = vmatpush2.bf16.msra.mxu1 %v18310_v62 }
 0xc0e   : > { %9757 = vmatmul.mubr.bf16.vlgmr.msra.gmra.mxu0 %v13678_v39  ;;  %9810 = vmatmul.mubr.bf16.vlgmr.msra.gmra.mxu1 %v13678_v39 }
 0xc0f   : > { %13015 = vmatprep.mubr.msk.bf16.mxu0 %vm602_vm0, %v13681_v50  ;;  %13018 = vmatprep.mubr.msk.bf16.mxu1 %vm602_vm0, %v13681_v50 }
 0xc16   : > { %9767 = vmatmul.mubr.bf16.gmra.mxu0 %v13683_v33  ;;  %9820 = vmatmul.mubr.bf16.gmra.mxu1 %v13683_v33  ;;  %v18644_v33 = vpop.permute.xlu0 %9008 }
 0xc1e   : > { %v18579_v15 = vpop.f32.mrf.mxu1  ;;  %v18587_v26 = vpop.f32.mrf.mxu0 }
 0xc20   : > { %v8993_v6 = vpop.f32.mrf.mxu1  ;;  %v18589_v34 = vpop.f32.mrf.mxu0 }
 0xc22   : > { %v18581_v20 = vpop.f32.mrf.mxu1  ;;  %v18591_v19 = vpop.f32.mrf.mxu0 }
 0xc24   : > { %v8996_v32 = vpop.f32.mrf.mxu1  ;;  %v18593_v16 = vpop.f32.mrf.mxu0 }
 0xc25   : > { %v18647_v32 = vpop.permute.xlu1 %9013 }
 0xc26   : > { %v18583_v9 = vpop.f32.mrf.mxu1  ;;  %v18595_v60 = vpop.f32.mrf.mxu0 }
 0xc28   : > { %v9001_v27 = vpop.f32.mrf.mxu1  ;;  %v18597_v45 = vpop.f32.mrf.mxu0 }
 0xc2a   : > { %v18585_v29 = vpop.f32.mrf.mxu1  ;;  %v18599_v44 = vpop.f32.mrf.mxu0 }
 0xc2b   : > { %20204 = vst [vmem:[#allocation21_spill] sm:$0xff] %v18599_v44  ;;  %v9028_v44 = vadd.f32 %v18644_v33, %v18579_v15  ;;  %v9030_v15 = vadd.f32 %v18647_v32, %v18593_v16 }
 0xc2c   : > { %v9004_v35 = vpop.f32.mrf.mxu1  ;;  %v18601_v1 = vpop.f32.mrf.mxu0 }
 0xc2d   : > { %v18651_v35 = vpop.permute.xlu0 %10482 }
 0xc2e   : > { %20205 = vst [vmem:[#allocation15_spill] sm:$0xff] %v18651_v35 }
 0xc4a   : > { %v9101_v22 = vpop.f32.mrf.mxu0  ;;  %v9154_v63 = vpop.f32.mrf.mxu1 }
 0xc4b   : > { %9189 = vrot.lane.b32.xlu0 %v9101_v22, %s13726_s25 }
 0xc4c   : > { %v9103_v53 = vpop.f32.mrf.mxu0  ;;  %v9156_v52 = vpop.f32.mrf.mxu1 }
 0xc4d   : > { %9191 = vrot.lane.b32.xlu1 %v9103_v53, %s13726_s25  ;;  %v18654_v53 = vpop.permute.xlu1 %10488 }
 0xc4e   : > { %v9105_v3 = vpop.f32.mrf.mxu0  ;;  %v9158_v25 = vpop.f32.mrf.mxu1  ;;  %20206 = vst [vmem:[#allocation18_spill] sm:$0xff] %v18654_v53 }
 0xc4f   : > { %9193 = vrot.lane.b32.xlu0 %v9154_v63, %s13726_s25 }
 0xc50   : > { %v9107_v31 = vpop.f32.mrf.mxu0  ;;  %v9160_v14 = vpop.f32.mrf.mxu1 }
 0xc51   : > { %9195 = vrot.lane.b32.xlu1 %v9156_v52, %s13726_s25 }
 0xc52   : > { %v9111_v51 = vpop.f32.mrf.mxu0  ;;  %v9164_v61 = vpop.f32.mrf.mxu1 }
 0xc53   : > { %9197 = vrot.lane.b32.xlu0 %v9105_v3, %s13726_s25 }
 0xc54   : > { %v9113_v30 = vpop.f32.mrf.mxu0  ;;  %v9166_v37 = vpop.f32.mrf.mxu1 }
 0xc55   : > { %9199 = vrot.lane.b32.xlu1 %v9107_v31, %s13726_s25  ;;  %v18661_v31 = vpop.permute.xlu1 %10476 }
 0xc56   : > { %v9115_v49 = vpop.f32.mrf.mxu0  ;;  %v9168_v5 = vpop.f32.mrf.mxu1  ;;  %20208 = vst [vmem:[#allocation11_spill] sm:$0xff] %v18661_v31 }
 0xc57   : > { %9201 = vrot.lane.b32.xlu0 %v9158_v25, %s13726_s25  ;;  %v18658_v25 = vpop.permute.xlu0 %10470 }
 0xc58   : > { %v9117_v41 = vpop.f32.mrf.mxu0  ;;  %v9170_v17 = vpop.f32.mrf.mxu1  ;;  %20207 = vst [vmem:[#allocation10_spill] sm:$0xff] %v18658_v25 }
 0xc59   : > { %9203 = vrot.lane.b32.xlu1 %v9160_v14, %s13726_s25 }
 0xc5b   : > { %9205 = vrot.lane.b32.xlu0 %v9111_v51, %s13726_s25 }
 0xc5d   : > { %9207 = vrot.lane.b32.xlu1 %v9113_v30, %s13726_s25 }
 0xc5f   : > { %9209 = vrot.lane.b32.xlu0 %v9164_v61, %s13726_s25 }
 0xc61   : > { %9211 = vrot.lane.b32.xlu1 %v9166_v37, %s13726_s25 }
 0xc63   : > { %9213 = vrot.lane.b32.xlu0 %v9115_v49, %s13726_s25 }
 0xc65   : > { %9215 = vrot.lane.b32.xlu1 %v9117_v41, %s13726_s25 }
 0xc67   : > { %9217 = vrot.lane.b32.xlu0 %v9168_v5, %s13726_s25 }
 0xc69   : > { %9219 = vrot.lane.b32.xlu1 %v9170_v17, %s13726_s25 }
 0xc76   : > { %v9320_v56 = vpop.f32.mrf.mxu0  ;;  %v9373_v47 = vpop.f32.mrf.mxu1 }
 0xc77   : > { %9408 = vrot.lane.b32.xlu0 %v9320_v56, %s13727_s26 }
 0xc78   : > { %v9322_v36 = vpop.f32.mrf.mxu0  ;;  %v9375_v0 = vpop.f32.mrf.mxu1 }
 0xc79   : > { %9410 = vrot.lane.b32.xlu1 %v9322_v36, %s13727_s26 }
 0xc7a   : > { %v9324_v62 = vpop.f32.mrf.mxu0  ;;  %v9377_v21 = vpop.f32.mrf.mxu1 }
 0xc7b   : > { %9412 = vrot.lane.b32.xlu0 %v9373_v47, %s13727_s26 }
 0xc7c   : > { %v9326_v24 = vpop.f32.mrf.mxu0  ;;  %v9379_v58 = vpop.f32.mrf.mxu1 }
 0xc7d   : > { %9414 = vrot.lane.b32.xlu1 %v9375_v0, %s13727_s26 }
 0xc7e   : > { %v9330_v28 = vpop.f32.mrf.mxu0  ;;  %v9383_v55 = vpop.f32.mrf.mxu1 }
 0xc7f   : > { %9416 = vrot.lane.b32.xlu0 %v9324_v62, %s13727_s26 }
 0xc80   : > { %v9332_v11 = vpop.f32.mrf.mxu0  ;;  %v9385_v13 = vpop.f32.mrf.mxu1 }
 0xc81   : > { %9418 = vrot.lane.b32.xlu1 %v9326_v24, %s13727_s26 }
 0xc82   : > { %v9334_v48 = vpop.f32.mrf.mxu0  ;;  %v9387_v7 = vpop.f32.mrf.mxu1 }
 0xc83   : > { %9420 = vrot.lane.b32.xlu0 %v9377_v21, %s13727_s26 }
 0xc84   : > { %v9336_v42 = vpop.f32.mrf.mxu0  ;;  %v9389_v2 = vpop.f32.mrf.mxu1 }
 0xc85   : > { %9422 = vrot.lane.b32.xlu1 %v9379_v58, %s13727_s26 }
 0xc87   : > { %9424 = vrot.lane.b32.xlu0 %v9330_v28, %s13727_s26 }
 0xc89   : > { %9426 = vrot.lane.b32.xlu1 %v9332_v11, %s13727_s26 }
 0xc8b   : > { %9428 = vrot.lane.b32.xlu0 %v9383_v55, %s13727_s26 }
 0xc8d   : > { %9430 = vrot.lane.b32.xlu1 %v9385_v13, %s13727_s26 }
 0xc8f   : > { %9432 = vrot.lane.b32.xlu0 %v9334_v48, %s13727_s26 }
 0xc91   : > { %9434 = vrot.lane.b32.xlu1 %v9336_v42, %s13727_s26 }
 0xc93   : > { %9436 = vrot.lane.b32.xlu0 %v9387_v7, %s13727_s26 }
 0xc95   : > { %9438 = vrot.lane.b32.xlu1 %v9389_v2, %s13727_s26 }
 0xca2   : > { %v9539_v8 = vpop.f32.mrf.mxu0  ;;  %v9592_v18 = vpop.f32.mrf.mxu1 }
 0xca3   : > { %9627 = vrot.lane.b32.xlu0 %v9539_v8, %s13728_s27 }
 0xca4   : > { %v9541_v23 = vpop.f32.mrf.mxu0  ;;  %v9594_v38 = vpop.f32.mrf.mxu1 }
 0xca5   : > { %9629 = vrot.lane.b32.xlu1 %v9541_v23, %s13728_s27 }
 0xca6   : > { %v9543_v4 = vpop.f32.mrf.mxu0  ;;  %v9596_v39 = vpop.f32.mrf.mxu1 }
 0xca7   : > { %9631 = vrot.lane.b32.xlu0 %v9592_v18, %s13728_s27 }
 0xca8   : > { %v9545_v50 = vpop.f32.mrf.mxu0  ;;  %v9598_v27 = vpop.f32.mrf.mxu1 }
 0xca9   : > { %9633 = vrot.lane.b32.xlu1 %v9594_v38, %s13728_s27 }
 0xcaa   : > { %v9549_v6 = vpop.f32.mrf.mxu0  ;;  %v9602_v63 = vpop.f32.mrf.mxu1 }
 0xcab   : > { %9635 = vrot.lane.b32.xlu0 %v9543_v4, %s13728_s27 }
 0xcac   : > { %v9551_v22 = vpop.f32.mrf.mxu0  ;;  %v9604_v52 = vpop.f32.mrf.mxu1 }
 0xcad   : > { %9637 = vrot.lane.b32.xlu1 %v9545_v50, %s13728_s27 }
 0xcae   : > { %v9553_v3 = vpop.f32.mrf.mxu0  ;;  %v9606_v14 = vpop.f32.mrf.mxu1 }
 0xcaf   : > { %9639 = vrot.lane.b32.xlu0 %v9596_v39, %s13728_s27 }
 0xcb0   : > { %v9555_v51 = vpop.f32.mrf.mxu0  ;;  %v9608_v61 = vpop.f32.mrf.mxu1 }
 0xcb1   : > { %9641 = vrot.lane.b32.xlu1 %v9598_v27, %s13728_s27 }
 0xcb3   : > { %9643 = vrot.lane.b32.xlu0 %v9549_v6, %s13728_s27 }
 0xcb5   : > { %9645 = vrot.lane.b32.xlu1 %v9551_v22, %s13728_s27 }
 0xcb7   : > { %9647 = vrot.lane.b32.xlu0 %v9602_v63, %s13728_s27 }
 0xcb9   : > { %9649 = vrot.lane.b32.xlu1 %v9604_v52, %s13728_s27 }
 0xcbb   : > { %9651 = vrot.lane.b32.xlu0 %v9553_v3, %s13728_s27 }
 0xcbd   : > { %9653 = vrot.lane.b32.xlu1 %v9555_v51, %s13728_s27  ;;  %v18665_v30 = vpop.permute.xlu0 %9189 }
 0xcbf   : > { %v18667_v37 = vpop.permute.xlu1 %9191  ;;  %9655 = vrot.lane.b32.xlu0 %v9606_v14, %s13728_s27 }
 0xcc1   : > { %9657 = vrot.lane.b32.xlu1 %v9608_v61, %s13728_s27  ;;  %v18671_v49 = vpop.permute.xlu0 %9193 }
 0xcc3   : > { %v18673_v41 = vpop.permute.xlu1 %9195 }
 0xcc5   : > { %v18675_v5 = vpop.permute.xlu0 %9197 }
 0xcc7   : > { %v18677_v17 = vpop.permute.xlu1 %9199 }
 0xcc9   : > { %v18679_v56 = vpop.permute.xlu0 %9201 }
 0xccb   : > { %v18681_v36 = vpop.permute.xlu1 %9203 }
 0xccd   : > { %v18685_v21 = vpop.permute.xlu0 %9205 }
 0xcce   : > { %v9758_v47 = vpop.f32.mrf.mxu0  ;;  %v9811_v0 = vpop.f32.mrf.mxu1 }
 0xccf   : > { %9846 = vrot.lane.b32.xlu0 %v9758_v47, %s13729_s28  ;;  %v18688_v58 = vpop.permute.xlu1 %9207 }
 0xcd0   : > { %v9760_v62 = vpop.f32.mrf.mxu0  ;;  %v9813_v24 = vpop.f32.mrf.mxu1 }
 0xcd1   : > { %9848 = vrot.lane.b32.xlu1 %v9760_v62, %s13729_s28  ;;  %v18692_v13 = vpop.permute.xlu0 %9209 }
 0xcd2   : > { %v9762_v28 = vpop.f32.mrf.mxu0  ;;  %v9815_v11 = vpop.f32.mrf.mxu1 }
 0xcd3   : > { %9850 = vrot.lane.b32.xlu0 %v9811_v0, %s13729_s28  ;;  %v18695_v42 = vpop.permute.xlu1 %9211 }
 0xcd4   : > { %v9764_v55 = vpop.f32.mrf.mxu0  ;;  %v9817_v7 = vpop.f32.mrf.mxu1 }
 0xcd5   : > { %9852 = vrot.lane.b32.xlu1 %v9813_v24, %s13729_s28  ;;  %v18699_v18 = vpop.permute.xlu0 %9213 }
 0xcd6   : > { %v9768_v48 = vpop.f32.mrf.mxu0  ;;  %v9821_v8 = vpop.f32.mrf.mxu1  ;;  %20209 = vst [vmem:[#allocation8_spill] sm:$0xff] %v18699_v18  ;;  %v9027_v18 = vadd.f32 %v18644_v33, %v18589_v34  ;;  %v9032_v34 = vadd.f32 %v18637_v59, %v18595_v60 }
 0xcd7   : > { %9854 = vrot.lane.b32.xlu0 %v9762_v28, %s13729_s28  ;;  %v18702_v23 = vpop.permute.xlu1 %9215 }
 0xcd8   : > { %v9770_v2 = vpop.f32.mrf.mxu0  ;;  %v9823_v38 = vpop.f32.mrf.mxu1 }
 0xcd9   : > { %9856 = vrot.lane.b32.xlu1 %v9764_v55, %s13729_s28  ;;  %v18706_v39 = vpop.permute.xlu0 %9217 }
 0xcda   : > { %v9772_v4 = vpop.f32.mrf.mxu0  ;;  %v9825_v6 = vpop.f32.mrf.mxu1 }
 0xcdb   : > { %9858 = vrot.lane.b32.xlu0 %v9815_v11, %s13729_s28  ;;  %v18709_v27 = vpop.permute.xlu1 %9219 }
 0xcdc   : > { %v9774_v50 = vpop.f32.mrf.mxu0  ;;  %v9827_v63 = vpop.f32.mrf.mxu1 }
 0xcdd   : > { %9860 = vrot.lane.b32.xlu1 %v9817_v7, %s13729_s28 }
 0xcdf   : > { %9862 = vrot.lane.b32.xlu0 %v9768_v48, %s13729_s28 }
 0xce1   : > { %9864 = vrot.lane.b32.xlu1 %v9770_v2, %s13729_s28 }
 0xce3   : > { %9866 = vrot.lane.b32.xlu0 %v9821_v8, %s13729_s28 }
 0xce5   : > { %9868 = vrot.lane.b32.xlu1 %v9823_v38, %s13729_s28 }
 0xce7   : > { %9870 = vrot.lane.b32.xlu0 %v9772_v4, %s13729_s28 }
 0xce9   : > { %9872 = vrot.lane.b32.xlu1 %v9774_v50, %s13729_s28  ;;  %v9409_v22 = vpop.permute.xlu0 %9408 }
 0xceb   : > { %v9411_v52 = vpop.permute.xlu1 %9410  ;;  %9874 = vrot.lane.b32.xlu0 %v9825_v6, %s13729_s28 }
 0xced   : > { %9876 = vrot.lane.b32.xlu1 %v9827_v63, %s13729_s28  ;;  %v9413_v3 = vpop.permute.xlu0 %9412 }
 0xcee   : > { %v9441_v16 = vsel %vm1159_vm8, %v9411_v52, %v9413_v3 }
 0xcef   : > { %v9415_v51 = vpop.permute.xlu1 %9414  ;;  %10342 = vrot.lane.b32.xlu0 %v20193_v40, %s13725_s24 }
 0xcf1   : > { %10348 = vrot.lane.b32.xlu1 %v20193_v40, %s13725_s24  ;;  %v18719_v14 = vpop.permute.xlu0 %9416 }
 0xcf3   : > { %10330 = vrot.lane.b32.xlu0 %v20193_v40, %s13725_s24  ;;  %v18723_v61 = vpop.permute.xlu1 %9418 }
 0xcf5   : > { %10336 = vrot.lane.b32.xlu1 %v20193_v40, %s13725_s24  ;;  %v18729_v47 = vpop.permute.xlu0 %9420 }
 0xcf7   : > { %10202 = vrot.lane.b32.xlu0 %v20193_v40, %s13730_s29  ;;  %v18733_v0 = vpop.permute.xlu1 %9422 }
 0xcf9   : > { %10208 = vrot.lane.b32.xlu1 %v20193_v40, %s13730_s29  ;;  %v18739_v62 = vpop.permute.xlu0 %9424 }
 0xcfb   : > { %10190 = vrot.lane.b32.xlu0 %v20193_v40, %s13730_s29  ;;  %v18741_v24 = vpop.permute.xlu1 %9426 }
 0xcfd   : > { %10196 = vrot.lane.b32.xlu1 %v20193_v40, %s13730_s29  ;;  %v18743_v28 = vpop.permute.xlu0 %9428  ;;  %v9221_v40 = vsel %vm939_vm4, %v18665_v30, %v18667_v37  ;;  %v9222_v30 = vsel %vm939_vm4, %v18667_v37, %v18671_v49  ;;  %v9223_v37 = vsel %vm939_vm4, %v18671_v49, %v18673_v41  ;;  %v18825_v49 = vadd.f32 %v18640_v10, %v18601_v1 }
 0xcfe   : > { %v9246_v60 = vadd.f32 %v9222_v30, %v9027_v18  ;;  %v9442_v41 = vsel %vm1159_vm8, %v9413_v3, %v9415_v51  ;;  %v9443_v3 = vsel %vm1159_vm8, %v18719_v14, %v18723_v61  ;;  %v9228_v14 = vsel %vm939_vm4, %v18688_v58, %v18692_v13 }
 0xcff   : > { %v18745_v11 = vpop.permute.xlu1 %9430 }
 0xd01   : > { %v18747_v55 = vpop.permute.xlu0 %9432 }
 0xd02   : > { %20210 = vst [vmem:[#allocation13_spill] sm:$0xff] %v18747_v55  ;;  %v9026_v55 = vadd.f32 %v18644_v33, %v18587_v26  ;;  %v9440_v26 = vsel %vm1159_vm8, %v9409_v22, %v9411_v52  ;;  %v18800_v33 = vadd.f32 %v18637_v59, %v18583_v9  ;;  %v9224_v9 = vsel %vm939_vm4, %v18675_v5, %v18677_v17 }
 0xd03   : > { %v18749_v48 = vpop.permute.xlu1 %9434  ;;  %v9247_v52 = vadd.f32 %v9223_v37, %v9028_v44  ;;  %v9226_v5 = vsel %vm939_vm4, %v18679_v56, %v18681_v36 }
 0xd05   : > { %v18751_v7 = vpop.permute.xlu0 %9436  ;;  %v9466_v1 = vadd.f32 %v9442_v41, %v9247_v52 }
 0xd07   : > { %v18753_v2 = vpop.permute.xlu1 %9438 }
 0xd08   : > { %20211 = vst [vmem:[#allocation14_spill] sm:$0xff] %v18753_v2 }
 0xd15   : > { %v9628_v8 = vpop.permute.xlu0 %9627 }
 0xd17   : > { %v9630_v38 = vpop.permute.xlu1 %9629 }
 0xd19   : > { %v9632_v4 = vpop.permute.xlu0 %9631 }
 0xd1a   : > { %v9660_v18 = vsel %vm1379_vm11, %v9630_v38, %v9632_v4 }
 0xd1b   : > { %v9634_v50 = vpop.permute.xlu1 %9633 }
 0xd1d   : > { %v18755_v6 = vpop.permute.xlu0 %9635 }
 0xd1f   : > { %v18757_v63 = vpop.permute.xlu1 %9637 }
 0xd21   : > { %v18759_v57 = vpop.permute.xlu0 %9639 }
 0xd23   : > { %v18761_v43 = vpop.permute.xlu1 %9641 }
 0xd25   : > { %v18763_v54 = vpop.permute.xlu0 %9643 }
 0xd27   : > { %v18765_v12 = vpop.permute.xlu1 %9645 }
 0xd29   : > { %v18767_v31 = vpop.permute.xlu0 %9647 }
 0xd2b   : > { %v18769_v25 = vpop.permute.xlu1 %9649 }
 0xd2d   : > { %v18771_v53 = vpop.permute.xlu0 %9651 }
 0xd2e   : > { %20212 = vst [vmem:[#allocation24_spill] sm:$0xff] %v18771_v53  ;;  %v9029_v53 = vadd.f32 %v18647_v32, %v18591_v19  ;;  %v9245_v19 = vadd.f32 %v9221_v40, %v9026_v55  ;;  %v9225_v40 = vsel %vm939_vm4, %v18677_v17, %v18679_v56  ;;  %v9465_v17 = vadd.f32 %v9441_v16, %v9246_v60 }
 0xd2f   : > { %v18773_v35 = vpop.permute.xlu1 %9653  ;;  %v9227_v56 = vsel %vm939_vm4, %v18685_v21, %v18688_v58  ;;  %v9662_v21 = vsel %vm1379_vm11, %v18755_v6, %v18757_v63  ;;  %v9663_v58 = vsel %vm1379_vm11, %v18757_v63, %v18759_v57 }
 0xd30   : > { %20213 = vst [vmem:[#allocation9_spill] sm:$0xff] %v18773_v35  ;;  %v9031_v35 = vadd.f32 %v18647_v32, %v18581_v20  ;;  %v18806_v20 = vadd.f32 %v18637_v59, %v18597_v45  ;;  %v9659_v32 = vsel %vm1379_vm11, %v9628_v8, %v9630_v38  ;;  %v9464_v22 = vadd.f32 %v9440_v26, %v9245_v19 }
 0xd31   : > { %v18784_v2 = vpop.permute.xlu0 %9655  ;;  %v18821_v59 = vadd.f32 %v18640_v10, %v18585_v29  ;;  %v9248_v30 = vadd.f32 %v9224_v9, %v9029_v53  ;;  %v9249_v26 = vadd.f32 %v9225_v40, %v9030_v15  ;;  %v9661_v29 = vsel %vm1379_vm11, %v9632_v4, %v9634_v50 }
 0xd32   : > { %20214 = vst [vmem:[#allocation17_spill] sm:$0xff] %v18784_v2  ;;  %v9683_v55 = vadd.f32 %v9659_v32, %v9464_v22  ;;  %v9684_v51 = vadd.f32 %v9660_v18, %v9465_v17  ;;  %v9250_v37 = vadd.f32 %v9226_v5, %v9031_v35  ;;  %v9444_v53 = vsel %vm1159_vm8, %v18723_v61, %v18729_v47 }
 0xd33   : > { %v18802_v2 = vpop.permute.xlu1 %9657  ;;  %v9685_v4 = vadd.f32 %v9661_v29, %v9466_v1  ;;  %v9467_v35 = vadd.f32 %v9443_v3, %v9248_v30  ;;  %v9468_v22 = vadd.f32 %v9444_v53, %v9249_v26  ;;  %v9251_v17 = vadd.f32 %v9227_v56, %v9032_v34  ;;  %v20216_v3 = vld [vmem:[#allocation25_spill] sm:$0xff] }
 0xd34   : > { %v20215_v30 = vmov 0.0   ;;  %v9252_v1 = vadd.f32 %v9228_v14, %v18806_v20  ;;  %v9447_v53 = vsel %vm1159_vm8, %v18741_v24, %v18743_v28 }
 0xd35   : > { %v9686_v18 = vadd.f32 %v9662_v21, %v9467_v35  ;;  %v9687_v26 = vadd.f32 %v9663_v58, %v9468_v22  ;;  %v9666_v21 = vsel %vm1379_vm11, %v18765_v12, %v18767_v31 }
 0xd41   : > { %v9847_v45 = vpop.permute.xlu0 %9846 }
 0xd43   : > { %v9849_v8 = vpop.permute.xlu1 %9848 }
 0xd44   : > { %v9878_v19 = vsel %vm1599_vm13, %v9847_v45, %v9849_v8  ;;  %v9445_v45 = vsel %vm1159_vm8, %v18729_v47, %v18733_v0 }
 0xd45   : > { %v9902_v44 = vadd.f32 %v9878_v19, %v9683_v55  ;;  %v9851_v38 = vpop.permute.xlu0 %9850  ;;  %v9664_v55 = vsel %vm1379_vm11, %v18759_v57, %v18761_v43  ;;  %v9469_v0 = vadd.f32 %v9445_v45, %v9250_v37  ;;  %v9229_v43 = vsel %vm939_vm4, %v18692_v13, %v18695_v42 }
 0xd46   : > { %v9879_v36 = vsel %vm1599_vm13, %v9849_v8, %v9851_v38  ;;  %v9231_v57 = vsel %vm939_vm4, %v18702_v23, %v18706_v39  ;;  %v9253_v14 = vadd.f32 %v9229_v43, %v18800_v33  ;;  %v9232_v33 = vsel %vm939_vm4, %v18706_v39, %v18709_v27 }
 0xd47   : > { %vm9914_vm2 = vcmp.gt.f32.partialorder %v9902_v44, 0.0  ;;  %v9926_v50 = vmul.f32 0.2, %v9902_v44  ;;  %v9903_v15 = vadd.f32 %v9879_v36, %v9684_v51  ;;  %v9853_v16 = vpop.permute.xlu1 %9852  ;;  %v9688_v37 = vadd.f32 %v9664_v55, %v9469_v0 }
 0xd48   : > { %v9880_v32 = vsel %vm1599_vm13, %v9851_v38, %v9853_v16  ;;  %v9448_v36 = vsel %vm1159_vm8, %v18743_v28, %v18745_v11  ;;  %v9255_v35 = vadd.f32 %v9231_v57, %v18825_v49  ;;  %v9471_v28 = vadd.f32 %v9447_v53, %v9252_v1  ;;  %v20220_v1 = vld [vmem:[#allocation9_spill] sm:$0xff] }
 0xd49   : > { %v9938_v60 = vsel %vm9914_vm2, %v9902_v44, %v9926_v50  ;;  %vm9915_vm3 = vcmp.gt.f32.partialorder %v9903_v15, 0.0  ;;  %v9927_v61 = vmul.f32 0.2, %v9903_v15  ;;  %v9904_v9 = vadd.f32 %v9880_v32, %v9685_v4  ;;  %v9855_v40 = vpop.permute.xlu0 %9854  ;;  %v20217_v44 = vld [vmem:[#allocation26_spill] sm:$0xff] }
 0xd4a   : > { %v9950_v41 = vmul.f32 %v14438_v46, %v9938_v60  ;;  %v9446_v49 = vsel %vm1159_vm8, %v18739_v62, %v18741_v24  ;;  %v9690_v22 = vadd.f32 %v9666_v21, %v9471_v28 }
 0xd4b   : > { %v9939_v6 = vsel %vm9915_vm3, %v9903_v15, %v9927_v61  ;;  %vm9916_vm5 = vcmp.gt.f32.partialorder %v9904_v9, 0.0  ;;  %v9928_v52 = vmul.f32 0.2, %v9904_v9  ;;  %v9857_v5 = vpop.permute.xlu1 %9856  ;;  %v9472_v61 = vadd.f32 %v9448_v36, %v9253_v14 }
 0xd4c   : > { %v9881_v8 = vsel %vm1599_vm13, %v9855_v40, %v9857_v5  ;;  %v18863_v47 = vpack.c.bf16 %v9950_v41, %v20215_v30  ;;  %v9951_v51 = vmul.f32 %v20216_v3, %v9939_v6  ;;  %v9450_v40 = vsel %vm1159_vm8, %v18749_v48, %v18751_v7 }
 0xd4d   : > { %v9940_v63 = vsel %vm9916_vm5, %v9904_v9, %v9928_v52  ;;  %v9905_v29 = vadd.f32 %v9881_v8, %v9686_v18  ;;  %v9859_v19 = vpop.permute.xlu0 %9858  ;;  %v9667_v9 = vsel %vm1379_vm11, %v18767_v31, %v18769_v25  ;;  %v9256_v25 = vadd.f32 %v9232_v33, %v18821_v59  ;;  %v20218_v59 = vld [vmem:[#allocation14_spill] sm:$0xff]  ;;  %v20221_v33 = vld [vmem:[#allocation8_spill] sm:$0xff] }
 0xd4e   : > { %v9952_v34 = vmul.f32 %v20217_v44, %v9940_v63  ;;  %v9882_v38 = vsel %vm1599_vm13, %v9857_v5, %v9859_v19  ;;  %10466 = vrot.lane.b32.xlu0 %v18863_v47, %s13724_s23  ;;  %v9470_v31 = vadd.f32 %v9446_v49, %v9251_v17  ;;  %v9691_v62 = vadd.f32 %v9667_v9, %v9472_v61  ;;  %v20222_v61 = vld [vmem:[#allocation21_spill] sm:$0xff] }
 0xd4f   : > { %v9906_v56 = vadd.f32 %v9882_v38, %v9687_v26  ;;  %v9861_v20 = vpop.permute.xlu1 %9860  ;;  %v9929_v13 = vmul.f32 0.2, %v9905_v29  ;;  %vm9917_vm15 = vcmp.gt.f32.partialorder %v9905_v29, 0.0  ;;  %v9665_v52 = vsel %vm1379_vm11, %v18763_v54, %v18765_v12 }
 0xd50   : > { %v18883_v4 = vpack.c.bf16 %v9952_v34, %v9951_v51  ;;  %v9883_v50 = vsel %vm1599_vm13, %v9859_v19, %v9861_v20  ;;  %v9474_v0 = vadd.f32 %v9450_v40, %v9255_v35  ;;  %v9451_v17 = vsel %vm1159_vm8, %v18751_v7, %v20218_v59  ;;  %v20219_v19 = vld [vmem:[#allocation17_spill] sm:$0xff]  ;;  %v13081_v59 = vld [vmem:[%s19979_s2 + $0xb0] sm:$0xff] }
 0xd51   : > { %vm9918_vm6 = vcmp.gt.f32.partialorder %v9906_v56, 0.0  ;;  %v9930_v42 = vmul.f32 0.2, %v9906_v56  ;;  %v9907_v15 = vadd.f32 %v9883_v50, %v9688_v37  ;;  %v9863_v16 = vpop.permute.xlu0 %9862  ;;  %v9941_v45 = vsel %vm9917_vm15, %v9905_v29, %v9929_v13 }
 0xd52   : > { %10326 = vrot.lane.b32.xlu0 %v18863_v47, %s13725_s24  ;;  %10468 = vrot.lane.b32.xlu1 %v18883_v4, %s13724_s23  ;;  %v9953_v5 = vmul.f32 %v14438_v46, %v9941_v45  ;;  %v9669_v51 = vsel %vm1379_vm11, %v20220_v1, %v20219_v19  ;;  %v9689_v12 = vadd.f32 %v9665_v52, %v9470_v31  ;;  %v20223_v45 = vld [vmem:[#allocation13_spill] sm:$0xff] }
 0xd53   : > { %v9942_v11 = vsel %vm9918_vm6, %v9906_v56, %v9930_v42  ;;  %vm9919_vm2 = vcmp.gt.f32.partialorder %v9907_v15, 0.0  ;;  %v9931_v32 = vmul.f32 0.2, %v9907_v15  ;;  %v9865_v60 = vpop.permute.xlu1 %9864  ;;  %v9670_v7 = vsel %vm1379_vm11, %v20219_v19, %v18802_v2  ;;  %v13082_v19 = vld [vmem:[%s19979_s2 + $0xb8] sm:$0xff] }
 0xd54   : > { %v9954_v18 = vmul.f32 %v20216_v3, %v9942_v11  ;;  %v9884_v54 = vsel %vm1599_vm13, %v9863_v16, %v9865_v60  ;;  %v18937_v57 = vpack.c.bf16 %v9953_v5, %v20215_v30  ;;  %v9475_v37 = vadd.f32 %v9451_v17, %v9256_v25 }
 0xd55   : > { %v9943_v58 = vsel %vm9919_vm2, %v9907_v15, %v9931_v32  ;;  %v9867_v41 = vpop.permute.xlu0 %9866  ;;  %v9693_v56 = vadd.f32 %v9669_v51, %v9474_v0  ;;  %v9908_v20 = vadd.f32 %v9884_v54, %v9689_v12  ;;  %v9230_v49 = vsel %vm939_vm4, %v20221_v33, %v18702_v23 }
 0xd56   : > { %v9955_v39 = vmul.f32 %v20217_v44, %v9943_v58  ;;  %v9885_v27 = vsel %vm1599_vm13, %v9865_v60, %v9867_v41  ;;  %10186 = vrot.lane.b32.xlu0 %v18863_v47, %s13730_s29  ;;  %10328 = vrot.lane.b32.xlu1 %v18883_v4, %s13725_s24  ;;  %v9694_v2 = vadd.f32 %v9670_v7, %v9475_v37 }
 0xd57   : > { %v9909_v24 = vadd.f32 %v9885_v27, %v9690_v22  ;;  %v9869_v6 = vpop.permute.xlu1 %9868  ;;  %v9932_v21 = vmul.f32 0.2, %v9908_v20  ;;  %vm9920_vm15 = vcmp.gt.f32.partialorder %v9908_v20, 0.0  ;;  %v9035_v9 = vadd.f32 %v18640_v10, %v20222_v61  ;;  %v20226_v61 = vld [vmem:[#allocation15_spill] sm:$0xff] }
 0xd58   : > { %v18919_v55 = vpack.c.bf16 %v9955_v39, %v9954_v18  ;;  %v9886_v8 = vsel %vm1599_vm13, %v9867_v41, %v9869_v6  ;;  %v9449_v58 = vsel %vm1159_vm8, %v20223_v45, %v18749_v48  ;;  %v20224_v39 = vld [vmem:[#allocation24_spill] sm:$0xff]  ;;  %v20228_v45 = vld [vmem:[#allocation10_spill] sm:$0xff] }
 0xd59   : > { %vm9921_vm3 = vcmp.gt.f32.partialorder %v9909_v24, 0.0  ;;  %v9933_v26 = vmul.f32 0.2, %v9909_v24  ;;  %v9910_v63 = vadd.f32 %v9886_v8, %v9691_v62  ;;  %v9871_v29 = vpop.permute.xlu0 %9870  ;;  %v9944_v40 = vsel %vm9920_vm15, %v9908_v20, %v9932_v21 }
 0xd5a   : > { %10046 = vrot.lane.b32.xlu0 %v18863_v47, %s13731_s30  ;;  %10188 = vrot.lane.b32.xlu1 %v18883_v4, %s13730_s29  ;;  %v9254_v23 = vadd.f32 %v9230_v49, %v9035_v9  ;;  %v9668_v10 = vsel %vm1379_vm11, %v20224_v39, %v20220_v1  ;;  %v9956_v27 = vmul.f32 %v14438_v46, %v9944_v40  ;;  %v10498_v9 = vrot.slane %v20226_v61, 4  ;;  %v20227_v40 = vld [vmem:[#allocation18_spill] sm:$0xff] }
 0xd5b   : > { %v9945_v34 = vsel %vm9921_vm3, %v9909_v24, %v9933_v26  ;;  %vm9922_vm5 = vcmp.gt.f32.partialorder %v9910_v63, 0.0  ;;  %v9934_v38 = vmul.f32 0.2, %v9910_v63  ;;  %v9873_v43 = vpop.permute.xlu1 %9872  ;;  %v20225_v26 = vmov 0.0|0.0  }
 0xd5c   : > { %v9957_v50 = vmul.f32 %v20216_v3, %v9945_v34  ;;  %v9473_v31 = vadd.f32 %v9449_v58, %v9254_v23  ;;  %v9887_v48 = vsel %vm1599_vm13, %v9871_v29, %v9873_v43  ;;  %v13446_v24 = vpack.c.bf16 %v9956_v27, %v20215_v30  ;;  %v13080_v29 = vld [vmem:[%s19979_s2 + $0xa8] sm:$0xff] }
 0xd5d   : > { %v9946_v53 = vsel %vm9922_vm5, %v9910_v63, %v9934_v38  ;;  %v9875_v36 = vpop.permute.xlu0 %9874  ;;  %v10492_v58 = vrot.slane %v20228_v45, 4 }
 0xd5e   : > { %v9958_v13 = vmul.f32 %v20217_v44, %v9946_v53  ;;  %v9888_v42 = vsel %vm1599_vm13, %v9873_v43, %v9875_v36  ;;  %10048 = vrot.lane.b32.xlu1 %v18883_v4, %s13731_s30  ;;  %10472 = vrot.lane.b32.xlu0 %v18937_v57, %s13724_s23  ;;  %v9692_v62 = vadd.f32 %v9668_v10, %v9473_v31 }
 0xd5f   : > { %v9912_v15 = vadd.f32 %v9888_v42, %v9693_v56  ;;  %v9877_v16 = vpop.permute.xlu1 %9876 }
 0xd60   : > { %v13447_v14 = vpack.c.bf16 %v9958_v13, %v9957_v50  ;;  %v9889_v35 = vsel %vm1599_vm13, %v9875_v36, %v9877_v16  ;;  %v9911_v6 = vadd.f32 %v9887_v48, %v9692_v62 }
 0xd61   : > { %vm9924_vm6 = vcmp.gt.f32.partialorder %v9912_v15, 0.0  ;;  %v9936_v28 = vmul.f32 0.2, %v9912_v15  ;;  %v9913_v11 = vadd.f32 %v9889_v35, %v9694_v2 }
 0xd62   : > { %10332 = vrot.lane.b32.xlu0 %v18937_v57, %s13725_s24  ;;  %10474 = vrot.lane.b32.xlu1 %v18919_v55, %s13724_s23  ;;  %v9935_v52 = vmul.f32 0.2, %v9911_v6  ;;  %vm9923_vm3 = vcmp.gt.f32.partialorder %v9911_v6, 0.0 }
 0xd63   : > { %v9948_v32 = vsel %vm9924_vm6, %v9912_v15, %v9936_v28  ;;  %vm9925_vm2 = vcmp.gt.f32.partialorder %v9913_v11, 0.0  ;;  %v9937_v60 = vmul.f32 0.2, %v9913_v11 }
 0xd64   : > { %v9960_v41 = vmul.f32 %v20216_v3, %v9948_v32  ;;  %v9947_v5 = vsel %vm9923_vm3, %v9911_v6, %v9935_v52 }
 0xd65   : > { %v9949_v22 = vsel %vm9925_vm2, %v9913_v11, %v9937_v60  ;;  %v9959_v8 = vmul.f32 %v14438_v46, %v9947_v5 }
 0xd66   : > { %v9961_v18 = vmul.f32 %v20217_v44, %v9949_v22  ;;  %10192 = vrot.lane.b32.xlu0 %v18937_v57, %s13730_s29  ;;  %10334 = vrot.lane.b32.xlu1 %v18919_v55, %s13725_s24  ;;  %v10501_v22 = vrot.slane %v20227_v40, 4 }
 0xd67   : > { %v13449_v0 = vpack.c.bf16 %v9959_v8, %v20215_v30  ;;  %v13686_v30 = vld [vmem:[%s19978_s1 + $0x324] ss:$8 sps:$4 sm:$0xff]  }
 0xd68   : > { %v13450_v25 = vpack.c.bf16 %v9961_v18, %v9960_v41  ;;  %13136 = vmatprep.mubr.msk.bf16.mxu0 %vm602_vm0, %v13686_v30  ;;  %13139 = vmatprep.mubr.msk.bf16.mxu1 %vm602_vm0, %v13686_v30  ;;  %v20229_v18 = vld [vmem:[#allocation11_spill] sm:$0xff] }
 0xd69   : > { %v10495_v23 = vrot.slane %v20229_v18, 4 }
 0xd6a   : > { %10052 = vrot.lane.b32.xlu0 %v18937_v57, %s13731_s30  ;;  %10194 = vrot.lane.b32.xlu1 %v18919_v55, %s13730_s29 }
 0xd6e   : > { %10054 = vrot.lane.b32.xlu1 %v18919_v55, %s13731_s30  ;;  %10478 = vrot.lane.b32.xlu0 %v13446_v24, %s13724_s23 }
 0xd72   : > { %10338 = vrot.lane.b32.xlu0 %v13446_v24, %s13725_s24  ;;  %10480 = vrot.lane.b32.xlu1 %v13447_v14, %s13724_s23 }
 0xd76   : > { %10198 = vrot.lane.b32.xlu0 %v13446_v24, %s13730_s29  ;;  %10340 = vrot.lane.b32.xlu1 %v13447_v14, %s13725_s24 }
 0xd7a   : > { %10058 = vrot.lane.b32.xlu0 %v13446_v24, %s13731_s30  ;;  %10200 = vrot.lane.b32.xlu1 %v13447_v14, %s13730_s29 }
 0xd7e   : > { %10060 = vrot.lane.b32.xlu1 %v13447_v14, %s13731_s30  ;;  %10484 = vrot.lane.b32.xlu0 %v13449_v0, %s13724_s23 }
 0xd82   : > { %10062 = vrot.lane.b32.xlu0 %v20225_v26, %s13731_s30  ;;  %10486 = vrot.lane.b32.xlu1 %v13450_v25, %s13724_s23  ;;  %s12193_s23 = sshll.u32 %s20237_s16, 3 }
 0xd83   : > { %s195_s20 = scalar_lea.vmem %s19981_s4, %s12193_s23 }
 0xd86   : > { %10344 = vrot.lane.b32.xlu0 %v13449_v0, %s13725_s24  ;;  %10068 = vrot.lane.b32.xlu1 %v20225_v26, %s13731_s30 }
 0xd8a   : > { %10050 = vrot.lane.b32.xlu0 %v20225_v26, %s13731_s30  ;;  %10346 = vrot.lane.b32.xlu1 %v13450_v25, %s13725_s24 }
 0xd8e   : > { %10204 = vrot.lane.b32.xlu0 %v13449_v0, %s13730_s29  ;;  %10056 = vrot.lane.b32.xlu1 %v20225_v26, %s13731_s30 }
 0xd92   : > { %10618 = vrot.lane.b32.xlu0 %v13446_v24, %s13733_s5  ;;  %10206 = vrot.lane.b32.xlu1 %v13450_v25, %s13730_s29 }
 0xd96   : > { %10064 = vrot.lane.b32.xlu0 %v13449_v0, %s13731_s30  ;;  %10620 = vrot.lane.b32.xlu1 %v13447_v14, %s13733_s5 }
 0xd9a   : > { %10606 = vrot.lane.b32.xlu0 %v18863_v47, %s13733_s5  ;;  %10066 = vrot.lane.b32.xlu1 %v13450_v25, %s13731_s30  ;;  %v19022_v47 = vpop.permute.xlu0 %10342 }
 0xd9b   : > { %v10358_v48 = vrot.slane %v19022_v47, 4 }
 0xd9e   : > { %10612 = vrot.lane.b32.xlu0 %v18937_v57, %s13733_s5  ;;  %10608 = vrot.lane.b32.xlu1 %v18883_v4, %s13733_s5  ;;  %v13079_v4 = vld [vmem:[%s19979_s2 + $0xa0] sm:$0xff]  ;;  %v19035_v63 = vpop.permute.xlu0 %10330 }
 0xd9f   : > { %v10352_v52 = vrot.slane %v19035_v63, 4 }
 0xda2   : > { %10624 = vrot.lane.b32.xlu0 %v13449_v0, %s13733_s5  ;;  %10614 = vrot.lane.b32.xlu1 %v18919_v55, %s13733_s5  ;;  %v19031_v55 = vpop.permute.xlu1 %10348  ;;  %v19048_v1 = vpop.permute.xlu0 %10202 }
 0xda3   : > { %v10361_v62 = vrot.slane %v19031_v55, 4 }
 0xda6   : > { %10622 = vrot.lane.b32.xlu0 %v20225_v26, %s13733_s5  ;;  %10626 = vrot.lane.b32.xlu1 %v13450_v25, %s13733_s5  ;;  %v19043_v17 = vpop.permute.xlu1 %10336  ;;  %v19052_v54 = vpop.permute.xlu0 %10190 }
 0xda7   : > { %v10355_v5 = vrot.slane %v19043_v17, 4 }
 0xdaa   : > { %10610 = vrot.lane.b32.xlu0 %v20225_v26, %s13733_s5  ;;  %10628 = vrot.lane.b32.xlu1 %v20225_v26, %s13733_s5  ;;  %v19050_v51 = vpop.permute.xlu1 %10208 }
 0xdae   : > { %11076 = vperm.xlu0 %13528, %v13079_v4   ;;  %10616 = vrot.lane.b32.xlu1 %v20225_v26, %s13733_s5  ;;  %v19054_v12 = vpop.permute.xlu1 %10196  ;;  %v10218_v26 = vrot.slane %v19048_v1, 4 }
 0xdb2   : > { %11081 = vperm.xlu0 %13528, %v13080_v29   ;;  %11086 = vperm.xlu1 %13529, %v13081_v59  }
 0xdb6   : > { %11091 = vperm.xlu0 %13528, %v13082_v19  }
 0xdc0   : > { %v10467_v34 = vpop.permute.xlu0 %10466 }
 0xdc1   : > { %v10490_v49 = vrot.slane %v10467_v34, 4 }
 0xdc4   : > { %v10469_v38 = vpop.permute.xlu1 %10468  ;;  %v19056_v43 = vpop.permute.xlu0 %10326 }
 0xdc5   : > { %v10491_v32 = vrot.slane %v10469_v38, 4  ;;  %v10350_v8 = vrot.slane %v19056_v43, 4 }
 0xdc7   : > { %v10502_v39 = vsel %vm609_vm1, %v10490_v49, %v10491_v32  ;;  %v10504_v24 = vsel %vm609_vm1, %v10491_v32, %v10492_v58 }
 0xdc8   : > { %v19058_v7 = vpop.permute.xlu1 %10328  ;;  %v19060_v57 = vpop.permute.xlu0 %10186  ;;  %v10503_v30 = vsel %vm2229_vm7, %v10467_v34, %v10502_v39  ;;  %v10505_v29 = vsel %vm2229_vm7, %v10469_v38, %v10504_v24 }
 0xdc9   : > { %v10351_v10 = vrot.slane %v19058_v7, 4  ;;  %v10210_v19 = vrot.slane %v19060_v57, 4 }
 0xdcb   : > { %v10362_v59 = vsel %vm609_vm1, %v10350_v8, %v10351_v10  ;;  %v10364_v49 = vsel %vm609_vm1, %v10351_v10, %v10352_v52 }
 0xdcc   : > { %v19062_v37 = vpop.permute.xlu1 %10188  ;;  %v19064_v56 = vpop.permute.xlu0 %10046 }
 0xdcd   : > { %v10211_v45 = vrot.slane %v19062_v37, 4 }
 0xdd0   : > { %v19066_v20 = vpop.permute.xlu1 %10048  ;;  %v10473_v53 = vpop.permute.xlu0 %10472 }
 0xdd1   : > { %v10493_v6 = vrot.slane %v10473_v53, 4 }
 0xdd4   : > { %v10475_v36 = vpop.permute.xlu1 %10474  ;;  %v19068_v50 = vpop.permute.xlu0 %10332 }
 0xdd5   : > { %v10494_v41 = vrot.slane %v10475_v36, 4 }
 0xdd7   : > { %v10506_v4 = vsel %vm609_vm1, %v10493_v6, %v10494_v41  ;;  %v10508_v47 = vsel %vm609_vm1, %v10494_v41, %v10495_v23  ;;  %v10353_v41 = vrot.slane %v19068_v50, 4 }
 0xdd8   : > { %v19070_v13 = vpop.permute.xlu1 %10334  ;;  %v19072_v42 = vpop.permute.xlu0 %10192  ;;  %v10507_v58 = vsel %vm2229_vm7, %v10473_v53, %v10506_v4  ;;  %v10509_v38 = vsel %vm2229_vm7, %v10475_v36, %v10508_v47  ;;  %v10212_v47 = vrot.slane %v19052_v54, 4 }
 0xdd9   : > { %v10354_v18 = vrot.slane %v19070_v13, 4 }
 0xddc   : > { %v19074_v2 = vpop.permute.xlu1 %10194  ;;  %v19076_v15 = vpop.permute.xlu0 %10052 }
 0xde0   : > { %v19078_v16 = vpop.permute.xlu1 %10054  ;;  %v10479_v14 = vpop.permute.xlu0 %10478 }
 0xde1   : > { %v10496_v0 = vrot.slane %v10479_v14, 4 }
 0xde4   : > { %v10481_v35 = vpop.permute.xlu1 %10480  ;;  %v19080_v21 = vpop.permute.xlu0 %10338 }
 0xde5   : > { %v10497_v27 = vrot.slane %v10481_v35, 4  ;;  %v10356_v4 = vrot.slane %v19080_v21, 4 }
 0xde7   : > { %v10510_v63 = vsel %vm609_vm1, %v10496_v0, %v10497_v27  ;;  %v10512_v61 = vsel %vm609_vm1, %v10497_v27, %v10498_v9 }
 0xde8   : > { %v19082_v28 = vpop.permute.xlu1 %10340  ;;  %v19084_v11 = vpop.permute.xlu0 %10198  ;;  %v10511_v23 = vsel %vm2229_vm7, %v10479_v14, %v10510_v63  ;;  %v10513_v9 = vsel %vm2229_vm7, %v10481_v35, %v10512_v61  ;;  %v10363_v35 = vsel %vm2088_vm9, %v19056_v43, %v10362_v59  ;;  %v19146_v63 = vcombine.high %v10505_v29, %v10509_v38 }
 0xde9   : > { %v10357_v27 = vrot.slane %v19082_v28, 4  ;;  %v10368_v61 = vsel %vm609_vm1, %v10354_v18, %v10355_v5  ;;  %v10215_v43 = vrot.slane %v19054_v12, 4  ;;  %v19156_v59 = vcombine.low %v10503_v30, %v10507_v58 }
 0xdeb   : > { %v10370_v54 = vsel %vm609_vm1, %v10356_v4, %v10357_v27 }
 0xdec   : > { %v19086_v60 = vpop.permute.xlu1 %10200  ;;  %v19088_v33 = vpop.permute.xlu0 %10058 }
 0xdf0   : > { %v19096_v25 = vpop.permute.xlu1 %10060  ;;  %v10485_v31 = vpop.permute.xlu0 %10484 }
 0xdf1   : > { %v10499_v34 = vrot.slane %v10485_v31, 4 }
 0xdf4   : > { %v10487_v17 = vpop.permute.xlu1 %10486  ;;  %v19112_v32 = vpop.permute.xlu0 %10062 }
 0xdf5   : > { %v10500_v40 = vrot.slane %v10487_v17, 4 }
 0xdf7   : > { %v10514_v39 = vsel %vm609_vm1, %v10499_v34, %v10500_v40  ;;  %v10516_v10 = vsel %vm609_vm1, %v10500_v40, %v10501_v22  ;;  %v10365_v22 = vsel %vm2088_vm9, %v19058_v7, %v10364_v49  ;;  %v10222_v7 = vsel %vm609_vm1, %v10210_v19, %v10211_v45 }
 0xdf8   : > { %v10515_v24 = vsel %vm2229_vm7, %v10485_v31, %v10514_v39  ;;  %v10517_v53 = vsel %vm2229_vm7, %v10487_v17, %v10516_v10  ;;  %v19128_v6 = vpop.permute.xlu1 %10068  ;;  %v10345_v36 = vpop.permute.xlu0 %10344  ;;  %v19142_v31 = vcombine.high %v10503_v30, %v10507_v58  ;;  %v10366_v17 = vsel %vm609_vm1, %v10353_v41, %v10354_v18 }
 0xdf9   : > { %v19130_v52 = vcombine.low %v10511_v23, %v10515_v24  ;;  %v19132_v8 = vcombine.high %v10511_v23, %v10515_v24  ;;  %v19134_v14 = vcombine.low %v10513_v9, %v10517_v53  ;;  %v19136_v0 = vcombine.high %v10513_v9, %v10517_v53 }
 0xdfa   : > { %v19163_v34 = vcombine.low %v10505_v29, %v10509_v38  ;;  %v10372_v40 = vsel %vm609_vm1, %v10357_v27, %v10358_v48  ;;  %v10359_v12 = vrot.slane %v10345_v36, 4  ;;  %v10367_v30 = vsel %vm2088_vm9, %v19068_v50, %v10366_v17 }
 0xdfb   : > { %10972 = vmatprep.subr.bf16.mxu0 %v19132_v8  ;;  %11025 = vmatprep.subr.bf16.mxu1 %v19136_v0  ;;  %v10369_v19 = vsel %vm2088_vm9, %v19070_v13, %v10368_v61  ;;  %v10213_v58 = vrot.slane %v19072_v42, 4  ;;  %v10214_v18 = vrot.slane %v19074_v2, 4  ;;  %v10371_v29 = vsel %vm2088_vm9, %v19080_v21, %v10370_v54 }
 0xdfc   : > { %11026 = vmatpush1.bf16.msra.mxu1 %v19134_v14  ;;  %v10347_v49 = vpop.permute.xlu1 %10346  ;;  %10973 = vmatpush1.bf16.msra.mxu0 %v19130_v52  ;;  %v19161_v5 = vpop.permute.xlu0 %10050  ;;  %v10217_v48 = vrot.slane %v19086_v60, 4  ;;  %v10373_v50 = vsel %vm2088_vm9, %v19082_v28, %v10372_v40  ;;  %v10216_v13 = vrot.slane %v19084_v11, 4  ;;  %v19200_v24 = vsel %vm1947_vm10, %v19060_v57, %v10222_v7 }
 0xdfd   : > { %v10360_v41 = vrot.slane %v10347_v49, 4  ;;  %10974 = vmatprep.subr.bf16.mxu0 %v19142_v31  ;;  %11027 = vmatprep.subr.bf16.mxu1 %v19146_v63  ;;  %v10224_v53 = vsel %vm609_vm1, %v10211_v45, %v10212_v47  ;;  %v10226_v4 = vsel %vm609_vm1, %v10213_v58, %v10214_v18  ;;  %v10221_v17 = vrot.slane %v19050_v51, 4 }
 0xdfe   : > { %v19209_v61 = vcombine.high %v10365_v22, %v10369_v19  ;;  %v10228_v54 = vsel %vm609_vm1, %v10214_v18, %v10215_v43  ;;  %v10071_v57 = vrot.slane %v19066_v20, 4  ;;  %v19216_v7 = vcombine.low %v10363_v35, %v10367_v30 }
 0xdff   : > { %v10374_v38 = vsel %vm609_vm1, %v10359_v12, %v10360_v41  ;;  %v10376_v23 = vsel %vm609_vm1, %v10360_v41, %v10361_v62  ;;  %v10073_v45 = vrot.slane %v19076_v15, 4  ;;  %v10232_v51 = vsel %vm609_vm1, %v10217_v48, %v10218_v26 }
 0xe00   : > { %v10375_v39 = vsel %vm2088_vm9, %v10345_v36, %v10374_v38  ;;  %v10377_v10 = vsel %vm2088_vm9, %v10347_v49, %v10376_v23  ;;  %11028 = vmatpush1.bf16.msra.mxu1 %v19163_v34  ;;  %v19187_v21 = vpop.permute.xlu1 %10056  ;;  %10975 = vmatpush1.bf16.msra.mxu0 %v19156_v59  ;;  %v10205_v9 = vpop.permute.xlu0 %10204  ;;  %v19205_v36 = vcombine.high %v10363_v35, %v10367_v30  ;;  %v10074_v26 = vrot.slane %v19078_v16, 4 }
 0xe01   : > { %v19190_v27 = vcombine.low %v10371_v29, %v10375_v39  ;;  %v19192_v55 = vcombine.high %v10371_v29, %v10375_v39  ;;  %v19194_v62 = vcombine.low %v10373_v50, %v10377_v10  ;;  %v19196_v28 = vcombine.high %v10373_v50, %v10377_v10 }
 0xe02   : > { %v10230_v49 = vsel %vm609_vm1, %v10216_v13, %v10217_v48  ;;  %v19226_v40 = vcombine.low %v10365_v22, %v10369_v19  ;;  %v10227_v12 = vsel %vm1947_vm10, %v19072_v42, %v10226_v4  ;;  %v10219_v35 = vrot.slane %v10205_v9, 4 }
 0xe03   : > { %10976 = vmatprep.subr.bf16.mxu0 %v19192_v55  ;;  %11029 = vmatprep.subr.bf16.mxu1 %v19196_v28  ;;  %v10229_v1 = vsel %vm1947_vm10, %v19074_v2, %v10228_v54  ;;  %v10231_v30 = vsel %vm1947_vm10, %v19084_v11, %v10230_v49  ;;  %v10076_v22 = vrot.slane %v19088_v33, 4  ;;  %v10233_v19 = vsel %vm1947_vm10, %v19086_v60, %v10232_v51 }
 0xe04   : > { %v10207_v47 = vpop.permute.xlu1 %10206  ;;  %10977 = vmatpush1.bf16.msra.mxu0 %v19190_v27  ;;  %11030 = vmatpush1.bf16.msra.mxu1 %v19194_v62  ;;  %v19224_v43 = vpop.permute.xlu0 %10618  ;;  %v10077_v42 = vrot.slane %v19096_v25, 4  ;;  %v10078_v29 = vrot.slane %v19112_v32, 4  ;;  %v10075_v2 = vrot.slane %v19187_v21, 4  ;;  %v10225_v39 = vsel %vm1947_vm10, %v19062_v37, %v10224_v53 }
 0xe05   : > { %v10220_v41 = vrot.slane %v10207_v47, 4  ;;  %10978 = vmatprep.subr.bf16.mxu0 %v19205_v36  ;;  %11031 = vmatprep.subr.bf16.mxu1 %v19209_v61  ;;  %v10070_v10 = vrot.slane %v19064_v56, 4  ;;  %v19263_v21 = vcombine.high %v19200_v24, %v10227_v12  ;;  %v10086_v4 = vsel %vm609_vm1, %v10073_v45, %v10074_v26 }
 0xe06   : > { %v10072_v54 = vrot.slane %v19161_v5, 4  ;;  %v10092_v37 = vsel %vm609_vm1, %v10077_v42, %v10078_v29  ;;  %v10081_v45 = vrot.slane %v19128_v6, 4 }
 0xe07   : > { %v10234_v58 = vsel %vm609_vm1, %v10219_v35, %v10220_v41  ;;  %v10236_v18 = vsel %vm609_vm1, %v10220_v41, %v10221_v17  ;;  %v10090_v17 = vsel %vm609_vm1, %v10076_v22, %v10077_v42  ;;  %v10082_v49 = vsel %vm609_vm1, %v10070_v10, %v10071_v57 }
 0xe08   : > { %v10235_v48 = vsel %vm1947_vm10, %v10205_v9, %v10234_v58  ;;  %v10237_v38 = vsel %vm1947_vm10, %v10207_v47, %v10236_v18  ;;  %v19247_v11 = vpop.permute.xlu1 %10620  ;;  %10979 = vmatpush1.bf16.msra.mxu0 %v19216_v7  ;;  %11032 = vmatpush1.bf16.msra.mxu1 %v19226_v40  ;;  %v10065_v60 = vpop.permute.xlu0 %10064  ;;  %v19265_v9 = vcombine.high %v10225_v39, %v10229_v1 }
 0xe09   : > { %v19251_v23 = vcombine.low %v10231_v30, %v10235_v48  ;;  %v19253_v50 = vcombine.high %v10231_v30, %v10235_v48  ;;  %v19255_v13 = vcombine.low %v10233_v19, %v10237_v38  ;;  %v19257_v32 = vcombine.high %v10233_v19, %v10237_v38 }
 0xe0a   : > { %v10088_v47 = vsel %vm609_vm1, %v10074_v26, %v10075_v2  ;;  %v10079_v5 = vrot.slane %v10065_v60, 4  ;;  %v19283_v41 = vcombine.low %v19200_v24, %v10227_v12  ;;  %v19285_v30 = vcombine.low %v10225_v39, %v10229_v1 }
 0xe0b   : > { %10980 = vmatprep.subr.bf16.mxu0 %v19253_v50  ;;  %11033 = vmatprep.subr.bf16.mxu1 %v19257_v32  ;;  %v10087_v22 = vsel %vm1806_vm12, %v19076_v15, %v10086_v4  ;;  %v10091_v19 = vsel %vm1806_vm12, %v19088_v33, %v10090_v17  ;;  %v10084_v6 = vsel %vm609_vm1, %v10071_v57, %v10072_v54  ;;  %v10636_v17 = vrot.slane %v19224_v43, 4 }
 0xe0c   : > { %v10067_v53 = vpop.permute.xlu1 %10066  ;;  %10981 = vmatpush1.bf16.msra.mxu0 %v19251_v23  ;;  %11034 = vmatpush1.bf16.msra.mxu1 %v19255_v13  ;;  %v19276_v51 = vpop.permute.xlu0 %10606  ;;  %v10093_v26 = vsel %vm1806_vm12, %v19096_v25, %v10092_v37  ;;  %v10089_v24 = vsel %vm1806_vm12, %v19078_v16, %v10088_v47  ;;  %v10083_v16 = vsel %vm1806_vm12, %v19064_v56, %v10082_v49 }
 0xe0d   : > { %v10080_v35 = vrot.slane %v10067_v53, 4  ;;  %10982 = vmatprep.subr.bf16.mxu0 %v19263_v21  ;;  %11035 = vmatprep.subr.bf16.mxu1 %v19265_v9  ;;  %v10085_v2 = vsel %vm1806_vm12, %v19066_v20, %v10084_v6  ;;  %v19316_v48 = vcombine.high %v10083_v16, %v10087_v22  ;;  %v19327_v20 = vcombine.low %v10083_v16, %v10087_v22  ;;  %v20230_v6 = vld [vmem:[#allocation4_spill] sm:$0xff] }
 0xe0e   : > { %v19318_v38 = vcombine.high %v10085_v2, %v10089_v24  ;;  %v19329_v4 = vcombine.low %v10085_v2, %v10089_v24 }
 0xe0f   : > { %v10094_v42 = vsel %vm609_vm1, %v10079_v5, %v10080_v35  ;;  %v10096_v58 = vsel %vm609_vm1, %v10080_v35, %v10081_v45 }
 0xe10   : > { %v10095_v12 = vsel %vm1806_vm12, %v10065_v60, %v10094_v42  ;;  %v10097_v1 = vsel %vm1806_vm12, %v10067_v53, %v10096_v58  ;;  %v19300_v15 = vpop.permute.xlu1 %10608  ;;  %10983 = vmatpush1.bf16.msra.mxu0 %v19283_v41  ;;  %11036 = vmatpush1.bf16.msra.mxu1 %v19285_v30  ;;  %v10613_v33 = vpop.permute.xlu0 %10612  ;;  %v10637_v60 = vrot.slane %v19247_v11, 4  ;;  %v10630_v53 = vrot.slane %v19276_v51, 4 }
 0xe11   : > { %v19304_v57 = vcombine.low %v10091_v19, %v10095_v12  ;;  %v19306_v25 = vcombine.high %v10091_v19, %v10095_v12  ;;  %v19308_v18 = vcombine.low %v10093_v26, %v10097_v1  ;;  %v19310_v29 = vcombine.high %v10093_v26, %v10097_v1  ;;  %v20231_v26 = vld [vmem:[#allocation5_spill] sm:$0xff] }
 0xe12   : > { %v10631_v54 = vrot.slane %v19300_v15, 4  ;;  %v10633_v49 = vrot.slane %v10613_v33, 4  ;;  %v10650_v37 = vsel %vm609_vm1, %v10636_v17, %v10637_v60  ;;  %v20232_v17 = vld [vmem:[#allocation6_spill] sm:$0xff] }
 0xe13   : > { %10984 = vmatprep.subr.bf16.mxu0 %v19306_v25  ;;  %11037 = vmatprep.subr.bf16.mxu1 %v19310_v29  ;;  %v10651_v42 = vsel %vm2370_vm14, %v19224_v43, %v10650_v37 }
 0xe14   : > { %v10615_v39 = vpop.permute.xlu1 %10614  ;;  %10985 = vmatpush1.bf16.msra.mxu0 %v19304_v57  ;;  %11038 = vmatpush1.bf16.msra.mxu1 %v19308_v18  ;;  %v10625_v10 = vpop.permute.xlu0 %10624  ;;  %v10642_v58 = vsel %vm609_vm1, %v10630_v53, %v10631_v54 }
 0xe15   : > { %v10634_v56 = vrot.slane %v10615_v39, 4  ;;  %10986 = vmatprep.subr.bf16.mxu0 %v19316_v48  ;;  %11039 = vmatprep.subr.bf16.mxu1 %v19318_v38  ;;  %v10639_v35 = vrot.slane %v10625_v10, 4  ;;  %v10643_v53 = vsel %vm2370_vm14, %v19276_v51, %v10642_v58 }
 0xe17   : > { %v10646_v5 = vsel %vm609_vm1, %v10633_v49, %v10634_v56 }
 0xe18   : > { %v10627_v45 = vpop.permute.xlu1 %10626  ;;  %10987 = vmatpush1.bf16.msra.mxu0 %v19327_v20  ;;  %11040 = vmatpush1.bf16.msra.mxu1 %v19329_v4  ;;  %v10623_v47 = vpop.permute.xlu0 %10622  ;;  %v10647_v12 = vsel %vm2370_vm14, %v10613_v33, %v10646_v5 }
 0xe19   : > { %v10640_v22 = vrot.slane %v10627_v45, 4  ;;  %v10638_v19 = vrot.slane %v10623_v47, 4  ;;  %13135 = vmatprep.subr.msk.bf16.mxu0 %vm609_vm1, %v20230_v6  ;;  %13138 = vmatprep.subr.msk.bf16.mxu1 %vm609_vm1, %v20231_v26  ;;  %v20233_v47 = vld [vmem:[#allocation7_spill] sm:$0xff]  ;;  %v19357_v33 = vcombine.high %v10643_v53, %v10647_v12 }
 0xe1b   : > { %v10654_v24 = vsel %vm609_vm1, %v10639_v35, %v10640_v22  ;;  %v10652_v16 = vsel %vm609_vm1, %v10637_v60, %v10638_v19 }
 0xe1c   : > { %v10655_v1 = vsel %vm2370_vm14, %v10625_v10, %v10654_v24  ;;  %v10629_v2 = vpop.permute.xlu1 %10628  ;;  %10999 = vmatpush2.bf16.msra.mxu0 %v20232_v17  ;;  %v10611_v49 = vpop.permute.xlu0 %10610  ;;  %11052 = vmatpush2.bf16.msra.mxu1 %v20233_v47  ;;  %v10653_v60 = vsel %vm2370_vm14, %v19247_v11, %v10652_v16  ;;  %v13684_v11 = vld [vmem:[%s19978_s1 + $0x320] ss:$8 sps:$4 sm:$0xff]  }
 0xe1d   : > { %v19351_v44 = vcombine.low %v10651_v42, %v10655_v1  ;;  %v19353_v3 = vcombine.high %v10651_v42, %v10655_v1  ;;  %v10641_v43 = vrot.slane %v10629_v2, 4  ;;  %v10632_v37 = vrot.slane %v10611_v49, 4  ;;  %v13690_v16 = vld [vmem:[%s19978_s1 + $0x340] ss:$8 sps:$4 sm:$0xff]   ;;  %v13693_v2 = vld [vmem:[%s19978_s1 + $0x354] ss:$8 sps:$4 sm:$0xff]  }
 0xe1e   : > { %v13695_v49 = vld [vmem:[%s19978_s1 + $0x350] ss:$8 sps:$4 sm:$0xff]  }
 0xe1f   : > { %v10656_v10 = vsel %vm609_vm1, %v10640_v22, %v10641_v43  ;;  %11000 = vmatprep.subr.bf16.mxu0 %v19353_v3  ;;  %v10644_v51 = vsel %vm609_vm1, %v10631_v54, %v10632_v37  ;;  %v19371_v22 = vcombine.low %v10643_v53, %v10647_v12  ;;  %v13698_v43 = vld [vmem:[%s19978_s1 + $0x364] ss:$8 sps:$4 sm:$0xff]   ;;  %v13696_v37 = vld [vmem:[%s19978_s1 + $0x360] ss:$8 sps:$4 sm:$0xff]   ;;  %v13699_v53 = vld [vmem:[%s19978_s1 + $0x374] ss:$8 sps:$4 sm:$0xff]  }
 0xe20   : > { %v10657_v5 = vsel %vm2370_vm14, %v10627_v45, %v10656_v10  ;;  %v10617_v35 = vpop.permute.xlu1 %10616  ;;  %11001 = vmatpush2.bf16.msra.mxu0 %v19351_v44  ;;  %v10645_v45 = vsel %vm2370_vm14, %v19300_v15, %v10644_v51  ;;  %v13689_v15 = vld [vmem:[%s19978_s1 + $0x330] ss:$8 sps:$4 sm:$0xff]  }
 0xe21   : > { %v19365_v19 = vcombine.low %v10653_v60, %v10657_v5  ;;  %v19367_v42 = vcombine.high %v10653_v60, %v10657_v5  ;;  %v10635_v58 = vrot.slane %v10617_v35, 4  ;;  %11002 = vmatprep.subr.bf16.mxu0 %v19357_v33  ;;  %v13701_v10 = vld [vmem:[%s19978_s1 + $0x370] ss:$8 sps:$4 sm:$0xff]   ;;  %v13704_v60 = vld [vmem:[%s19978_s1 + $0x384] ss:$8 sps:$4 sm:$0xff]  }
 0xe22   : > { %v13702_v5 = vld [vmem:[%s19978_s1 + $0x380] ss:$8 sps:$4 sm:$0xff]   ;;  %v13705_v35 = vld [vmem:[%s19978_s1 + $0x394] ss:$8 sps:$4 sm:$0xff]  }
 0xe23   : > { %v10648_v24 = vsel %vm609_vm1, %v10634_v56, %v10635_v58  ;;  %11053 = vmatprep.subr.bf16.mxu1 %v19367_v42  ;;  %v13687_v56 = vld [vmem:[%s19978_s1 + $0x334] ss:$8 sps:$4 sm:$0xff]  }
 0xe24   : > { %v10649_v1 = vsel %vm2370_vm14, %v10615_v39, %v10648_v24  ;;  %11003 = vmatpush2.bf16.msra.mxu0 %v19371_v22  ;;  %11054 = vmatpush2.bf16.msra.mxu1 %v19365_v19  ;;  %v13692_v39 = vld [vmem:[%s19978_s1 + $0x344] ss:$8 sps:$4 sm:$0xff]  }
 0xe25   : > { %v19383_v54 = vcombine.low %v10645_v45, %v10649_v1  ;;  %v19385_v12 = vcombine.high %v10645_v45, %v10649_v1  ;;  %11135 = vmatprep.subr.bf16.mxu0 %v19132_v8 }
 0xe27   : > { %11005 = vmatmul.mubr.bf16.vlgmr.msra.gmra.mxu0 %v13684_v11  ;;  %11055 = vmatprep.subr.bf16.mxu1 %v19385_v12 }
 0xe28   : > { %11056 = vmatpush2.bf16.msra.mxu1 %v19383_v54  ;;  %11136 = vmatpush1.bf16.msra.mxu0 %v19130_v52 }
 0xe29   : > { %11137 = vmatprep.subr.bf16.mxu0 %v19142_v31  ;;  %11188 = vmatprep.subr.bf16.mxu1 %v19136_v0 }
 0xe2a   : > { %13137 = vmatprep.mubr.msk.bf16.mxu0 %vm602_vm0, %v13687_v56 }
 0xe2b   : > { %11058 = vmatmul.mubr.bf16.vlgmr.msra.gmra.mxu1 %v13684_v11 }
 0xe2c   : > { %11138 = vmatpush1.bf16.msra.mxu0 %v19156_v59  ;;  %11189 = vmatpush1.bf16.msra.mxu1 %v19134_v14 }
 0xe2d   : > { %11139 = vmatprep.subr.bf16.mxu0 %v19192_v55  ;;  %11190 = vmatprep.subr.bf16.mxu1 %v19146_v63 }
 0xe2e   : > { %13140 = vmatprep.mubr.msk.bf16.mxu1 %vm602_vm0, %v13687_v56 }
 0xe2f   : > { %11015 = vmatmul.mubr.bf16.gmra.mxu0 %v13689_v15 }
 0xe30   : > { %11140 = vmatpush1.bf16.msra.mxu0 %v19190_v27  ;;  %11191 = vmatpush1.bf16.msra.mxu1 %v19163_v34 }
 0xe31   : > { %11141 = vmatprep.subr.bf16.mxu0 %v19205_v36  ;;  %11192 = vmatprep.subr.bf16.mxu1 %v19196_v28 }
 0xe32   : > { %13150 = vmatprep.mubr.msk.bf16.mxu0 %vm602_vm0, %v13692_v39 }
 0xe33   : > { %11066 = vmatmul.mubr.bf16.gmra.mxu1 %v13689_v15 }
 0xe34   : > { %11142 = vmatpush1.bf16.msra.mxu0 %v19216_v7  ;;  %11193 = vmatpush1.bf16.msra.mxu1 %v19194_v62 }
 0xe35   : > { %11143 = vmatprep.subr.bf16.mxu0 %v19253_v50  ;;  %11194 = vmatprep.subr.bf16.mxu1 %v19209_v61 }
 0xe36   : > { %13153 = vmatprep.mubr.msk.bf16.mxu1 %vm602_vm0, %v13692_v39 }
 0xe38   : > { %11144 = vmatpush1.bf16.msra.mxu0 %v19251_v23  ;;  %11195 = vmatpush1.bf16.msra.mxu1 %v19226_v40 }
 0xe39   : > { %11145 = vmatprep.subr.bf16.mxu0 %v19263_v21  ;;  %11196 = vmatprep.subr.bf16.mxu1 %v19257_v32 }
 0xe3c   : > { %11146 = vmatpush1.bf16.msra.mxu0 %v19283_v41  ;;  %11197 = vmatpush1.bf16.msra.mxu1 %v19255_v13 }
 0xe3d   : > { %11147 = vmatprep.subr.bf16.mxu0 %v19306_v25  ;;  %11198 = vmatprep.subr.bf16.mxu1 %v19265_v9 }
 0xe40   : > { %11148 = vmatpush1.bf16.msra.mxu0 %v19304_v57  ;;  %11199 = vmatpush1.bf16.msra.mxu1 %v19285_v30 }
 0xe41   : > { %11149 = vmatprep.subr.bf16.mxu0 %v19316_v48  ;;  %11200 = vmatprep.subr.bf16.mxu1 %v19310_v29 }
 0xe44   : > { %11150 = vmatpush1.bf16.msra.mxu0 %v19327_v20  ;;  %11201 = vmatpush1.bf16.msra.mxu1 %v19308_v18 }
 0xe45   : > { %11202 = vmatprep.subr.bf16.mxu1 %v19318_v38  ;;  %13149 = vmatprep.subr.msk.bf16.mxu0 %vm609_vm1, %v20230_v6 }
 0xe48   : > { %11162 = vmatpush2.bf16.msra.mxu0 %v20232_v17  ;;  %11203 = vmatpush1.bf16.msra.mxu1 %v19329_v4 }
 0xe49   : > { %11163 = vmatprep.subr.bf16.mxu0 %v19353_v3  ;;  %13152 = vmatprep.subr.msk.bf16.mxu1 %vm609_vm1, %v20231_v26 }
 0xe4c   : > { %11164 = vmatpush2.bf16.msra.mxu0 %v19351_v44  ;;  %11215 = vmatpush2.bf16.msra.mxu1 %v20233_v47 }
 0xe4d   : > { %11165 = vmatprep.subr.bf16.mxu0 %v19357_v33  ;;  %11216 = vmatprep.subr.bf16.mxu1 %v19367_v42 }
 0xe50   : > { %11166 = vmatpush2.bf16.msra.mxu0 %v19371_v22  ;;  %11217 = vmatpush2.bf16.msra.mxu1 %v19365_v19 }
 0xe51   : > { %11218 = vmatprep.subr.bf16.mxu1 %v19385_v12  ;;  %11354 = vmatprep.subr.bf16.mxu0 %v19132_v8 }
 0xe53   : > { %11168 = vmatmul.mubr.bf16.vlgmr.msra.gmra.mxu0 %v13690_v16 }
 0xe54   : > { %11219 = vmatpush2.bf16.msra.mxu1 %v19383_v54  ;;  %11355 = vmatpush1.bf16.msra.mxu0 %v19130_v52 }
 0xe55   : > { %11356 = vmatprep.subr.bf16.mxu0 %v19142_v31  ;;  %11407 = vmatprep.subr.bf16.mxu1 %v19136_v0 }
 0xe56   : > { %13151 = vmatprep.mubr.msk.bf16.mxu0 %vm602_vm0, %v13693_v2 }
 0xe57   : > { %11221 = vmatmul.mubr.bf16.vlgmr.msra.gmra.mxu1 %v13690_v16 }
 0xe58   : > { %11357 = vmatpush1.bf16.msra.mxu0 %v19156_v59  ;;  %11408 = vmatpush1.bf16.msra.mxu1 %v19134_v14 }
 0xe59   : > { %11358 = vmatprep.subr.bf16.mxu0 %v19192_v55  ;;  %11409 = vmatprep.subr.bf16.mxu1 %v19146_v63 }
 0xe5a   : > { %13154 = vmatprep.mubr.msk.bf16.mxu1 %vm602_vm0, %v13693_v2 }
 0xe5b   : > { %11178 = vmatmul.mubr.bf16.gmra.mxu0 %v13695_v49 }
 0xe5c   : > { %11359 = vmatpush1.bf16.msra.mxu0 %v19190_v27  ;;  %11410 = vmatpush1.bf16.msra.mxu1 %v19163_v34 }
 0xe5d   : > { %11360 = vmatprep.subr.bf16.mxu0 %v19205_v36  ;;  %11411 = vmatprep.subr.bf16.mxu1 %v19196_v28 }
 0xe5e   : > { %13164 = vmatprep.mubr.msk.bf16.mxu0 %vm602_vm0, %v13698_v43 }
 0xe5f   : > { %11231 = vmatmul.mubr.bf16.gmra.mxu1 %v13695_v49 }
 0xe60   : > { %11361 = vmatpush1.bf16.msra.mxu0 %v19216_v7  ;;  %11412 = vmatpush1.bf16.msra.mxu1 %v19194_v62 }
 0xe61   : > { %11362 = vmatprep.subr.bf16.mxu0 %v19253_v50  ;;  %11413 = vmatprep.subr.bf16.mxu1 %v19209_v61 }
 0xe62   : > { %13167 = vmatprep.mubr.msk.bf16.mxu1 %vm602_vm0, %v13698_v43 }
 0xe64   : > { %11363 = vmatpush1.bf16.msra.mxu0 %v19251_v23  ;;  %11414 = vmatpush1.bf16.msra.mxu1 %v19226_v40 }
 0xe65   : > { %11364 = vmatprep.subr.bf16.mxu0 %v19263_v21  ;;  %11415 = vmatprep.subr.bf16.mxu1 %v19257_v32 }
 0xe68   : > { %11365 = vmatpush1.bf16.msra.mxu0 %v19283_v41  ;;  %11416 = vmatpush1.bf16.msra.mxu1 %v19255_v13 }
 0xe69   : > { %11366 = vmatprep.subr.bf16.mxu0 %v19306_v25  ;;  %11417 = vmatprep.subr.bf16.mxu1 %v19265_v9 }
 0xe6c   : > { %11367 = vmatpush1.bf16.msra.mxu0 %v19304_v57  ;;  %11418 = vmatpush1.bf16.msra.mxu1 %v19285_v30 }
 0xe6d   : > { %11368 = vmatprep.subr.bf16.mxu0 %v19316_v48  ;;  %11419 = vmatprep.subr.bf16.mxu1 %v19310_v29 }
 0xe70   : > { %11369 = vmatpush1.bf16.msra.mxu0 %v19327_v20  ;;  %11420 = vmatpush1.bf16.msra.mxu1 %v19308_v18 }
 0xe71   : > { %11421 = vmatprep.subr.bf16.mxu1 %v19318_v38  ;;  %13163 = vmatprep.subr.msk.bf16.mxu0 %vm609_vm1, %v20230_v6 }
 0xe74   : > { %11381 = vmatpush2.bf16.msra.mxu0 %v20232_v17  ;;  %11422 = vmatpush1.bf16.msra.mxu1 %v19329_v4 }
 0xe75   : > { %11382 = vmatprep.subr.bf16.mxu0 %v19353_v3  ;;  %13166 = vmatprep.subr.msk.bf16.mxu1 %vm609_vm1, %v20231_v26 }
 0xe78   : > { %11383 = vmatpush2.bf16.msra.mxu0 %v19351_v44  ;;  %11434 = vmatpush2.bf16.msra.mxu1 %v20233_v47 }
 0xe79   : > { %11384 = vmatprep.subr.bf16.mxu0 %v19357_v33  ;;  %11435 = vmatprep.subr.bf16.mxu1 %v19367_v42 }
 0xe7c   : > { %11385 = vmatpush2.bf16.msra.mxu0 %v19371_v22  ;;  %11436 = vmatpush2.bf16.msra.mxu1 %v19365_v19 }
 0xe7d   : > { %11437 = vmatprep.subr.bf16.mxu1 %v19385_v12  ;;  %11573 = vmatprep.subr.bf16.mxu0 %v19132_v8 }
 0xe7f   : > { %11387 = vmatmul.mubr.bf16.vlgmr.msra.gmra.mxu0 %v13696_v37 }
 0xe80   : > { %11438 = vmatpush2.bf16.msra.mxu1 %v19383_v54  ;;  %11574 = vmatpush1.bf16.msra.mxu0 %v19130_v52 }
 0xe81   : > { %11575 = vmatprep.subr.bf16.mxu0 %v19142_v31  ;;  %11626 = vmatprep.subr.bf16.mxu1 %v19136_v0 }
 0xe82   : > { %13165 = vmatprep.mubr.msk.bf16.mxu0 %vm602_vm0, %v13699_v53 }
 0xe83   : > { %11440 = vmatmul.mubr.bf16.vlgmr.msra.gmra.mxu1 %v13696_v37 }
 0xe84   : > { %11576 = vmatpush1.bf16.msra.mxu0 %v19156_v59  ;;  %11627 = vmatpush1.bf16.msra.mxu1 %v19134_v14 }
 0xe85   : > { %11577 = vmatprep.subr.bf16.mxu0 %v19192_v55  ;;  %11628 = vmatprep.subr.bf16.mxu1 %v19146_v63 }
 0xe86   : > { %13168 = vmatprep.mubr.msk.bf16.mxu1 %vm602_vm0, %v13699_v53 }
 0xe87   : > { %11397 = vmatmul.mubr.bf16.gmra.mxu0 %v13701_v10 }
 0xe88   : > { %11578 = vmatpush1.bf16.msra.mxu0 %v19190_v27  ;;  %11629 = vmatpush1.bf16.msra.mxu1 %v19163_v34 }
 0xe89   : > { %11579 = vmatprep.subr.bf16.mxu0 %v19205_v36  ;;  %11630 = vmatprep.subr.bf16.mxu1 %v19196_v28 }
 0xe8a   : > { %13178 = vmatprep.mubr.msk.bf16.mxu0 %vm602_vm0, %v13704_v60 }
 0xe8b   : > { %11450 = vmatmul.mubr.bf16.gmra.mxu1 %v13701_v10  ;;  %v11077_v10 = vpop.permute.xlu0 %11076 }
 0xe8c   : > { %11580 = vmatpush1.bf16.msra.mxu0 %v19216_v7  ;;  %11631 = vmatpush1.bf16.msra.mxu1 %v19194_v62 }
 0xe8d   : > { %11581 = vmatprep.subr.bf16.mxu0 %v19253_v50  ;;  %11632 = vmatprep.subr.bf16.mxu1 %v19209_v61 }
 0xe8e   : > { %13181 = vmatprep.mubr.msk.bf16.mxu1 %vm602_vm0, %v13704_v60 }
 0xe90   : > { %11582 = vmatpush1.bf16.msra.mxu0 %v19251_v23  ;;  %11633 = vmatpush1.bf16.msra.mxu1 %v19226_v40 }
 0xe91   : > { %11583 = vmatprep.subr.bf16.mxu0 %v19263_v21  ;;  %11634 = vmatprep.subr.bf16.mxu1 %v19257_v32 }
 0xe94   : > { %11584 = vmatpush1.bf16.msra.mxu0 %v19283_v41  ;;  %11635 = vmatpush1.bf16.msra.mxu1 %v19255_v13 }
 0xe95   : > { %11585 = vmatprep.subr.bf16.mxu0 %v19306_v25  ;;  %11636 = vmatprep.subr.bf16.mxu1 %v19265_v9 }
 0xe98   : > { %11586 = vmatpush1.bf16.msra.mxu0 %v19304_v57  ;;  %11637 = vmatpush1.bf16.msra.mxu1 %v19285_v30 }
 0xe99   : > { %11587 = vmatprep.subr.bf16.mxu0 %v19316_v48  ;;  %11638 = vmatprep.subr.bf16.mxu1 %v19310_v29 }
 0xe9c   : > { %11588 = vmatpush1.bf16.msra.mxu0 %v19327_v20  ;;  %11639 = vmatpush1.bf16.msra.mxu1 %v19308_v18 }
 0xe9d   : > { %11640 = vmatprep.subr.bf16.mxu1 %v19318_v38  ;;  %13177 = vmatprep.subr.msk.bf16.mxu0 %vm609_vm1, %v20230_v6 }
 0xea0   : > { %11600 = vmatpush2.bf16.msra.mxu0 %v20232_v17  ;;  %11641 = vmatpush1.bf16.msra.mxu1 %v19329_v4 }
 0xea1   : > { %11601 = vmatprep.subr.bf16.mxu0 %v19353_v3  ;;  %13180 = vmatprep.subr.msk.bf16.mxu1 %vm609_vm1, %v20231_v26 }
 0xea4   : > { %11602 = vmatpush2.bf16.msra.mxu0 %v19351_v44  ;;  %11653 = vmatpush2.bf16.msra.mxu1 %v20233_v47 }
 0xea5   : > { %11603 = vmatprep.subr.bf16.mxu0 %v19357_v33  ;;  %11654 = vmatprep.subr.bf16.mxu1 %v19367_v42 }
 0xea8   : > { %11604 = vmatpush2.bf16.msra.mxu0 %v19371_v22  ;;  %11655 = vmatpush2.bf16.msra.mxu1 %v19365_v19 }
 0xea9   : > { %11656 = vmatprep.subr.bf16.mxu1 %v19385_v12  ;;  %11792 = vmatprep.subr.bf16.mxu0 %v19132_v8  ;;  %v13707_v8 = vld [vmem:[%s19978_s1 + $0x390] ss:$8 sps:$4 sm:$0xff]  }
 0xeab   : > { %11606 = vmatmul.mubr.bf16.vlgmr.msra.gmra.mxu0 %v13702_v5 }
 0xeac   : > { %11657 = vmatpush2.bf16.msra.mxu1 %v19383_v54  ;;  %11793 = vmatpush1.bf16.msra.mxu0 %v19130_v52  ;;  %v13710_v52 = vld [vmem:[%s19978_s1 + $0x3a4] ss:$8 sps:$4 sm:$0xff]  }
 0xead   : > { %11794 = vmatprep.subr.bf16.mxu0 %v19142_v31  ;;  %11845 = vmatprep.subr.bf16.mxu1 %v19136_v0 }
 0xeae   : > { %13179 = vmatprep.mubr.msk.bf16.mxu0 %vm602_vm0, %v13705_v35 }
 0xeaf   : > { %11659 = vmatmul.mubr.bf16.vlgmr.msra.gmra.mxu1 %v13702_v5 }
 0xeb0   : > { %11795 = vmatpush1.bf16.msra.mxu0 %v19156_v59  ;;  %11846 = vmatpush1.bf16.msra.mxu1 %v19134_v14  ;;  %v13708_v14 = vld [vmem:[%s19978_s1 + $0x3a0] ss:$8 sps:$4 sm:$0xff]  }
 0xeb1   : > { %11796 = vmatprep.subr.bf16.mxu0 %v19192_v55  ;;  %11847 = vmatprep.subr.bf16.mxu1 %v19146_v63 }
 0xeb2   : > { %13182 = vmatprep.mubr.msk.bf16.mxu1 %vm602_vm0, %v13705_v35 }
 0xeb3   : > { %11616 = vmatmul.mubr.bf16.gmra.mxu0 %v13707_v8 }
 0xeb4   : > { %11797 = vmatpush1.bf16.msra.mxu0 %v19190_v27  ;;  %11848 = vmatpush1.bf16.msra.mxu1 %v19163_v34 }
 0xeb5   : > { %11798 = vmatprep.subr.bf16.mxu0 %v19205_v36  ;;  %11849 = vmatprep.subr.bf16.mxu1 %v19196_v28 }
 0xeb6   : > { %13192 = vmatprep.mubr.msk.bf16.mxu0 %vm602_vm0, %v13710_v52 }
 0xeb7   : > { %11669 = vmatmul.mubr.bf16.gmra.mxu1 %v13707_v8 }
 0xeb8   : > { %11799 = vmatpush1.bf16.msra.mxu0 %v19216_v7  ;;  %11850 = vmatpush1.bf16.msra.mxu1 %v19194_v62 }
 0xeb9   : > { %11800 = vmatprep.subr.bf16.mxu0 %v19253_v50  ;;  %11851 = vmatprep.subr.bf16.mxu1 %v19209_v61 }
 0xeba   : > { %13195 = vmatprep.mubr.msk.bf16.mxu1 %vm602_vm0, %v13710_v52  ;;  %v11082_v52 = vpop.permute.xlu0 %11081 }
 0xebc   : > { %11801 = vmatpush1.bf16.msra.mxu0 %v19251_v23  ;;  %11852 = vmatpush1.bf16.msra.mxu1 %v19226_v40 }
 0xebd   : > { %11802 = vmatprep.subr.bf16.mxu0 %v19263_v21  ;;  %11853 = vmatprep.subr.bf16.mxu1 %v19257_v32 }
 0xec0   : > { %11803 = vmatpush1.bf16.msra.mxu0 %v19283_v41  ;;  %11854 = vmatpush1.bf16.msra.mxu1 %v19255_v13 }
 0xec1   : > { %11804 = vmatprep.subr.bf16.mxu0 %v19306_v25  ;;  %11855 = vmatprep.subr.bf16.mxu1 %v19265_v9 }
 0xec4   : > { %11805 = vmatpush1.bf16.msra.mxu0 %v19304_v57  ;;  %11856 = vmatpush1.bf16.msra.mxu1 %v19285_v30 }
 0xec5   : > { %11806 = vmatprep.subr.bf16.mxu0 %v19316_v48  ;;  %11857 = vmatprep.subr.bf16.mxu1 %v19310_v29 }
 0xec8   : > { %11807 = vmatpush1.bf16.msra.mxu0 %v19327_v20  ;;  %11858 = vmatpush1.bf16.msra.mxu1 %v19308_v18 }
 0xec9   : > { %11859 = vmatprep.subr.bf16.mxu1 %v19318_v38  ;;  %13191 = vmatprep.subr.msk.bf16.mxu0 %vm609_vm1, %v20230_v6 }
 0xecc   : > { %11819 = vmatpush2.bf16.msra.mxu0 %v20232_v17  ;;  %11860 = vmatpush1.bf16.msra.mxu1 %v19329_v4 }
 0xecd   : > { %11820 = vmatprep.subr.bf16.mxu0 %v19353_v3  ;;  %13194 = vmatprep.subr.msk.bf16.mxu1 %vm609_vm1, %v20231_v26  ;;  %v13711_v3 = vld [vmem:[%s19978_s1 + $0x3b4] ss:$8 sps:$4 sm:$0xff]  }
 0xed0   : > { %11821 = vmatpush2.bf16.msra.mxu0 %v19351_v44  ;;  %11872 = vmatpush2.bf16.msra.mxu1 %v20233_v47  ;;  %v13713_v44 = vld [vmem:[%s19978_s1 + $0x3b0] ss:$8 sps:$4 sm:$0xff]  }
 0xed1   : > { %11822 = vmatprep.subr.bf16.mxu0 %v19357_v33  ;;  %11873 = vmatprep.subr.bf16.mxu1 %v19367_v42 }
 0xed4   : > { %11823 = vmatpush2.bf16.msra.mxu0 %v19371_v22  ;;  %11874 = vmatpush2.bf16.msra.mxu1 %v19365_v19 }
 0xed5   : > { %11875 = vmatprep.subr.bf16.mxu1 %v19385_v12 }
 0xed7   : > { %11825 = vmatmul.mubr.bf16.vlgmr.msra.gmra.mxu0 %v13708_v14 }
 0xed8   : > { %11876 = vmatpush2.bf16.msra.mxu1 %v19383_v54  ;;  %13193 = vmatprep.mubr.msk.bf16.mxu0 %vm602_vm0, %v13711_v3 }
 0xedb   : > { %11878 = vmatmul.mubr.bf16.vlgmr.msra.gmra.mxu1 %v13708_v14 }
 0xedc   : > { %13196 = vmatprep.mubr.msk.bf16.mxu1 %vm602_vm0, %v13711_v3 }
 0xedf   : > { %11835 = vmatmul.mubr.bf16.gmra.mxu0 %v13713_v44 }
 0xee3   : > { %11888 = vmatmul.mubr.bf16.gmra.mxu1 %v13713_v44  ;;  %v11087_v44 = vpop.permute.xlu1 %11086 }
 0xee7   : > { %v19651_v27 = vpop.f32.mrf.mxu0 }
 0xee9   : > { %v19655_v28 = vpop.f32.mrf.mxu0 }
 0xeeb   : > { %v19645_v0 = vpop.f32.mrf.mxu1  ;;  %v19657_v61 = vpop.f32.mrf.mxu0 }
 0xeed   : > { %v11061_v31 = vpop.f32.mrf.mxu1  ;;  %v19659_v7 = vpop.f32.mrf.mxu0 }
 0xeee   : > { %v19713_v31 = vpop.permute.xlu0 %11091 }
 0xeef   : > { %v19647_v63 = vpop.f32.mrf.mxu1  ;;  %v19661_v40 = vpop.f32.mrf.mxu0 }
 0xef1   : > { %v11064_v59 = vpop.f32.mrf.mxu1  ;;  %v19663_v23 = vpop.f32.mrf.mxu0 }
 0xef3   : > { %v19649_v34 = vpop.f32.mrf.mxu1  ;;  %v19665_v50 = vpop.f32.mrf.mxu0 }
 0xef5   : > { %v11069_v55 = vpop.f32.mrf.mxu1  ;;  %v19667_v13 = vpop.f32.mrf.mxu0 }
 0xef7   : > { %v19653_v62 = vpop.f32.mrf.mxu1 }
 0xef9   : > { %v11072_v36 = vpop.f32.mrf.mxu1 }
 0xefa   : > { %v11094_v36 = vadd.f32 %v11077_v10, %v19651_v27  ;;  %v11097_v27 = vadd.f32 %v11082_v52, %v19657_v61 }
 0xf13   : > { %v11169_v32 = vpop.f32.mrf.mxu0 }
 0xf14   : > { %11257 = vrot.lane.b32.xlu1 %v11169_v32, %s13726_s25 }
 0xf15   : > { %v11171_v21 = vpop.f32.mrf.mxu0 }
 0xf16   : > { %11259 = vrot.lane.b32.xlu0 %v11171_v21, %s13726_s25 }
 0xf17   : > { %v11222_v9 = vpop.f32.mrf.mxu1  ;;  %v11173_v30 = vpop.f32.mrf.mxu0 }
 0xf18   : > { %11261 = vrot.lane.b32.xlu1 %v11222_v9, %s13726_s25  ;;  %v11095_v9 = vadd.f32 %v11077_v10, %v19655_v28 }
 0xf19   : > { %v11224_v41 = vpop.f32.mrf.mxu1  ;;  %v11175_v25 = vpop.f32.mrf.mxu0 }
 0xf1b   : > { %v11226_v57 = vpop.f32.mrf.mxu1  ;;  %v11179_v48 = vpop.f32.mrf.mxu0 }
 0xf1c   : > { %11263 = vrot.lane.b32.xlu1 %v11224_v41, %s13726_s25  ;;  %11269 = vrot.lane.b32.xlu0 %v11226_v57, %s13726_s25 }
 0xf1d   : > { %v11228_v18 = vpop.f32.mrf.mxu1  ;;  %v11181_v38 = vpop.f32.mrf.mxu0 }
 0xf1f   : > { %v11232_v29 = vpop.f32.mrf.mxu1  ;;  %v11183_v6 = vpop.f32.mrf.mxu0 }
 0xf20   : > { %11265 = vrot.lane.b32.xlu1 %v11173_v30, %s13726_s25  ;;  %11267 = vrot.lane.b32.xlu0 %v11175_v25, %s13726_s25 }
 0xf21   : > { %v11234_v20 = vpop.f32.mrf.mxu1  ;;  %v11185_v26 = vpop.f32.mrf.mxu0 }
 0xf23   : > { %v11236_v4 = vpop.f32.mrf.mxu1 }
 0xf24   : > { %11271 = vrot.lane.b32.xlu0 %v11228_v18, %s13726_s25  ;;  %11277 = vrot.lane.b32.xlu1 %v11232_v29, %s13726_s25  ;;  %v11096_v18 = vadd.f32 %v11077_v10, %v19645_v0 }
 0xf25   : > { %v11238_v17 = vpop.f32.mrf.mxu1 }
 0xf28   : > { %11273 = vrot.lane.b32.xlu0 %v11179_v48, %s13726_s25  ;;  %11275 = vrot.lane.b32.xlu1 %v11181_v38, %s13726_s25 }
 0xf2c   : > { %11279 = vrot.lane.b32.xlu1 %v11234_v20, %s13726_s25  ;;  %11285 = vrot.lane.b32.xlu0 %v11236_v4, %s13726_s25  ;;  %v11098_v4 = vadd.f32 %v11082_v52, %v19659_v7 }
 0xf30   : > { %11281 = vrot.lane.b32.xlu1 %v11183_v6, %s13726_s25  ;;  %11283 = vrot.lane.b32.xlu0 %v11185_v26, %s13726_s25 }
 0xf34   : > { %11287 = vrot.lane.b32.xlu1 %v11238_v17, %s13726_s25 }
 0xf3f   : > { %v11388_v47 = vpop.f32.mrf.mxu0 }
 0xf40   : > { %11476 = vrot.lane.b32.xlu0 %v11388_v47, %s13727_s26 }
 0xf41   : > { %v11390_v33 = vpop.f32.mrf.mxu0 }
 0xf42   : > { %11478 = vrot.lane.b32.xlu1 %v11390_v33, %s13727_s26 }
 0xf43   : > { %v11441_v19 = vpop.f32.mrf.mxu1  ;;  %v11392_v42 = vpop.f32.mrf.mxu0 }
 0xf44   : > { %11480 = vrot.lane.b32.xlu0 %v11441_v19, %s13727_s26 }
 0xf45   : > { %v11443_v51 = vpop.f32.mrf.mxu1  ;;  %v11394_v58 = vpop.f32.mrf.mxu0 }
 0xf46   : > { %11482 = vrot.lane.b32.xlu1 %v11443_v51, %s13727_s26 }
 0xf47   : > { %v11445_v22 = vpop.f32.mrf.mxu1  ;;  %v11398_v11 = vpop.f32.mrf.mxu0 }
 0xf48   : > { %11486 = vrot.lane.b32.xlu0 %v11394_v58, %s13727_s26 }
 0xf49   : > { %v11447_v24 = vpop.f32.mrf.mxu1  ;;  %v11400_v1 = vpop.f32.mrf.mxu0 }
 0xf4a   : > { %11484 = vrot.lane.b32.xlu1 %v11392_v42, %s13727_s26  ;;  %v11099_v42 = vadd.f32 %v11082_v52, %v19647_v63 }
 0xf4b   : > { %v11451_v45 = vpop.f32.mrf.mxu1  ;;  %v11402_v56 = vpop.f32.mrf.mxu0 }
 0xf4c   : > { %11490 = vrot.lane.b32.xlu0 %v11447_v24, %s13727_s26 }
 0xf4d   : > { %v11453_v54 = vpop.f32.mrf.mxu1  ;;  %v11404_v15 = vpop.f32.mrf.mxu0 }
 0xf4e   : > { %11488 = vrot.lane.b32.xlu1 %v11445_v22, %s13727_s26 }
 0xf4f   : > { %v11455_v12 = vpop.f32.mrf.mxu1 }
 0xf50   : > { %11492 = vrot.lane.b32.xlu0 %v11398_v11, %s13727_s26  ;;  %v11100_v11 = vadd.f32 %v11087_v44, %v19661_v40 }
 0xf51   : > { %v19701_v16 = vpop.f32.mrf.mxu1 }
 0xf52   : > { %11494 = vrot.lane.b32.xlu1 %v11400_v1, %s13727_s26 }
 0xf54   : > { %11496 = vrot.lane.b32.xlu0 %v11451_v45, %s13727_s26  ;;  %v11101_v45 = vadd.f32 %v11087_v44, %v19663_v23 }
 0xf56   : > { %11498 = vrot.lane.b32.xlu1 %v11453_v54, %s13727_s26 }
 0xf58   : > { %11504 = vrot.lane.b32.xlu0 %v11455_v12, %s13727_s26 }
 0xf5a   : > { %11500 = vrot.lane.b32.xlu1 %v11402_v56, %s13727_s26 }
 0xf5c   : > { %11502 = vrot.lane.b32.xlu0 %v11404_v15, %s13727_s26 }
 0xf6b   : > { %v11607_v39 = vpop.f32.mrf.mxu0 }
 0xf6c   : > { %11695 = vrot.lane.b32.xlu1 %v11607_v39, %s13728_s27 }
 0xf6d   : > { %v11609_v49 = vpop.f32.mrf.mxu0 }
 0xf6f   : > { %v11660_v2 = vpop.f32.mrf.mxu1  ;;  %v11611_v37 = vpop.f32.mrf.mxu0 }
 0xf70   : > { %11699 = vrot.lane.b32.xlu0 %v11660_v2, %s13728_s27 }
 0xf71   : > { %v11662_v43 = vpop.f32.mrf.mxu1  ;;  %v11613_v60 = vpop.f32.mrf.mxu0 }
 0xf72   : > { %11701 = vrot.lane.b32.xlu1 %v11662_v43, %s13728_s27  ;;  %v11102_v43 = vadd.f32 %v11087_v44, %v19649_v34 }
 0xf73   : > { %v11664_v53 = vpop.f32.mrf.mxu1  ;;  %v11617_v35 = vpop.f32.mrf.mxu0 }
 0xf74   : > { %11697 = vrot.lane.b32.xlu0 %v11609_v49, %s13728_s27 }
 0xf75   : > { %v11666_v5 = vpop.f32.mrf.mxu1  ;;  %v11619_v3 = vpop.f32.mrf.mxu0 }
 0xf76   : > { %11707 = vrot.lane.b32.xlu1 %v11664_v53, %s13728_s27 }
 0xf77   : > { %v11670_v8 = vpop.f32.mrf.mxu1  ;;  %v11621_v59 = vpop.f32.mrf.mxu0 }
 0xf78   : > { %11703 = vrot.lane.b32.xlu0 %v11611_v37, %s13728_s27 }
 0xf79   : > { %v11672_v14 = vpop.f32.mrf.mxu1  ;;  %v11623_v0 = vpop.f32.mrf.mxu0 }
 0xf7a   : > { %11705 = vrot.lane.b32.xlu1 %v11613_v60, %s13728_s27 }
 0xf7b   : > { %v11674_v19 = vpop.f32.mrf.mxu1 }
 0xf7c   : > { %11709 = vrot.lane.b32.xlu0 %v11666_v5, %s13728_s27  ;;  %v11103_v5 = vadd.f32 %v19713_v31, %v19665_v50  ;;  %v11105_v50 = vadd.f32 %v19713_v31, %v19653_v62 }
 0xf7d   : > { %v11676_v24 = vpop.f32.mrf.mxu1 }
 0xf7e   : > { %11711 = vrot.lane.b32.xlu1 %v11617_v35, %s13728_s27  ;;  %v11104_v35 = vadd.f32 %v19713_v31, %v19667_v13 }
 0xf80   : > { %11715 = vrot.lane.b32.xlu0 %v11670_v8, %s13728_s27 }
 0xf82   : > { %11717 = vrot.lane.b32.xlu1 %v11672_v14, %s13728_s27 }
 0xf84   : > { %11713 = vrot.lane.b32.xlu0 %v11619_v3, %s13728_s27 }
 0xf86   : > { %v11258_v55 = vpop.permute.xlu1 %11257  ;;  %11719 = vrot.lane.b32.xlu1 %v11621_v59, %s13728_s27 }
 0xf88   : > { %v11260_v32 = vpop.permute.xlu0 %11259 }
 0xf89   : > { %v11289_v21 = vsel %vm939_vm4, %v11258_v55, %v11260_v32 }
 0xf8a   : > { %v19720_v41 = vadd.f32 %v11289_v21, %v11094_v36  ;;  %v11262_v30 = vpop.permute.xlu1 %11261 }
 0xf8b   : > { %v11290_v57 = vsel %vm939_vm4, %v11260_v32, %v11262_v30 }
 0xf8c   : > { %v19723_v25 = vadd.f32 %v11290_v57, %v11095_v9 }
 0xf8e   : > { %v11264_v29 = vpop.permute.xlu1 %11263  ;;  %v11270_v48 = vpop.permute.xlu0 %11269 }
 0xf8f   : > { %v11291_v38 = vsel %vm939_vm4, %v11262_v30, %v11264_v29 }
 0xf90   : > { %v19727_v20 = vadd.f32 %v11291_v38, %v11096_v18 }
 0xf92   : > { %v11266_v28 = vpop.permute.xlu1 %11265  ;;  %v11268_v6 = vpop.permute.xlu0 %11267 }
 0xf93   : > { %v11292_v26 = vsel %vm939_vm4, %v11266_v28, %v11268_v6  ;;  %v11293_v17 = vsel %vm939_vm4, %v11268_v6, %v11270_v48 }
 0xf94   : > { %v19733_v47 = vadd.f32 %v11292_v26, %v11097_v27  ;;  %v19735_v33 = vadd.f32 %v11293_v17, %v11098_v4 }
 0xf96   : > { %v11278_v51 = vpop.permute.xlu1 %11277  ;;  %v11272_v58 = vpop.permute.xlu0 %11271 }
 0xf97   : > { %v11294_v61 = vsel %vm939_vm4, %v11270_v48, %v11272_v58  ;;  %v11826_v22 = vpop.f32.mrf.mxu0 }
 0xf98   : > { %v19739_v7 = vadd.f32 %v11294_v61, %v11099_v42  ;;  %11914 = vrot.lane.b32.xlu1 %v11826_v22, %s13729_s28 }
 0xf99   : > { %v11828_v2 = vpop.f32.mrf.mxu0 }
 0xf9a   : > { %v11276_v1 = vpop.permute.xlu1 %11275  ;;  %v11274_v54 = vpop.permute.xlu0 %11273 }
 0xf9b   : > { %v11296_v12 = vsel %vm939_vm4, %v11276_v1, %v11278_v51  ;;  %v11295_v63 = vsel %vm939_vm4, %v11274_v54, %v11276_v1  ;;  %v11879_v56 = vpop.f32.mrf.mxu1  ;;  %v11830_v10 = vpop.f32.mrf.mxu0 }
 0xf9c   : > { %v19746_v15 = vadd.f32 %v11296_v12, %v11101_v45  ;;  %v19748_v39 = vadd.f32 %v11295_v63, %v11100_v11  ;;  %11918 = vrot.lane.b32.xlu0 %v11879_v56, %s13729_s28 }
 0xf9d   : > { %v11881_v49 = vpop.f32.mrf.mxu1  ;;  %v11832_v59 = vpop.f32.mrf.mxu0 }
 0xf9e   : > { %v11280_v40 = vpop.permute.xlu1 %11279  ;;  %11920 = vrot.lane.b32.xlu1 %v11881_v49, %s13729_s28  ;;  %v11286_v23 = vpop.permute.xlu0 %11285 }
 0xf9f   : > { %v11297_v37 = vsel %vm939_vm4, %v11278_v51, %v11280_v40  ;;  %v11883_v60 = vpop.f32.mrf.mxu1  ;;  %v11836_v9 = vpop.f32.mrf.mxu0 }
 0xfa0   : > { %v19754_v53 = vadd.f32 %v11297_v37, %v11102_v43  ;;  %11916 = vrot.lane.b32.xlu0 %v11828_v2, %s13729_s28 }
 0xfa1   : > { %v11885_v32 = vpop.f32.mrf.mxu1  ;;  %v11838_v30 = vpop.f32.mrf.mxu0 }
 0xfa2   : > { %v11282_v8 = vpop.permute.xlu1 %11281  ;;  %11926 = vrot.lane.b32.xlu1 %v11883_v60, %s13729_s28  ;;  %v11284_v34 = vpop.permute.xlu0 %11283 }
 0xfa3   : > { %v11298_v52 = vsel %vm939_vm4, %v11282_v8, %v11284_v34  ;;  %v11299_v14 = vsel %vm939_vm4, %v11284_v34, %v11286_v23  ;;  %v11889_v21 = vpop.f32.mrf.mxu1 }
 0xfa4   : > { %v19764_v3 = vadd.f32 %v11298_v52, %v11103_v5  ;;  %v11323_v44 = vadd.f32 %v11299_v14, %v11104_v35  ;;  %11721 = vrot.lane.b32.xlu0 %v11623_v0, %s13728_s27 }
 0xfa5   : > { %v11891_v62 = vpop.f32.mrf.mxu1 }
 0xfa6   : > { %v11288_v55 = vpop.permute.xlu1 %11287  ;;  %11924 = vrot.lane.b32.xlu1 %v11832_v59, %s13729_s28 }
 0xfa7   : > { %v11300_v13 = vsel %vm939_vm4, %v11286_v23, %v11288_v55  ;;  %v11893_v18 = vpop.f32.mrf.mxu1 }
 0xfa8   : > { %v19771_v36 = vadd.f32 %v11300_v13, %v11105_v50  ;;  %11922 = vrot.lane.b32.xlu0 %v11830_v10, %s13729_s28 }
 0xfa9   : > { %v11895_v38 = vpop.f32.mrf.mxu1 }
 0xfaa   : > { %11506 = vrot.lane.b32.xlu1 %v19701_v16, %s13727_s26  ;;  %v11840_v16 = vpop.f32.mrf.mxu0 }
 0xfac   : > { %11928 = vrot.lane.b32.xlu0 %v11885_v32, %s13729_s28  ;;  %v11842_v48 = vpop.f32.mrf.mxu0 }
 0xfae   : > { %11930 = vrot.lane.b32.xlu1 %v11836_v9, %s13729_s28 }
 0xfb0   : > { %11934 = vrot.lane.b32.xlu0 %v11889_v21, %s13729_s28 }
 0xfb2   : > { %11936 = vrot.lane.b32.xlu1 %v11891_v62, %s13729_s28  ;;  %v11477_v31 = vpop.permute.xlu0 %11476 }
 0xfb4   : > { %11932 = vrot.lane.b32.xlu0 %v11838_v30, %s13729_s28  ;;  %v11479_v27 = vpop.permute.xlu1 %11478 }
 0xfb5   : > { %v11508_v5 = vsel %vm1159_vm8, %v11477_v31, %v11479_v27 }
 0xfb6   : > { %11725 = vrot.lane.b32.xlu1 %v11676_v24, %s13728_s27  ;;  %v11481_v57 = vpop.permute.xlu0 %11480  ;;  %v11532_v59 = vadd.f32 %v11508_v5, %v19720_v41  ;;  %v12062_v41 = vld [vmem:[%s19980_s3] sm:$0xff] }
 0xfb7   : > { %v11509_v35 = vsel %vm1159_vm8, %v11479_v27, %v11481_v57 }
 0xfb8   : > { %11723 = vrot.lane.b32.xlu0 %v11674_v19, %s13728_s27  ;;  %v11483_v6 = vpop.permute.xlu1 %11482  ;;  %v11533_v50 = vadd.f32 %v11509_v35, %v19723_v25 }
 0xfb9   : > { %v11510_v60 = vsel %vm1159_vm8, %v11481_v57, %v11483_v6 }
 0xfba   : > { %11938 = vrot.lane.b32.xlu1 %v11840_v16, %s13729_s28  ;;  %v11487_v29 = vpop.permute.xlu0 %11486  ;;  %v11534_v34 = vadd.f32 %v11510_v60, %v19727_v20 }
 0xfbc   : > { %11940 = vrot.lane.b32.xlu0 %v11842_v48, %s13729_s28  ;;  %v11485_v17 = vpop.permute.xlu1 %11484 }
 0xfbe   : > { %11944 = vrot.lane.b32.xlu1 %v11895_v38, %s13729_s28  ;;  %v19786_v4 = vpop.permute.xlu0 %11490  ;;  %v11511_v38 = vsel %vm1159_vm8, %v11485_v17, %v11487_v29 }
 0xfc0   : > { %11942 = vrot.lane.b32.xlu0 %v11893_v18, %s13729_s28  ;;  %v19800_v51 = vpop.permute.xlu1 %11488 }
 0xfc1   : > { %v11512_v20 = vsel %vm1159_vm8, %v11487_v29, %v19800_v51  ;;  %v11535_v29 = vadd.f32 %v11511_v38, %v19733_v47  ;;  %v12067_v47 = vld [vmem:[%s19980_s3 + $0x28] sm:$0xff] }
 0xfc2   : > { %v19789_v28 = vpop.permute.xlu0 %11492  ;;  %v11536_v6 = vadd.f32 %v11512_v20, %v19735_v33  ;;  %v12063_v33 = vld [vmem:[%s19980_s3 + $0x8] sm:$0xff] }
 0xfc4   : > { %v19804_v61 = vpop.permute.xlu1 %11494 }
 0xfc6   : > { %v19791_v26 = vpop.permute.xlu0 %11496 }
 0xfc8   : > { %v19806_v22 = vpop.permute.xlu1 %11498 }
 0xfca   : > { %v19793_v0 = vpop.permute.xlu0 %11504 }
 0xfcc   : > { %v19808_v24 = vpop.permute.xlu1 %11500 }
 0xfce   : > { %v19795_v19 = vpop.permute.xlu0 %11502 }
 0xfcf   : > { %v11518_v42 = vsel %vm1159_vm8, %v19795_v19, %v19793_v0 }
 0xfd0   : > { %v19802_v58 = vadd.f32 %v11518_v42, %v11323_v44 }
 0xfde   : > { %v11696_v11 = vpop.permute.xlu1 %11695 }
 0xfe2   : > { %v11700_v1 = vpop.permute.xlu0 %11699 }
 0xfe4   : > { %v11702_v45 = vpop.permute.xlu1 %11701 }
 0xfe5   : > { %v11729_v8 = vsel %vm1379_vm11, %v11700_v1, %v11702_v45 }
 0xfe6   : > { %v11698_v12 = vpop.permute.xlu0 %11697  ;;  %v11753_v55 = vadd.f32 %v11729_v8, %v11534_v34 }
 0xfe7   : > { %v11727_v14 = vsel %vm1379_vm11, %v11696_v11, %v11698_v12  ;;  %v11728_v44 = vsel %vm1379_vm11, %v11698_v12, %v11700_v1  ;;  %v12082_v1 = vmul.f32 0.0, %v12062_v41 }
 0xfe8   : > { %v19810_v54 = vpop.permute.xlu1 %11707  ;;  %v11751_v21 = vadd.f32 %v11727_v14, %v11532_v59  ;;  %v11752_v9 = vadd.f32 %v11728_v44, %v11533_v50  ;;  %v12064_v14 = vld [vmem:[%s19980_s3 + $0x10] sm:$0xff]  ;;  %v20234_v44 = vld [vmem:[#allocation25_spill] sm:$0xff] }
 0xfea   : > { %v11704_v56 = vpop.permute.xlu0 %11703 }
 0xfec   : > { %v11706_v63 = vpop.permute.xlu1 %11705 }
 0xfed   : > { %v11731_v27 = vsel %vm1379_vm11, %v11706_v63, %v19810_v54  ;;  %v11730_v45 = vsel %vm1379_vm11, %v11704_v56, %v11706_v63  ;;  %v11513_v63 = vsel %vm1159_vm8, %v19800_v51, %v19786_v4  ;;  %v20235_v51 = vld [vmem:[#allocation26_spill] sm:$0xff] }
 0xfee   : > { %v11710_v49 = vpop.permute.xlu0 %11709  ;;  %v11755_v17 = vadd.f32 %v11731_v27, %v11536_v6  ;;  %v11516_v27 = vsel %vm1159_vm8, %v19791_v26, %v19806_v22 }
 0xfef   : > { %v11732_v4 = vsel %vm1379_vm11, %v19810_v54, %v11710_v49 }
 0xff0   : > { %v19812_v2 = vpop.permute.xlu1 %11711 }
 0xff2   : > { %v19816_v40 = vpop.permute.xlu0 %11715 }
 0xff4   : > { %v19814_v43 = vpop.permute.xlu1 %11717 }
 0xff5   : > { %v11735_v22 = vsel %vm1379_vm11, %v19816_v40, %v19814_v43 }
 0xff6   : > { %v19820_v37 = vpop.permute.xlu0 %11713 }
 0xff8   : > { %v19818_v23 = vpop.permute.xlu1 %11719 }
0x100a   : > { %v11915_v10 = vpop.permute.xlu1 %11914 }
0x100e   : > { %v11919_v52 = vpop.permute.xlu0 %11918 }
0x1010   : > { %v11921_v13 = vpop.permute.xlu1 %11920 }
0x1011   : > { %v11948_v32 = vsel %vm1599_vm13, %v11919_v52, %v11921_v13 }
0x1012   : > { %v11972_v62 = vadd.f32 %v11948_v32, %v11753_v55  ;;  %v11917_v31 = vpop.permute.xlu0 %11916 }
0x1013   : > { %v11946_v30 = vsel %vm1599_vm13, %v11915_v10, %v11917_v31  ;;  %v11947_v57 = vsel %vm1599_vm13, %v11917_v31, %v11919_v52  ;;  %v12066_v10 = vld [vmem:[%s19980_s3 + $0x20] sm:$0xff]  ;;  %v11754_v52 = vadd.f32 %v11730_v45, %v11535_v29  ;;  %v12065_v31 = vld [vmem:[%s19980_s3 + $0x18] sm:$0xff] }
0x1014   : > { %v11996_v16 = vmul.f32 0.2, %v11972_v62  ;;  %v11970_v25 = vadd.f32 %v11946_v30, %v11751_v21  ;;  %v11971_v18 = vadd.f32 %v11947_v57, %v11752_v9  ;;  %v11927_v48 = vpop.permute.xlu1 %11926  ;;  %vm11984_vm0 = vcmp.gt.f32.partialorder %v11972_v62, 0.0 }
0x1015   : > { %v12086_v55 = vmul.f32 0.0, %v12066_v10  ;;  %v12087_v30 = vmul.f32 0.0, %v12067_v47 }
0x1016   : > { %vm11982_vm1 = vcmp.gt.f32.partialorder %v11970_v25, 0.0  ;;  %vm11983_vm4 = vcmp.gt.f32.partialorder %v11971_v18, 0.0  ;;  %v11994_v42 = vmul.f32 0.2, %v11970_v25  ;;  %v19843_v11 = vpop.permute.xlu0 %11721  ;;  %v11995_v12 = vmul.f32 0.2, %v11971_v18 }
0x1017   : > { %v12008_v60 = vsel %vm11984_vm0, %v11972_v62, %v11996_v16  ;;  %v11537_v62 = vadd.f32 %v11513_v63, %v19739_v7 }
0x1018   : > { %v12006_v5 = vsel %vm11982_vm1, %v11970_v25, %v11994_v42  ;;  %v11925_v35 = vpop.permute.xlu1 %11924  ;;  %v12007_v56 = vsel %vm11983_vm4, %v11971_v18, %v11995_v12  ;;  %v12020_v32 = vmul.f32 %v20235_v51, %v12008_v60 }
0x1019   : > { %v12018_v8 = vmul.f32 %v14438_v46, %v12006_v5  ;;  %v11950_v34 = vsel %vm1599_vm13, %v11925_v35, %v11927_v48  ;;  %v12019_v59 = vmul.f32 %v20234_v44, %v12007_v56  ;;  %v11756_v49 = vadd.f32 %v11732_v4, %v11537_v62 }
0x101a   : > { %v11974_v50 = vadd.f32 %v11950_v34, %v11755_v17  ;;  %v11923_v13 = vpop.permute.xlu0 %11922  ;;  %v12085_v6 = vmul.f32 %v12065_v31, %v12020_v32  ;;  %v12072_v32 = vld [vmem:[%s19980_s3 + $0x50] sm:$0xff] }
0x101b   : > { %v12083_v21 = vmul.f32 %v12063_v33, %v12018_v8  ;;  %v11949_v9 = vsel %vm1599_vm13, %v11923_v13, %v11925_v35  ;;  %v12084_v41 = vmul.f32 %v12064_v14, %v12019_v59  ;;  %v12069_v8 = vld [vmem:[%s19980_s3 + $0x38] sm:$0xff] }
0x101c   : > { %v11998_v20 = vmul.f32 0.2, %v11974_v50  ;;  %v11973_v57 = vadd.f32 %v11949_v9, %v11754_v52  ;;  %v11507_v16 = vpop.permute.xlu1 %11506  ;;  %vm11986_vm7 = vcmp.gt.f32.partialorder %v11974_v50, 0.0 }
0x101d   : > { %v12102_v25 = vadd.f32 %v12083_v21, %v12082_v1  ;;  %v11519_v54 = vsel %vm1159_vm8, %v19793_v0, %v11507_v16  ;;  %v11514_v1 = vsel %vm1159_vm8, %v19789_v28, %v19804_v61  ;;  %v12068_v28 = vld [vmem:[%s19980_s3 + $0x30] sm:$0xff] }
0x101e   : > { %vm11985_vm9 = vcmp.gt.f32.partialorder %v11973_v57, 0.0  ;;  %v11997_v18 = vmul.f32 0.2, %v11973_v57  ;;  %v19876_v38 = vadd.f32 %v11519_v54, %v19771_v36  ;;  %v11929_v7 = vpop.permute.xlu0 %11928  ;;  %v12010_v0 = vsel %vm11986_vm7, %v11974_v50, %v11998_v20 }
0x101f   : > { %v12103_v42 = vadd.f32 %v12102_v25, %v12084_v41  ;;  %v11951_v45 = vsel %vm1599_vm13, %v11927_v48, %v11929_v7  ;;  %v11515_v36 = vsel %vm1159_vm8, %v19804_v61, %v19791_v26  ;;  %v11540_v48 = vadd.f32 %v11516_v27, %v19754_v53 }
0x1020   : > { %v12009_v12 = vsel %vm11985_vm9, %v11973_v57, %v11997_v18  ;;  %v11975_v10 = vadd.f32 %v11951_v45, %v11756_v49  ;;  %v11931_v29 = vpop.permute.xlu1 %11930  ;;  %v11733_v26 = vsel %vm1379_vm11, %v19812_v2, %v19820_v37  ;;  %v11734_v61 = vsel %vm1379_vm11, %v19820_v37, %v19816_v40 }
0x1021   : > { %v12104_v17 = vadd.f32 %v12103_v42, %v12085_v6  ;;  %v12021_v60 = vmul.f32 %v14438_v46, %v12009_v12  ;;  %v12022_v43 = vmul.f32 %v20234_v44, %v12010_v0  ;;  %v11538_v53 = vadd.f32 %v11514_v1, %v19748_v39  ;;  %v12070_v39 = vld [vmem:[%s19980_s3 + $0x40] sm:$0xff] }
0x1022   : > { %vm11987_vm10 = vcmp.gt.f32.partialorder %v11975_v10, 0.0  ;;  %v11999_v33 = vmul.f32 0.2, %v11975_v10  ;;  %v11935_v5 = vpop.permute.xlu0 %11934  ;;  %v11539_v63 = vadd.f32 %v11515_v36, %v19746_v15  ;;  %v11759_v56 = vadd.f32 %v11735_v22, %v11540_v48  ;;  %v12071_v15 = vld [vmem:[%s19980_s3 + $0x48] sm:$0xff] }
0x1023   : > { %v12105_v35 = vadd.f32 %v12104_v17, %v12086_v55  ;;  %v12088_v2 = vmul.f32 %v12068_v28, %v12021_v60  ;;  %v11757_v37 = vadd.f32 %v11733_v26, %v11538_v53  ;;  %v12089_v13 = vmul.f32 %v12069_v8, %v12022_v43  ;;  %v12076_v60 = vld [vmem:[%s19980_s3 + $0x70] sm:$0xff]  ;;  %v12075_v26 = vld [vmem:[%s19980_s3 + $0x68] sm:$0xff] }
0x1024   : > { %v12011_v34 = vsel %vm11987_vm10, %v11975_v10, %v11999_v33  ;;  %v11937_v47 = vpop.permute.xlu1 %11936  ;;  %v11758_v59 = vadd.f32 %v11734_v61, %v11539_v63  ;;  %v11517_v57 = vsel %vm1159_vm8, %v19808_v24, %v19795_v19  ;;  %v12091_v16 = vmul.f32 0.0, %v12071_v15  ;;  %v12073_v19 = vld [vmem:[%s19980_s3 + $0x58] sm:$0xff] }
0x1025   : > { %v12106_v52 = vadd.f32 %v12105_v35, %v12087_v30  ;;  %v12023_v14 = vmul.f32 %v20235_v51, %v12011_v34  ;;  %v11954_v40 = vsel %vm1599_vm13, %v11935_v5, %v11937_v47  ;;  %v12092_v54 = vmul.f32 0.0, %v12072_v32  ;;  %v12077_v47 = vld [vmem:[%s19980_s3 + $0x78] sm:$0xff] }
0x1026   : > { %v11978_v50 = vadd.f32 %v11954_v40, %v11759_v56  ;;  %v11933_v55 = vpop.permute.xlu0 %11932  ;;  %v11736_v7 = vsel %vm1379_vm11, %v19818_v23, %v19843_v11  ;;  %v11541_v45 = vadd.f32 %v11517_v57, %v19764_v3  ;;  %v12074_v23 = vld [vmem:[%s19980_s3 + $0x60] sm:$0xff]  ;;  %v12096_v53 = vmul.f32 0.0, %v12076_v60  ;;  %v12081_v57 = vld [vmem:[%s19980_s3 + $0x98] sm:$0xff] }
0x1027   : > { %v12107_v4 = vadd.f32 %v12106_v52, %v12088_v2  ;;  %v11952_v21 = vsel %vm1599_vm13, %v11931_v29, %v11933_v55  ;;  %v11953_v9 = vsel %vm1599_vm13, %v11933_v55, %v11935_v5  ;;  %v12090_v25 = vmul.f32 %v12070_v39, %v12023_v14 }
0x1028   : > { %vm11990_vm12 = vcmp.gt.f32.partialorder %v11978_v50, 0.0  ;;  %v12002_v62 = vmul.f32 0.2, %v11978_v50  ;;  %v11976_v31 = vadd.f32 %v11952_v21, %v11757_v37  ;;  %v11977_v20 = vadd.f32 %v11953_v9, %v11758_v59  ;;  %v11726_v30 = vpop.permute.xlu1 %11725  ;;  %v12079_v9 = vld [vmem:[%s19980_s3 + $0x88] sm:$0xff] }
0x1029   : > { %v12108_v41 = vadd.f32 %v12107_v4, %v12089_v13  ;;  %v11760_v29 = vadd.f32 %v11736_v7, %v11541_v45 }
0x102a   : > { %vm11988_vm14 = vcmp.gt.f32.partialorder %v11976_v31, 0.0  ;;  %vm11989_vm5 = vcmp.gt.f32.partialorder %v11977_v20, 0.0  ;;  %v12000_v49 = vmul.f32 0.2, %v11976_v31  ;;  %v11724_v18 = vpop.permute.xlu0 %11723  ;;  %v12014_v6 = vsel %vm11990_vm12, %v11978_v50, %v12002_v62 }
0x102b   : > { %v12109_v27 = vadd.f32 %v12108_v41, %v12090_v25  ;;  %v12001_v42 = vmul.f32 0.2, %v11977_v20  ;;  %v12026_v36 = vmul.f32 %v20235_v51, %v12014_v6  ;;  %v11737_v3 = vsel %vm1379_vm11, %v19843_v11, %v11724_v18 }
0x102c   : > { %v12012_v24 = vsel %vm11988_vm14, %v11976_v31, %v12000_v49  ;;  %v11939_v1 = vpop.permute.xlu1 %11938  ;;  %v11738_v33 = vsel %vm1379_vm11, %v11724_v18, %v11726_v30  ;;  %v11761_v11 = vadd.f32 %v11737_v3, %v19802_v58  ;;  %v12097_v50 = vmul.f32 0.0, %v12077_v47 }
0x102d   : > { %v12110_v0 = vadd.f32 %v12109_v27, %v12091_v16  ;;  %v12013_v12 = vsel %vm11989_vm5, %v11977_v20, %v12001_v42  ;;  %v12024_v10 = vmul.f32 %v14438_v46, %v12012_v24  ;;  %v11762_v63 = vadd.f32 %v11738_v33, %v19876_v38  ;;  %v12078_v38 = vld [vmem:[%s19980_s3 + $0x80] sm:$0xff] }
0x102e   : > { %v12025_v22 = vmul.f32 %v20234_v44, %v12013_v12  ;;  %v11941_v17 = vpop.permute.xlu0 %11940  ;;  %v12095_v52 = vmul.f32 %v12075_v26, %v12026_v36 }
0x102f   : > { %v12111_v48 = vadd.f32 %v12110_v0, %v12092_v54  ;;  %v12093_v28 = vmul.f32 %v12073_v19, %v12024_v10  ;;  %v11955_v5 = vsel %vm1599_vm13, %v11939_v1, %v11941_v17  ;;  %v12101_v54 = vmul.f32 0.0, %v12081_v57 }
0x1030   : > { %v11979_v61 = vadd.f32 %v11955_v5, %v11760_v29  ;;  %v12094_v43 = vmul.f32 %v12074_v23, %v12025_v22  ;;  %v11945_v8 = vpop.permute.xlu1 %11944 }
0x1031   : > { %v12112_v35 = vadd.f32 %v12111_v48, %v12093_v28 }
0x1032   : > { %vm11991_vm8 = vcmp.gt.f32.partialorder %v11979_v61, 0.0  ;;  %v12003_v56 = vmul.f32 0.2, %v11979_v61  ;;  %v11943_v34 = vpop.permute.xlu0 %11942 }
0x1033   : > { %v12113_v2 = vadd.f32 %v12112_v35, %v12094_v43  ;;  %v11956_v14 = vsel %vm1599_vm13, %v11941_v17, %v11943_v34  ;;  %v11957_v40 = vsel %vm1599_vm13, %v11943_v34, %v11945_v8 }
0x1034   : > { %v12015_v37 = vsel %vm11991_vm8, %v11979_v61, %v12003_v56  ;;  %v11980_v59 = vadd.f32 %v11956_v14, %v11761_v11  ;;  %v11981_v39 = vadd.f32 %v11957_v40, %v11762_v63 }
0x1035   : > { %v12114_v58 = vadd.f32 %v12113_v2, %v12095_v52  ;;  %v12027_v15 = vmul.f32 %v14438_v46, %v12015_v37  ;;  %v12080_v46 = vld [vmem:[%s19980_s3 + $0x90] sm:$0xff] }
0x1036   : > { %vm11992_vm11 = vcmp.gt.f32.partialorder %v11980_v59, 0.0  ;;  %vm11993_vm6 = vcmp.gt.f32.partialorder %v11981_v39, 0.0  ;;  %v12004_v55 = vmul.f32 0.2, %v11980_v59  ;;  %v12005_v13 = vmul.f32 0.2, %v11981_v39 }
0x1037   : > { %v12115_v4 = vadd.f32 %v12114_v58, %v12096_v53  ;;  %v12098_v62 = vmul.f32 %v12078_v38, %v12027_v15 }
0x1038   : > { %v12016_v32 = vsel %vm11992_vm11, %v11980_v59, %v12004_v55  ;;  %v12017_v21 = vsel %vm11993_vm6, %v11981_v39, %v12005_v13 }
0x1039   : > { %v12028_v31 = vmul.f32 %v20234_v44, %v12016_v32  ;;  %v12029_v20 = vmul.f32 %v20235_v51, %v12017_v21  ;;  %v12116_v30 = vadd.f32 %v12115_v4, %v12097_v50 }
0x103b   : > { %v12099_v16 = vmul.f32 %v12079_v9, %v12028_v31  ;;  %v12117_v41 = vadd.f32 %v12116_v30, %v12098_v62  ;;  %v12100_v25 = vmul.f32 %v12080_v46, %v12029_v20 }
0x103d   : > { %v12118_v49 = vadd.f32 %v12117_v41, %v12099_v16 }
0x103f   : > { %v12119_v18 = vadd.f32 %v12118_v49, %v12100_v25 }
0x1041   : > { %v12120_v7 = vadd.f32 %v12119_v18, %v12101_v54 }
0x1043   : > { %12121 = vadd.xlane.f32.xlu0 %v12120_v7 }
0x10cc   : > { %v12122_v44 = vpop.xlane.xlu0 %12121 }
0x10cd   : > { %v12123_v51 = vrot.slane %v12122_v44, 4 }
0x10cf   : > { %v12124_v27 = vadd.f32 %v12123_v51, %v12122_v44 }
0x10d1   : > { %v12125_v6 = vrot.slane %v12124_v27, 2 }
0x10d3   : > { %v12126_v42 = vadd.f32 %v12125_v6, %v12124_v27 }
0x10d5   : > { %v12127_v45 = vrot.slane %v12126_v42, 1 }
0x10d7   : > { %v12128_v19 = vadd.f32 %v12127_v45, %v12126_v42 }
0x10d9   : > { %13506 = vpush %v12128_v19 }
0x110a   : > { %s13507_s24 = spop %13506 }
0x110b   : > { %v12130_v24 = vstv %s13507_s24 }
0x110c   : > { %v12131_v1 = vmul.f32 0.00390625, %v12130_v24 }
0x110e   : > { %12132 = vst [vmem:[%s195_s20] sm:$0xff] %v12131_v1 }
0x110f PF: > { %s14_s15 = sadd.s32 1, %s13720_s15  }
0x1110   : > { %p11_p4 = scmp.ge.s32.totalorder %s14_s15, 4  }
0x1112   :  { %13 = sbr.rel (!%p11_p4) target bundleno = 1 (0x1), region = 100 }

</bundles_post_ra>
